<compile_context>
chip_gen: v7x
topology: tpu7x:2x2x1
jax: 0.10.0
libtpu: 0.0.40
codegen_flags: <defaults>
</compile_context>

<pallas_src>
import functools

import jax
import jax.numpy as jnp
from jax.experimental import pallas as pl
from jax.experimental.pallas import tpu as pltpu


def _round_up(x, m):
    return (x + m - 1) // m * m


# ---------------------------------------------------------------------------
# Batched Pallas matmul kernel: (P, M, K) @ (P, K, N) + b, fused activations.
# Grid = (P, M tiles, K tiles); K is the innermost reduction axis.
# ---------------------------------------------------------------------------

def _bmm_kernel(a_ref, w_ref, b_ref, o_ref, acc_ref, *, pre_act, post_act):
    @pl.when(pl.program_id(2) == 0)
    def _():
        acc_ref[...] = jnp.zeros_like(acc_ref)

    a = a_ref[0]                                         # (tm, tk) bf16
    if pre_act == "leaky_relu":
        af = a.astype(jnp.float32)                       # prologue math in f32
        a = jnp.where(af >= 0, af, 0.2 * af).astype(jnp.bfloat16)
    elif pre_act == "relu":
        a = jnp.maximum(a, jnp.zeros_like(a))            # exact in bf16

    acc_ref[...] += jnp.dot(a, w_ref[0], preferred_element_type=jnp.float32)

    @pl.when(pl.program_id(2) == pl.num_programs(2) - 1)
    def _():
        out = acc_ref[...] + b_ref[...]                  # f32 epilogue
        if post_act == "tanh":
            out = jnp.tanh(out)
        o_ref[0] = out


def pallas_bmm(a, w, b, pre_act=None, post_act=None):
    """a: (P, M, K), w: (P, K, N), b: (N,) -> (P, M, N) f32.

    - Operands cast to bf16 (MXU-native, half the DMA bytes); f32 accumulation.
    - K and N zero-padded to multiples of 128 so stores are lane-dense and the
      MXU never streams a partial pass (covers the N=3 / K=48 outermost shapes).
    - K-reduction grid axis + f32 VMEM accumulator keeps resident VMEM small
      (fits v7x's 64 MiB with plenty of headroom at these channel counts).
    """
    P, M, K = a.shape
    _, _, N = w.shape

    N_pad = _round_up(N, 128)
    K_pad = _round_up(K, 128)
    tk = min(512, K_pad)
    K_pad = _round_up(K_pad, tk)

    if M >= 512:
        tm = 512
    elif M >= 256:
        tm = 256
    else:
        tm = _round_up(M, 8)
    M_pad = _round_up(M, tm)

    a_p = a.astype(jnp.bfloat16)
    if (M_pad, K_pad) != (M, K):
        a_p = jnp.pad(a_p, ((0, 0), (0, M_pad - M), (0, K_pad - K)))
    w_p = w.astype(jnp.bfloat16)
    if (K_pad, N_pad) != (K, N):
        w_p = jnp.pad(w_p, ((0, 0), (0, K_pad - K), (0, N_pad - N)))
    b_p = b.astype(jnp.float32).reshape(1, N)
    if N_pad != N:
        b_p = jnp.pad(b_p, ((0, 0), (0, N_pad - N)))

    grid = (P, M_pad // tm, K_pad // tk)
    kernel = functools.partial(_bmm_kernel, pre_act=pre_act, post_act=post_act)
    cost = pl.CostEstimate(
        flops=2 * P * M_pad * K_pad * N_pad,
        transcendentals=P * M_pad * N_pad if post_act == "tanh" else 0,
        bytes_accessed=a_p.size * 2 + w_p.size * 2 + P * M_pad * N_pad * 4,
    )
    out = pl.pallas_call(
        kernel,
        out_shape=jax.ShapeDtypeStruct((P, M_pad, N_pad), jnp.float32),
        grid=grid,
        in_specs=[
            pl.BlockSpec((1, tm, tk), lambda p, i, k: (p, i, k)),
            pl.BlockSpec((1, tk, N_pad), lambda p, i, k: (p, k, 0)),
            pl.BlockSpec((1, N_pad), lambda p, i, k: (0, 0)),
        ],
        out_specs=pl.BlockSpec((1, tm, N_pad), lambda p, i, k: (p, i, 0)),
        scratch_shapes=[pltpu.VMEM((tm, N_pad), jnp.float32)],
        compiler_params=pltpu.CompilerParams(
            dimension_semantics=("parallel", "parallel", "arbitrary"),
            vmem_limit_bytes=32 * 1024 * 1024,
        ),
        cost_estimate=cost,
    )(a_p, w_p, b_p)
    if (M_pad, N_pad) != (M, N):
        out = out[:, :M, :N]
    return out


def pallas_matmul(a, w, b, pre_act=None, post_act=None):
    """(M, K) @ (K, N) + b — thin wrapper over the batched kernel with P=1."""
    return pallas_bmm(a[None], w[None], b, pre_act=pre_act, post_act=post_act)[0]


# ---------------------------------------------------------------------------
# Tiled BatchNorm2d (training-mode batch statistics): pass 1 reduces per-channel
# sum / sum-of-squares over M tiles, pass 2 applies the folded scale/shift.
# ---------------------------------------------------------------------------

def _bn_stats_kernel(x_ref, sum_ref, sq_ref):
    @pl.when(pl.program_id(0) == 0)
    def _():
        sum_ref[...] = jnp.zeros_like(sum_ref)
        sq_ref[...] = jnp.zeros_like(sq_ref)
    x = x_ref[...]
    sum_ref[...] += jnp.sum(x, axis=0, keepdims=True)
    sq_ref[...] += jnp.sum(x * x, axis=0, keepdims=True)


def _bn_apply_kernel(x_ref, scale_ref, shift_ref, o_ref):
    o_ref[...] = x_ref[...] * scale_ref[...] + shift_ref[...]


def pallas_batchnorm(x2d, gamma, beta, eps=1e-5):
    M, C = x2d.shape
    tm = min(1024, _round_up(M, 8))
    M_pad = _round_up(M, tm)
    x_p = jnp.pad(x2d, ((0, M_pad - M), (0, 0))) if M_pad != M else x2d
    grid = (M_pad // tm,)

    s, sq = pl.pallas_call(
        _bn_stats_kernel,
        out_shape=(jax.ShapeDtypeStruct((1, C), jnp.float32),
                   jax.ShapeDtypeStruct((1, C), jnp.float32)),
        grid=grid,
        in_specs=[pl.BlockSpec((tm, C), lambda i: (i, 0))],
        out_specs=(pl.BlockSpec((1, C), lambda i: (0, 0)),
                   pl.BlockSpec((1, C), lambda i: (0, 0))),
        compiler_params=pltpu.CompilerParams(dimension_semantics=("arbitrary",)),
        cost_estimate=pl.CostEstimate(flops=3 * M_pad * C, transcendentals=0,
                                      bytes_accessed=M_pad * C * 4 + 2 * C * 4),
    )(x_p)

    # biased variance, eps=1e-5 — PyTorch BatchNorm2d training semantics
    mean = s / M
    var = jnp.maximum(sq / M - mean * mean, 0.0)
    inv = jax.lax.rsqrt(var + eps)
    scale = gamma.reshape(1, C) * inv
    shift = beta.reshape(1, C) - mean * scale

    # TODO(synk): the normalize/affine pass could be folded into the next conv's
    # matmul prologue (per-channel scale/shift) to save one HBM round-trip, but the
    # skip-concat structure makes the bookkeeping intricate; kept as a tiled kernel.
    y = pl.pallas_call(
        _bn_apply_kernel,
        out_shape=jax.ShapeDtypeStruct((M_pad, C), jnp.float32),
        grid=grid,
        in_specs=[pl.BlockSpec((tm, C), lambda i: (i, 0)),
                  pl.BlockSpec((1, C), lambda i: (0, 0)),
                  pl.BlockSpec((1, C), lambda i: (0, 0))],
        out_specs=pl.BlockSpec((tm, C), lambda i: (i, 0)),
        compiler_params=pltpu.CompilerParams(dimension_semantics=("parallel",)),
        cost_estimate=pl.CostEstimate(flops=2 * M_pad * C, transcendentals=0,
                                      bytes_accessed=2 * M_pad * C * 4),
    )(x_p, scale, shift)
    return y[:M] if M_pad != M else y


# ---------------------------------------------------------------------------
# Conv / ConvTranspose built on the Pallas matmul (im2col glue in plain JAX)
# ---------------------------------------------------------------------------

def _im2col(xpad, k, stride):
    """xpad: (N, H, W, C) already padded -> (N*Ho*Wo, k*k*C)."""
    N, H, W, C = xpad.shape
    Ho = (H - k) // stride + 1
    Wo = (W - k) // stride + 1
    cols = []
    for i in range(k):
        for j in range(k):
            cols.append(jax.lax.slice(
                xpad, (0, i, j, 0),
                (N, i + stride * (Ho - 1) + 1, j + stride * (Wo - 1) + 1, C),
                (1, stride, stride, 1)))
    patches = jnp.stack(cols, axis=3)          # (N, Ho, Wo, k*k, C)
    return patches.reshape(N * Ho * Wo, k * k * C), N, Ho, Wo


def conv_down(x, w, pre_act=None):
    """Conv2d(kernel=4, stride=2, padding=1, bias=False). x: NHWC, w: (out,in,4,4)."""
    out_c, in_c, k, _ = w.shape
    xpad = jnp.pad(x.astype(jnp.bfloat16), ((0, 0), (1, 1), (1, 1), (0, 0)))
    a, n, ho, wo = _im2col(xpad, k, 2)
    wmat = jnp.transpose(w, (2, 3, 1, 0)).reshape(k * k * in_c, out_c)
    bias = jnp.zeros((out_c,), jnp.float32)
    y = pallas_matmul(a, wmat, bias, pre_act=pre_act)
    return y.reshape(n, ho, wo, out_c)


def conv_up(x, w, bias=None, pre_act=None, post_act=None):
    """ConvTranspose2d(kernel=4, stride=2, padding=1) via 4-phase subpixel decomposition.

    Output phase (ph, pw) (oh = 2m+ph, ow = 2n+pw) only receives kernel taps
    kh = 3-ph-2*di, kw = 3-pw-2*dj over a 2x2 window of the 1-padded input, so each
    phase is a stride-1 2x2 conv (K = 4*Cin).  All 4 phases run as the leading
    "parallel" grid axis of one batched Pallas matmul.  x: NHWC, w: (in, out, 4, 4).
    """
    in_c, out_c, k, _ = w.shape
    n, h, wd, _ = x.shape
    xpad = jnp.pad(x.astype(jnp.bfloat16), ((0, 0), (1, 1), (1, 1), (0, 0)))
    if bias is None:
        bias = jnp.zeros((out_c,), jnp.float32)

    a_phases, w_phases = [], []
    for ph in range(2):
        for pw in range(2):
            cols = []
            for di in range(2):
                for dj in range(2):
                    cols.append(jax.lax.slice(
                        xpad, (0, ph + di, pw + dj, 0),
                        (n, ph + di + h, pw + dj + wd, in_c)))
            a_phases.append(jnp.stack(cols, axis=3).reshape(n * h * wd, 4 * in_c))
            wsub = jnp.stack(
                [w[:, :, 3 - ph - 2 * di, 3 - pw - 2 * dj]
                 for di in range(2) for dj in range(2)], axis=0)    # (4, in_c, out_c)
            w_phases.append(wsub.reshape(4 * in_c, out_c))          # matches A column order

    a_all = jnp.stack(a_phases, axis=0)                             # (4, n*h*w, 4*in_c)
    w_all = jnp.stack(w_phases, axis=0)                             # (4, 4*in_c, out_c)
    y = pallas_bmm(a_all, w_all, bias, pre_act=pre_act, post_act=post_act)
    # (phase=(ph,pw), n, h, w, c) -> (n, h, ph, w, pw, c) -> (n, 2h, 2w, c)
    y = y.reshape(2, 2, n, h, wd, out_c)
    y = jnp.transpose(y, (2, 3, 0, 4, 1, 5))
    return y.reshape(n, 2 * h, 2 * wd, out_c)


def apply_bn(x, gamma, beta):
    n, h, w, c = x.shape
    y = pallas_batchnorm(x.reshape(n * h * w, c), gamma, beta)
    return y.reshape(n, h, w, c)


# ---------------------------------------------------------------------------
# UnetSkipConnectionBlock / UnetGenerator (parameters + forward)
# ---------------------------------------------------------------------------

def make_block_params(key, outer_nc, inner_nc, input_nc=None, sub=None,
                      outermost=False, innermost=False):
    if input_nc is None:
        input_nc = outer_nc
    k1, k2, k3 = jax.random.split(key, 3)
    p = {"outermost": outermost, "innermost": innermost, "sub": sub}
    # downconv: Conv2d(input_nc -> inner_nc), bias=False (BatchNorm case)
    p["down_w"] = 0.05 * jax.random.normal(k1, (inner_nc, input_nc, 4, 4), jnp.float32)
    if outermost:
        # upconv: ConvTranspose2d(inner_nc*2 -> outer_nc), bias=True
        p["up_w"] = 0.05 * jax.random.normal(k2, (inner_nc * 2, outer_nc, 4, 4), jnp.float32)
        p["up_b"] = 0.01 * jax.random.normal(k3, (outer_nc,), jnp.float32)
    elif innermost:
        p["up_w"] = 0.05 * jax.random.normal(k2, (inner_nc, outer_nc, 4, 4), jnp.float32)
        p["up_gamma"] = jnp.ones((outer_nc,), jnp.float32)
        p["up_beta"] = jnp.zeros((outer_nc,), jnp.float32)
    else:
        p["down_gamma"] = jnp.ones((inner_nc,), jnp.float32)
        p["down_beta"] = jnp.zeros((inner_nc,), jnp.float32)
        p["up_w"] = 0.05 * jax.random.normal(k2, (inner_nc * 2, outer_nc, 4, 4), jnp.float32)
        p["up_gamma"] = jnp.ones((outer_nc,), jnp.float32)
        p["up_beta"] = jnp.zeros((outer_nc,), jnp.float32)
    return p


def make_unet_params(key, input_nc, output_nc, num_downs, ngf):
    keys = jax.random.split(key, num_downs + 1)
    ki = iter(keys)
    block = make_block_params(next(ki), ngf * 8, ngf * 8, innermost=True)
    for _ in range(num_downs - 5):
        block = make_block_params(next(ki), ngf * 8, ngf * 8, sub=block)
    block = make_block_params(next(ki), ngf * 4, ngf * 8, sub=block)
    block = make_block_params(next(ki), ngf * 2, ngf * 4, sub=block)
    block = make_block_params(next(ki), ngf, ngf * 2, sub=block)
    block = make_block_params(next(ki), output_nc, ngf, input_nc=input_nc,
                              sub=block, outermost=True)
    return block


def unet_block_apply(p, x):
    # --- down path ---
    if p["outermost"]:
        h = conv_down(x, p["down_w"], pre_act=None)                 # [downconv]
    elif p["innermost"]:
        h = conv_down(x, p["down_w"], pre_act="leaky_relu")         # [lrelu, downconv]
    else:
        h = conv_down(x, p["down_w"], pre_act="leaky_relu")         # [lrelu, downconv, bn]
        h = apply_bn(h, p["down_gamma"], p["down_beta"])
    # --- submodule ---
    if p["sub"] is not None:
        h = unet_block_apply(p["sub"], h)
    # --- up path ---
    if p["outermost"]:
        # [relu, upconvT, tanh]  (all fused into the matmul kernel)
        return conv_up(h, p["up_w"], bias=p["up_b"], pre_act="relu", post_act="tanh")
    y = conv_up(h, p["up_w"], pre_act="relu")                       # [relu, upconvT, bn]
    y = apply_bn(y, p["up_gamma"], p["up_beta"])
    return jnp.concatenate([x, y], axis=-1)                         # torch.cat([x, .], 1)


def unet_generator(params, x_nchw):
    # wrapper is NCHW (PyTorch convention); kernels run on NHWC internally.
    x = jnp.transpose(x_nchw, (0, 2, 3, 1)).astype(jnp.float32)
    y = unet_block_apply(params, x)
    return jnp.transpose(y, (0, 3, 1, 2))


# TODO(synk): nn.Dropout path (use_dropout=True) not implemented — default config has it off.

if __name__ == "__main__":
    key = jax.random.PRNGKey(0)
    kp, kx = jax.random.split(key)

    # num_downs=5 is the structural minimum of UnetGenerator -> spatial >= 2**5 = 32
    input_nc, output_nc, num_downs, ngf = 3, 3, 5, 8
    params = make_unet_params(kp, input_nc, output_nc, num_downs, ngf)

    x = jax.random.normal(kx, (2, input_nc, 32, 32), jnp.float32)
    fwd = jax.jit(lambda inp: unet_generator(params, inp))
    y = fwd(x)
    jax.block_until_ready(y)

    assert y.shape == (2, output_nc, 32, 32), y.shape
    assert bool(jnp.all(jnp.isfinite(y)))
    print("KERNEL_OK")
</pallas_src>

<mosaic_0001>
module attributes {stable_mosaic.version = 11 : i64} {
  func.func @_bmm_kernel(%arg0: i32, %arg1: i32, %arg2: i32, %arg3: memref<1x512x128xbf16, #tpu.memory_space<vmem>>, %arg4: memref<1x128x128xbf16, #tpu.memory_space<vmem>>, %arg5: memref<1x128xf32, #tpu.memory_space<vmem>>, %arg6: memref<1x512x128xf32, #tpu.memory_space<vmem>>, %arg7: memref<512x128xf32, #tpu.memory_space<vmem>>) attributes {dimension_semantics = [#tpu.dimension_semantics<parallel>, #tpu.dimension_semantics<parallel>, #tpu.dimension_semantics<arbitrary>], iteration_bounds = array<i64: 1, 1, 1>, scalar_prefetch = 0 : i64, scratch_operands = 1 : i64, tpu.core_type = #tpu.core_type<tc>, window_params = [{transform_indices = @transform_0, window_bounds = array<i64: 1, 512, 128>}, {transform_indices = @transform_1, window_bounds = array<i64: 1, 128, 128>}, {pipeline_mode = #tpu.pipeline_mode<synchronous>, transform_indices = @transform_2, window_bounds = array<i64: 1, 128>}, {transform_indices = @transform_3, window_bounds = array<i64: 1, 512, 128>}]} {
    %c0_i32 = arith.constant 0 : i32
    %0 = arith.cmpi eq, %arg2, %c0_i32 : i32
    %1 = arith.extui %0 : i1 to i32
    %c0_i32_0 = arith.constant 0 : i32
    %2 = arith.cmpi ne, %1, %c0_i32_0 : i32
    scf.if %2 {
      %cst_12 = arith.constant 0.000000e+00 : f32
      %14 = vector.broadcast %cst_12 : f32 to vector<512x128xf32>
      %c0_13 = arith.constant 0 : index
      %c0_14 = arith.constant 0 : index
      %15 = vector.load %arg7[%c0_13, %c0_14] : memref<512x128xf32, #tpu.memory_space<vmem>>, vector<512x128xf32>
      tpu.vector_store %arg7[%c0_13, %c0_14], %14 {strides = array<i32>} : memref<512x128xf32, #tpu.memory_space<vmem>>, vector<512x128xf32>,
    } else {
    }
    %c0 = arith.constant 0 : index
    %c0_1 = arith.constant 0 : index
    %c0_2 = arith.constant 0 : index
    %3 = vector.load %arg3[%c0, %c0_1, %c0_2] : memref<1x512x128xbf16, #tpu.memory_space<vmem>>, vector<1x512x128xbf16>
    %4 = vector.shape_cast %3 : vector<1x512x128xbf16> to vector<512x128xbf16>
    %c0_3 = arith.constant 0 : index
    %c0_4 = arith.constant 0 : index
    %5 = vector.load %arg7[%c0_3, %c0_4] : memref<512x128xf32, #tpu.memory_space<vmem>>, vector<512x128xf32>
    %c0_5 = arith.constant 0 : index
    %c0_6 = arith.constant 0 : index
    %c0_7 = arith.constant 0 : index
    %6 = vector.load %arg4[%c0_5, %c0_6, %c0_7] : memref<1x128x128xbf16, #tpu.memory_space<vmem>>, vector<1x128x128xbf16>
    %7 = vector.shape_cast %6 : vector<1x128x128xbf16> to vector<128x128xbf16>
    %cst = arith.constant dense<0.000000e+00> : vector<512x128xf32>
    %8 = tpu.matmul %4, %7, %cst {dimension_numbers = #tpu.dot_dimension_numbers<[1], [0], [0], [1], [0, 0, 1, 1], [], []>} : vector<512x128xbf16>, vector<128x128xbf16>, vector<512x128xf32> -> vector<512x128xf32>
    %9 = arith.addf %5, %8 : vector<512x128xf32>
    %c0_8 = arith.constant 0 : index
    %c0_9 = arith.constant 0 : index
    %10 = vector.load %arg7[%c0_8, %c0_9] : memref<512x128xf32, #tpu.memory_space<vmem>>, vector<512x128xf32>
    tpu.vector_store %arg7[%c0_8, %c0_9], %9 {strides = array<i32>} : memref<512x128xf32, #tpu.memory_space<vmem>>, vector<512x128xf32>,
    %c0_i32_10 = arith.constant 0 : i32
    %11 = arith.cmpi eq, %arg2, %c0_i32_10 : i32
    %12 = arith.extui %11 : i1 to i32
    %c0_i32_11 = arith.constant 0 : i32
    %13 = arith.cmpi ne, %12, %c0_i32_11 : i32
    scf.if %13 {
      %c0_12 = arith.constant 0 : index
      %c0_13 = arith.constant 0 : index
      %14 = vector.load %arg7[%c0_12, %c0_13] : memref<512x128xf32, #tpu.memory_space<vmem>>, vector<512x128xf32>
      %c0_14 = arith.constant 0 : index
      %c0_15 = arith.constant 0 : index
      %15 = vector.load %arg5[%c0_14, %c0_15] : memref<1x128xf32, #tpu.memory_space<vmem>>, vector<1x128xf32>
      %16 = vector.broadcast %15 : vector<1x128xf32> to vector<512x128xf32>
      %17 = arith.addf %14, %16 : vector<512x128xf32>
      %c0_16 = arith.constant 0 : index
      %c0_17 = arith.constant 0 : index
      %c0_18 = arith.constant 0 : index
      %18 = vector.load %arg6[%c0_16, %c0_17, %c0_18] : memref<1x512x128xf32, #tpu.memory_space<vmem>>, vector<1x512x128xf32>
      %19 = vector.shape_cast %18 : vector<1x512x128xf32> to vector<512x128xf32>
      %20 = vector.shape_cast %17 : vector<512x128xf32> to vector<1x512x128xf32>
      tpu.vector_store %arg6[%c0_16, %c0_17, %c0_18], %20 {strides = array<i32>} : memref<1x512x128xf32, #tpu.memory_space<vmem>>, vector<1x512x128xf32>,
    } else {
    }
    return
  }
  func.func @transform_0(%arg0: i32, %arg1: i32, %arg2: i32) -> (i32, i32, i32) {
    %c0_i32 = arith.constant 0 : i32
    return %arg0, %arg1, %arg2 : i32, i32, i32
  }
  func.func @transform_1(%arg0: i32, %arg1: i32, %arg2: i32) -> (i32, i32, i32) {
    %c0_i32 = arith.constant 0 : i32
    %c0_i32_0 = arith.constant 0 : i32
    return %arg0, %arg2, %c0_i32 : i32, i32, i32
  }
  func.func @transform_2(%arg0: i32, %arg1: i32, %arg2: i32) -> (i32, i32) {
    %c0_i32 = arith.constant 0 : i32
    %c0_i32_0 = arith.constant 0 : i32
    %c0_i32_1 = arith.constant 0 : i32
    return %c0_i32, %c0_i32_0 : i32, i32
  }
  func.func @transform_3(%arg0: i32, %arg1: i32, %arg2: i32) -> (i32, i32, i32) {
    %c0_i32 = arith.constant 0 : i32
    %c0_i32_0 = arith.constant 0 : i32
    return %arg0, %arg1, %c0_i32 : i32, i32, i32
  }
}

module attributes {stable_mosaic.version = 11 : i64} {
  func.func @_bmm_kernel(%arg0: i32, %arg1: i32, %arg2: i32, %arg3: memref<1x128x128xbf16, #tpu.memory_space<vmem>>, %arg4: memref<1x128x128xbf16, #tpu.memory_space<vmem>>, %arg5: memref<1x128xf32, #tpu.memory_space<vmem>>, %arg6: memref<1x128x128xf32, #tpu.memory_space<vmem>>, %arg7: memref<128x128xf32, #tpu.memory_space<vmem>>) attributes {dimension_semantics = [#tpu.dimension_semantics<parallel>, #tpu.dimension_semantics<parallel>, #tpu.dimension_semantics<arbitrary>], iteration_bounds = array<i64: 1, 1, 1>, scalar_prefetch = 0 : i64, scratch_operands = 1 : i64, tpu.core_type = #tpu.core_type<tc>, window_params = [{transform_indices = @transform_0, window_bounds = array<i64: 1, 128, 128>}, {transform_indices = @transform_1, window_bounds = array<i64: 1, 128, 128>}, {pipeline_mode = #tpu.pipeline_mode<synchronous>, transform_indices = @transform_2, window_bounds = array<i64: 1, 128>}, {transform_indices = @transform_3, window_bounds = array<i64: 1, 128, 128>}]} {
    %c0_i32 = arith.constant 0 : i32
    %0 = arith.cmpi eq, %arg2, %c0_i32 : i32
    %1 = arith.extui %0 : i1 to i32
    %c0_i32_0 = arith.constant 0 : i32
    %2 = arith.cmpi ne, %1, %c0_i32_0 : i32
    scf.if %2 {
      %cst_14 = arith.constant 0.000000e+00 : f32
      %21 = vector.broadcast %cst_14 : f32 to vector<128x128xf32>
      %c0_15 = arith.constant 0 : index
      %c0_16 = arith.constant 0 : index
      %22 = vector.load %arg7[%c0_15, %c0_16] : memref<128x128xf32, #tpu.memory_space<vmem>>, vector<128x128xf32>
      tpu.vector_store %arg7[%c0_15, %c0_16], %21 {strides = array<i32>} : memref<128x128xf32, #tpu.memory_space<vmem>>, vector<128x128xf32>,
    } else {
    }
    %c0 = arith.constant 0 : index
    %c0_1 = arith.constant 0 : index
    %c0_2 = arith.constant 0 : index
    %3 = vector.load %arg3[%c0, %c0_1, %c0_2] : memref<1x128x128xbf16, #tpu.memory_space<vmem>>, vector<1x128x128xbf16>
    %4 = vector.shape_cast %3 : vector<1x128x128xbf16> to vector<128x128xbf16>
    %5 = arith.extf %4 : vector<128x128xbf16> to vector<128x128xf32>
    %cst = arith.constant 0.000000e+00 : f32
    %6 = vector.broadcast %cst : f32 to vector<128x128xf32>
    %7 = arith.cmpf oge, %5, %6 : vector<128x128xf32>
    %cst_3 = arith.constant 2.000000e-01 : f32
    %8 = vector.broadcast %cst_3 : f32 to vector<128x128xf32>
    %9 = arith.mulf %8, %5 : vector<128x128xf32>
    %10 = arith.select %7, %5, %9 : vector<128x128xi1>, vector<128x128xf32>
    %11 = arith.truncf %10 : vector<128x128xf32> to vector<128x128xbf16>
    %c0_4 = arith.constant 0 : index
    %c0_5 = arith.constant 0 : index
    %12 = vector.load %arg7[%c0_4, %c0_5] : memref<128x128xf32, #tpu.memory_space<vmem>>, vector<128x128xf32>
    %c0_6 = arith.constant 0 : index
    %c0_7 = arith.constant 0 : index
    %c0_8 = arith.constant 0 : index
    %13 = vector.load %arg4[%c0_6, %c0_7, %c0_8] : memref<1x128x128xbf16, #tpu.memory_space<vmem>>, vector<1x128x128xbf16>
    %14 = vector.shape_cast %13 : vector<1x128x128xbf16> to vector<128x128xbf16>
    %cst_9 = arith.constant dense<0.000000e+00> : vector<128x128xf32>
    %15 = tpu.matmul %11, %14, %cst_9 {dimension_numbers = #tpu.dot_dimension_numbers<[1], [0], [0], [1], [0, 0, 1, 1], [], []>} : vector<128x128xbf16>, vector<128x128xbf16>, vector<128x128xf32> -> vector<128x128xf32>
    %16 = arith.addf %12, %15 : vector<128x128xf32>
    %c0_10 = arith.constant 0 : index
    %c0_11 = arith.constant 0 : index
    %17 = vector.load %arg7[%c0_10, %c0_11] : memref<128x128xf32, #tpu.memory_space<vmem>>, vector<128x128xf32>
    tpu.vector_store %arg7[%c0_10, %c0_11], %16 {strides = array<i32>} : memref<128x128xf32, #tpu.memory_space<vmem>>, vector<128x128xf32>,
    %c0_i32_12 = arith.constant 0 : i32
    %18 = arith.cmpi eq, %arg2, %c0_i32_12 : i32
    %19 = arith.extui %18 : i1 to i32
    %c0_i32_13 = arith.constant 0 : i32
    %20 = arith.cmpi ne, %19, %c0_i32_13 : i32
    scf.if %20 {
      %c0_14 = arith.constant 0 : index
      %c0_15 = arith.constant 0 : index
      %21 = vector.load %arg7[%c0_14, %c0_15] : memref<128x128xf32, #tpu.memory_space<vmem>>, vector<128x128xf32>
      %c0_16 = arith.constant 0 : index
      %c0_17 = arith.constant 0 : index
      %22 = vector.load %arg5[%c0_16, %c0_17] : memref<1x128xf32, #tpu.memory_space<vmem>>, vector<1x128xf32>
      %23 = vector.broadcast %22 : vector<1x128xf32> to vector<128x128xf32>
      %24 = arith.addf %21, %23 : vector<128x128xf32>
      %c0_18 = arith.constant 0 : index
      %c0_19 = arith.constant 0 : index
      %c0_20 = arith.constant 0 : index
      %25 = vector.load %arg6[%c0_18, %c0_19, %c0_20] : memref<1x128x128xf32, #tpu.memory_space<vmem>>, vector<1x128x128xf32>
      %26 = vector.shape_cast %25 : vector<1x128x128xf32> to vector<128x128xf32>
      %27 = vector.shape_cast %24 : vector<128x128xf32> to vector<1x128x128xf32>
      tpu.vector_store %arg6[%c0_18, %c0_19, %c0_20], %27 {strides = array<i32>} : memref<1x128x128xf32, #tpu.memory_space<vmem>>, vector<1x128x128xf32>,
    } else {
    }
    return
  }
  func.func @transform_0(%arg0: i32, %arg1: i32, %arg2: i32) -> (i32, i32, i32) {
    %c0_i32 = arith.constant 0 : i32
    return %arg0, %arg1, %arg2 : i32, i32, i32
  }
  func.func @transform_1(%arg0: i32, %arg1: i32, %arg2: i32) -> (i32, i32, i32) {
    %c0_i32 = arith.constant 0 : i32
    %c0_i32_0 = arith.constant 0 : i32
    return %arg0, %arg2, %c0_i32 : i32, i32, i32
  }
  func.func @transform_2(%arg0: i32, %arg1: i32, %arg2: i32) -> (i32, i32) {
    %c0_i32 = arith.constant 0 : i32
    %c0_i32_0 = arith.constant 0 : i32
    %c0_i32_1 = arith.constant 0 : i32
    return %c0_i32, %c0_i32_0 : i32, i32
  }
  func.func @transform_3(%arg0: i32, %arg1: i32, %arg2: i32) -> (i32, i32, i32) {
    %c0_i32 = arith.constant 0 : i32
    %c0_i32_0 = arith.constant 0 : i32
    return %arg0, %arg1, %c0_i32 : i32, i32, i32
  }
}

module attributes {stable_mosaic.version = 11 : i64} {
  func.func @_bn_stats_kernel(%arg0: i32, %arg1: memref<128x16xf32, #tpu.memory_space<vmem>>, %arg2: memref<1x16xf32, #tpu.memory_space<vmem>>, %arg3: memref<1x16xf32, #tpu.memory_space<vmem>>) attributes {dimension_semantics = [#tpu.dimension_semantics<arbitrary>], iteration_bounds = array<i64: 1>, scalar_prefetch = 0 : i64, scratch_operands = 0 : i64, tpu.core_type = #tpu.core_type<tc>, window_params = [{transform_indices = @transform_0, window_bounds = array<i64: 128, 16>}, {pipeline_mode = #tpu.pipeline_mode<synchronous>, transform_indices = @transform_1, window_bounds = array<i64: 1, 16>}, {pipeline_mode = #tpu.pipeline_mode<synchronous>, transform_indices = @transform_2, window_bounds = array<i64: 1, 16>}]} {
    %c0_i32 = arith.constant 0 : i32
    %0 = arith.cmpi eq, %arg0, %c0_i32 : i32
    %1 = arith.extui %0 : i1 to i32
    %c0_i32_0 = arith.constant 0 : i32
    %2 = arith.cmpi ne, %1, %c0_i32_0 : i32
    scf.if %2 {
      %cst_11 = arith.constant 0.000000e+00 : f32
      %15 = vector.broadcast %cst_11 : f32 to vector<1x16xf32>
      %c0_12 = arith.constant 0 : index
      %c0_13 = arith.constant 0 : index
      %16 = vector.load %arg2[%c0_12, %c0_13] : memref<1x16xf32, #tpu.memory_space<vmem>>, vector<1x16xf32>
      tpu.vector_store %arg2[%c0_12, %c0_13], %15 {strides = array<i32>} : memref<1x16xf32, #tpu.memory_space<vmem>>, vector<1x16xf32>,
      %cst_14 = arith.constant 0.000000e+00 : f32
      %17 = vector.broadcast %cst_14 : f32 to vector<1x16xf32>
      %c0_15 = arith.constant 0 : index
      %c0_16 = arith.constant 0 : index
      %18 = vector.load %arg3[%c0_15, %c0_16] : memref<1x16xf32, #tpu.memory_space<vmem>>, vector<1x16xf32>
      tpu.vector_store %arg3[%c0_15, %c0_16], %17 {strides = array<i32>} : memref<1x16xf32, #tpu.memory_space<vmem>>, vector<1x16xf32>,
    } else {
    }
    %c0 = arith.constant 0 : index
    %c0_1 = arith.constant 0 : index
    %3 = vector.load %arg1[%c0, %c0_1] : memref<128x16xf32, #tpu.memory_space<vmem>>, vector<128x16xf32>
    %c0_2 = arith.constant 0 : index
    %c0_3 = arith.constant 0 : index
    %4 = vector.load %arg2[%c0_2, %c0_3] : memref<1x16xf32, #tpu.memory_space<vmem>>, vector<1x16xf32>
    %cst = arith.constant dense<0.000000e+00> : vector<16xf32>
    %5 = vector.multi_reduction <add>, %3, %cst [0] : vector<128x16xf32> to vector<16xf32>
    %6 = vector.shape_cast %5 : vector<16xf32> to vector<1x16xf32>
    %7 = arith.addf %4, %6 : vector<1x16xf32>
    %c0_4 = arith.constant 0 : index
    %c0_5 = arith.constant 0 : index
    %8 = vector.load %arg2[%c0_4, %c0_5] : memref<1x16xf32, #tpu.memory_space<vmem>>, vector<1x16xf32>
    tpu.vector_store %arg2[%c0_4, %c0_5], %7 {strides = array<i32>} : memref<1x16xf32, #tpu.memory_space<vmem>>, vector<1x16xf32>,
    %c0_6 = arith.constant 0 : index
    %c0_7 = arith.constant 0 : index
    %9 = vector.load %arg3[%c0_6, %c0_7] : memref<1x16xf32, #tpu.memory_space<vmem>>, vector<1x16xf32>
    %10 = arith.mulf %3, %3 : vector<128x16xf32>
    %cst_8 = arith.constant dense<0.000000e+00> : vector<16xf32>
    %11 = vector.multi_reduction <add>, %10, %cst_8 [0] : vector<128x16xf32> to vector<16xf32>
    %12 = vector.shape_cast %11 : vector<16xf32> to vector<1x16xf32>
    %13 = arith.addf %9, %12 : vector<1x16xf32>
    %c0_9 = arith.constant 0 : index
    %c0_10 = arith.constant 0 : index
    %14 = vector.load %arg3[%c0_9, %c0_10] : memref<1x16xf32, #tpu.memory_space<vmem>>, vector<1x16xf32>
    tpu.vector_store %arg3[%c0_9, %c0_10], %13 {strides = array<i32>} : memref<1x16xf32, #tpu.memory_space<vmem>>, vector<1x16xf32>,
    return
  }
  func.func @transform_0(%arg0: i32) -> (i32, i32) {
    %c0_i32 = arith.constant 0 : i32
    %c0_i32_0 = arith.constant 0 : i32
    return %arg0, %c0_i32 : i32, i32
  }
  func.func @transform_1(%arg0: i32) -> (i32, i32) {
    %c0_i32 = arith.constant 0 : i32
    %c0_i32_0 = arith.constant 0 : i32
    %c0_i32_1 = arith.constant 0 : i32
    return %c0_i32, %c0_i32_0 : i32, i32
  }
  func.func @transform_2(%arg0: i32) -> (i32, i32) {
    %c0_i32 = arith.constant 0 : i32
    %c0_i32_0 = arith.constant 0 : i32
    %c0_i32_1 = arith.constant 0 : i32
    return %c0_i32, %c0_i32_0 : i32, i32
  }
}

module attributes {stable_mosaic.version = 11 : i64} {
  func.func @_bn_apply_kernel(%arg0: i32, %arg1: memref<128x16xf32, #tpu.memory_space<vmem>>, %arg2: memref<1x16xf32, #tpu.memory_space<vmem>>, %arg3: memref<1x16xf32, #tpu.memory_space<vmem>>, %arg4: memref<128x16xf32, #tpu.memory_space<vmem>>) attributes {dimension_semantics = [#tpu.dimension_semantics<parallel>], iteration_bounds = array<i64: 1>, scalar_prefetch = 0 : i64, scratch_operands = 0 : i64, tpu.core_type = #tpu.core_type<tc>, window_params = [{transform_indices = @transform_0, window_bounds = array<i64: 128, 16>}, {pipeline_mode = #tpu.pipeline_mode<synchronous>, transform_indices = @transform_1, window_bounds = array<i64: 1, 16>}, {pipeline_mode = #tpu.pipeline_mode<synchronous>, transform_indices = @transform_2, window_bounds = array<i64: 1, 16>}, {transform_indices = @transform_3, window_bounds = array<i64: 128, 16>}]} {
    %c0 = arith.constant 0 : index
    %c0_0 = arith.constant 0 : index
    %0 = vector.load %arg1[%c0, %c0_0] : memref<128x16xf32, #tpu.memory_space<vmem>>, vector<128x16xf32>
    %c0_1 = arith.constant 0 : index
    %c0_2 = arith.constant 0 : index
    %1 = vector.load %arg2[%c0_1, %c0_2] : memref<1x16xf32, #tpu.memory_space<vmem>>, vector<1x16xf32>
    %2 = vector.broadcast %1 : vector<1x16xf32> to vector<128x16xf32>
    %3 = arith.mulf %0, %2 : vector<128x16xf32>
    %c0_3 = arith.constant 0 : index
    %c0_4 = arith.constant 0 : index
    %4 = vector.load %arg3[%c0_3, %c0_4] : memref<1x16xf32, #tpu.memory_space<vmem>>, vector<1x16xf32>
    %5 = vector.broadcast %4 : vector<1x16xf32> to vector<128x16xf32>
    %6 = arith.addf %3, %5 : vector<128x16xf32>
    %c0_5 = arith.constant 0 : index
    %c0_6 = arith.constant 0 : index
    %7 = vector.load %arg4[%c0_5, %c0_6] : memref<128x16xf32, #tpu.memory_space<vmem>>, vector<128x16xf32>
    tpu.vector_store %arg4[%c0_5, %c0_6], %6 {strides = array<i32>} : memref<128x16xf32, #tpu.memory_space<vmem>>, vector<128x16xf32>,
    return
  }
  func.func @transform_0(%arg0: i32) -> (i32, i32) {
    %c0_i32 = arith.constant 0 : i32
    %c0_i32_0 = arith.constant 0 : i32
    return %arg0, %c0_i32 : i32, i32
  }
  func.func @transform_1(%arg0: i32) -> (i32, i32) {
    %c0_i32 = arith.constant 0 : i32
    %c0_i32_0 = arith.constant 0 : i32
    %c0_i32_1 = arith.constant 0 : i32
    return %c0_i32, %c0_i32_0 : i32, i32
  }
  func.func @transform_2(%arg0: i32) -> (i32, i32) {
    %c0_i32 = arith.constant 0 : i32
    %c0_i32_0 = arith.constant 0 : i32
    %c0_i32_1 = arith.constant 0 : i32
    return %c0_i32, %c0_i32_0 : i32, i32
  }
  func.func @transform_3(%arg0: i32) -> (i32, i32) {
    %c0_i32 = arith.constant 0 : i32
    %c0_i32_0 = arith.constant 0 : i32
    return %arg0, %c0_i32 : i32, i32
  }
}

module attributes {stable_mosaic.version = 11 : i64} {
  func.func @_bmm_kernel(%arg0: i32, %arg1: i32, %arg2: i32, %arg3: memref<1x32x256xbf16, #tpu.memory_space<vmem>>, %arg4: memref<1x256x128xbf16, #tpu.memory_space<vmem>>, %arg5: memref<1x128xf32, #tpu.memory_space<vmem>>, %arg6: memref<1x32x128xf32, #tpu.memory_space<vmem>>, %arg7: memref<32x128xf32, #tpu.memory_space<vmem>>) attributes {dimension_semantics = [#tpu.dimension_semantics<parallel>, #tpu.dimension_semantics<parallel>, #tpu.dimension_semantics<arbitrary>], iteration_bounds = array<i64: 1, 1, 1>, scalar_prefetch = 0 : i64, scratch_operands = 1 : i64, tpu.core_type = #tpu.core_type<tc>, window_params = [{transform_indices = @transform_0, window_bounds = array<i64: 1, 32, 256>}, {transform_indices = @transform_1, window_bounds = array<i64: 1, 256, 128>}, {pipeline_mode = #tpu.pipeline_mode<synchronous>, transform_indices = @transform_2, window_bounds = array<i64: 1, 128>}, {transform_indices = @transform_3, window_bounds = array<i64: 1, 32, 128>}]} {
    %c0_i32 = arith.constant 0 : i32
    %0 = arith.cmpi eq, %arg2, %c0_i32 : i32
    %1 = arith.extui %0 : i1 to i32
    %c0_i32_0 = arith.constant 0 : i32
    %2 = arith.cmpi ne, %1, %c0_i32_0 : i32
    scf.if %2 {
      %cst_14 = arith.constant 0.000000e+00 : f32
      %21 = vector.broadcast %cst_14 : f32 to vector<32x128xf32>
      %c0_15 = arith.constant 0 : index
      %c0_16 = arith.constant 0 : index
      %22 = vector.load %arg7[%c0_15, %c0_16] : memref<32x128xf32, #tpu.memory_space<vmem>>, vector<32x128xf32>
      tpu.vector_store %arg7[%c0_15, %c0_16], %21 {strides = array<i32>} : memref<32x128xf32, #tpu.memory_space<vmem>>, vector<32x128xf32>,
    } else {
    }
    %c0 = arith.constant 0 : index
    %c0_1 = arith.constant 0 : index
    %c0_2 = arith.constant 0 : index
    %3 = vector.load %arg3[%c0, %c0_1, %c0_2] : memref<1x32x256xbf16, #tpu.memory_space<vmem>>, vector<1x32x256xbf16>
    %4 = vector.shape_cast %3 : vector<1x32x256xbf16> to vector<32x256xbf16>
    %5 = arith.extf %4 : vector<32x256xbf16> to vector<32x256xf32>
    %cst = arith.constant 0.000000e+00 : f32
    %6 = vector.broadcast %cst : f32 to vector<32x256xf32>
    %7 = arith.cmpf oge, %5, %6 : vector<32x256xf32>
    %cst_3 = arith.constant 2.000000e-01 : f32
    %8 = vector.broadcast %cst_3 : f32 to vector<32x256xf32>
    %9 = arith.mulf %8, %5 : vector<32x256xf32>
    %10 = arith.select %7, %5, %9 : vector<32x256xi1>, vector<32x256xf32>
    %11 = arith.truncf %10 : vector<32x256xf32> to vector<32x256xbf16>
    %c0_4 = arith.constant 0 : index
    %c0_5 = arith.constant 0 : index
    %12 = vector.load %arg7[%c0_4, %c0_5] : memref<32x128xf32, #tpu.memory_space<vmem>>, vector<32x128xf32>
    %c0_6 = arith.constant 0 : index
    %c0_7 = arith.constant 0 : index
    %c0_8 = arith.constant 0 : index
    %13 = vector.load %arg4[%c0_6, %c0_7, %c0_8] : memref<1x256x128xbf16, #tpu.memory_space<vmem>>, vector<1x256x128xbf16>
    %14 = vector.shape_cast %13 : vector<1x256x128xbf16> to vector<256x128xbf16>
    %cst_9 = arith.constant dense<0.000000e+00> : vector<32x128xf32>
    %15 = tpu.matmul %11, %14, %cst_9 {dimension_numbers = #tpu.dot_dimension_numbers<[1], [0], [0], [1], [0, 0, 1, 1], [], []>} : vector<32x256xbf16>, vector<256x128xbf16>, vector<32x128xf32> -> vector<32x128xf32>
    %16 = arith.addf %12, %15 : vector<32x128xf32>
    %c0_10 = arith.constant 0 : index
    %c0_11 = arith.constant 0 : index
    %17 = vector.load %arg7[%c0_10, %c0_11] : memref<32x128xf32, #tpu.memory_space<vmem>>, vector<32x128xf32>
    tpu.vector_store %arg7[%c0_10, %c0_11], %16 {strides = array<i32>} : memref<32x128xf32, #tpu.memory_space<vmem>>, vector<32x128xf32>,
    %c0_i32_12 = arith.constant 0 : i32
    %18 = arith.cmpi eq, %arg2, %c0_i32_12 : i32
    %19 = arith.extui %18 : i1 to i32
    %c0_i32_13 = arith.constant 0 : i32
    %20 = arith.cmpi ne, %19, %c0_i32_13 : i32
    scf.if %20 {
      %c0_14 = arith.constant 0 : index
      %c0_15 = arith.constant 0 : index
      %21 = vector.load %arg7[%c0_14, %c0_15] : memref<32x128xf32, #tpu.memory_space<vmem>>, vector<32x128xf32>
      %c0_16 = arith.constant 0 : index
      %c0_17 = arith.constant 0 : index
      %22 = vector.load %arg5[%c0_16, %c0_17] : memref<1x128xf32, #tpu.memory_space<vmem>>, vector<1x128xf32>
      %23 = vector.broadcast %22 : vector<1x128xf32> to vector<32x128xf32>
      %24 = arith.addf %21, %23 : vector<32x128xf32>
      %c0_18 = arith.constant 0 : index
      %c0_19 = arith.constant 0 : index
      %c0_20 = arith.constant 0 : index
      %25 = vector.load %arg6[%c0_18, %c0_19, %c0_20] : memref<1x32x128xf32, #tpu.memory_space<vmem>>, vector<1x32x128xf32>
      %26 = vector.shape_cast %25 : vector<1x32x128xf32> to vector<32x128xf32>
      %27 = vector.shape_cast %24 : vector<32x128xf32> to vector<1x32x128xf32>
      tpu.vector_store %arg6[%c0_18, %c0_19, %c0_20], %27 {strides = array<i32>} : memref<1x32x128xf32, #tpu.memory_space<vmem>>, vector<1x32x128xf32>,
    } else {
    }
    return
  }
  func.func @transform_0(%arg0: i32, %arg1: i32, %arg2: i32) -> (i32, i32, i32) {
    %c0_i32 = arith.constant 0 : i32
    return %arg0, %arg1, %arg2 : i32, i32, i32
  }
  func.func @transform_1(%arg0: i32, %arg1: i32, %arg2: i32) -> (i32, i32, i32) {
    %c0_i32 = arith.constant 0 : i32
    %c0_i32_0 = arith.constant 0 : i32
    return %arg0, %arg2, %c0_i32 : i32, i32, i32
  }
  func.func @transform_2(%arg0: i32, %arg1: i32, %arg2: i32) -> (i32, i32) {
    %c0_i32 = arith.constant 0 : i32
    %c0_i32_0 = arith.constant 0 : i32
    %c0_i32_1 = arith.constant 0 : i32
    return %c0_i32, %c0_i32_0 : i32, i32
  }
  func.func @transform_3(%arg0: i32, %arg1: i32, %arg2: i32) -> (i32, i32, i32) {
    %c0_i32 = arith.constant 0 : i32
    %c0_i32_0 = arith.constant 0 : i32
    return %arg0, %arg1, %c0_i32 : i32, i32, i32
  }
}

module attributes {stable_mosaic.version = 11 : i64} {
  func.func @_bn_apply_kernel(%arg0: i32, %arg1: memref<32x32xf32, #tpu.memory_space<vmem>>, %arg2: memref<1x32xf32, #tpu.memory_space<vmem>>, %arg3: memref<1x32xf32, #tpu.memory_space<vmem>>, %arg4: memref<32x32xf32, #tpu.memory_space<vmem>>) attributes {dimension_semantics = [#tpu.dimension_semantics<parallel>], iteration_bounds = array<i64: 1>, scalar_prefetch = 0 : i64, scratch_operands = 0 : i64, tpu.core_type = #tpu.core_type<tc>, window_params = [{transform_indices = @transform_0, window_bounds = array<i64: 32, 32>}, {pipeline_mode = #tpu.pipeline_mode<synchronous>, transform_indices = @transform_1, window_bounds = array<i64: 1, 32>}, {pipeline_mode = #tpu.pipeline_mode<synchronous>, transform_indices = @transform_2, window_bounds = array<i64: 1, 32>}, {transform_indices = @transform_3, window_bounds = array<i64: 32, 32>}]} {
    %c0 = arith.constant 0 : index
    %c0_0 = arith.constant 0 : index
    %0 = vector.load %arg1[%c0, %c0_0] : memref<32x32xf32, #tpu.memory_space<vmem>>, vector<32x32xf32>
    %c0_1 = arith.constant 0 : index
    %c0_2 = arith.constant 0 : index
    %1 = vector.load %arg2[%c0_1, %c0_2] : memref<1x32xf32, #tpu.memory_space<vmem>>, vector<1x32xf32>
    %2 = vector.broadcast %1 : vector<1x32xf32> to vector<32x32xf32>
    %3 = arith.mulf %0, %2 : vector<32x32xf32>
    %c0_3 = arith.constant 0 : index
    %c0_4 = arith.constant 0 : index
    %4 = vector.load %arg3[%c0_3, %c0_4] : memref<1x32xf32, #tpu.memory_space<vmem>>, vector<1x32xf32>
    %5 = vector.broadcast %4 : vector<1x32xf32> to vector<32x32xf32>
    %6 = arith.addf %3, %5 : vector<32x32xf32>
    %c0_5 = arith.constant 0 : index
    %c0_6 = arith.constant 0 : index
    %7 = vector.load %arg4[%c0_5, %c0_6] : memref<32x32xf32, #tpu.memory_space<vmem>>, vector<32x32xf32>
    tpu.vector_store %arg4[%c0_5, %c0_6], %6 {strides = array<i32>} : memref<32x32xf32, #tpu.memory_space<vmem>>, vector<32x32xf32>,
    return
  }
  func.func @transform_0(%arg0: i32) -> (i32, i32) {
    %c0_i32 = arith.constant 0 : i32
    %c0_i32_0 = arith.constant 0 : i32
    return %arg0, %c0_i32 : i32, i32
  }
  func.func @transform_1(%arg0: i32) -> (i32, i32) {
    %c0_i32 = arith.constant 0 : i32
    %c0_i32_0 = arith.constant 0 : i32
    %c0_i32_1 = arith.constant 0 : i32
    return %c0_i32, %c0_i32_0 : i32, i32
  }
  func.func @transform_2(%arg0: i32) -> (i32, i32) {
    %c0_i32 = arith.constant 0 : i32
    %c0_i32_0 = arith.constant 0 : i32
    %c0_i32_1 = arith.constant 0 : i32
    return %c0_i32, %c0_i32_0 : i32, i32
  }
  func.func @transform_3(%arg0: i32) -> (i32, i32) {
    %c0_i32 = arith.constant 0 : i32
    %c0_i32_0 = arith.constant 0 : i32
    return %arg0, %c0_i32 : i32, i32
  }
}

module attributes {stable_mosaic.version = 11 : i64} {
  func.func @_bn_stats_kernel(%arg0: i32, %arg1: memref<32x32xf32, #tpu.memory_space<vmem>>, %arg2: memref<1x32xf32, #tpu.memory_space<vmem>>, %arg3: memref<1x32xf32, #tpu.memory_space<vmem>>) attributes {dimension_semantics = [#tpu.dimension_semantics<arbitrary>], iteration_bounds = array<i64: 1>, scalar_prefetch = 0 : i64, scratch_operands = 0 : i64, tpu.core_type = #tpu.core_type<tc>, window_params = [{transform_indices = @transform_0, window_bounds = array<i64: 32, 32>}, {pipeline_mode = #tpu.pipeline_mode<synchronous>, transform_indices = @transform_1, window_bounds = array<i64: 1, 32>}, {pipeline_mode = #tpu.pipeline_mode<synchronous>, transform_indices = @transform_2, window_bounds = array<i64: 1, 32>}]} {
    %c0_i32 = arith.constant 0 : i32
    %0 = arith.cmpi eq, %arg0, %c0_i32 : i32
    %1 = arith.extui %0 : i1 to i32
    %c0_i32_0 = arith.constant 0 : i32
    %2 = arith.cmpi ne, %1, %c0_i32_0 : i32
    scf.if %2 {
      %cst_11 = arith.constant 0.000000e+00 : f32
      %15 = vector.broadcast %cst_11 : f32 to vector<1x32xf32>
      %c0_12 = arith.constant 0 : index
      %c0_13 = arith.constant 0 : index
      %16 = vector.load %arg2[%c0_12, %c0_13] : memref<1x32xf32, #tpu.memory_space<vmem>>, vector<1x32xf32>
      tpu.vector_store %arg2[%c0_12, %c0_13], %15 {strides = array<i32>} : memref<1x32xf32, #tpu.memory_space<vmem>>, vector<1x32xf32>,
      %cst_14 = arith.constant 0.000000e+00 : f32
      %17 = vector.broadcast %cst_14 : f32 to vector<1x32xf32>
      %c0_15 = arith.constant 0 : index
      %c0_16 = arith.constant 0 : index
      %18 = vector.load %arg3[%c0_15, %c0_16] : memref<1x32xf32, #tpu.memory_space<vmem>>, vector<1x32xf32>
      tpu.vector_store %arg3[%c0_15, %c0_16], %17 {strides = array<i32>} : memref<1x32xf32, #tpu.memory_space<vmem>>, vector<1x32xf32>,
    } else {
    }
    %c0 = arith.constant 0 : index
    %c0_1 = arith.constant 0 : index
    %3 = vector.load %arg1[%c0, %c0_1] : memref<32x32xf32, #tpu.memory_space<vmem>>, vector<32x32xf32>
    %c0_2 = arith.constant 0 : index
    %c0_3 = arith.constant 0 : index
    %4 = vector.load %arg2[%c0_2, %c0_3] : memref<1x32xf32, #tpu.memory_space<vmem>>, vector<1x32xf32>
    %cst = arith.constant dense<0.000000e+00> : vector<32xf32>
    %5 = vector.multi_reduction <add>, %3, %cst [0] : vector<32x32xf32> to vector<32xf32>
    %6 = vector.shape_cast %5 : vector<32xf32> to vector<1x32xf32>
    %7 = arith.addf %4, %6 : vector<1x32xf32>
    %c0_4 = arith.constant 0 : index
    %c0_5 = arith.constant 0 : index
    %8 = vector.load %arg2[%c0_4, %c0_5] : memref<1x32xf32, #tpu.memory_space<vmem>>, vector<1x32xf32>
    tpu.vector_store %arg2[%c0_4, %c0_5], %7 {strides = array<i32>} : memref<1x32xf32, #tpu.memory_space<vmem>>, vector<1x32xf32>,
    %c0_6 = arith.constant 0 : index
    %c0_7 = arith.constant 0 : index
    %9 = vector.load %arg3[%c0_6, %c0_7] : memref<1x32xf32, #tpu.memory_space<vmem>>, vector<1x32xf32>
    %10 = arith.mulf %3, %3 : vector<32x32xf32>
    %cst_8 = arith.constant dense<0.000000e+00> : vector<32xf32>
    %11 = vector.multi_reduction <add>, %10, %cst_8 [0] : vector<32x32xf32> to vector<32xf32>
    %12 = vector.shape_cast %11 : vector<32xf32> to vector<1x32xf32>
    %13 = arith.addf %9, %12 : vector<1x32xf32>
    %c0_9 = arith.constant 0 : index
    %c0_10 = arith.constant 0 : index
    %14 = vector.load %arg3[%c0_9, %c0_10] : memref<1x32xf32, #tpu.memory_space<vmem>>, vector<1x32xf32>
    tpu.vector_store %arg3[%c0_9, %c0_10], %13 {strides = array<i32>} : memref<1x32xf32, #tpu.memory_space<vmem>>, vector<1x32xf32>,
    return
  }
  func.func @transform_0(%arg0: i32) -> (i32, i32) {
    %c0_i32 = arith.constant 0 : i32
    %c0_i32_0 = arith.constant 0 : i32
    return %arg0, %c0_i32 : i32, i32
  }
  func.func @transform_1(%arg0: i32) -> (i32, i32) {
    %c0_i32 = arith.constant 0 : i32
    %c0_i32_0 = arith.constant 0 : i32
    %c0_i32_1 = arith.constant 0 : i32
    return %c0_i32, %c0_i32_0 : i32, i32
  }
  func.func @transform_2(%arg0: i32) -> (i32, i32) {
    %c0_i32 = arith.constant 0 : i32
    %c0_i32_0 = arith.constant 0 : i32
    %c0_i32_1 = arith.constant 0 : i32
    return %c0_i32, %c0_i32_0 : i32, i32
  }
}

module attributes {stable_mosaic.version = 11 : i64} {
  func.func @_bmm_kernel(%arg0: i32, %arg1: i32, %arg2: i32, %arg3: memref<1x8x512xbf16, #tpu.memory_space<vmem>>, %arg4: memref<1x512x128xbf16, #tpu.memory_space<vmem>>, %arg5: memref<1x128xf32, #tpu.memory_space<vmem>>, %arg6: memref<1x8x128xf32, #tpu.memory_space<vmem>>, %arg7: memref<8x128xf32, #tpu.memory_space<vmem>>) attributes {dimension_semantics = [#tpu.dimension_semantics<parallel>, #tpu.dimension_semantics<parallel>, #tpu.dimension_semantics<arbitrary>], iteration_bounds = array<i64: 1, 1, 1>, scalar_prefetch = 0 : i64, scratch_operands = 1 : i64, tpu.core_type = #tpu.core_type<tc>, window_params = [{transform_indices = @transform_0, window_bounds = array<i64: 1, 8, 512>}, {transform_indices = @transform_1, window_bounds = array<i64: 1, 512, 128>}, {pipeline_mode = #tpu.pipeline_mode<synchronous>, transform_indices = @transform_2, window_bounds = array<i64: 1, 128>}, {transform_indices = @transform_3, window_bounds = array<i64: 1, 8, 128>}]} {
    %c0_i32 = arith.constant 0 : i32
    %0 = arith.cmpi eq, %arg2, %c0_i32 : i32
    %1 = arith.extui %0 : i1 to i32
    %c0_i32_0 = arith.constant 0 : i32
    %2 = arith.cmpi ne, %1, %c0_i32_0 : i32
    scf.if %2 {
      %cst_14 = arith.constant 0.000000e+00 : f32
      %21 = vector.broadcast %cst_14 : f32 to vector<8x128xf32>
      %c0_15 = arith.constant 0 : index
      %c0_16 = arith.constant 0 : index
      %22 = vector.load %arg7[%c0_15, %c0_16] : memref<8x128xf32, #tpu.memory_space<vmem>>, vector<8x128xf32>
      tpu.vector_store %arg7[%c0_15, %c0_16], %21 {strides = array<i32>} : memref<8x128xf32, #tpu.memory_space<vmem>>, vector<8x128xf32>,
    } else {
    }
    %c0 = arith.constant 0 : index
    %c0_1 = arith.constant 0 : index
    %c0_2 = arith.constant 0 : index
    %3 = vector.load %arg3[%c0, %c0_1, %c0_2] : memref<1x8x512xbf16, #tpu.memory_space<vmem>>, vector<1x8x512xbf16>
    %4 = vector.shape_cast %3 : vector<1x8x512xbf16> to vector<8x512xbf16>
    %5 = arith.extf %4 : vector<8x512xbf16> to vector<8x512xf32>
    %cst = arith.constant 0.000000e+00 : f32
    %6 = vector.broadcast %cst : f32 to vector<8x512xf32>
    %7 = arith.cmpf oge, %5, %6 : vector<8x512xf32>
    %cst_3 = arith.constant 2.000000e-01 : f32
    %8 = vector.broadcast %cst_3 : f32 to vector<8x512xf32>
    %9 = arith.mulf %8, %5 : vector<8x512xf32>
    %10 = arith.select %7, %5, %9 : vector<8x512xi1>, vector<8x512xf32>
    %11 = arith.truncf %10 : vector<8x512xf32> to vector<8x512xbf16>
    %c0_4 = arith.constant 0 : index
    %c0_5 = arith.constant 0 : index
    %12 = vector.load %arg7[%c0_4, %c0_5] : memref<8x128xf32, #tpu.memory_space<vmem>>, vector<8x128xf32>
    %c0_6 = arith.constant 0 : index
    %c0_7 = arith.constant 0 : index
    %c0_8 = arith.constant 0 : index
    %13 = vector.load %arg4[%c0_6, %c0_7, %c0_8] : memref<1x512x128xbf16, #tpu.memory_space<vmem>>, vector<1x512x128xbf16>
    %14 = vector.shape_cast %13 : vector<1x512x128xbf16> to vector<512x128xbf16>
    %cst_9 = arith.constant dense<0.000000e+00> : vector<8x128xf32>
    %15 = tpu.matmul %11, %14, %cst_9 {dimension_numbers = #tpu.dot_dimension_numbers<[1], [0], [0], [1], [0, 0, 1, 1], [], []>} : vector<8x512xbf16>, vector<512x128xbf16>, vector<8x128xf32> -> vector<8x128xf32>
    %16 = arith.addf %12, %15 : vector<8x128xf32>
    %c0_10 = arith.constant 0 : index
    %c0_11 = arith.constant 0 : index
    %17 = vector.load %arg7[%c0_10, %c0_11] : memref<8x128xf32, #tpu.memory_space<vmem>>, vector<8x128xf32>
    tpu.vector_store %arg7[%c0_10, %c0_11], %16 {strides = array<i32>} : memref<8x128xf32, #tpu.memory_space<vmem>>, vector<8x128xf32>,
    %c0_i32_12 = arith.constant 0 : i32
    %18 = arith.cmpi eq, %arg2, %c0_i32_12 : i32
    %19 = arith.extui %18 : i1 to i32
    %c0_i32_13 = arith.constant 0 : i32
    %20 = arith.cmpi ne, %19, %c0_i32_13 : i32
    scf.if %20 {
      %c0_14 = arith.constant 0 : index
      %c0_15 = arith.constant 0 : index
      %21 = vector.load %arg7[%c0_14, %c0_15] : memref<8x128xf32, #tpu.memory_space<vmem>>, vector<8x128xf32>
      %c0_16 = arith.constant 0 : index
      %c0_17 = arith.constant 0 : index
      %22 = vector.load %arg5[%c0_16, %c0_17] : memref<1x128xf32, #tpu.memory_space<vmem>>, vector<1x128xf32>
      %23 = vector.broadcast %22 : vector<1x128xf32> to vector<8x128xf32>
      %24 = arith.addf %21, %23 : vector<8x128xf32>
      %c0_18 = arith.constant 0 : index
      %c0_19 = arith.constant 0 : index
      %c0_20 = arith.constant 0 : index
      %25 = vector.load %arg6[%c0_18, %c0_19, %c0_20] : memref<1x8x128xf32, #tpu.memory_space<vmem>>, vector<1x8x128xf32>
      %26 = vector.shape_cast %25 : vector<1x8x128xf32> to vector<8x128xf32>
      %27 = vector.shape_cast %24 : vector<8x128xf32> to vector<1x8x128xf32>
      tpu.vector_store %arg6[%c0_18, %c0_19, %c0_20], %27 {strides = array<i32>} : memref<1x8x128xf32, #tpu.memory_space<vmem>>, vector<1x8x128xf32>,
    } else {
    }
    return
  }
  func.func @transform_0(%arg0: i32, %arg1: i32, %arg2: i32) -> (i32, i32, i32) {
    %c0_i32 = arith.constant 0 : i32
    return %arg0, %arg1, %arg2 : i32, i32, i32
  }
  func.func @transform_1(%arg0: i32, %arg1: i32, %arg2: i32) -> (i32, i32, i32) {
    %c0_i32 = arith.constant 0 : i32
    %c0_i32_0 = arith.constant 0 : i32
    return %arg0, %arg2, %c0_i32 : i32, i32, i32
  }
  func.func @transform_2(%arg0: i32, %arg1: i32, %arg2: i32) -> (i32, i32) {
    %c0_i32 = arith.constant 0 : i32
    %c0_i32_0 = arith.constant 0 : i32
    %c0_i32_1 = arith.constant 0 : i32
    return %c0_i32, %c0_i32_0 : i32, i32
  }
  func.func @transform_3(%arg0: i32, %arg1: i32, %arg2: i32) -> (i32, i32, i32) {
    %c0_i32 = arith.constant 0 : i32
    %c0_i32_0 = arith.constant 0 : i32
    return %arg0, %arg1, %c0_i32 : i32, i32, i32
  }
}

module attributes {stable_mosaic.version = 11 : i64} {
  func.func @_bn_stats_kernel(%arg0: i32, %arg1: memref<8x64xf32, #tpu.memory_space<vmem>>, %arg2: memref<1x64xf32, #tpu.memory_space<vmem>>, %arg3: memref<1x64xf32, #tpu.memory_space<vmem>>) attributes {dimension_semantics = [#tpu.dimension_semantics<arbitrary>], iteration_bounds = array<i64: 1>, scalar_prefetch = 0 : i64, scratch_operands = 0 : i64, tpu.core_type = #tpu.core_type<tc>, window_params = [{transform_indices = @transform_0, window_bounds = array<i64: 8, 64>}, {pipeline_mode = #tpu.pipeline_mode<synchronous>, transform_indices = @transform_1, window_bounds = array<i64: 1, 64>}, {pipeline_mode = #tpu.pipeline_mode<synchronous>, transform_indices = @transform_2, window_bounds = array<i64: 1, 64>}]} {
    %c0_i32 = arith.constant 0 : i32
    %0 = arith.cmpi eq, %arg0, %c0_i32 : i32
    %1 = arith.extui %0 : i1 to i32
    %c0_i32_0 = arith.constant 0 : i32
    %2 = arith.cmpi ne, %1, %c0_i32_0 : i32
    scf.if %2 {
      %cst_11 = arith.constant 0.000000e+00 : f32
      %15 = vector.broadcast %cst_11 : f32 to vector<1x64xf32>
      %c0_12 = arith.constant 0 : index
      %c0_13 = arith.constant 0 : index
      %16 = vector.load %arg2[%c0_12, %c0_13] : memref<1x64xf32, #tpu.memory_space<vmem>>, vector<1x64xf32>
      tpu.vector_store %arg2[%c0_12, %c0_13], %15 {strides = array<i32>} : memref<1x64xf32, #tpu.memory_space<vmem>>, vector<1x64xf32>,
      %cst_14 = arith.constant 0.000000e+00 : f32
      %17 = vector.broadcast %cst_14 : f32 to vector<1x64xf32>
      %c0_15 = arith.constant 0 : index
      %c0_16 = arith.constant 0 : index
      %18 = vector.load %arg3[%c0_15, %c0_16] : memref<1x64xf32, #tpu.memory_space<vmem>>, vector<1x64xf32>
      tpu.vector_store %arg3[%c0_15, %c0_16], %17 {strides = array<i32>} : memref<1x64xf32, #tpu.memory_space<vmem>>, vector<1x64xf32>,
    } else {
    }
    %c0 = arith.constant 0 : index
    %c0_1 = arith.constant 0 : index
    %3 = vector.load %arg1[%c0, %c0_1] : memref<8x64xf32, #tpu.memory_space<vmem>>, vector<8x64xf32>
    %c0_2 = arith.constant 0 : index
    %c0_3 = arith.constant 0 : index
    %4 = vector.load %arg2[%c0_2, %c0_3] : memref<1x64xf32, #tpu.memory_space<vmem>>, vector<1x64xf32>
    %cst = arith.constant dense<0.000000e+00> : vector<64xf32>
    %5 = vector.multi_reduction <add>, %3, %cst [0] : vector<8x64xf32> to vector<64xf32>
    %6 = vector.shape_cast %5 : vector<64xf32> to vector<1x64xf32>
    %7 = arith.addf %4, %6 : vector<1x64xf32>
    %c0_4 = arith.constant 0 : index
    %c0_5 = arith.constant 0 : index
    %8 = vector.load %arg2[%c0_4, %c0_5] : memref<1x64xf32, #tpu.memory_space<vmem>>, vector<1x64xf32>
    tpu.vector_store %arg2[%c0_4, %c0_5], %7 {strides = array<i32>} : memref<1x64xf32, #tpu.memory_space<vmem>>, vector<1x64xf32>,
    %c0_6 = arith.constant 0 : index
    %c0_7 = arith.constant 0 : index
    %9 = vector.load %arg3[%c0_6, %c0_7] : memref<1x64xf32, #tpu.memory_space<vmem>>, vector<1x64xf32>
    %10 = arith.mulf %3, %3 : vector<8x64xf32>
    %cst_8 = arith.constant dense<0.000000e+00> : vector<64xf32>
    %11 = vector.multi_reduction <add>, %10, %cst_8 [0] : vector<8x64xf32> to vector<64xf32>
    %12 = vector.shape_cast %11 : vector<64xf32> to vector<1x64xf32>
    %13 = arith.addf %9, %12 : vector<1x64xf32>
    %c0_9 = arith.constant 0 : index
    %c0_10 = arith.constant 0 : index
    %14 = vector.load %arg3[%c0_9, %c0_10] : memref<1x64xf32, #tpu.memory_space<vmem>>, vector<1x64xf32>
    tpu.vector_store %arg3[%c0_9, %c0_10], %13 {strides = array<i32>} : memref<1x64xf32, #tpu.memory_space<vmem>>, vector<1x64xf32>,
    return
  }
  func.func @transform_0(%arg0: i32) -> (i32, i32) {
    %c0_i32 = arith.constant 0 : i32
    %c0_i32_0 = arith.constant 0 : i32
    return %arg0, %c0_i32 : i32, i32
  }
  func.func @transform_1(%arg0: i32) -> (i32, i32) {
    %c0_i32 = arith.constant 0 : i32
    %c0_i32_0 = arith.constant 0 : i32
    %c0_i32_1 = arith.constant 0 : i32
    return %c0_i32, %c0_i32_0 : i32, i32
  }
  func.func @transform_2(%arg0: i32) -> (i32, i32) {
    %c0_i32 = arith.constant 0 : i32
    %c0_i32_0 = arith.constant 0 : i32
    %c0_i32_1 = arith.constant 0 : i32
    return %c0_i32, %c0_i32_0 : i32, i32
  }
}

module attributes {stable_mosaic.version = 11 : i64} {
  func.func @_bn_apply_kernel(%arg0: i32, %arg1: memref<8x64xf32, #tpu.memory_space<vmem>>, %arg2: memref<1x64xf32, #tpu.memory_space<vmem>>, %arg3: memref<1x64xf32, #tpu.memory_space<vmem>>, %arg4: memref<8x64xf32, #tpu.memory_space<vmem>>) attributes {dimension_semantics = [#tpu.dimension_semantics<parallel>], iteration_bounds = array<i64: 1>, scalar_prefetch = 0 : i64, scratch_operands = 0 : i64, tpu.core_type = #tpu.core_type<tc>, window_params = [{transform_indices = @transform_0, window_bounds = array<i64: 8, 64>}, {pipeline_mode = #tpu.pipeline_mode<synchronous>, transform_indices = @transform_1, window_bounds = array<i64: 1, 64>}, {pipeline_mode = #tpu.pipeline_mode<synchronous>, transform_indices = @transform_2, window_bounds = array<i64: 1, 64>}, {transform_indices = @transform_3, window_bounds = array<i64: 8, 64>}]} {
    %c0 = arith.constant 0 : index
    %c0_0 = arith.constant 0 : index
    %0 = vector.load %arg1[%c0, %c0_0] : memref<8x64xf32, #tpu.memory_space<vmem>>, vector<8x64xf32>
    %c0_1 = arith.constant 0 : index
    %c0_2 = arith.constant 0 : index
    %1 = vector.load %arg2[%c0_1, %c0_2] : memref<1x64xf32, #tpu.memory_space<vmem>>, vector<1x64xf32>
    %2 = vector.broadcast %1 : vector<1x64xf32> to vector<8x64xf32>
    %3 = arith.mulf %0, %2 : vector<8x64xf32>
    %c0_3 = arith.constant 0 : index
    %c0_4 = arith.constant 0 : index
    %4 = vector.load %arg3[%c0_3, %c0_4] : memref<1x64xf32, #tpu.memory_space<vmem>>, vector<1x64xf32>
    %5 = vector.broadcast %4 : vector<1x64xf32> to vector<8x64xf32>
    %6 = arith.addf %3, %5 : vector<8x64xf32>
    %c0_5 = arith.constant 0 : index
    %c0_6 = arith.constant 0 : index
    %7 = vector.load %arg4[%c0_5, %c0_6] : memref<8x64xf32, #tpu.memory_space<vmem>>, vector<8x64xf32>
    tpu.vector_store %arg4[%c0_5, %c0_6], %6 {strides = array<i32>} : memref<8x64xf32, #tpu.memory_space<vmem>>, vector<8x64xf32>,
    return
  }
  func.func @transform_0(%arg0: i32) -> (i32, i32) {
    %c0_i32 = arith.constant 0 : i32
    %c0_i32_0 = arith.constant 0 : i32
    return %arg0, %c0_i32 : i32, i32
  }
  func.func @transform_1(%arg0: i32) -> (i32, i32) {
    %c0_i32 = arith.constant 0 : i32
    %c0_i32_0 = arith.constant 0 : i32
    %c0_i32_1 = arith.constant 0 : i32
    return %c0_i32, %c0_i32_0 : i32, i32
  }
  func.func @transform_2(%arg0: i32) -> (i32, i32) {
    %c0_i32 = arith.constant 0 : i32
    %c0_i32_0 = arith.constant 0 : i32
    %c0_i32_1 = arith.constant 0 : i32
    return %c0_i32, %c0_i32_0 : i32, i32
  }
  func.func @transform_3(%arg0: i32) -> (i32, i32) {
    %c0_i32 = arith.constant 0 : i32
    %c0_i32_0 = arith.constant 0 : i32
    return %arg0, %c0_i32 : i32, i32
  }
}

module attributes {stable_mosaic.version = 11 : i64} {
  func.func @_bmm_kernel(%arg0: i32, %arg1: i32, %arg2: i32, %arg3: memref<1x8x256xbf16, #tpu.memory_space<vmem>>, %arg4: memref<1x256x128xbf16, #tpu.memory_space<vmem>>, %arg5: memref<1x128xf32, #tpu.memory_space<vmem>>, %arg6: memref<1x8x128xf32, #tpu.memory_space<vmem>>, %arg7: memref<8x128xf32, #tpu.memory_space<vmem>>) attributes {dimension_semantics = [#tpu.dimension_semantics<parallel>, #tpu.dimension_semantics<parallel>, #tpu.dimension_semantics<arbitrary>], iteration_bounds = array<i64: 4, 1, 1>, scalar_prefetch = 0 : i64, scratch_operands = 1 : i64, tpu.core_type = #tpu.core_type<tc>, window_params = [{transform_indices = @transform_0, window_bounds = array<i64: 1, 8, 256>}, {transform_indices = @transform_1, window_bounds = array<i64: 1, 256, 128>}, {pipeline_mode = #tpu.pipeline_mode<synchronous>, transform_indices = @transform_2, window_bounds = array<i64: 1, 128>}, {transform_indices = @transform_3, window_bounds = array<i64: 1, 8, 128>}]} {
    %c0_i32 = arith.constant 0 : i32
    %0 = arith.cmpi eq, %arg2, %c0_i32 : i32
    %1 = arith.extui %0 : i1 to i32
    %c0_i32_0 = arith.constant 0 : i32
    %2 = arith.cmpi ne, %1, %c0_i32_0 : i32
    scf.if %2 {
      %cst_13 = arith.constant 0.000000e+00 : f32
      %16 = vector.broadcast %cst_13 : f32 to vector<8x128xf32>
      %c0_14 = arith.constant 0 : index
      %c0_15 = arith.constant 0 : index
      %17 = vector.load %arg7[%c0_14, %c0_15] : memref<8x128xf32, #tpu.memory_space<vmem>>, vector<8x128xf32>
      tpu.vector_store %arg7[%c0_14, %c0_15], %16 {strides = array<i32>} : memref<8x128xf32, #tpu.memory_space<vmem>>, vector<8x128xf32>,
    } else {
    }
    %c0 = arith.constant 0 : index
    %c0_1 = arith.constant 0 : index
    %c0_2 = arith.constant 0 : index
    %3 = vector.load %arg3[%c0, %c0_1, %c0_2] : memref<1x8x256xbf16, #tpu.memory_space<vmem>>, vector<1x8x256xbf16>
    %4 = vector.shape_cast %3 : vector<1x8x256xbf16> to vector<8x256xbf16>
    %cst = arith.constant 0.000000e+00 : bf16
    %5 = vector.broadcast %cst : bf16 to vector<8x256xbf16>
    %6 = arith.maximumf %4, %5 : vector<8x256xbf16>
    %c0_3 = arith.constant 0 : index
    %c0_4 = arith.constant 0 : index
    %7 = vector.load %arg7[%c0_3, %c0_4] : memref<8x128xf32, #tpu.memory_space<vmem>>, vector<8x128xf32>
    %c0_5 = arith.constant 0 : index
    %c0_6 = arith.constant 0 : index
    %c0_7 = arith.constant 0 : index
    %8 = vector.load %arg4[%c0_5, %c0_6, %c0_7] : memref<1x256x128xbf16, #tpu.memory_space<vmem>>, vector<1x256x128xbf16>
    %9 = vector.shape_cast %8 : vector<1x256x128xbf16> to vector<256x128xbf16>
    %cst_8 = arith.constant dense<0.000000e+00> : vector<8x128xf32>
    %10 = tpu.matmul %6, %9, %cst_8 {dimension_numbers = #tpu.dot_dimension_numbers<[1], [0], [0], [1], [0, 0, 1, 1], [], []>} : vector<8x256xbf16>, vector<256x128xbf16>, vector<8x128xf32> -> vector<8x128xf32>
    %11 = arith.addf %7, %10 : vector<8x128xf32>
    %c0_9 = arith.constant 0 : index
    %c0_10 = arith.constant 0 : index
    %12 = vector.load %arg7[%c0_9, %c0_10] : memref<8x128xf32, #tpu.memory_space<vmem>>, vector<8x128xf32>
    tpu.vector_store %arg7[%c0_9, %c0_10], %11 {strides = array<i32>} : memref<8x128xf32, #tpu.memory_space<vmem>>, vector<8x128xf32>,
    %c0_i32_11 = arith.constant 0 : i32
    %13 = arith.cmpi eq, %arg2, %c0_i32_11 : i32
    %14 = arith.extui %13 : i1 to i32
    %c0_i32_12 = arith.constant 0 : i32
    %15 = arith.cmpi ne, %14, %c0_i32_12 : i32
    scf.if %15 {
      %c0_13 = arith.constant 0 : index
      %c0_14 = arith.constant 0 : index
      %16 = vector.load %arg7[%c0_13, %c0_14] : memref<8x128xf32, #tpu.memory_space<vmem>>, vector<8x128xf32>
      %c0_15 = arith.constant 0 : index
      %c0_16 = arith.constant 0 : index
      %17 = vector.load %arg5[%c0_15, %c0_16] : memref<1x128xf32, #tpu.memory_space<vmem>>, vector<1x128xf32>
      %18 = vector.broadcast %17 : vector<1x128xf32> to vector<8x128xf32>
      %19 = arith.addf %16, %18 : vector<8x128xf32>
      %c0_17 = arith.constant 0 : index
      %c0_18 = arith.constant 0 : index
      %c0_19 = arith.constant 0 : index
      %20 = vector.load %arg6[%c0_17, %c0_18, %c0_19] : memref<1x8x128xf32, #tpu.memory_space<vmem>>, vector<1x8x128xf32>
      %21 = vector.shape_cast %20 : vector<1x8x128xf32> to vector<8x128xf32>
      %22 = vector.shape_cast %19 : vector<8x128xf32> to vector<1x8x128xf32>
      tpu.vector_store %arg6[%c0_17, %c0_18, %c0_19], %22 {strides = array<i32>} : memref<1x8x128xf32, #tpu.memory_space<vmem>>, vector<1x8x128xf32>,
    } else {
    }
    return
  }
  func.func @transform_0(%arg0: i32, %arg1: i32, %arg2: i32) -> (i32, i32, i32) {
    %c0_i32 = arith.constant 0 : i32
    return %arg0, %arg1, %arg2 : i32, i32, i32
  }
  func.func @transform_1(%arg0: i32, %arg1: i32, %arg2: i32) -> (i32, i32, i32) {
    %c0_i32 = arith.constant 0 : i32
    %c0_i32_0 = arith.constant 0 : i32
    return %arg0, %arg2, %c0_i32 : i32, i32, i32
  }
  func.func @transform_2(%arg0: i32, %arg1: i32, %arg2: i32) -> (i32, i32) {
    %c0_i32 = arith.constant 0 : i32
    %c0_i32_0 = arith.constant 0 : i32
    %c0_i32_1 = arith.constant 0 : i32
    return %c0_i32, %c0_i32_0 : i32, i32
  }
  func.func @transform_3(%arg0: i32, %arg1: i32, %arg2: i32) -> (i32, i32, i32) {
    %c0_i32 = arith.constant 0 : i32
    %c0_i32_0 = arith.constant 0 : i32
    return %arg0, %arg1, %c0_i32 : i32, i32, i32
  }
}

module attributes {stable_mosaic.version = 11 : i64} {
  func.func @_bmm_kernel(%arg0: i32, %arg1: i32, %arg2: i32, %arg3: memref<1x8x512xbf16, #tpu.memory_space<vmem>>, %arg4: memref<1x512x128xbf16, #tpu.memory_space<vmem>>, %arg5: memref<1x128xf32, #tpu.memory_space<vmem>>, %arg6: memref<1x8x128xf32, #tpu.memory_space<vmem>>, %arg7: memref<8x128xf32, #tpu.memory_space<vmem>>) attributes {dimension_semantics = [#tpu.dimension_semantics<parallel>, #tpu.dimension_semantics<parallel>, #tpu.dimension_semantics<arbitrary>], iteration_bounds = array<i64: 1, 1, 2>, scalar_prefetch = 0 : i64, scratch_operands = 1 : i64, tpu.core_type = #tpu.core_type<tc>, window_params = [{transform_indices = @transform_0, window_bounds = array<i64: 1, 8, 512>}, {transform_indices = @transform_1, window_bounds = array<i64: 1, 512, 128>}, {pipeline_mode = #tpu.pipeline_mode<synchronous>, transform_indices = @transform_2, window_bounds = array<i64: 1, 128>}, {transform_indices = @transform_3, window_bounds = array<i64: 1, 8, 128>}]} {
    %c0_i32 = arith.constant 0 : i32
    %0 = arith.cmpi eq, %arg2, %c0_i32 : i32
    %1 = arith.extui %0 : i1 to i32
    %c0_i32_0 = arith.constant 0 : i32
    %2 = arith.cmpi ne, %1, %c0_i32_0 : i32
    scf.if %2 {
      %cst_13 = arith.constant 0.000000e+00 : f32
      %21 = vector.broadcast %cst_13 : f32 to vector<8x128xf32>
      %c0_14 = arith.constant 0 : index
      %c0_15 = arith.constant 0 : index
      %22 = vector.load %arg7[%c0_14, %c0_15] : memref<8x128xf32, #tpu.memory_space<vmem>>, vector<8x128xf32>
      tpu.vector_store %arg7[%c0_14, %c0_15], %21 {strides = array<i32>} : memref<8x128xf32, #tpu.memory_space<vmem>>, vector<8x128xf32>,
    } else {
    }
    %c0 = arith.constant 0 : index
    %c0_1 = arith.constant 0 : index
    %c0_2 = arith.constant 0 : index
    %3 = vector.load %arg3[%c0, %c0_1, %c0_2] : memref<1x8x512xbf16, #tpu.memory_space<vmem>>, vector<1x8x512xbf16>
    %4 = vector.shape_cast %3 : vector<1x8x512xbf16> to vector<8x512xbf16>
    %5 = arith.extf %4 : vector<8x512xbf16> to vector<8x512xf32>
    %cst = arith.constant 0.000000e+00 : f32
    %6 = vector.broadcast %cst : f32 to vector<8x512xf32>
    %7 = arith.cmpf oge, %5, %6 : vector<8x512xf32>
    %cst_3 = arith.constant 2.000000e-01 : f32
    %8 = vector.broadcast %cst_3 : f32 to vector<8x512xf32>
    %9 = arith.mulf %8, %5 : vector<8x512xf32>
    %10 = arith.select %7, %5, %9 : vector<8x512xi1>, vector<8x512xf32>
    %11 = arith.truncf %10 : vector<8x512xf32> to vector<8x512xbf16>
    %c0_4 = arith.constant 0 : index
    %c0_5 = arith.constant 0 : index
    %12 = vector.load %arg7[%c0_4, %c0_5] : memref<8x128xf32, #tpu.memory_space<vmem>>, vector<8x128xf32>
    %c0_6 = arith.constant 0 : index
    %c0_7 = arith.constant 0 : index
    %c0_8 = arith.constant 0 : index
    %13 = vector.load %arg4[%c0_6, %c0_7, %c0_8] : memref<1x512x128xbf16, #tpu.memory_space<vmem>>, vector<1x512x128xbf16>
    %14 = vector.shape_cast %13 : vector<1x512x128xbf16> to vector<512x128xbf16>
    %cst_9 = arith.constant dense<0.000000e+00> : vector<8x128xf32>
    %15 = tpu.matmul %11, %14, %cst_9 {dimension_numbers = #tpu.dot_dimension_numbers<[1], [0], [0], [1], [0, 0, 1, 1], [], []>} : vector<8x512xbf16>, vector<512x128xbf16>, vector<8x128xf32> -> vector<8x128xf32>
    %16 = arith.addf %12, %15 : vector<8x128xf32>
    %c0_10 = arith.constant 0 : index
    %c0_11 = arith.constant 0 : index
    %17 = vector.load %arg7[%c0_10, %c0_11] : memref<8x128xf32, #tpu.memory_space<vmem>>, vector<8x128xf32>
    tpu.vector_store %arg7[%c0_10, %c0_11], %16 {strides = array<i32>} : memref<8x128xf32, #tpu.memory_space<vmem>>, vector<8x128xf32>,
    %c1_i32 = arith.constant 1 : i32
    %18 = arith.cmpi eq, %arg2, %c1_i32 : i32
    %19 = arith.extui %18 : i1 to i32
    %c0_i32_12 = arith.constant 0 : i32
    %20 = arith.cmpi ne, %19, %c0_i32_12 : i32
    scf.if %20 {
      %c0_13 = arith.constant 0 : index
      %c0_14 = arith.constant 0 : index
      %21 = vector.load %arg7[%c0_13, %c0_14] : memref<8x128xf32, #tpu.memory_space<vmem>>, vector<8x128xf32>
      %c0_15 = arith.constant 0 : index
      %c0_16 = arith.constant 0 : index
      %22 = vector.load %arg5[%c0_15, %c0_16] : memref<1x128xf32, #tpu.memory_space<vmem>>, vector<1x128xf32>
      %23 = vector.broadcast %22 : vector<1x128xf32> to vector<8x128xf32>
      %24 = arith.addf %21, %23 : vector<8x128xf32>
      %c0_17 = arith.constant 0 : index
      %c0_18 = arith.constant 0 : index
      %c0_19 = arith.constant 0 : index
      %25 = vector.load %arg6[%c0_17, %c0_18, %c0_19] : memref<1x8x128xf32, #tpu.memory_space<vmem>>, vector<1x8x128xf32>
      %26 = vector.shape_cast %25 : vector<1x8x128xf32> to vector<8x128xf32>
      %27 = vector.shape_cast %24 : vector<8x128xf32> to vector<1x8x128xf32>
      tpu.vector_store %arg6[%c0_17, %c0_18, %c0_19], %27 {strides = array<i32>} : memref<1x8x128xf32, #tpu.memory_space<vmem>>, vector<1x8x128xf32>,
    } else {
    }
    return
  }
  func.func @transform_0(%arg0: i32, %arg1: i32, %arg2: i32) -> (i32, i32, i32) {
    %c0_i32 = arith.constant 0 : i32
    return %arg0, %arg1, %arg2 : i32, i32, i32
  }
  func.func @transform_1(%arg0: i32, %arg1: i32, %arg2: i32) -> (i32, i32, i32) {
    %c0_i32 = arith.constant 0 : i32
    %c0_i32_0 = arith.constant 0 : i32
    return %arg0, %arg2, %c0_i32 : i32, i32, i32
  }
  func.func @transform_2(%arg0: i32, %arg1: i32, %arg2: i32) -> (i32, i32) {
    %c0_i32 = arith.constant 0 : i32
    %c0_i32_0 = arith.constant 0 : i32
    %c0_i32_1 = arith.constant 0 : i32
    return %c0_i32, %c0_i32_0 : i32, i32
  }
  func.func @transform_3(%arg0: i32, %arg1: i32, %arg2: i32) -> (i32, i32, i32) {
    %c0_i32 = arith.constant 0 : i32
    %c0_i32_0 = arith.constant 0 : i32
    return %arg0, %arg1, %c0_i32 : i32, i32, i32
  }
}

module attributes {stable_mosaic.version = 11 : i64} {
  func.func @_bmm_kernel(%arg0: i32, %arg1: i32, %arg2: i32, %arg3: memref<1x8x512xbf16, #tpu.memory_space<vmem>>, %arg4: memref<1x512x128xbf16, #tpu.memory_space<vmem>>, %arg5: memref<1x128xf32, #tpu.memory_space<vmem>>, %arg6: memref<1x8x128xf32, #tpu.memory_space<vmem>>, %arg7: memref<8x128xf32, #tpu.memory_space<vmem>>) attributes {dimension_semantics = [#tpu.dimension_semantics<parallel>, #tpu.dimension_semantics<parallel>, #tpu.dimension_semantics<arbitrary>], iteration_bounds = array<i64: 4, 1, 1>, scalar_prefetch = 0 : i64, scratch_operands = 1 : i64, tpu.core_type = #tpu.core_type<tc>, window_params = [{transform_indices = @transform_0, window_bounds = array<i64: 1, 8, 512>}, {transform_indices = @transform_1, window_bounds = array<i64: 1, 512, 128>}, {pipeline_mode = #tpu.pipeline_mode<synchronous>, transform_indices = @transform_2, window_bounds = array<i64: 1, 128>}, {transform_indices = @transform_3, window_bounds = array<i64: 1, 8, 128>}]} {
    %c0_i32 = arith.constant 0 : i32
    %0 = arith.cmpi eq, %arg2, %c0_i32 : i32
    %1 = arith.extui %0 : i1 to i32
    %c0_i32_0 = arith.constant 0 : i32
    %2 = arith.cmpi ne, %1, %c0_i32_0 : i32
    scf.if %2 {
      %cst_13 = arith.constant 0.000000e+00 : f32
      %16 = vector.broadcast %cst_13 : f32 to vector<8x128xf32>
      %c0_14 = arith.constant 0 : index
      %c0_15 = arith.constant 0 : index
      %17 = vector.load %arg7[%c0_14, %c0_15] : memref<8x128xf32, #tpu.memory_space<vmem>>, vector<8x128xf32>
      tpu.vector_store %arg7[%c0_14, %c0_15], %16 {strides = array<i32>} : memref<8x128xf32, #tpu.memory_space<vmem>>, vector<8x128xf32>,
    } else {
    }
    %c0 = arith.constant 0 : index
    %c0_1 = arith.constant 0 : index
    %c0_2 = arith.constant 0 : index
    %3 = vector.load %arg3[%c0, %c0_1, %c0_2] : memref<1x8x512xbf16, #tpu.memory_space<vmem>>, vector<1x8x512xbf16>
    %4 = vector.shape_cast %3 : vector<1x8x512xbf16> to vector<8x512xbf16>
    %cst = arith.constant 0.000000e+00 : bf16
    %5 = vector.broadcast %cst : bf16 to vector<8x512xbf16>
    %6 = arith.maximumf %4, %5 : vector<8x512xbf16>
    %c0_3 = arith.constant 0 : index
    %c0_4 = arith.constant 0 : index
    %7 = vector.load %arg7[%c0_3, %c0_4] : memref<8x128xf32, #tpu.memory_space<vmem>>, vector<8x128xf32>
    %c0_5 = arith.constant 0 : index
    %c0_6 = arith.constant 0 : index
    %c0_7 = arith.constant 0 : index
    %8 = vector.load %arg4[%c0_5, %c0_6, %c0_7] : memref<1x512x128xbf16, #tpu.memory_space<vmem>>, vector<1x512x128xbf16>
    %9 = vector.shape_cast %8 : vector<1x512x128xbf16> to vector<512x128xbf16>
    %cst_8 = arith.constant dense<0.000000e+00> : vector<8x128xf32>
    %10 = tpu.matmul %6, %9, %cst_8 {dimension_numbers = #tpu.dot_dimension_numbers<[1], [0], [0], [1], [0, 0, 1, 1], [], []>} : vector<8x512xbf16>, vector<512x128xbf16>, vector<8x128xf32> -> vector<8x128xf32>
    %11 = arith.addf %7, %10 : vector<8x128xf32>
    %c0_9 = arith.constant 0 : index
    %c0_10 = arith.constant 0 : index
    %12 = vector.load %arg7[%c0_9, %c0_10] : memref<8x128xf32, #tpu.memory_space<vmem>>, vector<8x128xf32>
    tpu.vector_store %arg7[%c0_9, %c0_10], %11 {strides = array<i32>} : memref<8x128xf32, #tpu.memory_space<vmem>>, vector<8x128xf32>,
    %c0_i32_11 = arith.constant 0 : i32
    %13 = arith.cmpi eq, %arg2, %c0_i32_11 : i32
    %14 = arith.extui %13 : i1 to i32
    %c0_i32_12 = arith.constant 0 : i32
    %15 = arith.cmpi ne, %14, %c0_i32_12 : i32
    scf.if %15 {
      %c0_13 = arith.constant 0 : index
      %c0_14 = arith.constant 0 : index
      %16 = vector.load %arg7[%c0_13, %c0_14] : memref<8x128xf32, #tpu.memory_space<vmem>>, vector<8x128xf32>
      %c0_15 = arith.constant 0 : index
      %c0_16 = arith.constant 0 : index
      %17 = vector.load %arg5[%c0_15, %c0_16] : memref<1x128xf32, #tpu.memory_space<vmem>>, vector<1x128xf32>
      %18 = vector.broadcast %17 : vector<1x128xf32> to vector<8x128xf32>
      %19 = arith.addf %16, %18 : vector<8x128xf32>
      %c0_17 = arith.constant 0 : index
      %c0_18 = arith.constant 0 : index
      %c0_19 = arith.constant 0 : index
      %20 = vector.load %arg6[%c0_17, %c0_18, %c0_19] : memref<1x8x128xf32, #tpu.memory_space<vmem>>, vector<1x8x128xf32>
      %21 = vector.shape_cast %20 : vector<1x8x128xf32> to vector<8x128xf32>
      %22 = vector.shape_cast %19 : vector<8x128xf32> to vector<1x8x128xf32>
      tpu.vector_store %arg6[%c0_17, %c0_18, %c0_19], %22 {strides = array<i32>} : memref<1x8x128xf32, #tpu.memory_space<vmem>>, vector<1x8x128xf32>,
    } else {
    }
    return
  }
  func.func @transform_0(%arg0: i32, %arg1: i32, %arg2: i32) -> (i32, i32, i32) {
    %c0_i32 = arith.constant 0 : i32
    return %arg0, %arg1, %arg2 : i32, i32, i32
  }
  func.func @transform_1(%arg0: i32, %arg1: i32, %arg2: i32) -> (i32, i32, i32) {
    %c0_i32 = arith.constant 0 : i32
    %c0_i32_0 = arith.constant 0 : i32
    return %arg0, %arg2, %c0_i32 : i32, i32, i32
  }
  func.func @transform_2(%arg0: i32, %arg1: i32, %arg2: i32) -> (i32, i32) {
    %c0_i32 = arith.constant 0 : i32
    %c0_i32_0 = arith.constant 0 : i32
    %c0_i32_1 = arith.constant 0 : i32
    return %c0_i32, %c0_i32_0 : i32, i32
  }
  func.func @transform_3(%arg0: i32, %arg1: i32, %arg2: i32) -> (i32, i32, i32) {
    %c0_i32 = arith.constant 0 : i32
    %c0_i32_0 = arith.constant 0 : i32
    return %arg0, %arg1, %c0_i32 : i32, i32, i32
  }
}

module attributes {stable_mosaic.version = 11 : i64} {
  func.func @_bmm_kernel(%arg0: i32, %arg1: i32, %arg2: i32, %arg3: memref<1x32x256xbf16, #tpu.memory_space<vmem>>, %arg4: memref<1x256x128xbf16, #tpu.memory_space<vmem>>, %arg5: memref<1x128xf32, #tpu.memory_space<vmem>>, %arg6: memref<1x32x128xf32, #tpu.memory_space<vmem>>, %arg7: memref<32x128xf32, #tpu.memory_space<vmem>>) attributes {dimension_semantics = [#tpu.dimension_semantics<parallel>, #tpu.dimension_semantics<parallel>, #tpu.dimension_semantics<arbitrary>], iteration_bounds = array<i64: 4, 1, 1>, scalar_prefetch = 0 : i64, scratch_operands = 1 : i64, tpu.core_type = #tpu.core_type<tc>, window_params = [{transform_indices = @transform_0, window_bounds = array<i64: 1, 32, 256>}, {transform_indices = @transform_1, window_bounds = array<i64: 1, 256, 128>}, {pipeline_mode = #tpu.pipeline_mode<synchronous>, transform_indices = @transform_2, window_bounds = array<i64: 1, 128>}, {transform_indices = @transform_3, window_bounds = array<i64: 1, 32, 128>}]} {
    %c0_i32 = arith.constant 0 : i32
    %0 = arith.cmpi eq, %arg2, %c0_i32 : i32
    %1 = arith.extui %0 : i1 to i32
    %c0_i32_0 = arith.constant 0 : i32
    %2 = arith.cmpi ne, %1, %c0_i32_0 : i32
    scf.if %2 {
      %cst_13 = arith.constant 0.000000e+00 : f32
      %16 = vector.broadcast %cst_13 : f32 to vector<32x128xf32>
      %c0_14 = arith.constant 0 : index
      %c0_15 = arith.constant 0 : index
      %17 = vector.load %arg7[%c0_14, %c0_15] : memref<32x128xf32, #tpu.memory_space<vmem>>, vector<32x128xf32>
      tpu.vector_store %arg7[%c0_14, %c0_15], %16 {strides = array<i32>} : memref<32x128xf32, #tpu.memory_space<vmem>>, vector<32x128xf32>,
    } else {
    }
    %c0 = arith.constant 0 : index
    %c0_1 = arith.constant 0 : index
    %c0_2 = arith.constant 0 : index
    %3 = vector.load %arg3[%c0, %c0_1, %c0_2] : memref<1x32x256xbf16, #tpu.memory_space<vmem>>, vector<1x32x256xbf16>
    %4 = vector.shape_cast %3 : vector<1x32x256xbf16> to vector<32x256xbf16>
    %cst = arith.constant 0.000000e+00 : bf16
    %5 = vector.broadcast %cst : bf16 to vector<32x256xbf16>
    %6 = arith.maximumf %4, %5 : vector<32x256xbf16>
    %c0_3 = arith.constant 0 : index
    %c0_4 = arith.constant 0 : index
    %7 = vector.load %arg7[%c0_3, %c0_4] : memref<32x128xf32, #tpu.memory_space<vmem>>, vector<32x128xf32>
    %c0_5 = arith.constant 0 : index
    %c0_6 = arith.constant 0 : index
    %c0_7 = arith.constant 0 : index
    %8 = vector.load %arg4[%c0_5, %c0_6, %c0_7] : memref<1x256x128xbf16, #tpu.memory_space<vmem>>, vector<1x256x128xbf16>
    %9 = vector.shape_cast %8 : vector<1x256x128xbf16> to vector<256x128xbf16>
    %cst_8 = arith.constant dense<0.000000e+00> : vector<32x128xf32>
    %10 = tpu.matmul %6, %9, %cst_8 {dimension_numbers = #tpu.dot_dimension_numbers<[1], [0], [0], [1], [0, 0, 1, 1], [], []>} : vector<32x256xbf16>, vector<256x128xbf16>, vector<32x128xf32> -> vector<32x128xf32>
    %11 = arith.addf %7, %10 : vector<32x128xf32>
    %c0_9 = arith.constant 0 : index
    %c0_10 = arith.constant 0 : index
    %12 = vector.load %arg7[%c0_9, %c0_10] : memref<32x128xf32, #tpu.memory_space<vmem>>, vector<32x128xf32>
    tpu.vector_store %arg7[%c0_9, %c0_10], %11 {strides = array<i32>} : memref<32x128xf32, #tpu.memory_space<vmem>>, vector<32x128xf32>,
    %c0_i32_11 = arith.constant 0 : i32
    %13 = arith.cmpi eq, %arg2, %c0_i32_11 : i32
    %14 = arith.extui %13 : i1 to i32
    %c0_i32_12 = arith.constant 0 : i32
    %15 = arith.cmpi ne, %14, %c0_i32_12 : i32
    scf.if %15 {
      %c0_13 = arith.constant 0 : index
      %c0_14 = arith.constant 0 : index
      %16 = vector.load %arg7[%c0_13, %c0_14] : memref<32x128xf32, #tpu.memory_space<vmem>>, vector<32x128xf32>
      %c0_15 = arith.constant 0 : index
      %c0_16 = arith.constant 0 : index
      %17 = vector.load %arg5[%c0_15, %c0_16] : memref<1x128xf32, #tpu.memory_space<vmem>>, vector<1x128xf32>
      %18 = vector.broadcast %17 : vector<1x128xf32> to vector<32x128xf32>
      %19 = arith.addf %16, %18 : vector<32x128xf32>
      %c0_17 = arith.constant 0 : index
      %c0_18 = arith.constant 0 : index
      %c0_19 = arith.constant 0 : index
      %20 = vector.load %arg6[%c0_17, %c0_18, %c0_19] : memref<1x32x128xf32, #tpu.memory_space<vmem>>, vector<1x32x128xf32>
      %21 = vector.shape_cast %20 : vector<1x32x128xf32> to vector<32x128xf32>
      %22 = vector.shape_cast %19 : vector<32x128xf32> to vector<1x32x128xf32>
      tpu.vector_store %arg6[%c0_17, %c0_18, %c0_19], %22 {strides = array<i32>} : memref<1x32x128xf32, #tpu.memory_space<vmem>>, vector<1x32x128xf32>,
    } else {
    }
    return
  }
  func.func @transform_0(%arg0: i32, %arg1: i32, %arg2: i32) -> (i32, i32, i32) {
    %c0_i32 = arith.constant 0 : i32
    return %arg0, %arg1, %arg2 : i32, i32, i32
  }
  func.func @transform_1(%arg0: i32, %arg1: i32, %arg2: i32) -> (i32, i32, i32) {
    %c0_i32 = arith.constant 0 : i32
    %c0_i32_0 = arith.constant 0 : i32
    return %arg0, %arg2, %c0_i32 : i32, i32, i32
  }
  func.func @transform_2(%arg0: i32, %arg1: i32, %arg2: i32) -> (i32, i32) {
    %c0_i32 = arith.constant 0 : i32
    %c0_i32_0 = arith.constant 0 : i32
    %c0_i32_1 = arith.constant 0 : i32
    return %c0_i32, %c0_i32_0 : i32, i32
  }
  func.func @transform_3(%arg0: i32, %arg1: i32, %arg2: i32) -> (i32, i32, i32) {
    %c0_i32 = arith.constant 0 : i32
    %c0_i32_0 = arith.constant 0 : i32
    return %arg0, %arg1, %c0_i32 : i32, i32, i32
  }
}

module attributes {stable_mosaic.version = 11 : i64} {
  func.func @_bmm_kernel(%arg0: i32, %arg1: i32, %arg2: i32, %arg3: memref<1x128x128xbf16, #tpu.memory_space<vmem>>, %arg4: memref<1x128x128xbf16, #tpu.memory_space<vmem>>, %arg5: memref<1x128xf32, #tpu.memory_space<vmem>>, %arg6: memref<1x128x128xf32, #tpu.memory_space<vmem>>, %arg7: memref<128x128xf32, #tpu.memory_space<vmem>>) attributes {dimension_semantics = [#tpu.dimension_semantics<parallel>, #tpu.dimension_semantics<parallel>, #tpu.dimension_semantics<arbitrary>], iteration_bounds = array<i64: 4, 1, 1>, scalar_prefetch = 0 : i64, scratch_operands = 1 : i64, tpu.core_type = #tpu.core_type<tc>, window_params = [{transform_indices = @transform_0, window_bounds = array<i64: 1, 128, 128>}, {transform_indices = @transform_1, window_bounds = array<i64: 1, 128, 128>}, {pipeline_mode = #tpu.pipeline_mode<synchronous>, transform_indices = @transform_2, window_bounds = array<i64: 1, 128>}, {transform_indices = @transform_3, window_bounds = array<i64: 1, 128, 128>}]} {
    %c0_i32 = arith.constant 0 : i32
    %0 = arith.cmpi eq, %arg2, %c0_i32 : i32
    %1 = arith.extui %0 : i1 to i32
    %c0_i32_0 = arith.constant 0 : i32
    %2 = arith.cmpi ne, %1, %c0_i32_0 : i32
    scf.if %2 {
      %cst_13 = arith.constant 0.000000e+00 : f32
      %16 = vector.broadcast %cst_13 : f32 to vector<128x128xf32>
      %c0_14 = arith.constant 0 : index
      %c0_15 = arith.constant 0 : index
      %17 = vector.load %arg7[%c0_14, %c0_15] : memref<128x128xf32, #tpu.memory_space<vmem>>, vector<128x128xf32>
      tpu.vector_store %arg7[%c0_14, %c0_15], %16 {strides = array<i32>} : memref<128x128xf32, #tpu.memory_space<vmem>>, vector<128x128xf32>,
    } else {
    }
    %c0 = arith.constant 0 : index
    %c0_1 = arith.constant 0 : index
    %c0_2 = arith.constant 0 : index
    %3 = vector.load %arg3[%c0, %c0_1, %c0_2] : memref<1x128x128xbf16, #tpu.memory_space<vmem>>, vector<1x128x128xbf16>
    %4 = vector.shape_cast %3 : vector<1x128x128xbf16> to vector<128x128xbf16>
    %cst = arith.constant 0.000000e+00 : bf16
    %5 = vector.broadcast %cst : bf16 to vector<128x128xbf16>
    %6 = arith.maximumf %4, %5 : vector<128x128xbf16>
    %c0_3 = arith.constant 0 : index
    %c0_4 = arith.constant 0 : index
    %7 = vector.load %arg7[%c0_3, %c0_4] : memref<128x128xf32, #tpu.memory_space<vmem>>, vector<128x128xf32>
    %c0_5 = arith.constant 0 : index
    %c0_6 = arith.constant 0 : index
    %c0_7 = arith.constant 0 : index
    %8 = vector.load %arg4[%c0_5, %c0_6, %c0_7] : memref<1x128x128xbf16, #tpu.memory_space<vmem>>, vector<1x128x128xbf16>
    %9 = vector.shape_cast %8 : vector<1x128x128xbf16> to vector<128x128xbf16>
    %cst_8 = arith.constant dense<0.000000e+00> : vector<128x128xf32>
    %10 = tpu.matmul %6, %9, %cst_8 {dimension_numbers = #tpu.dot_dimension_numbers<[1], [0], [0], [1], [0, 0, 1, 1], [], []>} : vector<128x128xbf16>, vector<128x128xbf16>, vector<128x128xf32> -> vector<128x128xf32>
    %11 = arith.addf %7, %10 : vector<128x128xf32>
    %c0_9 = arith.constant 0 : index
    %c0_10 = arith.constant 0 : index
    %12 = vector.load %arg7[%c0_9, %c0_10] : memref<128x128xf32, #tpu.memory_space<vmem>>, vector<128x128xf32>
    tpu.vector_store %arg7[%c0_9, %c0_10], %11 {strides = array<i32>} : memref<128x128xf32, #tpu.memory_space<vmem>>, vector<128x128xf32>,
    %c0_i32_11 = arith.constant 0 : i32
    %13 = arith.cmpi eq, %arg2, %c0_i32_11 : i32
    %14 = arith.extui %13 : i1 to i32
    %c0_i32_12 = arith.constant 0 : i32
    %15 = arith.cmpi ne, %14, %c0_i32_12 : i32
    scf.if %15 {
      %c0_13 = arith.constant 0 : index
      %c0_14 = arith.constant 0 : index
      %16 = vector.load %arg7[%c0_13, %c0_14] : memref<128x128xf32, #tpu.memory_space<vmem>>, vector<128x128xf32>
      %c0_15 = arith.constant 0 : index
      %c0_16 = arith.constant 0 : index
      %17 = vector.load %arg5[%c0_15, %c0_16] : memref<1x128xf32, #tpu.memory_space<vmem>>, vector<1x128xf32>
      %18 = vector.broadcast %17 : vector<1x128xf32> to vector<128x128xf32>
      %19 = arith.addf %16, %18 : vector<128x128xf32>
      %c0_17 = arith.constant 0 : index
      %c0_18 = arith.constant 0 : index
      %c0_19 = arith.constant 0 : index
      %20 = vector.load %arg6[%c0_17, %c0_18, %c0_19] : memref<1x128x128xf32, #tpu.memory_space<vmem>>, vector<1x128x128xf32>
      %21 = vector.shape_cast %20 : vector<1x128x128xf32> to vector<128x128xf32>
      %22 = vector.shape_cast %19 : vector<128x128xf32> to vector<1x128x128xf32>
      tpu.vector_store %arg6[%c0_17, %c0_18, %c0_19], %22 {strides = array<i32>} : memref<1x128x128xf32, #tpu.memory_space<vmem>>, vector<1x128x128xf32>,
    } else {
    }
    return
  }
  func.func @transform_0(%arg0: i32, %arg1: i32, %arg2: i32) -> (i32, i32, i32) {
    %c0_i32 = arith.constant 0 : i32
    return %arg0, %arg1, %arg2 : i32, i32, i32
  }
  func.func @transform_1(%arg0: i32, %arg1: i32, %arg2: i32) -> (i32, i32, i32) {
    %c0_i32 = arith.constant 0 : i32
    %c0_i32_0 = arith.constant 0 : i32
    return %arg0, %arg2, %c0_i32 : i32, i32, i32
  }
  func.func @transform_2(%arg0: i32, %arg1: i32, %arg2: i32) -> (i32, i32) {
    %c0_i32 = arith.constant 0 : i32
    %c0_i32_0 = arith.constant 0 : i32
    %c0_i32_1 = arith.constant 0 : i32
    return %c0_i32, %c0_i32_0 : i32, i32
  }
  func.func @transform_3(%arg0: i32, %arg1: i32, %arg2: i32) -> (i32, i32, i32) {
    %c0_i32 = arith.constant 0 : i32
    %c0_i32_0 = arith.constant 0 : i32
    return %arg0, %arg1, %c0_i32 : i32, i32, i32
  }
}

module attributes {stable_mosaic.version = 11 : i64} {
  func.func @_bn_stats_kernel(%arg0: i32, %arg1: memref<512x8xf32, #tpu.memory_space<vmem>>, %arg2: memref<1x8xf32, #tpu.memory_space<vmem>>, %arg3: memref<1x8xf32, #tpu.memory_space<vmem>>) attributes {dimension_semantics = [#tpu.dimension_semantics<arbitrary>], iteration_bounds = array<i64: 1>, scalar_prefetch = 0 : i64, scratch_operands = 0 : i64, tpu.core_type = #tpu.core_type<tc>, window_params = [{transform_indices = @transform_0, window_bounds = array<i64: 512, 8>}, {pipeline_mode = #tpu.pipeline_mode<synchronous>, transform_indices = @transform_1, window_bounds = array<i64: 1, 8>}, {pipeline_mode = #tpu.pipeline_mode<synchronous>, transform_indices = @transform_2, window_bounds = array<i64: 1, 8>}]} {
    %c0_i32 = arith.constant 0 : i32
    %0 = arith.cmpi eq, %arg0, %c0_i32 : i32
    %1 = arith.extui %0 : i1 to i32
    %c0_i32_0 = arith.constant 0 : i32
    %2 = arith.cmpi ne, %1, %c0_i32_0 : i32
    scf.if %2 {
      %cst_11 = arith.constant 0.000000e+00 : f32
      %15 = vector.broadcast %cst_11 : f32 to vector<1x8xf32>
      %c0_12 = arith.constant 0 : index
      %c0_13 = arith.constant 0 : index
      %16 = vector.load %arg2[%c0_12, %c0_13] : memref<1x8xf32, #tpu.memory_space<vmem>>, vector<1x8xf32>
      tpu.vector_store %arg2[%c0_12, %c0_13], %15 {strides = array<i32>} : memref<1x8xf32, #tpu.memory_space<vmem>>, vector<1x8xf32>,
      %cst_14 = arith.constant 0.000000e+00 : f32
      %17 = vector.broadcast %cst_14 : f32 to vector<1x8xf32>
      %c0_15 = arith.constant 0 : index
      %c0_16 = arith.constant 0 : index
      %18 = vector.load %arg3[%c0_15, %c0_16] : memref<1x8xf32, #tpu.memory_space<vmem>>, vector<1x8xf32>
      tpu.vector_store %arg3[%c0_15, %c0_16], %17 {strides = array<i32>} : memref<1x8xf32, #tpu.memory_space<vmem>>, vector<1x8xf32>,
    } else {
    }
    %c0 = arith.constant 0 : index
    %c0_1 = arith.constant 0 : index
    %3 = vector.load %arg1[%c0, %c0_1] : memref<512x8xf32, #tpu.memory_space<vmem>>, vector<512x8xf32>
    %c0_2 = arith.constant 0 : index
    %c0_3 = arith.constant 0 : index
    %4 = vector.load %arg2[%c0_2, %c0_3] : memref<1x8xf32, #tpu.memory_space<vmem>>, vector<1x8xf32>
    %cst = arith.constant dense<0.000000e+00> : vector<8xf32>
    %5 = vector.multi_reduction <add>, %3, %cst [0] : vector<512x8xf32> to vector<8xf32>
    %6 = vector.shape_cast %5 : vector<8xf32> to vector<1x8xf32>
    %7 = arith.addf %4, %6 : vector<1x8xf32>
    %c0_4 = arith.constant 0 : index
    %c0_5 = arith.constant 0 : index
    %8 = vector.load %arg2[%c0_4, %c0_5] : memref<1x8xf32, #tpu.memory_space<vmem>>, vector<1x8xf32>
    tpu.vector_store %arg2[%c0_4, %c0_5], %7 {strides = array<i32>} : memref<1x8xf32, #tpu.memory_space<vmem>>, vector<1x8xf32>,
    %c0_6 = arith.constant 0 : index
    %c0_7 = arith.constant 0 : index
    %9 = vector.load %arg3[%c0_6, %c0_7] : memref<1x8xf32, #tpu.memory_space<vmem>>, vector<1x8xf32>
    %10 = arith.mulf %3, %3 : vector<512x8xf32>
    %cst_8 = arith.constant dense<0.000000e+00> : vector<8xf32>
    %11 = vector.multi_reduction <add>, %10, %cst_8 [0] : vector<512x8xf32> to vector<8xf32>
    %12 = vector.shape_cast %11 : vector<8xf32> to vector<1x8xf32>
    %13 = arith.addf %9, %12 : vector<1x8xf32>
    %c0_9 = arith.constant 0 : index
    %c0_10 = arith.constant 0 : index
    %14 = vector.load %arg3[%c0_9, %c0_10] : memref<1x8xf32, #tpu.memory_space<vmem>>, vector<1x8xf32>
    tpu.vector_store %arg3[%c0_9, %c0_10], %13 {strides = array<i32>} : memref<1x8xf32, #tpu.memory_space<vmem>>, vector<1x8xf32>,
    return
  }
  func.func @transform_0(%arg0: i32) -> (i32, i32) {
    %c0_i32 = arith.constant 0 : i32
    %c0_i32_0 = arith.constant 0 : i32
    return %arg0, %c0_i32 : i32, i32
  }
  func.func @transform_1(%arg0: i32) -> (i32, i32) {
    %c0_i32 = arith.constant 0 : i32
    %c0_i32_0 = arith.constant 0 : i32
    %c0_i32_1 = arith.constant 0 : i32
    return %c0_i32, %c0_i32_0 : i32, i32
  }
  func.func @transform_2(%arg0: i32) -> (i32, i32) {
    %c0_i32 = arith.constant 0 : i32
    %c0_i32_0 = arith.constant 0 : i32
    %c0_i32_1 = arith.constant 0 : i32
    return %c0_i32, %c0_i32_0 : i32, i32
  }
}

module attributes {stable_mosaic.version = 11 : i64} {
  func.func @_bn_apply_kernel(%arg0: i32, %arg1: memref<512x8xf32, #tpu.memory_space<vmem>>, %arg2: memref<1x8xf32, #tpu.memory_space<vmem>>, %arg3: memref<1x8xf32, #tpu.memory_space<vmem>>, %arg4: memref<512x8xf32, #tpu.memory_space<vmem>>) attributes {dimension_semantics = [#tpu.dimension_semantics<parallel>], iteration_bounds = array<i64: 1>, scalar_prefetch = 0 : i64, scratch_operands = 0 : i64, tpu.core_type = #tpu.core_type<tc>, window_params = [{transform_indices = @transform_0, window_bounds = array<i64: 512, 8>}, {pipeline_mode = #tpu.pipeline_mode<synchronous>, transform_indices = @transform_1, window_bounds = array<i64: 1, 8>}, {pipeline_mode = #tpu.pipeline_mode<synchronous>, transform_indices = @transform_2, window_bounds = array<i64: 1, 8>}, {transform_indices = @transform_3, window_bounds = array<i64: 512, 8>}]} {
    %c0 = arith.constant 0 : index
    %c0_0 = arith.constant 0 : index
    %0 = vector.load %arg1[%c0, %c0_0] : memref<512x8xf32, #tpu.memory_space<vmem>>, vector<512x8xf32>
    %c0_1 = arith.constant 0 : index
    %c0_2 = arith.constant 0 : index
    %1 = vector.load %arg2[%c0_1, %c0_2] : memref<1x8xf32, #tpu.memory_space<vmem>>, vector<1x8xf32>
    %2 = vector.broadcast %1 : vector<1x8xf32> to vector<512x8xf32>
    %3 = arith.mulf %0, %2 : vector<512x8xf32>
    %c0_3 = arith.constant 0 : index
    %c0_4 = arith.constant 0 : index
    %4 = vector.load %arg3[%c0_3, %c0_4] : memref<1x8xf32, #tpu.memory_space<vmem>>, vector<1x8xf32>
    %5 = vector.broadcast %4 : vector<1x8xf32> to vector<512x8xf32>
    %6 = arith.addf %3, %5 : vector<512x8xf32>
    %c0_5 = arith.constant 0 : index
    %c0_6 = arith.constant 0 : index
    %7 = vector.load %arg4[%c0_5, %c0_6] : memref<512x8xf32, #tpu.memory_space<vmem>>, vector<512x8xf32>
    tpu.vector_store %arg4[%c0_5, %c0_6], %6 {strides = array<i32>} : memref<512x8xf32, #tpu.memory_space<vmem>>, vector<512x8xf32>,
    return
  }
  func.func @transform_0(%arg0: i32) -> (i32, i32) {
    %c0_i32 = arith.constant 0 : i32
    %c0_i32_0 = arith.constant 0 : i32
    return %arg0, %c0_i32 : i32, i32
  }
  func.func @transform_1(%arg0: i32) -> (i32, i32) {
    %c0_i32 = arith.constant 0 : i32
    %c0_i32_0 = arith.constant 0 : i32
    %c0_i32_1 = arith.constant 0 : i32
    return %c0_i32, %c0_i32_0 : i32, i32
  }
  func.func @transform_2(%arg0: i32) -> (i32, i32) {
    %c0_i32 = arith.constant 0 : i32
    %c0_i32_0 = arith.constant 0 : i32
    %c0_i32_1 = arith.constant 0 : i32
    return %c0_i32, %c0_i32_0 : i32, i32
  }
  func.func @transform_3(%arg0: i32) -> (i32, i32) {
    %c0_i32 = arith.constant 0 : i32
    %c0_i32_0 = arith.constant 0 : i32
    return %arg0, %c0_i32 : i32, i32
  }
}

module attributes {stable_mosaic.version = 11 : i64} {
  func.func @_bmm_kernel(%arg0: i32, %arg1: i32, %arg2: i32, %arg3: memref<1x512x128xbf16, #tpu.memory_space<vmem>>, %arg4: memref<1x128x128xbf16, #tpu.memory_space<vmem>>, %arg5: memref<1x128xf32, #tpu.memory_space<vmem>>, %arg6: memref<1x512x128xf32, #tpu.memory_space<vmem>>, %arg7: memref<512x128xf32, #tpu.memory_space<vmem>>) attributes {dimension_semantics = [#tpu.dimension_semantics<parallel>, #tpu.dimension_semantics<parallel>, #tpu.dimension_semantics<arbitrary>], iteration_bounds = array<i64: 4, 1, 1>, scalar_prefetch = 0 : i64, scratch_operands = 1 : i64, tpu.core_type = #tpu.core_type<tc>, window_params = [{transform_indices = @transform_0, window_bounds = array<i64: 1, 512, 128>}, {transform_indices = @transform_1, window_bounds = array<i64: 1, 128, 128>}, {pipeline_mode = #tpu.pipeline_mode<synchronous>, transform_indices = @transform_2, window_bounds = array<i64: 1, 128>}, {transform_indices = @transform_3, window_bounds = array<i64: 1, 512, 128>}]} {
    %c0_i32 = arith.constant 0 : i32
    %0 = arith.cmpi eq, %arg2, %c0_i32 : i32
    %1 = arith.extui %0 : i1 to i32
    %c0_i32_0 = arith.constant 0 : i32
    %2 = arith.cmpi ne, %1, %c0_i32_0 : i32
    scf.if %2 {
      %cst_13 = arith.constant 0.000000e+00 : f32
      %16 = vector.broadcast %cst_13 : f32 to vector<512x128xf32>
      %c0_14 = arith.constant 0 : index
      %c0_15 = arith.constant 0 : index
      %17 = vector.load %arg7[%c0_14, %c0_15] : memref<512x128xf32, #tpu.memory_space<vmem>>, vector<512x128xf32>
      tpu.vector_store %arg7[%c0_14, %c0_15], %16 {strides = array<i32>} : memref<512x128xf32, #tpu.memory_space<vmem>>, vector<512x128xf32>,
    } else {
    }
    %c0 = arith.constant 0 : index
    %c0_1 = arith.constant 0 : index
    %c0_2 = arith.constant 0 : index
    %3 = vector.load %arg3[%c0, %c0_1, %c0_2] : memref<1x512x128xbf16, #tpu.memory_space<vmem>>, vector<1x512x128xbf16>
    %4 = vector.shape_cast %3 : vector<1x512x128xbf16> to vector<512x128xbf16>
    %cst = arith.constant 0.000000e+00 : bf16
    %5 = vector.broadcast %cst : bf16 to vector<512x128xbf16>
    %6 = arith.maximumf %4, %5 : vector<512x128xbf16>
    %c0_3 = arith.constant 0 : index
    %c0_4 = arith.constant 0 : index
    %7 = vector.load %arg7[%c0_3, %c0_4] : memref<512x128xf32, #tpu.memory_space<vmem>>, vector<512x128xf32>
    %c0_5 = arith.constant 0 : index
    %c0_6 = arith.constant 0 : index
    %c0_7 = arith.constant 0 : index
    %8 = vector.load %arg4[%c0_5, %c0_6, %c0_7] : memref<1x128x128xbf16, #tpu.memory_space<vmem>>, vector<1x128x128xbf16>
    %9 = vector.shape_cast %8 : vector<1x128x128xbf16> to vector<128x128xbf16>
    %cst_8 = arith.constant dense<0.000000e+00> : vector<512x128xf32>
    %10 = tpu.matmul %6, %9, %cst_8 {dimension_numbers = #tpu.dot_dimension_numbers<[1], [0], [0], [1], [0, 0, 1, 1], [], []>} : vector<512x128xbf16>, vector<128x128xbf16>, vector<512x128xf32> -> vector<512x128xf32>
    %11 = arith.addf %7, %10 : vector<512x128xf32>
    %c0_9 = arith.constant 0 : index
    %c0_10 = arith.constant 0 : index
    %12 = vector.load %arg7[%c0_9, %c0_10] : memref<512x128xf32, #tpu.memory_space<vmem>>, vector<512x128xf32>
    tpu.vector_store %arg7[%c0_9, %c0_10], %11 {strides = array<i32>} : memref<512x128xf32, #tpu.memory_space<vmem>>, vector<512x128xf32>,
    %c0_i32_11 = arith.constant 0 : i32
    %13 = arith.cmpi eq, %arg2, %c0_i32_11 : i32
    %14 = arith.extui %13 : i1 to i32
    %c0_i32_12 = arith.constant 0 : i32
    %15 = arith.cmpi ne, %14, %c0_i32_12 : i32
    scf.if %15 {
      %c0_13 = arith.constant 0 : index
      %c0_14 = arith.constant 0 : index
      %16 = vector.load %arg7[%c0_13, %c0_14] : memref<512x128xf32, #tpu.memory_space<vmem>>, vector<512x128xf32>
      %c0_15 = arith.constant 0 : index
      %c0_16 = arith.constant 0 : index
      %17 = vector.load %arg5[%c0_15, %c0_16] : memref<1x128xf32, #tpu.memory_space<vmem>>, vector<1x128xf32>
      %18 = vector.broadcast %17 : vector<1x128xf32> to vector<512x128xf32>
      %19 = arith.addf %16, %18 : vector<512x128xf32>
      %20 = math.tanh %19 : vector<512x128xf32>
      %c0_17 = arith.constant 0 : index
      %c0_18 = arith.constant 0 : index
      %c0_19 = arith.constant 0 : index
      %21 = vector.load %arg6[%c0_17, %c0_18, %c0_19] : memref<1x512x128xf32, #tpu.memory_space<vmem>>, vector<1x512x128xf32>
      %22 = vector.shape_cast %21 : vector<1x512x128xf32> to vector<512x128xf32>
      %23 = vector.shape_cast %20 : vector<512x128xf32> to vector<1x512x128xf32>
      tpu.vector_store %arg6[%c0_17, %c0_18, %c0_19], %23 {strides = array<i32>} : memref<1x512x128xf32, #tpu.memory_space<vmem>>, vector<1x512x128xf32>,
    } else {
    }
    return
  }
  func.func @transform_0(%arg0: i32, %arg1: i32, %arg2: i32) -> (i32, i32, i32) {
    %c0_i32 = arith.constant 0 : i32
    return %arg0, %arg1, %arg2 : i32, i32, i32
  }
  func.func @transform_1(%arg0: i32, %arg1: i32, %arg2: i32) -> (i32, i32, i32) {
    %c0_i32 = arith.constant 0 : i32
    %c0_i32_0 = arith.constant 0 : i32
    return %arg0, %arg2, %c0_i32 : i32, i32, i32
  }
  func.func @transform_2(%arg0: i32, %arg1: i32, %arg2: i32) -> (i32, i32) {
    %c0_i32 = arith.constant 0 : i32
    %c0_i32_0 = arith.constant 0 : i32
    %c0_i32_1 = arith.constant 0 : i32
    return %c0_i32, %c0_i32_0 : i32, i32
  }
  func.func @transform_3(%arg0: i32, %arg1: i32, %arg2: i32) -> (i32, i32, i32) {
    %c0_i32 = arith.constant 0 : i32
    %c0_i32_0 = arith.constant 0 : i32
    return %arg0, %arg1, %c0_i32 : i32, i32, i32
  }
}

</mosaic_0001>

<bundles_post_ra>
// kernel: _lambda_.24
= control target key start
LH: loop header
LB: loop body
LE: loop exit
PB: predicated region body
PF: predicated region fallthrough
CT: control target
= control target key end

     0   :  { %s1708_s1 = inlined_call_operand.vmem [shape: bf16[1,128,128], index: 1, kind: input, shape index: {}]   ;;  %s1709_s0 = inlined_call_operand.vmem [shape: bf16[1,512,128], index: 0, kind: input, shape index: {}]   ;;  %s1710_s2 = inlined_call_operand.vmem [shape: f32[1,128], index: 2, kind: input, shape index: {}]   ;;  %s1711_s3 = inlined_call_operand.vmem [shape: f32[1,512,128], index: 3, kind: output, shape index: {}]  }
   0x1   :  { %v1267_v0 = vld [vmem:[%s1708_s1] sm:$0xff]   ;;  %v1268_v1 = vld [vmem:[%s1708_s1 + $0x8] sm:$0xff]   ;;  %v1269_v2 = vld [vmem:[%s1708_s1 + $0x10] sm:$0xff]  }
   0x2   :  { %1171 = vmatprep.subr.bf16.mxu0 %v1267_v0  ;;  %1251 = vmatprep.subr.bf16.mxu1 %v1267_v0  ;;  %v1270_v3 = vld [vmem:[%s1708_s1 + $0x18] sm:$0xff]   ;;  %v1275_v4 = vld [vmem:[%s1709_s0] sm:$0xff]   ;;  %v1272_v7 = vld [vmem:[%s1708_s1 + $0x28] sm:$0xff]  }
   0x3   :  { %1172 = vmatpush3.bf16.msra.mxu0 %v1267_v0  ;;  %1259 = vmatpush3.bf16.msra.mxu1 %v1267_v0  ;;  %v1276_v5 = vld [vmem:[%s1709_s0 + $0x80] sm:$0xff]   ;;  %v1273_v8 = vld [vmem:[%s1708_s1 + $0x30] sm:$0xff]   ;;  %v1274_v9 = vld [vmem:[%s1708_s1 + $0x38] sm:$0xff]  }
   0x4   :  { %1173 = vmatprep.subr.bf16.mxu0 %v1268_v1  ;;  %1252 = vmatprep.subr.bf16.mxu1 %v1268_v1  ;;  %v1271_v6 = vld [vmem:[%s1708_s1 + $0x20] sm:$0xff]   ;;  %v1277_v10 = vld [vmem:[%s1709_s0 + $0x8] sm:$0xff]   ;;  %v1279_v12 = vld [vmem:[%s1709_s0 + $0x10] sm:$0xff]  }
   0x5   :  { %1187 = vmatprep.mubr.bf16.mxu0 %v1275_v4  ;;  %1219 = vmatprep.mubr.bf16.mxu1 %v1276_v5  ;;  %v1278_v11 = vld [vmem:[%s1709_s0 + $0x88] sm:$0xff]   ;;  %v1280_v13 = vld [vmem:[%s1709_s0 + $0x90] sm:$0xff]   ;;  %v1281_v14 = vld [vmem:[%s1709_s0 + $0x18] sm:$0xff]  }
   0x6   :  { %v1282_v15 = vld [vmem:[%s1709_s0 + $0x98] sm:$0xff]   ;;  %v1283_v16 = vld [vmem:[%s1709_s0 + $0x20] sm:$0xff]   ;;  %v1285_v18 = vld [vmem:[%s1709_s0 + $0x28] sm:$0xff]  }
   0x7   :  { %1174 = vmatpush3.bf16.msra.mxu0 %v1268_v1  ;;  %1260 = vmatpush3.bf16.msra.mxu1 %v1268_v1  ;;  %v1284_v17 = vld [vmem:[%s1709_s0 + $0xa0] sm:$0xff]   ;;  %v1286_v19 = vld [vmem:[%s1709_s0 + $0xa8] sm:$0xff]   ;;  %v1287_v20 = vld [vmem:[%s1709_s0 + $0x30] sm:$0xff]  }
   0x8   :  { %1175 = vmatprep.subr.bf16.mxu0 %v1269_v2  ;;  %1253 = vmatprep.subr.bf16.mxu1 %v1269_v2  ;;  %v1288_v21 = vld [vmem:[%s1709_s0 + $0xb0] sm:$0xff]   ;;  %v1289_v22 = vld [vmem:[%s1709_s0 + $0x38] sm:$0xff]   ;;  %v1291_v24 = vld [vmem:[%s1709_s0 + $0x40] sm:$0xff]  }
   0x9   :  { %v1290_v23 = vld [vmem:[%s1709_s0 + $0xb8] sm:$0xff]   ;;  %v1292_v25 = vld [vmem:[%s1709_s0 + $0xc0] sm:$0xff]   ;;  %v1293_v26 = vld [vmem:[%s1709_s0 + $0x48] sm:$0xff]  }
   0xa   :  { %v1294_v27 = vld [vmem:[%s1709_s0 + $0xc8] sm:$0xff]   ;;  %v1295_v28 = vld [vmem:[%s1709_s0 + $0x50] sm:$0xff]   ;;  %v1297_v30 = vld [vmem:[%s1709_s0 + $0x58] sm:$0xff]  }
   0xb   :  { %1176 = vmatpush3.bf16.msra.mxu0 %v1269_v2  ;;  %1261 = vmatpush3.bf16.msra.mxu1 %v1269_v2  ;;  %v1296_v29 = vld [vmem:[%s1709_s0 + $0xd0] sm:$0xff]   ;;  %v1298_v31 = vld [vmem:[%s1709_s0 + $0xd8] sm:$0xff]   ;;  %v1299_v32 = vld [vmem:[%s1709_s0 + $0x60] sm:$0xff]  }
   0xc   :  { %1177 = vmatprep.subr.bf16.mxu0 %v1270_v3  ;;  %1254 = vmatprep.subr.bf16.mxu1 %v1270_v3  ;;  %v1300_v33 = vld [vmem:[%s1709_s0 + $0xe0] sm:$0xff]   ;;  %v1301_v34 = vld [vmem:[%s1709_s0 + $0x68] sm:$0xff]   ;;  %v1303_v36 = vld [vmem:[%s1709_s0 + $0x70] sm:$0xff]  }
   0xd   :  { %v1302_v35 = vld [vmem:[%s1709_s0 + $0xe8] sm:$0xff]   ;;  %v1304_v37 = vld [vmem:[%s1709_s0 + $0xf0] sm:$0xff]   ;;  %v1305_v38 = vld [vmem:[%s1709_s0 + $0x78] sm:$0xff]  }
   0xe   :  { %v1306_v39 = vld [vmem:[%s1709_s0 + $0xf8] sm:$0xff]   ;;  %v1450_v40 = vld [vmem:[%s1710_s2] ss:$0 sm:$0xff] }
   0xf   :  { %1178 = vmatpush3.bf16.msra.mxu0 %v1270_v3  ;;  %1262 = vmatpush3.bf16.msra.mxu1 %v1270_v3 }
  0x10   :  { %1179 = vmatprep.subr.bf16.mxu0 %v1271_v6  ;;  %1255 = vmatprep.subr.bf16.mxu1 %v1271_v6 }
  0x13   :  { %1180 = vmatpush3.bf16.msra.mxu0 %v1271_v6  ;;  %1263 = vmatpush3.bf16.msra.mxu1 %v1271_v6 }
  0x14   :  { %1181 = vmatprep.subr.bf16.mxu0 %v1272_v7  ;;  %1256 = vmatprep.subr.bf16.mxu1 %v1272_v7 }
  0x17   :  { %1182 = vmatpush3.bf16.msra.mxu0 %v1272_v7  ;;  %1264 = vmatpush3.bf16.msra.mxu1 %v1272_v7 }
  0x18   :  { %1183 = vmatprep.subr.bf16.mxu0 %v1273_v8  ;;  %1257 = vmatprep.subr.bf16.mxu1 %v1273_v8 }
  0x1b   :  { %1184 = vmatpush3.bf16.msra.mxu0 %v1273_v8  ;;  %1265 = vmatpush3.bf16.msra.mxu1 %v1273_v8 }
  0x1c   :  { %1185 = vmatprep.subr.bf16.mxu0 %v1274_v9  ;;  %1258 = vmatprep.subr.bf16.mxu1 %v1274_v9 }
  0x1f   :  { %1186 = vmatpush3.bf16.msra.mxu0 %v1274_v9  ;;  %1266 = vmatpush3.bf16.msra.mxu1 %v1274_v9 }
  0x22   :  { %1188 = vmatmul.mubr.bf16.vlgmr.msra.gmra.mrb[0].mxu0 %v1277_v10  ;;  %1220 = vmatmul.mubr.bf16.vlgmr.msra.gmra.mrb[0].mxu1 %v1278_v11 }
  0x23   :  { %1191 = vmatprep.mubr.bf16.mxu0 %v1279_v12  ;;  %1223 = vmatprep.mubr.bf16.mxu1 %v1280_v13 }
  0x2a   :  { %1192 = vmatmul.mubr.bf16.gmra.mrb[4].mxu0 %v1281_v14  ;;  %1224 = vmatmul.mubr.bf16.gmra.mrb[4].mxu1 %v1282_v15 }
  0x2b   :  { %1195 = vmatprep.mubr.bf16.mxu0 %v1283_v16  ;;  %1227 = vmatprep.mubr.bf16.mxu1 %v1284_v17 }
  0x32   :  { %1196 = vmatmul.mubr.bf16.gmra.mrb[8].mxu0 %v1285_v18  ;;  %1228 = vmatmul.mubr.bf16.gmra.mrb[8].mxu1 %v1286_v19 }
  0x33   :  { %1199 = vmatprep.mubr.bf16.mxu0 %v1287_v20  ;;  %1231 = vmatprep.mubr.bf16.mxu1 %v1288_v21 }
  0x3a   :  { %1200 = vmatmul.mubr.bf16.gmra.mrb[12].mxu0 %v1289_v22  ;;  %1232 = vmatmul.mubr.bf16.gmra.mrb[12].mxu1 %v1290_v23 }
  0x3b   :  { %1203 = vmatprep.mubr.bf16.mxu0 %v1291_v24  ;;  %1235 = vmatprep.mubr.bf16.mxu1 %v1292_v25 }
  0x42   :  { %1204 = vmatmul.mubr.bf16.gmra.mrb[16].mxu0 %v1293_v26  ;;  %1236 = vmatmul.mubr.bf16.gmra.mrb[16].mxu1 %v1294_v27 }
  0x43   :  { %1207 = vmatprep.mubr.bf16.mxu0 %v1295_v28  ;;  %1239 = vmatprep.mubr.bf16.mxu1 %v1296_v29 }
  0x4a   :  { %1208 = vmatmul.mubr.bf16.gmra.mrb[20].mxu0 %v1297_v30  ;;  %1240 = vmatmul.mubr.bf16.gmra.mrb[20].mxu1 %v1298_v31 }
  0x4b   :  { %1211 = vmatprep.mubr.bf16.mxu0 %v1299_v32  ;;  %1243 = vmatprep.mubr.bf16.mxu1 %v1300_v33 }
  0x52   :  { %1212 = vmatmul.mubr.bf16.gmra.mrb[24].mxu0 %v1301_v34  ;;  %1244 = vmatmul.mubr.bf16.gmra.mrb[24].mxu1 %v1302_v35 }
  0x53   :  { %1215 = vmatprep.mubr.bf16.mxu0 %v1303_v36  ;;  %1247 = vmatprep.mubr.bf16.mxu1 %v1304_v37 }
  0x5a   :  { %1216 = vmatmul.mubr.bf16.gmra.mrb[28].mxu0 %v1305_v38  ;;  %1248 = vmatmul.mubr.bf16.gmra.mrb[28].mxu1 %v1306_v39 }
  0xf5   :  { %v1189_v41 = vpop.f32.mrb[0].mxu0  ;;  %v1221_v42 = vpop.f32.mrb[0].mxu1 }
  0xf6   :  { %v960_v43 = vadd.f32 %v1189_v41, %v1450_v40  ;;  %v992_v44 = vadd.f32 %v1221_v42, %v1450_v40  ;;  %v501_v45 = vpop.f32.mrb[1].mxu0  ;;  %v629_v46 = vpop.f32.mrb[1].mxu1 }
  0xf7   :  { %v958_v47 = vadd.f32 %v1450_v40, %v501_v45  ;;  %v990_v48 = vadd.f32 %v1450_v40, %v629_v46  ;;  %v1190_v49 = vpop.f32.mrb[2].mxu0  ;;  %v1222_v50 = vpop.f32.mrb[2].mxu1 }
  0xf8   :  { %1024 = vst [vmem:[%s1711_s3 + $0x10] sm:$0xff] %v960_v43  ;;  %1056 = vst [vmem:[%s1711_s3 + $0x110] sm:$0xff] %v992_v44  ;;  %v961_v51 = vadd.f32 %v1190_v49, %v1450_v40  ;;  %v993_v52 = vadd.f32 %v1222_v50, %v1450_v40  ;;  %v504_v53 = vpop.f32.mrb[3].mxu0  ;;  %v632_v54 = vpop.f32.mrb[3].mxu1 }
  0xf9   :  { %1022 = vst [vmem:[%s1711_s3] sm:$0xff] %v958_v47  ;;  %1054 = vst [vmem:[%s1711_s3 + $0x100] sm:$0xff] %v990_v48  ;;  %v959_v55 = vadd.f32 %v1450_v40, %v504_v53  ;;  %v991_v56 = vadd.f32 %v1450_v40, %v632_v54 }
  0xfa   :  { %1025 = vst [vmem:[%s1711_s3 + $0x18] sm:$0xff] %v961_v51  ;;  %1057 = vst [vmem:[%s1711_s3 + $0x118] sm:$0xff] %v993_v52 }
  0xfb   :  { %1023 = vst [vmem:[%s1711_s3 + $0x8] sm:$0xff] %v959_v55  ;;  %1055 = vst [vmem:[%s1711_s3 + $0x108] sm:$0xff] %v991_v56 }
  0xfd   :  { %v1193_v57 = vpop.f32.mrb[4].mxu0  ;;  %v1225_v58 = vpop.f32.mrb[4].mxu1 }
  0xfe   :  { %v964_v59 = vadd.f32 %v1193_v57, %v1450_v40  ;;  %v996_v60 = vadd.f32 %v1225_v58, %v1450_v40  ;;  %v517_v61 = vpop.f32.mrb[5].mxu0  ;;  %v645_v62 = vpop.f32.mrb[5].mxu1 }
  0xff   :  { %v962_v63 = vadd.f32 %v1450_v40, %v517_v61  ;;  %v994_v0 = vadd.f32 %v1450_v40, %v645_v62  ;;  %v1194_v1 = vpop.f32.mrb[6].mxu0  ;;  %v1226_v2 = vpop.f32.mrb[6].mxu1 }
 0x100   :  { %1028 = vst [vmem:[%s1711_s3 + $0x30] sm:$0xff] %v964_v59  ;;  %1060 = vst [vmem:[%s1711_s3 + $0x130] sm:$0xff] %v996_v60  ;;  %v965_v3 = vadd.f32 %v1194_v1, %v1450_v40  ;;  %v997_v4 = vadd.f32 %v1226_v2, %v1450_v40  ;;  %v520_v5 = vpop.f32.mrb[7].mxu0  ;;  %v648_v6 = vpop.f32.mrb[7].mxu1 }
 0x101   :  { %1026 = vst [vmem:[%s1711_s3 + $0x20] sm:$0xff] %v962_v63  ;;  %1058 = vst [vmem:[%s1711_s3 + $0x120] sm:$0xff] %v994_v0  ;;  %v963_v7 = vadd.f32 %v1450_v40, %v520_v5  ;;  %v995_v8 = vadd.f32 %v1450_v40, %v648_v6 }
 0x102   :  { %1029 = vst [vmem:[%s1711_s3 + $0x38] sm:$0xff] %v965_v3  ;;  %1061 = vst [vmem:[%s1711_s3 + $0x138] sm:$0xff] %v997_v4 }
 0x103   :  { %1027 = vst [vmem:[%s1711_s3 + $0x28] sm:$0xff] %v963_v7  ;;  %1059 = vst [vmem:[%s1711_s3 + $0x128] sm:$0xff] %v995_v8 }
 0x105   :  { %v1197_v9 = vpop.f32.mrb[8].mxu0  ;;  %v1229_v10 = vpop.f32.mrb[8].mxu1 }
 0x106   :  { %v968_v11 = vadd.f32 %v1197_v9, %v1450_v40  ;;  %v1000_v12 = vadd.f32 %v1229_v10, %v1450_v40  ;;  %v533_v13 = vpop.f32.mrb[9].mxu0  ;;  %v661_v14 = vpop.f32.mrb[9].mxu1 }
 0x107   :  { %v966_v15 = vadd.f32 %v1450_v40, %v533_v13  ;;  %v998_v16 = vadd.f32 %v1450_v40, %v661_v14  ;;  %v1198_v17 = vpop.f32.mrb[10].mxu0  ;;  %v1230_v18 = vpop.f32.mrb[10].mxu1 }
 0x108   :  { %1032 = vst [vmem:[%s1711_s3 + $0x50] sm:$0xff] %v968_v11  ;;  %1064 = vst [vmem:[%s1711_s3 + $0x150] sm:$0xff] %v1000_v12  ;;  %v969_v19 = vadd.f32 %v1198_v17, %v1450_v40  ;;  %v1001_v20 = vadd.f32 %v1230_v18, %v1450_v40  ;;  %v536_v21 = vpop.f32.mrb[11].mxu0  ;;  %v664_v22 = vpop.f32.mrb[11].mxu1 }
 0x109   :  { %1030 = vst [vmem:[%s1711_s3 + $0x40] sm:$0xff] %v966_v15  ;;  %1062 = vst [vmem:[%s1711_s3 + $0x140] sm:$0xff] %v998_v16  ;;  %v967_v23 = vadd.f32 %v1450_v40, %v536_v21  ;;  %v999_v24 = vadd.f32 %v1450_v40, %v664_v22 }
 0x10a   :  { %1033 = vst [vmem:[%s1711_s3 + $0x58] sm:$0xff] %v969_v19  ;;  %1065 = vst [vmem:[%s1711_s3 + $0x158] sm:$0xff] %v1001_v20 }
 0x10b   :  { %1031 = vst [vmem:[%s1711_s3 + $0x48] sm:$0xff] %v967_v23  ;;  %1063 = vst [vmem:[%s1711_s3 + $0x148] sm:$0xff] %v999_v24 }
 0x10d   :  { %v1201_v25 = vpop.f32.mrb[12].mxu0  ;;  %v1233_v26 = vpop.f32.mrb[12].mxu1 }
 0x10e   :  { %v972_v27 = vadd.f32 %v1201_v25, %v1450_v40  ;;  %v1004_v28 = vadd.f32 %v1233_v26, %v1450_v40  ;;  %v549_v29 = vpop.f32.mrb[13].mxu0  ;;  %v677_v30 = vpop.f32.mrb[13].mxu1 }
 0x10f   :  { %v970_v31 = vadd.f32 %v1450_v40, %v549_v29  ;;  %v1002_v32 = vadd.f32 %v1450_v40, %v677_v30  ;;  %v1202_v33 = vpop.f32.mrb[14].mxu0  ;;  %v1234_v34 = vpop.f32.mrb[14].mxu1 }
 0x110   :  { %1036 = vst [vmem:[%s1711_s3 + $0x70] sm:$0xff] %v972_v27  ;;  %1068 = vst [vmem:[%s1711_s3 + $0x170] sm:$0xff] %v1004_v28  ;;  %v973_v35 = vadd.f32 %v1202_v33, %v1450_v40  ;;  %v1005_v36 = vadd.f32 %v1234_v34, %v1450_v40  ;;  %v552_v37 = vpop.f32.mrb[15].mxu0  ;;  %v680_v38 = vpop.f32.mrb[15].mxu1 }
 0x111   :  { %1034 = vst [vmem:[%s1711_s3 + $0x60] sm:$0xff] %v970_v31  ;;  %1066 = vst [vmem:[%s1711_s3 + $0x160] sm:$0xff] %v1002_v32  ;;  %v971_v39 = vadd.f32 %v1450_v40, %v552_v37  ;;  %v1003_v41 = vadd.f32 %v1450_v40, %v680_v38 }
 0x112   :  { %1037 = vst [vmem:[%s1711_s3 + $0x78] sm:$0xff] %v973_v35  ;;  %1069 = vst [vmem:[%s1711_s3 + $0x178] sm:$0xff] %v1005_v36 }
 0x113   :  { %1035 = vst [vmem:[%s1711_s3 + $0x68] sm:$0xff] %v971_v39  ;;  %1067 = vst [vmem:[%s1711_s3 + $0x168] sm:$0xff] %v1003_v41 }
 0x115   :  { %v1205_v42 = vpop.f32.mrb[16].mxu0  ;;  %v1237_v43 = vpop.f32.mrb[16].mxu1 }
 0x116   :  { %v976_v44 = vadd.f32 %v1205_v42, %v1450_v40  ;;  %v1008_v45 = vadd.f32 %v1237_v43, %v1450_v40  ;;  %v565_v46 = vpop.f32.mrb[17].mxu0  ;;  %v693_v47 = vpop.f32.mrb[17].mxu1 }
 0x117   :  { %v974_v48 = vadd.f32 %v1450_v40, %v565_v46  ;;  %v1006_v49 = vadd.f32 %v1450_v40, %v693_v47  ;;  %v1206_v50 = vpop.f32.mrb[18].mxu0  ;;  %v1238_v51 = vpop.f32.mrb[18].mxu1 }
 0x118   :  { %1040 = vst [vmem:[%s1711_s3 + $0x90] sm:$0xff] %v976_v44  ;;  %1072 = vst [vmem:[%s1711_s3 + $0x190] sm:$0xff] %v1008_v45  ;;  %v977_v52 = vadd.f32 %v1206_v50, %v1450_v40  ;;  %v1009_v53 = vadd.f32 %v1238_v51, %v1450_v40  ;;  %v568_v54 = vpop.f32.mrb[19].mxu0  ;;  %v696_v55 = vpop.f32.mrb[19].mxu1 }
 0x119   :  { %1038 = vst [vmem:[%s1711_s3 + $0x80] sm:$0xff] %v974_v48  ;;  %1070 = vst [vmem:[%s1711_s3 + $0x180] sm:$0xff] %v1006_v49  ;;  %v975_v56 = vadd.f32 %v1450_v40, %v568_v54  ;;  %v1007_v57 = vadd.f32 %v1450_v40, %v696_v55 }
 0x11a   :  { %1041 = vst [vmem:[%s1711_s3 + $0x98] sm:$0xff] %v977_v52  ;;  %1073 = vst [vmem:[%s1711_s3 + $0x198] sm:$0xff] %v1009_v53 }
 0x11b   :  { %1039 = vst [vmem:[%s1711_s3 + $0x88] sm:$0xff] %v975_v56  ;;  %1071 = vst [vmem:[%s1711_s3 + $0x188] sm:$0xff] %v1007_v57 }
 0x11d   :  { %v1209_v58 = vpop.f32.mrb[20].mxu0  ;;  %v1241_v59 = vpop.f32.mrb[20].mxu1 }
 0x11e   :  { %v980_v60 = vadd.f32 %v1209_v58, %v1450_v40  ;;  %v1012_v61 = vadd.f32 %v1241_v59, %v1450_v40  ;;  %v581_v62 = vpop.f32.mrb[21].mxu0  ;;  %v709_v63 = vpop.f32.mrb[21].mxu1 }
 0x11f   :  { %v978_v0 = vadd.f32 %v1450_v40, %v581_v62  ;;  %v1010_v1 = vadd.f32 %v1450_v40, %v709_v63  ;;  %v1210_v2 = vpop.f32.mrb[22].mxu0  ;;  %v1242_v3 = vpop.f32.mrb[22].mxu1 }
 0x120   :  { %1044 = vst [vmem:[%s1711_s3 + $0xb0] sm:$0xff] %v980_v60  ;;  %1076 = vst [vmem:[%s1711_s3 + $0x1b0] sm:$0xff] %v1012_v61  ;;  %v981_v4 = vadd.f32 %v1210_v2, %v1450_v40  ;;  %v1013_v5 = vadd.f32 %v1242_v3, %v1450_v40  ;;  %v584_v6 = vpop.f32.mrb[23].mxu0  ;;  %v712_v7 = vpop.f32.mrb[23].mxu1 }
 0x121   :  { %1042 = vst [vmem:[%s1711_s3 + $0xa0] sm:$0xff] %v978_v0  ;;  %1074 = vst [vmem:[%s1711_s3 + $0x1a0] sm:$0xff] %v1010_v1  ;;  %v979_v8 = vadd.f32 %v1450_v40, %v584_v6  ;;  %v1011_v9 = vadd.f32 %v1450_v40, %v712_v7 }
 0x122   :  { %1045 = vst [vmem:[%s1711_s3 + $0xb8] sm:$0xff] %v981_v4  ;;  %1077 = vst [vmem:[%s1711_s3 + $0x1b8] sm:$0xff] %v1013_v5 }
 0x123   :  { %1043 = vst [vmem:[%s1711_s3 + $0xa8] sm:$0xff] %v979_v8  ;;  %1075 = vst [vmem:[%s1711_s3 + $0x1a8] sm:$0xff] %v1011_v9 }
 0x125   :  { %v1213_v10 = vpop.f32.mrb[24].mxu0  ;;  %v1245_v11 = vpop.f32.mrb[24].mxu1 }
 0x126   :  { %v984_v12 = vadd.f32 %v1213_v10, %v1450_v40  ;;  %v1016_v13 = vadd.f32 %v1245_v11, %v1450_v40  ;;  %v597_v14 = vpop.f32.mrb[25].mxu0  ;;  %v725_v15 = vpop.f32.mrb[25].mxu1 }
 0x127   :  { %v982_v16 = vadd.f32 %v1450_v40, %v597_v14  ;;  %v1014_v17 = vadd.f32 %v1450_v40, %v725_v15  ;;  %v1214_v18 = vpop.f32.mrb[26].mxu0  ;;  %v1246_v19 = vpop.f32.mrb[26].mxu1 }
 0x128   :  { %1048 = vst [vmem:[%s1711_s3 + $0xd0] sm:$0xff] %v984_v12  ;;  %1080 = vst [vmem:[%s1711_s3 + $0x1d0] sm:$0xff] %v1016_v13  ;;  %v985_v20 = vadd.f32 %v1214_v18, %v1450_v40  ;;  %v1017_v21 = vadd.f32 %v1246_v19, %v1450_v40  ;;  %v600_v22 = vpop.f32.mrb[27].mxu0  ;;  %v728_v23 = vpop.f32.mrb[27].mxu1 }
 0x129   :  { %1046 = vst [vmem:[%s1711_s3 + $0xc0] sm:$0xff] %v982_v16  ;;  %1078 = vst [vmem:[%s1711_s3 + $0x1c0] sm:$0xff] %v1014_v17  ;;  %v983_v24 = vadd.f32 %v1450_v40, %v600_v22  ;;  %v1015_v25 = vadd.f32 %v1450_v40, %v728_v23 }
 0x12a   :  { %1049 = vst [vmem:[%s1711_s3 + $0xd8] sm:$0xff] %v985_v20  ;;  %1081 = vst [vmem:[%s1711_s3 + $0x1d8] sm:$0xff] %v1017_v21 }
 0x12b   :  { %1047 = vst [vmem:[%s1711_s3 + $0xc8] sm:$0xff] %v983_v24  ;;  %1079 = vst [vmem:[%s1711_s3 + $0x1c8] sm:$0xff] %v1015_v25 }
 0x12d   :  { %v1217_v26 = vpop.f32.mrb[28].mxu0  ;;  %v1249_v27 = vpop.f32.mrb[28].mxu1 }
 0x12e   :  { %v988_v28 = vadd.f32 %v1217_v26, %v1450_v40  ;;  %v1020_v29 = vadd.f32 %v1249_v27, %v1450_v40  ;;  %v613_v30 = vpop.f32.mrb[29].mxu0  ;;  %v741_v31 = vpop.f32.mrb[29].mxu1 }
 0x12f   :  { %v986_v32 = vadd.f32 %v1450_v40, %v613_v30  ;;  %v1018_v33 = vadd.f32 %v1450_v40, %v741_v31  ;;  %v1218_v34 = vpop.f32.mrb[30].mxu0  ;;  %v1250_v35 = vpop.f32.mrb[30].mxu1 }
 0x130   :  { %1052 = vst [vmem:[%s1711_s3 + $0xf0] sm:$0xff] %v988_v28  ;;  %1084 = vst [vmem:[%s1711_s3 + $0x1f0] sm:$0xff] %v1020_v29  ;;  %v989_v36 = vadd.f32 %v1218_v34, %v1450_v40  ;;  %v1021_v37 = vadd.f32 %v1250_v35, %v1450_v40  ;;  %v616_v38 = vpop.f32.mrb[31].mxu0  ;;  %v744_v39 = vpop.f32.mrb[31].mxu1 }
 0x131   :  { %1050 = vst [vmem:[%s1711_s3 + $0xe0] sm:$0xff] %v986_v32  ;;  %1082 = vst [vmem:[%s1711_s3 + $0x1e0] sm:$0xff] %v1018_v33  ;;  %v987_v41 = vadd.f32 %v1450_v40, %v616_v38  ;;  %v1019_v42 = vadd.f32 %v1450_v40, %v744_v39 }
 0x132   :  { %1053 = vst [vmem:[%s1711_s3 + $0xf8] sm:$0xff] %v989_v36  ;;  %1085 = vst [vmem:[%s1711_s3 + $0x1f8] sm:$0xff] %v1021_v37 }
 0x133   :  { %1051 = vst [vmem:[%s1711_s3 + $0xe8] sm:$0xff] %v987_v41  ;;  %1083 = vst [vmem:[%s1711_s3 + $0x1e8] sm:$0xff] %v1019_v42 }

// kernel: _lambda_.25
= control target key start
LH: loop header
LB: loop body
LE: loop exit
PB: predicated region body
PF: predicated region fallthrough
CT: control target
= control target key end

     0   :  { %s635_s1 = inlined_call_operand.vmem [shape: bf16[1,128,128], index: 1, kind: input, shape index: {}]   ;;  %s636_s0 = inlined_call_operand.vmem [shape: bf16[1,128,128], index: 0, kind: input, shape index: {}]   ;;  %s637_s2 = inlined_call_operand.vmem [shape: f32[1,128], index: 2, kind: input, shape index: {}]   ;;  %s638_s3 = inlined_call_operand.vmem [shape: f32[1,128,128], index: 3, kind: output, shape index: {}]  }
   0x1   :  { %v506_v0 = vld [vmem:[%s635_s1] sm:$0xff]   ;;  %v507_v1 = vld [vmem:[%s635_s1 + $0x8] sm:$0xff]   ;;  %v508_v2 = vld [vmem:[%s635_s1 + $0x10] sm:$0xff]  }
   0x2   :  { %458 = vmatprep.subr.bf16.mxu0 %v506_v0  ;;  %490 = vmatprep.subr.bf16.mxu1 %v506_v0  ;;  %v509_v3 = vld [vmem:[%s635_s1 + $0x18] sm:$0xff]   ;;  %v404_v4 = vld [vmem:[%s636_s0] sm:$0xff]   ;;  %v435_v20 = vld [vmem:[%s636_s0 + $0x8] sm:$0xff]  }
   0x3   :  { %459 = vmatpush3.bf16.msra.mxu0 %v506_v0  ;;  %498 = vmatpush3.bf16.msra.mxu1 %v506_v0  ;;  %v438_v5 = vld [vmem:[%s636_s0 + $0x20] sm:$0xff]   ;;  %v405_v6 = vunpack.c.l.bf16 %v404_v4  ;;  %v406_v7 = vunpack.c.h.bf16 %v404_v4  ;;  %v439_v22 = vld [vmem:[%s636_s0 + $0x28] sm:$0xff]   ;;  %v436_v23 = vld [vmem:[%s636_s0 + $0x10] sm:$0xff]   ;;  %v409_v25 = vunpack.c.l.bf16 %v435_v20  ;;  %v410_v26 = vunpack.c.h.bf16 %v435_v20 }
   0x4   :  { %460 = vmatprep.subr.bf16.mxu0 %v507_v1  ;;  %491 = vmatprep.subr.bf16.mxu1 %v507_v1  ;;  %v421_v8 = vunpack.c.l.bf16 %v438_v5  ;;  %v422_v9 = vunpack.c.h.bf16 %v438_v5  ;;  %v510_v10 = vld [vmem:[%s635_s1 + $0x20] sm:$0xff]   ;;  %v511_v24 = vld [vmem:[%s635_s1 + $0x28] sm:$0xff]   ;;  %v440_v27 = vld [vmem:[%s636_s0 + $0x30] sm:$0xff]   ;;  %v425_v28 = vunpack.c.l.bf16 %v439_v22  ;;  %v426_v29 = vunpack.c.h.bf16 %v439_v22 }
   0x5   :  { %vm67_vm0 = vcmp.ge.f32.partialorder %v405_v6, 0.0  ;;  %vm68_vm1 = vcmp.ge.f32.partialorder %v406_v7, 0.0  ;;  %v83_v11 = vmul.f32 0.2, %v405_v6  ;;  %v84_v12 = vmul.f32 0.2, %v406_v7 }
   0x6   :  { %vm75_vm2 = vcmp.ge.f32.partialorder %v421_v8, 0.0  ;;  %vm76_vm3 = vcmp.ge.f32.partialorder %v422_v9, 0.0  ;;  %v91_v13 = vmul.f32 0.2, %v421_v8  ;;  %v92_v14 = vmul.f32 0.2, %v422_v9 }
   0x7   :  { %461 = vmatpush3.bf16.msra.mxu0 %v507_v1  ;;  %499 = vmatpush3.bf16.msra.mxu1 %v507_v1  ;;  %v99_v15 = vsel %vm67_vm0, %v405_v6, %v83_v11  ;;  %v100_v16 = vsel %vm68_vm1, %v406_v7, %v84_v12  ;;  %v413_v30 = vunpack.c.l.bf16 %v436_v23  ;;  %v414_v31 = vunpack.c.h.bf16 %v436_v23  ;;  %v512_v32 = vld [vmem:[%s635_s1 + $0x30] sm:$0xff]   ;;  %v513_v37 = vld [vmem:[%s635_s1 + $0x38] sm:$0xff]  }
   0x8   :  { %462 = vmatprep.subr.bf16.mxu0 %v508_v2  ;;  %492 = vmatprep.subr.bf16.mxu1 %v508_v2  ;;  %v115_v17 = vpack.c.bf16 %v100_v16, %v99_v15  ;;  %v107_v18 = vsel %vm75_vm2, %v421_v8, %v91_v13  ;;  %v108_v19 = vsel %vm76_vm3, %v422_v9, %v92_v14  ;;  %v429_v33 = vunpack.c.l.bf16 %v440_v27  ;;  %v437_v42 = vld [vmem:[%s636_s0 + $0x18] sm:$0xff]   ;;  %v402_v8 = vld [vmem:[%s637_s2] ss:$0 sm:$0xff] }
   0x9   :  { %v119_v21 = vpack.c.bf16 %v108_v19, %v107_v18  ;;  %v430_v34 = vunpack.c.h.bf16 %v440_v27  ;;  %vm69_vm4 = vcmp.ge.f32.partialorder %v409_v25, 0.0  ;;  %vm70_vm5 = vcmp.ge.f32.partialorder %v410_v26, 0.0  ;;  %v441_v45 = vld [vmem:[%s636_s0 + $0x38] sm:$0xff]  }
   0xa   :  { %474 = vmatprep.mubr.bf16.mxu0 %v115_v17  ;;  %v85_v35 = vmul.f32 0.2, %v409_v25  ;;  %v86_v36 = vmul.f32 0.2, %v410_v26  ;;  %v93_v38 = vmul.f32 0.2, %v425_v28  ;;  %v417_v51 = vunpack.c.l.bf16 %v437_v42 }
   0xb   :  { %463 = vmatpush3.bf16.msra.mxu0 %v508_v2  ;;  %500 = vmatpush3.bf16.msra.mxu1 %v508_v2  ;;  %v94_v39 = vmul.f32 0.2, %v426_v29  ;;  %v87_v40 = vmul.f32 0.2, %v413_v30  ;;  %vm77_vm6 = vcmp.ge.f32.partialorder %v425_v28, 0.0  ;;  %vm78_vm7 = vcmp.ge.f32.partialorder %v426_v29, 0.0 }
   0xc   :  { %464 = vmatprep.subr.bf16.mxu0 %v509_v3  ;;  %493 = vmatprep.subr.bf16.mxu1 %v509_v3  ;;  %vm71_vm8 = vcmp.ge.f32.partialorder %v413_v30, 0.0  ;;  %v88_v41 = vmul.f32 0.2, %v414_v31  ;;  %vm72_vm9 = vcmp.ge.f32.partialorder %v414_v31, 0.0  ;;  %v95_v43 = vmul.f32 0.2, %v429_v33 }
   0xd   :  { %482 = vmatprep.mubr.bf16.mxu1 %v119_v21  ;;  %v96_v44 = vmul.f32 0.2, %v430_v34  ;;  %v101_v46 = vsel %vm69_vm4, %v409_v25, %v85_v35  ;;  %v102_v47 = vsel %vm70_vm5, %v410_v26, %v86_v36  ;;  %vm79_vm10 = vcmp.ge.f32.partialorder %v429_v33, 0.0 }
   0xe   :  { %vm80_vm11 = vcmp.ge.f32.partialorder %v430_v34, 0.0  ;;  %v109_v48 = vsel %vm77_vm6, %v425_v28, %v93_v38  ;;  %v110_v49 = vsel %vm78_vm7, %v426_v29, %v94_v39  ;;  %v103_v50 = vsel %vm71_vm8, %v413_v30, %v87_v40 }
   0xf   :  { %465 = vmatpush3.bf16.msra.mxu0 %v509_v3  ;;  %501 = vmatpush3.bf16.msra.mxu1 %v509_v3  ;;  %v104_v52 = vsel %vm72_vm9, %v414_v31, %v88_v41  ;;  %v418_v53 = vunpack.c.h.bf16 %v437_v42  ;;  %v433_v54 = vunpack.c.l.bf16 %v441_v45  ;;  %v434_v55 = vunpack.c.h.bf16 %v441_v45 }
  0x10   :  { %466 = vmatprep.subr.bf16.mxu0 %v510_v10  ;;  %494 = vmatprep.subr.bf16.mxu1 %v510_v10  ;;  %v111_v56 = vsel %vm79_vm10, %v429_v33, %v95_v43  ;;  %v112_v57 = vsel %vm80_vm11, %v430_v34, %v96_v44  ;;  %v116_v58 = vpack.c.bf16 %v102_v47, %v101_v46  ;;  %vm73_vm12 = vcmp.ge.f32.partialorder %v417_v51, 0.0 }
  0x11   :  { %v120_v59 = vpack.c.bf16 %v110_v49, %v109_v48  ;;  %v117_v60 = vpack.c.bf16 %v104_v52, %v103_v50  ;;  %v89_v61 = vmul.f32 0.2, %v417_v51  ;;  %v121_v62 = vpack.c.bf16 %v112_v57, %v111_v56 }
  0x12   :  { %v90_v63 = vmul.f32 0.2, %v418_v53  ;;  %v97_v0 = vmul.f32 0.2, %v433_v54  ;;  %v98_v1 = vmul.f32 0.2, %v434_v55 }
  0x13   :  { %467 = vmatpush3.bf16.msra.mxu0 %v510_v10  ;;  %502 = vmatpush3.bf16.msra.mxu1 %v510_v10  ;;  %vm74_vm13 = vcmp.ge.f32.partialorder %v418_v53, 0.0  ;;  %vm81_vm14 = vcmp.ge.f32.partialorder %v433_v54, 0.0  ;;  %vm82_vm15 = vcmp.ge.f32.partialorder %v434_v55, 0.0  ;;  %v105_v2 = vsel %vm73_vm12, %v417_v51, %v89_v61 }
  0x14   :  { %468 = vmatprep.subr.bf16.mxu0 %v511_v24  ;;  %495 = vmatprep.subr.bf16.mxu1 %v511_v24  ;;  %v106_v3 = vsel %vm74_vm13, %v418_v53, %v90_v63  ;;  %v113_v4 = vsel %vm81_vm14, %v433_v54, %v97_v0  ;;  %v114_v5 = vsel %vm82_vm15, %v434_v55, %v98_v1 }
  0x15   :  { %v118_v6 = vpack.c.bf16 %v106_v3, %v105_v2  ;;  %v122_v7 = vpack.c.bf16 %v114_v5, %v113_v4 }
  0x17   :  { %469 = vmatpush3.bf16.msra.mxu0 %v511_v24  ;;  %503 = vmatpush3.bf16.msra.mxu1 %v511_v24 }
  0x18   :  { %470 = vmatprep.subr.bf16.mxu0 %v512_v32  ;;  %496 = vmatprep.subr.bf16.mxu1 %v512_v32 }
  0x1b   :  { %471 = vmatpush3.bf16.msra.mxu0 %v512_v32  ;;  %504 = vmatpush3.bf16.msra.mxu1 %v512_v32 }
  0x1c   :  { %472 = vmatprep.subr.bf16.mxu0 %v513_v37  ;;  %497 = vmatprep.subr.bf16.mxu1 %v513_v37 }
  0x1f   :  { %473 = vmatpush3.bf16.msra.mxu0 %v513_v37  ;;  %505 = vmatpush3.bf16.msra.mxu1 %v513_v37 }
  0x22   :  { %475 = vmatmul.mubr.bf16.vlgmr.msra.gmra.mrb[0].mxu0 %v116_v58  ;;  %483 = vmatmul.mubr.bf16.vlgmr.msra.gmra.mrb[0].mxu1 %v120_v59 }
  0x23   :  { %478 = vmatprep.mubr.bf16.mxu0 %v117_v60  ;;  %486 = vmatprep.mubr.bf16.mxu1 %v121_v62 }
  0x2a   :  { %479 = vmatmul.mubr.bf16.gmra.mrb[4].mxu0 %v118_v6  ;;  %487 = vmatmul.mubr.bf16.gmra.mrb[4].mxu1 %v122_v7 }
  0xf5   :  { %v476_v9 = vpop.f32.mrb[0].mxu0  ;;  %v484_v10 = vpop.f32.mrb[0].mxu1 }
  0xf6   :  { %v360_v11 = vadd.f32 %v476_v9, %v402_v8  ;;  %v368_v12 = vadd.f32 %v484_v10, %v402_v8  ;;  %v237_v13 = vpop.f32.mrb[1].mxu0  ;;  %v269_v14 = vpop.f32.mrb[1].mxu1 }
  0xf7   :  { %v358_v15 = vadd.f32 %v402_v8, %v237_v13  ;;  %v366_v16 = vadd.f32 %v402_v8, %v269_v14  ;;  %v477_v17 = vpop.f32.mrb[2].mxu0  ;;  %v485_v18 = vpop.f32.mrb[2].mxu1 }
  0xf8   :  { %376 = vst [vmem:[%s638_s3 + $0x10] sm:$0xff] %v360_v11  ;;  %384 = vst [vmem:[%s638_s3 + $0x50] sm:$0xff] %v368_v12  ;;  %v361_v19 = vadd.f32 %v477_v17, %v402_v8  ;;  %v369_v20 = vadd.f32 %v485_v18, %v402_v8  ;;  %v240_v21 = vpop.f32.mrb[3].mxu0  ;;  %v272_v22 = vpop.f32.mrb[3].mxu1 }
  0xf9   :  { %374 = vst [vmem:[%s638_s3] sm:$0xff] %v358_v15  ;;  %382 = vst [vmem:[%s638_s3 + $0x40] sm:$0xff] %v366_v16  ;;  %v359_v23 = vadd.f32 %v402_v8, %v240_v21  ;;  %v367_v24 = vadd.f32 %v402_v8, %v272_v22 }
  0xfa   :  { %377 = vst [vmem:[%s638_s3 + $0x18] sm:$0xff] %v361_v19  ;;  %385 = vst [vmem:[%s638_s3 + $0x58] sm:$0xff] %v369_v20 }
  0xfb   :  { %375 = vst [vmem:[%s638_s3 + $0x8] sm:$0xff] %v359_v23  ;;  %383 = vst [vmem:[%s638_s3 + $0x48] sm:$0xff] %v367_v24 }
  0xfd   :  { %v480_v25 = vpop.f32.mrb[4].mxu0  ;;  %v488_v26 = vpop.f32.mrb[4].mxu1 }
  0xfe   :  { %v364_v27 = vadd.f32 %v480_v25, %v402_v8  ;;  %v372_v28 = vadd.f32 %v488_v26, %v402_v8  ;;  %v253_v29 = vpop.f32.mrb[5].mxu0  ;;  %v285_v30 = vpop.f32.mrb[5].mxu1 }
  0xff   :  { %v362_v31 = vadd.f32 %v402_v8, %v253_v29  ;;  %v370_v32 = vadd.f32 %v402_v8, %v285_v30  ;;  %v481_v33 = vpop.f32.mrb[6].mxu0  ;;  %v489_v34 = vpop.f32.mrb[6].mxu1 }
 0x100   :  { %380 = vst [vmem:[%s638_s3 + $0x30] sm:$0xff] %v364_v27  ;;  %388 = vst [vmem:[%s638_s3 + $0x70] sm:$0xff] %v372_v28  ;;  %v365_v35 = vadd.f32 %v481_v33, %v402_v8  ;;  %v373_v36 = vadd.f32 %v489_v34, %v402_v8  ;;  %v256_v37 = vpop.f32.mrb[7].mxu0  ;;  %v288_v38 = vpop.f32.mrb[7].mxu1 }
 0x101   :  { %378 = vst [vmem:[%s638_s3 + $0x20] sm:$0xff] %v362_v31  ;;  %386 = vst [vmem:[%s638_s3 + $0x60] sm:$0xff] %v370_v32  ;;  %v363_v39 = vadd.f32 %v402_v8, %v256_v37  ;;  %v371_v40 = vadd.f32 %v402_v8, %v288_v38 }
 0x102   :  { %381 = vst [vmem:[%s638_s3 + $0x38] sm:$0xff] %v365_v35  ;;  %389 = vst [vmem:[%s638_s3 + $0x78] sm:$0xff] %v373_v36 }
 0x103   :  { %379 = vst [vmem:[%s638_s3 + $0x28] sm:$0xff] %v363_v39  ;;  %387 = vst [vmem:[%s638_s3 + $0x68] sm:$0xff] %v371_v40 }

// kernel: _lambda_.26
= control target key start
LH: loop header
LB: loop body
LE: loop exit
PB: predicated region body
PF: predicated region fallthrough
CT: control target
= control target key end

     0   :  { %vm14_vm0 = vcmask 122880   ;;  %vm34_vm1 = vcmask 130048   ;;  %v140_v0 = vmov 0.0   ;;  %s258_s0 = inlined_call_operand.vmem [shape: f32[128,16], index: 0, kind: input, shape index: {}]   ;;  %s259_s1 = inlined_call_operand.vmem [shape: f32[1,16], index: 1, kind: output, shape index: {0}]   ;;  %s260_s2 = inlined_call_operand.vmem [shape: f32[1,16], index: 2, kind: output, shape index: {1}]  }
   0x1   :  { %15 = vst.msk [vmem:[%s259_s1] sm:$0x1] %vm14_vm0, %v140_v0  ;;  %v17_v1 = vld [vmem:[%s258_s0] sm:$0xff]  ;;  %v18_v2 = vld [vmem:[%s258_s0 + $0x8] sm:$0xff]  ;;  %v19_v3 = vld [vmem:[%s258_s0 + $0x10] sm:$0xff] }
   0x2   :  { %16 = vst.msk [vmem:[%s260_s2] sm:$0x1] %vm14_vm0, %v140_v0  ;;  %v35_v4 = vsel %vm34_vm1, %v17_v1, 0.0  ;;  %v36_v5 = vsel %vm34_vm1, %v18_v2, 0.0  ;;  %v38_v6 = vsel %vm34_vm1, %v19_v3, 0.0  ;;  %v20_v7 = vld [vmem:[%s258_s0 + $0x18] sm:$0xff]  ;;  %v76_v15 = vmul.f32 %v17_v1, %v17_v1 }
   0x3   :  { %v37_v8 = vadd.f32 %v36_v5, %v35_v4  ;;  %v40_v9 = vsel %vm34_vm1, %v20_v7, 0.0  ;;  %v21_v10 = vld [vmem:[%s258_s0 + $0x20] sm:$0xff]  ;;  %v22_v13 = vld [vmem:[%s258_s0 + $0x28] sm:$0xff]  ;;  %v77_v16 = vmul.f32 %v18_v2, %v18_v2  ;;  %v78_v17 = vmul.f32 %v19_v3, %v19_v3  ;;  %v23_v19 = vld [vmem:[%s258_s0 + $0x30] sm:$0xff] }
   0x4   :  { %v42_v12 = vsel %vm34_vm1, %v21_v10, 0.0  ;;  %v44_v18 = vsel %vm34_vm1, %v22_v13, 0.0  ;;  %v79_v21 = vmul.f32 %v20_v7, %v20_v7  ;;  %v46_v22 = vsel %vm34_vm1, %v23_v19, 0.0  ;;  %v24_v24 = vld [vmem:[%s258_s0 + $0x38] sm:$0xff]  ;;  %v25_v31 = vld [vmem:[%s258_s0 + $0x40] sm:$0xff]  ;;  %v26_v37 = vld [vmem:[%s258_s0 + $0x48] sm:$0xff] }
   0x5   :  { %v39_v11 = vadd.f32 %v38_v6, %v37_v8  ;;  %v80_v23 = vmul.f32 %v21_v10, %v21_v10  ;;  %v92_v26 = vsel %vm34_vm1, %v76_v15, 0.0  ;;  %v93_v27 = vsel %vm34_vm1, %v77_v16, 0.0  ;;  %v27_v43 = vld [vmem:[%s258_s0 + $0x50] sm:$0xff]  ;;  %v28_v49 = vld [vmem:[%s258_s0 + $0x58] sm:$0xff]  ;;  %v29_v55 = vld [vmem:[%s258_s0 + $0x60] sm:$0xff] }
   0x6   :  { %v95_v28 = vsel %vm34_vm1, %v78_v17, 0.0  ;;  %v48_v29 = vsel %vm34_vm1, %v24_v24, 0.0  ;;  %v94_v30 = vadd.f32 %v93_v27, %v92_v26  ;;  %v81_v33 = vmul.f32 %v22_v13, %v22_v13  ;;  %v30_v61 = vld [vmem:[%s258_s0 + $0x68] sm:$0xff]  ;;  %v31_v3 = vld [vmem:[%s258_s0 + $0x70] sm:$0xff] }
   0x7   :  { %v41_v14 = vadd.f32 %v40_v9, %v39_v11  ;;  %v97_v34 = vsel %vm34_vm1, %v79_v21, 0.0  ;;  %v50_v35 = vsel %vm34_vm1, %v25_v31, 0.0  ;;  %v82_v39 = vmul.f32 %v23_v19, %v23_v19  ;;  %v32_v9 = vld [vmem:[%s258_s0 + $0x78] sm:$0xff] }
   0x8   :  { %v96_v36 = vadd.f32 %v95_v28, %v94_v30  ;;  %v99_v40 = vsel %vm34_vm1, %v80_v23, 0.0  ;;  %v52_v41 = vsel %vm34_vm1, %v26_v37, 0.0  ;;  %v83_v45 = vmul.f32 %v24_v24, %v24_v24 }
   0x9   :  { %v43_v20 = vadd.f32 %v42_v12, %v41_v14  ;;  %v101_v46 = vsel %vm34_vm1, %v81_v33, 0.0  ;;  %v54_v47 = vsel %vm34_vm1, %v27_v43, 0.0  ;;  %v84_v51 = vmul.f32 %v25_v31, %v25_v31 }
   0xa   :  { %v98_v42 = vadd.f32 %v97_v34, %v96_v36  ;;  %v103_v52 = vsel %vm34_vm1, %v82_v39, 0.0  ;;  %v56_v53 = vsel %vm34_vm1, %v28_v49, 0.0  ;;  %v85_v57 = vmul.f32 %v26_v37, %v26_v37  ;;  %v33_v36 = vld [vmem:[%s259_s1] sm:$0x1] }
   0xb   :  { %v45_v25 = vadd.f32 %v44_v18, %v43_v20  ;;  %v105_v58 = vsel %vm34_vm1, %v83_v45, 0.0  ;;  %v58_v59 = vsel %vm34_vm1, %v29_v55, 0.0  ;;  %v86_v63 = vmul.f32 %v27_v43, %v27_v43 }
   0xc   :  { %v100_v48 = vadd.f32 %v99_v40, %v98_v42  ;;  %v107_v0 = vsel %vm34_vm1, %v84_v51, 0.0  ;;  %v60_v1 = vsel %vm34_vm1, %v30_v61, 0.0  ;;  %v87_v5 = vmul.f32 %v28_v49, %v28_v49 }
   0xd   :  { %v47_v32 = vadd.f32 %v46_v22, %v45_v25  ;;  %v109_v6 = vsel %vm34_vm1, %v85_v57, 0.0  ;;  %v62_v7 = vsel %vm34_vm1, %v31_v3, 0.0  ;;  %v88_v11 = vmul.f32 %v29_v55, %v29_v55 }
   0xe   :  { %v102_v54 = vadd.f32 %v101_v46, %v100_v48  ;;  %v111_v12 = vsel %vm34_vm1, %v86_v63, 0.0  ;;  %v64_v13 = vsel %vm34_vm1, %v32_v9, 0.0  ;;  %v89_v16 = vmul.f32 %v30_v61, %v30_v61 }
   0xf   :  { %v49_v38 = vadd.f32 %v48_v29, %v47_v32  ;;  %v113_v17 = vsel %vm34_vm1, %v87_v5, 0.0  ;;  %v90_v20 = vmul.f32 %v31_v3, %v31_v3  ;;  %v115_v21 = vsel %vm34_vm1, %v88_v11, 0.0 }
  0x10   :  { %v104_v60 = vadd.f32 %v103_v52, %v102_v54  ;;  %v91_v24 = vmul.f32 %v32_v9, %v32_v9  ;;  %v117_v25 = vsel %vm34_vm1, %v89_v16, 0.0 }
  0x11   :  { %v51_v44 = vadd.f32 %v50_v35, %v49_v38  ;;  %v119_v28 = vsel %vm34_vm1, %v90_v20, 0.0 }
  0x12   :  { %v106_v2 = vadd.f32 %v105_v58, %v104_v60  ;;  %v121_v31 = vsel %vm34_vm1, %v91_v24, 0.0 }
  0x13   :  { %v53_v50 = vadd.f32 %v52_v41, %v51_v44  ;;  %v75_v44 = vld [vmem:[%s260_s2] sm:$0x1] }
  0x14   :  { %v108_v8 = vadd.f32 %v107_v0, %v106_v2 }
  0x15   :  { %v55_v56 = vadd.f32 %v54_v47, %v53_v50 }
  0x16   :  { %v110_v14 = vadd.f32 %v109_v6, %v108_v8 }
  0x17   :  { %v57_v62 = vadd.f32 %v56_v53, %v55_v56 }
  0x18   :  { %v112_v18 = vadd.f32 %v111_v12, %v110_v14 }
  0x19   :  { %v59_v4 = vadd.f32 %v58_v59, %v57_v62 }
  0x1a   :  { %v114_v22 = vadd.f32 %v113_v17, %v112_v18 }
  0x1b   :  { %v61_v10 = vadd.f32 %v60_v1, %v59_v4 }
  0x1c   :  { %v116_v26 = vadd.f32 %v115_v21, %v114_v22 }
  0x1d   :  { %v63_v15 = vadd.f32 %v62_v7, %v61_v10 }
  0x1e   :  { %v118_v29 = vadd.f32 %v117_v25, %v116_v26 }
  0x1f   :  { %v65_v19 = vadd.f32 %v64_v13, %v63_v15 }
  0x20   :  { %v120_v32 = vadd.f32 %v119_v28, %v118_v29 }
  0x21   :  { %v66_v23 = vrot.slane %v65_v19, 4 }
  0x22   :  { %v122_v34 = vadd.f32 %v121_v31, %v120_v32 }
  0x23   :  { %v67_v27 = vadd.f32 %v66_v23, %v65_v19 }
  0x24   :  { %v123_v37 = vrot.slane %v122_v34, 4 }
  0x25   :  { %v68_v30 = vrot.slane %v67_v27, 2 }
  0x26   :  { %v124_v39 = vadd.f32 %v123_v37, %v122_v34 }
  0x27   :  { %v69_v33 = vadd.f32 %v68_v30, %v67_v27 }
  0x28   :  { %v125_v41 = vrot.slane %v124_v39, 2 }
  0x29   :  { %v70_v35 = vrot.slane %v69_v33, 1 }
  0x2a   :  { %v126_v42 = vadd.f32 %v125_v41, %v124_v39 }
  0x2b   :  { %v71_v38 = vadd.f32 %v70_v35, %v69_v33 }
  0x2c   :  { %v127_v43 = vrot.slane %v126_v42, 1 }
  0x2d   :  { %v72_v40 = vadd.f32 %v71_v38, %v33_v36 }
  0x2e   :  { %v128_v45 = vadd.f32 %v127_v43, %v126_v42 }
  0x2f   :  { %74 = vst.msk [vmem:[%s259_s1] sm:$0x1] %vm14_vm0, %v72_v40 }
  0x30   :  { %v129_v46 = vadd.f32 %v128_v45, %v75_v44 }
  0x32   :  { %130 = vst.msk [vmem:[%s260_s2] sm:$0x1] %vm14_vm0, %v129_v46 }

// kernel: _lambda_.27
= control target key start
LH: loop header
LB: loop body
LE: loop exit
PB: predicated region body
PF: predicated region fallthrough
CT: control target
= control target key end

     0   :  { %vm76_vm0 = vcmask 130048   ;;  %s237_s0 = inlined_call_operand.vmem [shape: f32[128,16], index: 0, kind: input, shape index: {}]   ;;  %s238_s1 = inlined_call_operand.vmem [shape: f32[1,16], index: 1, kind: input, shape index: {}]   ;;  %s239_s2 = inlined_call_operand.vmem [shape: f32[1,16], index: 2, kind: input, shape index: {}]   ;;  %s240_s3 = inlined_call_operand.vmem [shape: f32[128,16], index: 3, kind: output, shape index: {}]  }
   0x1   :  { %v14_v0 = vld [vmem:[%s237_s0] sm:$0xff]  ;;  %v15_v4 = vld [vmem:[%s237_s0 + $0x8] sm:$0xff]  ;;  %v16_v5 = vld [vmem:[%s237_s0 + $0x10] sm:$0xff] }
   0x2   :  { %v97_v1 = vld [vmem:[%s238_s1] ss:$0 sm:$0xff]  ;;  %v17_v6 = vld [vmem:[%s237_s0 + $0x18] sm:$0xff]  ;;  %v19_v11 = vld [vmem:[%s237_s0 + $0x28] sm:$0xff] }
   0x3   :  { %v98_v2 = vld [vmem:[%s239_s2] ss:$0 sm:$0xff]  ;;  %v37_v3 = vmul.f32 %v97_v1, %v14_v0  ;;  %v38_v7 = vmul.f32 %v97_v1, %v15_v4  ;;  %v39_v8 = vmul.f32 %v97_v1, %v16_v5  ;;  %v40_v9 = vmul.f32 %v97_v1, %v17_v6  ;;  %v20_v12 = vld [vmem:[%s237_s0 + $0x30] sm:$0xff]  ;;  %v21_v17 = vld [vmem:[%s237_s0 + $0x38] sm:$0xff] }
   0x4   :  { %v18_v10 = vld [vmem:[%s237_s0 + $0x20] sm:$0xff]  ;;  %v42_v15 = vmul.f32 %v97_v1, %v19_v11  ;;  %v43_v16 = vmul.f32 %v97_v1, %v20_v12  ;;  %v23_v19 = vld [vmem:[%s237_s0 + $0x48] sm:$0xff]  ;;  %v44_v23 = vmul.f32 %v97_v1, %v21_v17  ;;  %v24_v24 = vld [vmem:[%s237_s0 + $0x50] sm:$0xff] }
   0x5   :  { %v60_v13 = vadd.f32 %v98_v2, %v37_v3  ;;  %v41_v14 = vmul.f32 %v97_v1, %v18_v10  ;;  %v22_v18 = vld [vmem:[%s237_s0 + $0x40] sm:$0xff]  ;;  %v61_v20 = vadd.f32 %v98_v2, %v38_v7  ;;  %v62_v21 = vadd.f32 %v98_v2, %v39_v8  ;;  %v25_v25 = vld [vmem:[%s237_s0 + $0x58] sm:$0xff]  ;;  %v27_v31 = vld [vmem:[%s237_s0 + $0x68] sm:$0xff] }
   0x6   :  { %v63_v22 = vadd.f32 %v98_v2, %v40_v9  ;;  %v26_v26 = vld [vmem:[%s237_s0 + $0x60] sm:$0xff]  ;;  %v65_v28 = vadd.f32 %v98_v2, %v42_v15  ;;  %v66_v29 = vadd.f32 %v98_v2, %v43_v16  ;;  %v45_v30 = vmul.f32 %v97_v1, %v22_v18  ;;  %v28_v32 = vld [vmem:[%s237_s0 + $0x70] sm:$0xff]  ;;  %v29_v33 = vld [vmem:[%s237_s0 + $0x78] sm:$0xff] }
   0x7   :  { %77 = vst.msk [vmem:[%s240_s3] sm:$0xff] %vm76_vm0, %v60_v13  ;;  %v64_v27 = vadd.f32 %v98_v2, %v41_v14  ;;  %78 = vst.msk [vmem:[%s240_s3 + $0x8] sm:$0xff] %vm76_vm0, %v61_v20  ;;  %v67_v34 = vadd.f32 %v98_v2, %v44_v23  ;;  %v46_v35 = vmul.f32 %v97_v1, %v23_v19 }
   0x8   :  { %79 = vst.msk [vmem:[%s240_s3 + $0x10] sm:$0xff] %vm76_vm0, %v62_v21  ;;  %80 = vst.msk [vmem:[%s240_s3 + $0x18] sm:$0xff] %vm76_vm0, %v63_v22  ;;  %v47_v36 = vmul.f32 %v97_v1, %v24_v24  ;;  %v48_v37 = vmul.f32 %v97_v1, %v25_v25  ;;  %v68_v38 = vadd.f32 %v98_v2, %v45_v30 }
   0x9   :  { %81 = vst.msk [vmem:[%s240_s3 + $0x20] sm:$0xff] %vm76_vm0, %v64_v27  ;;  %82 = vst.msk [vmem:[%s240_s3 + $0x28] sm:$0xff] %vm76_vm0, %v65_v28  ;;  %v49_v39 = vmul.f32 %v97_v1, %v26_v26  ;;  %v50_v40 = vmul.f32 %v97_v1, %v27_v31  ;;  %v51_v41 = vmul.f32 %v97_v1, %v28_v32 }
   0xa   :  { %83 = vst.msk [vmem:[%s240_s3 + $0x30] sm:$0xff] %vm76_vm0, %v66_v29  ;;  %84 = vst.msk [vmem:[%s240_s3 + $0x38] sm:$0xff] %vm76_vm0, %v67_v34  ;;  %v69_v42 = vadd.f32 %v98_v2, %v46_v35  ;;  %v70_v43 = vadd.f32 %v98_v2, %v47_v36  ;;  %v71_v44 = vadd.f32 %v98_v2, %v48_v37 }
   0xb   :  { %v52_v45 = vmul.f32 %v97_v1, %v29_v33  ;;  %85 = vst.msk [vmem:[%s240_s3 + $0x40] sm:$0xff] %vm76_vm0, %v68_v38  ;;  %v72_v46 = vadd.f32 %v98_v2, %v49_v39  ;;  %v73_v47 = vadd.f32 %v98_v2, %v50_v40  ;;  %v74_v48 = vadd.f32 %v98_v2, %v51_v41 }
   0xc   :  { %86 = vst.msk [vmem:[%s240_s3 + $0x48] sm:$0xff] %vm76_vm0, %v69_v42  ;;  %87 = vst.msk [vmem:[%s240_s3 + $0x50] sm:$0xff] %vm76_vm0, %v70_v43 }
   0xd   :  { %88 = vst.msk [vmem:[%s240_s3 + $0x58] sm:$0xff] %vm76_vm0, %v71_v44  ;;  %v75_v49 = vadd.f32 %v98_v2, %v52_v45  ;;  %89 = vst.msk [vmem:[%s240_s3 + $0x60] sm:$0xff] %vm76_vm0, %v72_v46 }
   0xe   :  { %90 = vst.msk [vmem:[%s240_s3 + $0x68] sm:$0xff] %vm76_vm0, %v73_v47  ;;  %91 = vst.msk [vmem:[%s240_s3 + $0x70] sm:$0xff] %vm76_vm0, %v74_v48 }
   0xf   :  { %92 = vst.msk [vmem:[%s240_s3 + $0x78] sm:$0xff] %vm76_vm0, %v75_v49 }

// kernel: _lambda_.28
= control target key start
LH: loop header
LB: loop body
LE: loop exit
PB: predicated region body
PF: predicated region fallthrough
CT: control target
= control target key end

     0   :  { %s450_s1 = inlined_call_operand.vmem [shape: bf16[1,256,128], index: 1, kind: input, shape index: {}]   ;;  %s451_s0 = inlined_call_operand.vmem [shape: bf16[1,32,256], index: 0, kind: input, shape index: {}]   ;;  %s452_s2 = inlined_call_operand.vmem [shape: f32[1,128], index: 2, kind: input, shape index: {}]   ;;  %s453_s3 = inlined_call_operand.vmem [shape: f32[1,32,128], index: 3, kind: output, shape index: {}]  }
   0x1   :  { %v339_v0 = vld [vmem:[%s450_s1 + $0x40] sm:$0xff]   ;;  %v341_v2 = vld [vmem:[%s450_s1 + $0x48] sm:$0xff]   ;;  %v343_v4 = vld [vmem:[%s450_s1 + $0x50] sm:$0xff]  }
   0x2   :  { %v340_v1 = vld [vmem:[%s450_s1] sm:$0xff]   ;;  %295 = vmatprep.subr.bf16.mxu0 %v339_v0  ;;  %323 = vmatprep.subr.bf16.mxu1 %v339_v0  ;;  %v342_v3 = vld [vmem:[%s450_s1 + $0x8] sm:$0xff]   ;;  %v344_v5 = vld [vmem:[%s450_s1 + $0x10] sm:$0xff]  }
   0x3   :  { %296 = vmatpush3.bf16.msra.mxu0 %v340_v1  ;;  %331 = vmatpush3.bf16.msra.mxu1 %v340_v1  ;;  %v345_v6 = vld [vmem:[%s450_s1 + $0x58] sm:$0xff]   ;;  %v347_v8 = vld [vmem:[%s450_s1 + $0x60] sm:$0xff]   ;;  %v349_v10 = vld [vmem:[%s450_s1 + $0x68] sm:$0xff]  }
   0x4   :  { %297 = vmatprep.subr.bf16.mxu0 %v341_v2  ;;  %324 = vmatprep.subr.bf16.mxu1 %v341_v2  ;;  %v346_v7 = vld [vmem:[%s450_s1 + $0x18] sm:$0xff]   ;;  %v348_v9 = vld [vmem:[%s450_s1 + $0x20] sm:$0xff]   ;;  %v24_v12 = vld [vmem:[%s451_s0 + $0x8] sm:$0xff] }
   0x5   :  { %v23_v11 = vld [vmem:[%s451_s0] sm:$0xff]  ;;  %v25_v13 = vld [vmem:[%s451_s0 + $0x10] sm:$0xff]  ;;  %v29_v16 = vunpack.c.l.bf16 %v24_v12  ;;  %v30_v17 = vunpack.c.h.bf16 %v24_v12  ;;  %v26_v18 = vld [vmem:[%s451_s0 + $0x18] sm:$0xff] }
   0x6   :  { %v27_v14 = vunpack.c.l.bf16 %v23_v11  ;;  %v28_v15 = vunpack.c.h.bf16 %v23_v11  ;;  %v350_v19 = vld [vmem:[%s450_s1 + $0x28] sm:$0xff]   ;;  %v351_v20 = vld [vmem:[%s450_s1 + $0x70] sm:$0xff]   ;;  %v31_v21 = vunpack.c.l.bf16 %v25_v13  ;;  %v32_v22 = vunpack.c.h.bf16 %v25_v13  ;;  %v353_v36 = vld [vmem:[%s450_s1 + $0x78] sm:$0xff]  }
   0x7   :  { %298 = vmatpush3.bf16.msra.mxu0 %v342_v3  ;;  %332 = vmatpush3.bf16.msra.mxu1 %v342_v3  ;;  %v33_v23 = vunpack.c.l.bf16 %v26_v18  ;;  %v34_v24 = vunpack.c.h.bf16 %v26_v18  ;;  %vm38_vm1 = vcmp.ge.f32.partialorder %v30_v17, 0.0  ;;  %v46_v26 = vmul.f32 0.2, %v30_v17  ;;  %v352_v35 = vld [vmem:[%s450_s1 + $0x30] sm:$0xff]   ;;  %v354_v42 = vld [vmem:[%s450_s1 + $0x38] sm:$0xff]  }
   0x8   :  { %299 = vmatprep.subr.bf16.mxu0 %v343_v4  ;;  %325 = vmatprep.subr.bf16.mxu1 %v343_v4  ;;  %vm36_vm0 = vcmp.ge.f32.partialorder %v28_v15, 0.0  ;;  %v44_v25 = vmul.f32 0.2, %v28_v15  ;;  %vm40_vm2 = vcmp.ge.f32.partialorder %v32_v22, 0.0  ;;  %v48_v27 = vmul.f32 0.2, %v32_v22 }
   0x9   :  { %vm42_vm3 = vcmp.ge.f32.partialorder %v34_v24, 0.0  ;;  %v50_v28 = vmul.f32 0.2, %v34_v24  ;;  %v54_v30 = vsel %vm38_vm1, %v30_v17, %v46_v26  ;;  %v43_v34 = vmul.f32 0.2, %v27_v14 }
   0xa   :  { %v52_v29 = vsel %vm36_vm0, %v28_v15, %v44_v25  ;;  %v56_v32 = vsel %vm40_vm2, %v32_v22, %v48_v27  ;;  %vm35_vm4 = vcmp.ge.f32.partialorder %v27_v14, 0.0  ;;  %vm37_vm5 = vcmp.ge.f32.partialorder %v29_v16, 0.0  ;;  %v294_v51 = vld [vmem:[%s452_s2] ss:$0 sm:$0xff] }
   0xb   :  { %300 = vmatpush3.bf16.msra.mxu0 %v344_v5  ;;  %333 = vmatpush3.bf16.msra.mxu1 %v344_v5  ;;  %v60_v31 = vpack.c.bf16 %v54_v30, %v52_v29  ;;  %v58_v33 = vsel %vm42_vm3, %v34_v24, %v50_v28  ;;  %v45_v38 = vmul.f32 0.2, %v29_v16  ;;  %vm39_vm6 = vcmp.ge.f32.partialorder %v31_v21, 0.0 }
   0xc   :  { %301 = vmatprep.subr.bf16.mxu0 %v345_v6  ;;  %326 = vmatprep.subr.bf16.mxu1 %v345_v6  ;;  %v62_v37 = vpack.c.bf16 %v58_v33, %v56_v32  ;;  %vm41_vm7 = vcmp.ge.f32.partialorder %v33_v23, 0.0  ;;  %v47_v39 = vmul.f32 0.2, %v31_v21  ;;  %v49_v40 = vmul.f32 0.2, %v33_v23 }
   0xd   :  { %227 = vmatprep.mubr.bf16.mxu0 %v60_v31  ;;  %v51_v41 = vsel %vm35_vm4, %v27_v14, %v43_v34  ;;  %v53_v43 = vsel %vm37_vm5, %v29_v16, %v45_v38 }
   0xe   :  { %235 = vmatprep.mubr.bf16.mxu1 %v62_v37  ;;  %v55_v44 = vsel %vm39_vm6, %v31_v21, %v47_v39  ;;  %v57_v45 = vsel %vm41_vm7, %v33_v23, %v49_v40  ;;  %v59_v46 = vpack.c.bf16 %v53_v43, %v51_v41 }
   0xf   :  { %302 = vmatpush3.bf16.msra.mxu0 %v346_v7  ;;  %334 = vmatpush3.bf16.msra.mxu1 %v346_v7  ;;  %v61_v47 = vpack.c.bf16 %v57_v45, %v55_v44 }
  0x10   :  { %303 = vmatprep.subr.bf16.mxu0 %v347_v8  ;;  %327 = vmatprep.subr.bf16.mxu1 %v347_v8 }
  0x13   :  { %304 = vmatpush3.bf16.msra.mxu0 %v348_v9  ;;  %335 = vmatpush3.bf16.msra.mxu1 %v348_v9 }
  0x14   :  { %305 = vmatprep.subr.bf16.mxu0 %v349_v10  ;;  %328 = vmatprep.subr.bf16.mxu1 %v349_v10 }
  0x17   :  { %306 = vmatpush3.bf16.msra.mxu0 %v350_v19  ;;  %336 = vmatpush3.bf16.msra.mxu1 %v350_v19 }
  0x18   :  { %307 = vmatprep.subr.bf16.mxu0 %v351_v20  ;;  %329 = vmatprep.subr.bf16.mxu1 %v351_v20 }
  0x1b   :  { %308 = vmatpush3.bf16.msra.mxu0 %v352_v35  ;;  %337 = vmatpush3.bf16.msra.mxu1 %v352_v35 }
  0x1c   :  { %309 = vmatprep.subr.bf16.mxu0 %v353_v36  ;;  %330 = vmatprep.subr.bf16.mxu1 %v353_v36 }
  0x1f   :  { %310 = vmatpush3.bf16.msra.mxu0 %v354_v42  ;;  %338 = vmatpush3.bf16.msra.mxu1 %v354_v42 }
  0x22   :  { %228 = vmatmul.mubr.bf16.vlgmr.msra.gmra.mrb[0].mxu0 %v59_v46  ;;  %236 = vmatmul.mubr.bf16.vlgmr.msra.gmra.mrb[0].mxu1 %v61_v47 }
  0xf5   :  { %v311_v48 = vpop.f32.mrb[0].mxu0  ;;  %v317_v49 = vpop.f32.mrb[0].mxu1 }
  0xf6   :  { %v312_v50 = vpop.f32.mrb[1].mxu0  ;;  %v318_v52 = vpop.f32.mrb[1].mxu1 }
  0xf7   :  { %v313_v53 = vadd.f32 %v312_v50, %v311_v48  ;;  %v319_v54 = vadd.f32 %v318_v52, %v317_v49  ;;  %v314_v55 = vpop.f32.mrb[2].mxu0  ;;  %v320_v56 = vpop.f32.mrb[2].mxu1 }
  0xf8   :  { %v315_v57 = vpop.f32.mrb[3].mxu0  ;;  %v321_v58 = vpop.f32.mrb[3].mxu1 }
  0xf9   :  { %v266_v59 = vadd.f32 %v313_v53, %v294_v51  ;;  %v268_v60 = vadd.f32 %v319_v54, %v294_v51  ;;  %v316_v61 = vadd.f32 %v315_v57, %v314_v55  ;;  %v322_v62 = vadd.f32 %v321_v58, %v320_v56 }
  0xfb   :  { %270 = vst [vmem:[%s453_s3] sm:$0xff] %v266_v59  ;;  %272 = vst [vmem:[%s453_s3 + $0x10] sm:$0xff] %v268_v60  ;;  %v267_v63 = vadd.f32 %v316_v61, %v294_v51  ;;  %v269_v0 = vadd.f32 %v322_v62, %v294_v51 }
  0xfd   :  { %271 = vst [vmem:[%s453_s3 + $0x8] sm:$0xff] %v267_v63  ;;  %273 = vst [vmem:[%s453_s3 + $0x18] sm:$0xff] %v269_v0 }

// kernel: _lambda_.30
= control target key start
LH: loop header
LB: loop body
LE: loop exit
PB: predicated region body
PF: predicated region fallthrough
CT: control target
= control target key end

     0   :  { %vm40_vm0 = vcmask 261120   ;;  %s101_s0 = inlined_call_operand.vmem [shape: f32[32,32], index: 0, kind: input, shape index: {}]   ;;  %s102_s1 = inlined_call_operand.vmem [shape: f32[1,32], index: 1, kind: input, shape index: {}]   ;;  %s103_s2 = inlined_call_operand.vmem [shape: f32[1,32], index: 2, kind: input, shape index: {}]   ;;  %s104_s3 = inlined_call_operand.vmem [shape: f32[32,32], index: 3, kind: output, shape index: {}]  }
   0x1   :  { %v14_v0 = vld [vmem:[%s101_s0] sm:$0xff]  ;;  %v15_v4 = vld [vmem:[%s101_s0 + $0x8] sm:$0xff]  ;;  %v16_v5 = vld [vmem:[%s101_s0 + $0x10] sm:$0xff] }
   0x2   :  { %v49_v1 = vld [vmem:[%s102_s1] ss:$0 sm:$0xff]  ;;  %v17_v6 = vld [vmem:[%s101_s0 + $0x18] sm:$0xff] }
   0x3   :  { %v50_v2 = vld [vmem:[%s103_s2] ss:$0 sm:$0xff]  ;;  %v25_v3 = vmul.f32 %v49_v1, %v14_v0  ;;  %v26_v7 = vmul.f32 %v49_v1, %v15_v4  ;;  %v27_v8 = vmul.f32 %v49_v1, %v16_v5  ;;  %v28_v9 = vmul.f32 %v49_v1, %v17_v6 }
   0x5   :  { %v36_v10 = vadd.f32 %v50_v2, %v25_v3  ;;  %v37_v11 = vadd.f32 %v50_v2, %v26_v7  ;;  %v38_v12 = vadd.f32 %v50_v2, %v27_v8  ;;  %v39_v13 = vadd.f32 %v50_v2, %v28_v9 }
   0x7   :  { %41 = vst.msk [vmem:[%s104_s3] sm:$0xff] %vm40_vm0, %v36_v10  ;;  %42 = vst.msk [vmem:[%s104_s3 + $0x8] sm:$0xff] %vm40_vm0, %v37_v11 }
   0x8   :  { %43 = vst.msk [vmem:[%s104_s3 + $0x10] sm:$0xff] %vm40_vm0, %v38_v12  ;;  %44 = vst.msk [vmem:[%s104_s3 + $0x18] sm:$0xff] %vm40_vm0, %v39_v13 }

// kernel: _lambda_.29
= control target key start
LH: loop header
LB: loop body
LE: loop exit
PB: predicated region body
PF: predicated region fallthrough
CT: control target
= control target key end

     0   :  { %vm14_vm0 = vcmask 253952   ;;  %vm22_vm1 = vcmask 261120   ;;  %v68_v0 = vmov 0.0   ;;  %s126_s0 = inlined_call_operand.vmem [shape: f32[32,32], index: 0, kind: input, shape index: {}]   ;;  %s127_s1 = inlined_call_operand.vmem [shape: f32[1,32], index: 1, kind: output, shape index: {0}]   ;;  %s128_s2 = inlined_call_operand.vmem [shape: f32[1,32], index: 2, kind: output, shape index: {1}]  }
   0x1   :  { %15 = vst.msk [vmem:[%s127_s1] sm:$0x1] %vm14_vm0, %v68_v0  ;;  %v17_v1 = vld [vmem:[%s126_s0] sm:$0xff]  ;;  %v18_v2 = vld [vmem:[%s126_s0 + $0x8] sm:$0xff]  ;;  %v19_v3 = vld [vmem:[%s126_s0 + $0x10] sm:$0xff] }
   0x2   :  { %16 = vst.msk [vmem:[%s128_s2] sm:$0x1] %vm14_vm0, %v68_v0  ;;  %v20_v4 = vld [vmem:[%s126_s0 + $0x18] sm:$0xff]  ;;  %v23_v5 = vsel %vm22_vm1, %v17_v1, 0.0  ;;  %v24_v6 = vsel %vm22_vm1, %v18_v2, 0.0  ;;  %v26_v7 = vsel %vm22_vm1, %v19_v3, 0.0  ;;  %v40_v8 = vmul.f32 %v17_v1, %v17_v1 }
   0x3   :  { %v25_v9 = vadd.f32 %v24_v6, %v23_v5  ;;  %v41_v10 = vmul.f32 %v18_v2, %v18_v2  ;;  %v42_v11 = vmul.f32 %v19_v3, %v19_v3  ;;  %v28_v12 = vsel %vm22_vm1, %v20_v4, 0.0 }
   0x4   :  { %v43_v13 = vmul.f32 %v20_v4, %v20_v4  ;;  %v44_v14 = vsel %vm22_vm1, %v40_v8, 0.0 }
   0x5   :  { %v27_v15 = vadd.f32 %v26_v7, %v25_v9  ;;  %v45_v16 = vsel %vm22_vm1, %v41_v10, 0.0  ;;  %v47_v17 = vsel %vm22_vm1, %v42_v11, 0.0 }
   0x6   :  { %v46_v18 = vadd.f32 %v45_v16, %v44_v14  ;;  %v49_v20 = vsel %vm22_vm1, %v43_v13, 0.0 }
   0x7   :  { %v29_v19 = vadd.f32 %v28_v12, %v27_v15 }
   0x8   :  { %v48_v21 = vadd.f32 %v47_v17, %v46_v18  ;;  %v21_v31 = vld [vmem:[%s127_s1] sm:$0x1] }
   0x9   :  { %v30_v22 = vrot.slane %v29_v19, 4  ;;  %v39_v36 = vld [vmem:[%s128_s2] sm:$0x1] }
   0xa   :  { %v50_v23 = vadd.f32 %v49_v20, %v48_v21 }
   0xb   :  { %v31_v24 = vadd.f32 %v30_v22, %v29_v19 }
   0xc   :  { %v51_v25 = vrot.slane %v50_v23, 4 }
   0xd   :  { %v32_v26 = vrot.slane %v31_v24, 2 }
   0xe   :  { %v52_v27 = vadd.f32 %v51_v25, %v50_v23 }
   0xf   :  { %v33_v28 = vadd.f32 %v32_v26, %v31_v24 }
  0x10   :  { %v53_v29 = vrot.slane %v52_v27, 2 }
  0x11   :  { %v34_v30 = vrot.slane %v33_v28, 1 }
  0x12   :  { %v54_v32 = vadd.f32 %v53_v29, %v52_v27 }
  0x13   :  { %v35_v33 = vadd.f32 %v34_v30, %v33_v28 }
  0x14   :  { %v55_v34 = vrot.slane %v54_v32, 1 }
  0x15   :  { %v36_v35 = vadd.f32 %v35_v33, %v21_v31 }
  0x16   :  { %v56_v37 = vadd.f32 %v55_v34, %v54_v32 }
  0x17   :  { %38 = vst.msk [vmem:[%s127_s1] sm:$0x1] %vm14_vm0, %v36_v35 }
  0x18   :  { %v57_v38 = vadd.f32 %v56_v37, %v39_v36 }
  0x1a   :  { %58 = vst.msk [vmem:[%s128_s2] sm:$0x1] %vm14_vm0, %v57_v38 }

// kernel: _lambda_.31
= control target key start
LH: loop header
LB: loop body
LE: loop exit
PB: predicated region body
PF: predicated region fallthrough
CT: control target
= control target key end

     0   :  { %s635_s1 = inlined_call_operand.vmem [shape: bf16[1,512,128], index: 1, kind: input, shape index: {}]   ;;  %s636_s0 = inlined_call_operand.vmem [shape: bf16[1,8,512], index: 0, kind: input, shape index: {}]   ;;  %s637_s2 = inlined_call_operand.vmem [shape: f32[1,128], index: 2, kind: input, shape index: {}]   ;;  %s638_s3 = inlined_call_operand.vmem [shape: f32[1,8,128], index: 3, kind: output, shape index: {}]  }
   0x1   :  { %v475_v0 = vld [vmem:[%s635_s1 + $0x40] sm:$0xff]   ;;  %v479_v4 = vld [vmem:[%s635_s1 + $0x48] sm:$0xff]   ;;  %v483_v8 = vld [vmem:[%s635_s1 + $0x50] sm:$0xff]  }
   0x2   :  { %v476_v1 = vld [vmem:[%s635_s1 + $0xc0] sm:$0xff]   ;;  %431 = vmatprep.subr.bf16.mxu0 %v475_v0  ;;  %v480_v5 = vld [vmem:[%s635_s1 + $0xc8] sm:$0xff]   ;;  %v484_v9 = vld [vmem:[%s635_s1 + $0xd0] sm:$0xff]  }
   0x3   :  { %v477_v2 = vld [vmem:[%s635_s1] sm:$0xff]   ;;  %453 = vmatprep.subr.bf16.mxu1 %v476_v1  ;;  %v481_v6 = vld [vmem:[%s635_s1 + $0x8] sm:$0xff]   ;;  %v485_v10 = vld [vmem:[%s635_s1 + $0x10] sm:$0xff]  }
   0x4   :  { %v478_v3 = vld [vmem:[%s635_s1 + $0x80] sm:$0xff]   ;;  %432 = vmatpush3.bf16.msra.mxu0 %v477_v2  ;;  %v482_v7 = vld [vmem:[%s635_s1 + $0x88] sm:$0xff]   ;;  %v486_v11 = vld [vmem:[%s635_s1 + $0x90] sm:$0xff]  }
   0x5   :  { %454 = vmatpush3.bf16.msra.mxu1 %v478_v3  ;;  %433 = vmatprep.subr.bf16.mxu0 %v479_v4  ;;  %v487_v12 = vld [vmem:[%s635_s1 + $0x58] sm:$0xff]   ;;  %v491_v16 = vld [vmem:[%s635_s1 + $0x60] sm:$0xff]   ;;  %v495_v20 = vld [vmem:[%s635_s1 + $0x68] sm:$0xff]  }
   0x6   :  { %455 = vmatprep.subr.bf16.mxu1 %v480_v5  ;;  %v488_v13 = vld [vmem:[%s635_s1 + $0xd8] sm:$0xff]   ;;  %v492_v17 = vld [vmem:[%s635_s1 + $0xe0] sm:$0xff]   ;;  %v496_v21 = vld [vmem:[%s635_s1 + $0xe8] sm:$0xff]  }
   0x7   :  { %v489_v14 = vld [vmem:[%s635_s1 + $0x18] sm:$0xff]   ;;  %v493_v18 = vld [vmem:[%s635_s1 + $0x20] sm:$0xff]   ;;  %v497_v22 = vld [vmem:[%s635_s1 + $0x28] sm:$0xff]  }
   0x8   :  { %434 = vmatpush3.bf16.msra.mxu0 %v481_v6  ;;  %v490_v15 = vld [vmem:[%s635_s1 + $0x98] sm:$0xff]   ;;  %v494_v19 = vld [vmem:[%s635_s1 + $0xa0] sm:$0xff]   ;;  %v498_v23 = vld [vmem:[%s635_s1 + $0xa8] sm:$0xff]  }
   0x9   :  { %456 = vmatpush3.bf16.msra.mxu1 %v482_v7  ;;  %435 = vmatprep.subr.bf16.mxu0 %v483_v8  ;;  %v499_v24 = vld [vmem:[%s635_s1 + $0x70] sm:$0xff]   ;;  %v503_v28 = vld [vmem:[%s635_s1 + $0x78] sm:$0xff]   ;;  %v20_v32 = vld [vmem:[%s636_s0] sm:$0xff] }
   0xa   :  { %457 = vmatprep.subr.bf16.mxu1 %v484_v9  ;;  %v500_v25 = vld [vmem:[%s635_s1 + $0xf0] sm:$0xff]   ;;  %v504_v29 = vld [vmem:[%s635_s1 + $0xf8] sm:$0xff]   ;;  %v21_v33 = vld [vmem:[%s636_s0 + $0x8] sm:$0xff]  ;;  %v22_v34 = vunpack.c.l.bf16 %v20_v32  ;;  %v23_v35 = vunpack.c.h.bf16 %v20_v32 }
   0xb   :  { %v501_v26 = vld [vmem:[%s635_s1 + $0x30] sm:$0xff]   ;;  %v505_v30 = vld [vmem:[%s635_s1 + $0x38] sm:$0xff]   ;;  %v24_v36 = vunpack.c.l.bf16 %v21_v33  ;;  %v25_v37 = vunpack.c.h.bf16 %v21_v33  ;;  %v430_v58 = vld [vmem:[%s637_s2] ss:$0 sm:$0xff] }
   0xc   :  { %436 = vmatpush3.bf16.msra.mxu0 %v485_v10  ;;  %v502_v27 = vld [vmem:[%s635_s1 + $0xb0] sm:$0xff]   ;;  %v506_v31 = vld [vmem:[%s635_s1 + $0xb8] sm:$0xff]   ;;  %vm27_vm0 = vcmp.ge.f32.partialorder %v23_v35, 0.0  ;;  %v31_v38 = vmul.f32 0.2, %v23_v35  ;;  %vm26_vm2 = vcmp.ge.f32.partialorder %v22_v34, 0.0 }
   0xd   :  { %458 = vmatpush3.bf16.msra.mxu1 %v486_v11  ;;  %437 = vmatprep.subr.bf16.mxu0 %v487_v12  ;;  %vm29_vm1 = vcmp.ge.f32.partialorder %v25_v37, 0.0  ;;  %v33_v39 = vmul.f32 0.2, %v25_v37  ;;  %v30_v40 = vmul.f32 0.2, %v22_v34  ;;  %vm28_vm3 = vcmp.ge.f32.partialorder %v24_v36, 0.0 }
   0xe   :  { %459 = vmatprep.subr.bf16.mxu1 %v488_v13  ;;  %v32_v41 = vmul.f32 0.2, %v24_v36  ;;  %v35_v42 = vsel %vm27_vm0, %v23_v35, %v31_v38 }
   0xf   :  { %v37_v43 = vsel %vm29_vm1, %v25_v37, %v33_v39  ;;  %v39_v44 = vpack.c.bf16 %v35_v42, %v35_v42  ;;  %v34_v46 = vsel %vm26_vm2, %v22_v34, %v30_v40 }
  0x10   :  { %438 = vmatpush3.bf16.msra.mxu0 %v489_v14  ;;  %v41_v45 = vpack.c.bf16 %v37_v43, %v37_v43  ;;  %v36_v47 = vsel %vm28_vm3, %v24_v36, %v32_v41  ;;  %v38_v48 = vpack.c.bf16 %v34_v46, %v34_v46 }
  0x11   :  { %460 = vmatpush3.bf16.msra.mxu1 %v490_v15  ;;  %439 = vmatprep.subr.bf16.mxu0 %v491_v16  ;;  %v40_v49 = vpack.c.bf16 %v36_v47, %v36_v47 }
  0x12   :  { %461 = vmatprep.subr.bf16.mxu1 %v492_v17  ;;  %331 = vmatprep.mubr.bf16.mxu0 %v39_v44 }
  0x13   :  { %371 = vmatprep.mubr.bf16.mxu1 %v41_v45 }
  0x14   :  { %440 = vmatpush3.bf16.msra.mxu0 %v493_v18 }
  0x15   :  { %462 = vmatpush3.bf16.msra.mxu1 %v494_v19  ;;  %441 = vmatprep.subr.bf16.mxu0 %v495_v20 }
  0x16   :  { %463 = vmatprep.subr.bf16.mxu1 %v496_v21 }
  0x18   :  { %442 = vmatpush3.bf16.msra.mxu0 %v497_v22 }
  0x19   :  { %464 = vmatpush3.bf16.msra.mxu1 %v498_v23  ;;  %443 = vmatprep.subr.bf16.mxu0 %v499_v24 }
  0x1a   :  { %465 = vmatprep.subr.bf16.mxu1 %v500_v25 }
  0x1c   :  { %444 = vmatpush3.bf16.msra.mxu0 %v501_v26 }
  0x1d   :  { %466 = vmatpush3.bf16.msra.mxu1 %v502_v27  ;;  %445 = vmatprep.subr.bf16.mxu0 %v503_v28 }
  0x1e   :  { %467 = vmatprep.subr.bf16.mxu1 %v504_v29 }
  0x20   :  { %446 = vmatpush3.bf16.msra.mxu0 %v505_v30 }
  0x21   :  { %468 = vmatpush3.bf16.msra.mxu1 %v506_v31 }
  0x23   :  { %332 = vmatmul.mubr.bf16.vlgmr.msra.gmra.mrb[0].mxu0 %v38_v48 }
  0x24   :  { %372 = vmatmul.mubr.bf16.vlgmr.msra.gmra.mrb[0].mxu1 %v40_v49 }
  0xf6   :  { %v447_v50 = vpop.f32.mrb[0].mxu0 }
  0xf7   :  { %v469_v51 = vpop.f32.mrb[0].mxu1  ;;  %v448_v52 = vpop.f32.mrb[1].mxu0 }
  0xf8   :  { %v470_v53 = vpop.f32.mrb[1].mxu1  ;;  %v449_v54 = vadd.f32 %v448_v52, %v447_v50  ;;  %v450_v56 = vpop.f32.mrb[2].mxu0 }
  0xf9   :  { %v471_v55 = vadd.f32 %v470_v53, %v469_v51  ;;  %v472_v57 = vpop.f32.mrb[2].mxu1  ;;  %v451_v59 = vpop.f32.mrb[3].mxu0 }
  0xfa   :  { %v473_v60 = vpop.f32.mrb[3].mxu1 }
  0xfb   :  { %v374_v61 = vadd.f32 %v471_v55, %v449_v54 }
  0xfd   :  { %v392_v62 = vadd.f32 %v430_v58, %v374_v61 }
  0xff   :  { %393 = vst [vmem:[%s638_s3] sm:$0xff] %v392_v62 }

// kernel: _lambda_.33
= control target key start
LH: loop header
LB: loop body
LE: loop exit
PB: predicated region body
PF: predicated region fallthrough
CT: control target
= control target key end

     0   :  { %vm31_vm0 = vcmask 523264   ;;  %s71_s0 = inlined_call_operand.vmem [shape: f32[8,64], index: 0, kind: input, shape index: {}]   ;;  %s72_s1 = inlined_call_operand.vmem [shape: f32[1,64], index: 1, kind: input, shape index: {}]   ;;  %s73_s2 = inlined_call_operand.vmem [shape: f32[1,64], index: 2, kind: input, shape index: {}]   ;;  %s74_s3 = inlined_call_operand.vmem [shape: f32[8,64], index: 3, kind: output, shape index: {}]  }
   0x1   :  { %v14_v0 = vld [vmem:[%s71_s0] sm:$0xff] }
   0x2   :  { %v37_v1 = vld [vmem:[%s72_s1] ss:$0 sm:$0xff] }
   0x3   :  { %v38_v2 = vld [vmem:[%s73_s2] ss:$0 sm:$0xff]  ;;  %v22_v3 = vmul.f32 %v37_v1, %v14_v0 }
   0x5   :  { %v30_v4 = vadd.f32 %v38_v2, %v22_v3 }
   0x7   :  { %32 = vst.msk [vmem:[%s74_s3] sm:$0xff] %vm31_vm0, %v30_v4 }

// kernel: _lambda_.32
= control target key start
LH: loop header
LB: loop body
LE: loop exit
PB: predicated region body
PF: predicated region fallthrough
CT: control target
= control target key end

     0   :  { %vm14_vm0 = vcmask 516096   ;;  %vm19_vm1 = vcmask 523264   ;;  %v50_v0 = vmov 0.0   ;;  %s91_s0 = inlined_call_operand.vmem [shape: f32[8,64], index: 0, kind: input, shape index: {}]   ;;  %s92_s1 = inlined_call_operand.vmem [shape: f32[1,64], index: 1, kind: output, shape index: {0}]   ;;  %s93_s2 = inlined_call_operand.vmem [shape: f32[1,64], index: 2, kind: output, shape index: {1}]  }
   0x1   :  { %15 = vst.msk [vmem:[%s92_s1] sm:$0x1] %vm14_vm0, %v50_v0  ;;  %v17_v1 = vld [vmem:[%s91_s0] sm:$0xff]  ;;  %16 = vst.msk [vmem:[%s93_s2] sm:$0x1] %vm14_vm0, %v50_v0 }
   0x2   :  { %v20_v2 = vsel %vm19_vm1, %v17_v1, 0.0  ;;  %v31_v3 = vmul.f32 %v17_v1, %v17_v1 }
   0x3   :  { %v21_v4 = vrot.slane %v20_v2, 4 }
   0x4   :  { %v32_v5 = vsel %vm19_vm1, %v31_v3, 0.0 }
   0x5   :  { %v22_v6 = vadd.f32 %v21_v4, %v20_v2  ;;  %v33_v7 = vrot.slane %v32_v5, 4 }
   0x7   :  { %v23_v8 = vrot.slane %v22_v6, 2  ;;  %v34_v9 = vadd.f32 %v33_v7, %v32_v5 }
   0x8   :  { %v18_v14 = vld [vmem:[%s92_s1] sm:$0x1] }
   0x9   :  { %v24_v10 = vadd.f32 %v23_v8, %v22_v6  ;;  %v35_v11 = vrot.slane %v34_v9, 2  ;;  %v30_v17 = vld [vmem:[%s93_s2] sm:$0x1] }
   0xb   :  { %v25_v12 = vrot.slane %v24_v10, 1  ;;  %v36_v13 = vadd.f32 %v35_v11, %v34_v9 }
   0xd   :  { %v26_v15 = vadd.f32 %v25_v12, %v24_v10  ;;  %v37_v16 = vrot.slane %v36_v13, 1 }
   0xf   :  { %v27_v18 = vadd.f32 %v26_v15, %v18_v14  ;;  %v38_v19 = vadd.f32 %v37_v16, %v36_v13 }
  0x11   :  { %29 = vst.msk [vmem:[%s92_s1] sm:$0x1] %vm14_vm0, %v27_v18  ;;  %v39_v20 = vadd.f32 %v38_v19, %v30_v17 }
  0x13   :  { %40 = vst.msk [vmem:[%s93_s2] sm:$0x1] %vm14_vm0, %v39_v20 }

// kernel: _lambda_.35
= control target key start
LH: loop header
LB: loop body
LE: loop exit
PB: predicated region body
PF: predicated region fallthrough
CT: control target
= control target key end

     0   :  { %s706_s12 = smov 0   ;;  %s708_s13 = smov 0   ;;  %s771_s0 = inlined_call_operand.vmem [shape: bf16[4,8,256], index: 0, kind: input, shape index: {}]   ;;  %s772_s1 = inlined_call_operand.vmem [shape: bf16[4,256,128], index: 1, kind: input, shape index: {}]   ;;  %s773_s2 = inlined_call_operand.vmem [shape: f32[1,128], index: 2, kind: input, shape index: {}]   ;;  %s774_s3 = inlined_call_operand.vmem [shape: f32[4,8,128], index: 3, kind: output, shape index: {}]  }
   0x1   :  { %s710_s14 = smov 0  }
   0x2 LB: > { %s32_s15 = sadd.s32 1, %s679_s13  ;;  %p569_p0 = scmp.ge.s32.totalorder %s683_s14, 1  ;;  %s683_s14 = sphi %s710_s14, %s13_s14   ;;  %s679_s13 = sphi %s708_s13, %s776_s13   ;;  %s675_s12 = sphi %s706_s12, %s775_s12  }
   0x3   : > { %p34_p1 = scmp.ge.s32.totalorder %s32_s15, 4  ;;  %p188_p2 = scmp.lt.s32.totalorder %s683_s14, 5 }
   0x5   : > { %s778_s15 = smov (%p34_p1, %s32_s15), 0  ;;  %p189_p3 = pnand %p569_p0, %p188_p2 }
   0x6   : > { %p232_p4 = scmp.lt.s32.totalorder (!%p189_p3), %s675_s12, 3  ;;  %v685_v12 = vmov (!%p189_p3), 0   ;;  %v593_v23 = vld [vmem:[%s773_s2] ss:$0 sm:$0xff] (!%p189_p3) }
   0x7   : > { %192 = sbr.rel (%p189_p3) target bundleno = 268 (0x10c), region = 32 }
   0xe   : > { %s780_s12 = smov (!%p232_p4, %s675_s12), 3 }
   0xf   : > { %s597_s16 = sshll.u32 %s780_s12, 7  ;;  %s596_s20 = sshll.u32 %s780_s12, 3 }
  0x10   : > { %s730_s19 = scalar_lea.vmem %s772_s1, %s597_s16  ;;  %s243_s23 = scalar_lea.vmem %s771_s0, %s596_s20 }
  0x11   : > { %v645_v0 = vld [vmem:[%s730_s19 + $0x40] sm:$0xff]   ;;  %v647_v2 = vld [vmem:[%s730_s19 + $0x48] sm:$0xff]   ;;  %v649_v4 = vld [vmem:[%s730_s19 + $0x50] sm:$0xff]   ;;  %s261_s28 = scalar_lea.vmem %s774_s3, %s596_s20 }
  0x12   : > { %v646_v1 = vld [vmem:[%s730_s19] sm:$0xff]   ;;  %598 = vmatprep.subr.bf16.mxu0 %v645_v0  ;;  %v648_v3 = vld [vmem:[%s730_s19 + $0x8] sm:$0xff]   ;;  %v650_v5 = vld [vmem:[%s730_s19 + $0x10] sm:$0xff]  }
  0x13   : > { %599 = vmatpush3.bf16.msra.mxu0 %v646_v1  ;;  %v651_v6 = vld [vmem:[%s730_s19 + $0x58] sm:$0xff]   ;;  %v653_v8 = vld [vmem:[%s730_s19 + $0x60] sm:$0xff]   ;;  %v655_v10 = vld [vmem:[%s730_s19 + $0x68] sm:$0xff]  }
  0x14   : > { %600 = vmatprep.subr.bf16.mxu0 %v647_v2  ;;  %v652_v7 = vld [vmem:[%s730_s19 + $0x18] sm:$0xff]   ;;  %v654_v9 = vld [vmem:[%s730_s19 + $0x20] sm:$0xff]   ;;  %v656_v14 = vld [vmem:[%s730_s19 + $0x28] sm:$0xff]  }
  0x15   : > { %v268_v11 = vld [vmem:[%s243_s23] sm:$0xff]  ;;  %v657_v16 = vld [vmem:[%s730_s19 + $0x70] sm:$0xff]   ;;  %v659_v18 = vld [vmem:[%s730_s19 + $0x78] sm:$0xff]  }
  0x16   : > { %v269_v13 = vmax.bf16 %v685_v12, %v268_v11  ;;  %v658_v17 = vld [vmem:[%s730_s19 + $0x30] sm:$0xff]   ;;  %v660_v19 = vld [vmem:[%s730_s19 + $0x38] sm:$0xff]  }
  0x17   : > { %601 = vmatpush3.bf16.msra.mxu0 %v648_v3 }
  0x18   : > { %602 = vmatprep.subr.bf16.mxu0 %v649_v4  ;;  %v576_v15 = vcombine.high %v269_v13, %v269_v13  ;;  %v575_v20 = vcombine.low %v269_v13, %v269_v13 }
  0x1a   : > { %438 = vmatprep.mubr.bf16.mxu0 %v576_v15 }
  0x1b   : > { %603 = vmatpush3.bf16.msra.mxu0 %v650_v5 }
  0x1c   : > { %604 = vmatprep.subr.bf16.mxu0 %v651_v6 }
  0x1f   : > { %605 = vmatpush3.bf16.msra.mxu0 %v652_v7 }
  0x20   : > { %606 = vmatprep.subr.bf16.mxu0 %v653_v8 }
  0x23   : > { %607 = vmatpush3.bf16.msra.mxu0 %v654_v9 }
  0x24   : > { %608 = vmatprep.subr.bf16.mxu0 %v655_v10 }
  0x27   : > { %609 = vmatpush3.bf16.msra.mxu0 %v656_v14 }
  0x28   : > { %610 = vmatprep.subr.bf16.mxu0 %v657_v16 }
  0x2b   : > { %611 = vmatpush3.bf16.msra.mxu0 %v658_v17 }
  0x2c   : > { %612 = vmatprep.subr.bf16.mxu0 %v659_v18 }
  0x2f   : > { %613 = vmatpush3.bf16.msra.mxu0 %v660_v19 }
  0x32   : > { %439 = vmatmul.mubr.bf16.vlgmr.msra.gmra.mrb[0].mxu0 %v575_v20 }
 0x105   : > { %v614_v21 = vpop.f32.mrb[0].mxu0 }
 0x106   : > { %v615_v22 = vpop.f32.mrb[1].mxu0 }
 0x107   : > { %v616_v24 = vadd.f32 %v615_v22, %v614_v21  ;;  %v617_v25 = vpop.f32.mrb[2].mxu0 }
 0x108   : > { %v618_v26 = vpop.f32.mrb[3].mxu0 }
 0x109   : > { %v459_v27 = vadd.f32 %v616_v24, %v593_v23 }
 0x10b   : > { %460 = vst [vmem:[%s261_s28] sm:$0xff] %v459_v27 }
 0x10c PF: > { %s13_s14 = sadd.s32 1, %s683_s14   ;;  %s775_s12 = smov %s679_s13 }
 0x10d   : > { %p10_p5 = scmp.ge.s32.totalorder %s13_s14, 6   ;;  %s776_s13 = smov %s778_s15 }
 0x10f   :  { %12 = sbr.rel (!%p10_p5) target bundleno = 2 (0x2), region = 73 }

// kernel: _lambda_.34
= control target key start
LH: loop header
LB: loop body
LE: loop exit
PB: predicated region body
PF: predicated region fallthrough
CT: control target
= control target key end

     0   :  { %s937_s12 = smov 0   ;;  %s939_s13 = smov 0   ;;  %s1020_s0 = inlined_call_operand.vmem [shape: bf16[1,8,1024], index: 0, kind: input, shape index: {}]   ;;  %s1021_s1 = inlined_call_operand.vmem [shape: bf16[1,1024,128], index: 1, kind: input, shape index: {}]   ;;  %s1022_s2 = inlined_call_operand.vmem [shape: f32[1,128], index: 2, kind: input, shape index: {}]   ;;  %s1023_s3 = inlined_call_operand.vmem [shape: f32[1,8,128], index: 3, kind: output, shape index: {}]  }
   0x1   :  { %s941_s14 = smov 0  }
   0x2 LB: > { %s25_s15 = sadd.s32 1, %s910_s13  ;;  %p748_p0 = scmp.ge.s32.totalorder %s914_s14, 1  ;;  %s914_s14 = sphi %s941_s14, %s13_s14   ;;  %s910_s13 = sphi %s939_s13, %s1025_s13   ;;  %s906_s12 = sphi %s937_s12, %s1024_s12  }
   0x3   : > { %p26_p1 = scmp.ge.s32.totalorder %s25_s15, 2  ;;  %p188_p2 = scmp.lt.s32.totalorder %s914_s14, 3 }
   0x5   : > { %s1027_s15 = smov (%p26_p1, %s25_s15), 0  ;;  %p189_p3 = pnand %p748_p0, %p188_p2 }
   0x6   : > { %s749_s16 = sshll.u32 (!%p189_p3), %s906_s12, 2  ;;  %s751_s17 = sshll.u32 (!%p189_p3), %s906_s12, 6 }
   0x7   : > { %192 = sbr.rel (%p189_p3) target bundleno = 289 (0x121), region = 32  ;;  %p236_p4 = scmp.lt.s32.totalorder (!%p189_p3), %s749_s16, 7 }
   0x8   : > { %p248_p5 = scmp.lt.s32.totalorder (!%p189_p3), %s751_s17, 127  ;;  %p753_p6 = scmp.ne.s32.totalorder (!%p189_p3), %s906_s12, 0 }
   0xe   : > { %s1029_s16 = smov (!%p236_p4, %s749_s16), 7  ;;  %s1031_s17 = smov (!%p248_p5, %s751_s17), 127 }
   0xf   : > { %s750_s18 = sshll.u32 %s1029_s16, 2  ;;  %s752_s22 = sshll.u32 %s1031_s17, 2  ;;  %v916_v0 = vmov (!%p753_p6), 0.0  }
  0x10   : > { %s962_s21 = scalar_lea.vmem %s1020_s0, %s750_s18  ;;  %s967_s25 = scalar_lea.vmem %s1021_s1, %s752_s22  ;;  %267 = vst [vmem:[#allocation2] sm:$0xff] (!%p753_p6), %v916_v0 }
  0x11   : > { %266 = sbr.rel (%p753_p6) target bundleno = 24 (0x18), region = 36 }
  0x18 PF: > { %v860_v1 = vld [vmem:[%s967_s25 + $0x40] sm:$0xff]   ;;  %v864_v5 = vld [vmem:[%s967_s25 + $0x48] sm:$0xff]   ;;  %v868_v9 = vld [vmem:[%s967_s25 + $0x50] sm:$0xff]   ;;  %p786_p7 = scmp.ne.s32.totalorder %s906_s12, 1 }
  0x19   : > { %v861_v2 = vld [vmem:[%s967_s25 + $0xc0] sm:$0xff]   ;;  %791 = vmatprep.subr.bf16.mxu0 %v860_v1  ;;  %v865_v6 = vld [vmem:[%s967_s25 + $0xc8] sm:$0xff]   ;;  %v869_v10 = vld [vmem:[%s967_s25 + $0xd0] sm:$0xff]  }
  0x1a   : > { %v862_v3 = vld [vmem:[%s967_s25] sm:$0xff]   ;;  %813 = vmatprep.subr.bf16.mxu1 %v861_v2  ;;  %v866_v7 = vld [vmem:[%s967_s25 + $0x8] sm:$0xff]   ;;  %v870_v11 = vld [vmem:[%s967_s25 + $0x10] sm:$0xff]  }
  0x1b   : > { %v863_v4 = vld [vmem:[%s967_s25 + $0x80] sm:$0xff]   ;;  %792 = vmatpush3.bf16.msra.mxu0 %v862_v3  ;;  %v867_v8 = vld [vmem:[%s967_s25 + $0x88] sm:$0xff]   ;;  %v871_v12 = vld [vmem:[%s967_s25 + $0x90] sm:$0xff]  }
  0x1c   : > { %814 = vmatpush3.bf16.msra.mxu1 %v863_v4  ;;  %793 = vmatprep.subr.bf16.mxu0 %v864_v5  ;;  %v872_v13 = vld [vmem:[%s967_s25 + $0x58] sm:$0xff]   ;;  %v876_v17 = vld [vmem:[%s967_s25 + $0x60] sm:$0xff]   ;;  %v880_v21 = vld [vmem:[%s967_s25 + $0x68] sm:$0xff]  }
  0x1d   : > { %815 = vmatprep.subr.bf16.mxu1 %v865_v6  ;;  %v873_v14 = vld [vmem:[%s967_s25 + $0xd8] sm:$0xff]   ;;  %v877_v18 = vld [vmem:[%s967_s25 + $0xe0] sm:$0xff]   ;;  %v881_v22 = vld [vmem:[%s967_s25 + $0xe8] sm:$0xff]  }
  0x1e   : > { %v874_v15 = vld [vmem:[%s967_s25 + $0x18] sm:$0xff]   ;;  %v878_v19 = vld [vmem:[%s967_s25 + $0x20] sm:$0xff]   ;;  %v882_v23 = vld [vmem:[%s967_s25 + $0x28] sm:$0xff]  }
  0x1f   : > { %794 = vmatpush3.bf16.msra.mxu0 %v866_v7  ;;  %v875_v16 = vld [vmem:[%s967_s25 + $0x98] sm:$0xff]   ;;  %v879_v20 = vld [vmem:[%s967_s25 + $0xa0] sm:$0xff]   ;;  %v883_v24 = vld [vmem:[%s967_s25 + $0xa8] sm:$0xff]  }
  0x20   : > { %816 = vmatpush3.bf16.msra.mxu1 %v867_v8  ;;  %795 = vmatprep.subr.bf16.mxu0 %v868_v9  ;;  %v884_v25 = vld [vmem:[%s967_s25 + $0x70] sm:$0xff]   ;;  %v888_v29 = vld [vmem:[%s967_s25 + $0x78] sm:$0xff]   ;;  %v268_v33 = vld [vmem:[%s962_s21] sm:$0xff] }
  0x21   : > { %817 = vmatprep.subr.bf16.mxu1 %v869_v10  ;;  %v885_v26 = vld [vmem:[%s967_s25 + $0xf0] sm:$0xff]   ;;  %v889_v30 = vld [vmem:[%s967_s25 + $0xf8] sm:$0xff]   ;;  %v269_v34 = vld [vmem:[%s962_s21 + $0x8] sm:$0xff]  ;;  %v270_v35 = vunpack.c.l.bf16 %v268_v33  ;;  %v271_v36 = vunpack.c.h.bf16 %v268_v33 }
  0x22   : > { %v886_v27 = vld [vmem:[%s967_s25 + $0x30] sm:$0xff]   ;;  %v890_v31 = vld [vmem:[%s967_s25 + $0x38] sm:$0xff]   ;;  %v272_v37 = vunpack.c.l.bf16 %v269_v34  ;;  %v273_v38 = vunpack.c.h.bf16 %v269_v34  ;;  %v290_v59 = vld [vmem:[#allocation2] sm:$0xff] }
  0x23   : > { %796 = vmatpush3.bf16.msra.mxu0 %v870_v11  ;;  %v887_v28 = vld [vmem:[%s967_s25 + $0xb0] sm:$0xff]   ;;  %v891_v32 = vld [vmem:[%s967_s25 + $0xb8] sm:$0xff]   ;;  %vm275_vm0 = vcmp.ge.f32.partialorder %v271_v36, 0.0  ;;  %v279_v39 = vmul.f32 0.2, %v271_v36  ;;  %vm274_vm2 = vcmp.ge.f32.partialorder %v270_v35, 0.0 }
  0x24   : > { %818 = vmatpush3.bf16.msra.mxu1 %v871_v12  ;;  %797 = vmatprep.subr.bf16.mxu0 %v872_v13  ;;  %vm277_vm1 = vcmp.ge.f32.partialorder %v273_v38, 0.0  ;;  %v281_v40 = vmul.f32 0.2, %v273_v38  ;;  %v278_v41 = vmul.f32 0.2, %v270_v35  ;;  %vm276_vm3 = vcmp.ge.f32.partialorder %v272_v37, 0.0 }
  0x25   : > { %819 = vmatprep.subr.bf16.mxu1 %v873_v14  ;;  %v280_v42 = vmul.f32 0.2, %v272_v37  ;;  %v283_v43 = vsel %vm275_vm0, %v271_v36, %v279_v39  ;;  %v787_v1 = vld [vmem:[%s1022_s2] ss:$0 sm:$0xff] (!%p786_p7) }
  0x26   : > { %v285_v44 = vsel %vm277_vm1, %v273_v38, %v281_v40  ;;  %v287_v45 = vpack.c.bf16 %v283_v43, %v283_v43  ;;  %v282_v47 = vsel %vm274_vm2, %v270_v35, %v278_v41 }
  0x27   : > { %798 = vmatpush3.bf16.msra.mxu0 %v874_v15  ;;  %v289_v46 = vpack.c.bf16 %v285_v44, %v285_v44  ;;  %v284_v48 = vsel %vm276_vm3, %v272_v37, %v280_v42  ;;  %v286_v49 = vpack.c.bf16 %v282_v47, %v282_v47 }
  0x28   : > { %820 = vmatpush3.bf16.msra.mxu1 %v875_v16  ;;  %799 = vmatprep.subr.bf16.mxu0 %v876_v17  ;;  %v288_v50 = vpack.c.bf16 %v284_v48, %v284_v48 }
  0x29   : > { %821 = vmatprep.subr.bf16.mxu1 %v877_v18  ;;  %579 = vmatprep.mubr.bf16.mxu0 %v287_v45 }
  0x2a   : > { %619 = vmatprep.mubr.bf16.mxu1 %v289_v46 }
  0x2b   : > { %800 = vmatpush3.bf16.msra.mxu0 %v878_v19 }
  0x2c   : > { %822 = vmatpush3.bf16.msra.mxu1 %v879_v20  ;;  %801 = vmatprep.subr.bf16.mxu0 %v880_v21 }
  0x2d   : > { %823 = vmatprep.subr.bf16.mxu1 %v881_v22 }
  0x2f   : > { %802 = vmatpush3.bf16.msra.mxu0 %v882_v23 }
  0x30   : > { %824 = vmatpush3.bf16.msra.mxu1 %v883_v24  ;;  %803 = vmatprep.subr.bf16.mxu0 %v884_v25 }
  0x31   : > { %825 = vmatprep.subr.bf16.mxu1 %v885_v26 }
  0x33   : > { %804 = vmatpush3.bf16.msra.mxu0 %v886_v27 }
  0x34   : > { %826 = vmatpush3.bf16.msra.mxu1 %v887_v28  ;;  %805 = vmatprep.subr.bf16.mxu0 %v888_v29 }
  0x35   : > { %827 = vmatprep.subr.bf16.mxu1 %v889_v30 }
  0x37   : > { %806 = vmatpush3.bf16.msra.mxu0 %v890_v31 }
  0x38   : > { %828 = vmatpush3.bf16.msra.mxu1 %v891_v32 }
  0x3a   : > { %580 = vmatmul.mubr.bf16.vlgmr.msra.gmra.mrb[0].mxu0 %v286_v49 }
  0x3b   : > { %620 = vmatmul.mubr.bf16.vlgmr.msra.gmra.mrb[0].mxu1 %v288_v50 }
 0x10d   : > { %v807_v51 = vpop.f32.mrb[0].mxu0 }
 0x10e   : > { %v829_v52 = vpop.f32.mrb[0].mxu1  ;;  %v808_v53 = vpop.f32.mrb[1].mxu0 }
 0x10f   : > { %v830_v54 = vpop.f32.mrb[1].mxu1  ;;  %v809_v55 = vadd.f32 %v808_v53, %v807_v51  ;;  %v810_v57 = vpop.f32.mrb[2].mxu0 }
 0x110   : > { %v831_v56 = vadd.f32 %v830_v54, %v829_v52  ;;  %v832_v58 = vpop.f32.mrb[2].mxu1  ;;  %v811_v60 = vpop.f32.mrb[3].mxu0  ;;  %632 = sbr.rel (%p786_p7) target bundleno = 289 (0x121), region = 40 }
 0x111   : > { %v833_v61 = vpop.f32.mrb[3].mxu1 }
 0x112   : > { %v622_v62 = vadd.f32 %v831_v56, %v809_v55 }
 0x114   : > { %v627_v63 = vadd.f32 %v622_v62, %v290_v59 }
 0x116   : > { %628 = vst [vmem:[#allocation2] sm:$0xff] %v627_v63 }
 0x11d   : > { %v633_v0 = vld [vmem:[#allocation2] sm:$0xff] }
 0x11e   : > { %v641_v2 = vadd.f32 %v787_v1, %v633_v0 }
 0x120   : > { %642 = vst [vmem:[%s1023_s3] sm:$0xff] %v641_v2 }
 0x121 PF: > { %s13_s14 = sadd.s32 1, %s914_s14   ;;  %s1024_s12 = smov %s910_s13 }
 0x122   : > { %p10_p8 = scmp.ge.s32.totalorder %s13_s14, 4   ;;  %s1025_s13 = smov %s1027_s15 }
 0x124   :  { %12 = sbr.rel (!%p10_p8) target bundleno = 2 (0x2), region = 73 }

// kernel: _lambda_.38
= control target key start
LH: loop header
LB: loop body
LE: loop exit
PB: predicated region body
PF: predicated region fallthrough
CT: control target
= control target key end

     0   :  { %s939_s12 = smov 0   ;;  %s941_s13 = smov 0   ;;  %s1017_s0 = inlined_call_operand.vmem [shape: bf16[4,8,512], index: 0, kind: input, shape index: {}]   ;;  %s1018_s1 = inlined_call_operand.vmem [shape: bf16[4,512,128], index: 1, kind: input, shape index: {}]   ;;  %s1019_s2 = inlined_call_operand.vmem [shape: f32[1,128], index: 2, kind: input, shape index: {}]   ;;  %s1020_s3 = inlined_call_operand.vmem [shape: f32[4,8,128], index: 3, kind: output, shape index: {}]  }
   0x1   :  { %s943_s14 = smov 0  }
   0x2 LB: > { %s32_s15 = sadd.s32 1, %s912_s13  ;;  %p746_p0 = scmp.ge.s32.totalorder %s916_s14, 1  ;;  %s916_s14 = sphi %s943_s14, %s13_s14   ;;  %s912_s13 = sphi %s941_s13, %s1022_s13   ;;  %s908_s12 = sphi %s939_s12, %s1021_s12  }
   0x3   : > { %p34_p1 = scmp.ge.s32.totalorder %s32_s15, 4  ;;  %p188_p2 = scmp.lt.s32.totalorder %s916_s14, 5 }
   0x5   : > { %s1024_s15 = smov (%p34_p1, %s32_s15), 0  ;;  %p189_p3 = pnand %p746_p0, %p188_p2 }
   0x6   : > { %p232_p4 = scmp.lt.s32.totalorder (!%p189_p3), %s908_s12, 3  ;;  %v918_v34 = vmov (!%p189_p3), 0   ;;  %v788_v49 = vld [vmem:[%s1019_s2] ss:$0 sm:$0xff] (!%p189_p3) }
   0x7   : > { %192 = sbr.rel (%p189_p3) target bundleno = 272 (0x110), region = 32 }
   0xe   : > { %s1026_s12 = smov (!%p232_p4, %s908_s12), 3 }
   0xf   : > { %s792_s16 = sshll.u32 %s1026_s12, 8  ;;  %s791_s20 = sshll.u32 %s1026_s12, 4 }
  0x10   : > { %s963_s19 = scalar_lea.vmem %s1018_s1, %s792_s16  ;;  %s243_s23 = scalar_lea.vmem %s1017_s0, %s791_s20 }
  0x11   : > { %v862_v0 = vld [vmem:[%s963_s19 + $0x40] sm:$0xff]   ;;  %v866_v4 = vld [vmem:[%s963_s19 + $0x48] sm:$0xff]   ;;  %v870_v8 = vld [vmem:[%s963_s19 + $0x50] sm:$0xff]   ;;  %s751_s24 = sshll.u32 %s1026_s12, 3 }
  0x12   : > { %v863_v1 = vld [vmem:[%s963_s19 + $0xc0] sm:$0xff]   ;;  %793 = vmatprep.subr.bf16.mxu0 %v862_v0  ;;  %v867_v5 = vld [vmem:[%s963_s19 + $0xc8] sm:$0xff]   ;;  %v871_v9 = vld [vmem:[%s963_s19 + $0xd0] sm:$0xff]   ;;  %s261_s29 = scalar_lea.vmem %s1020_s3, %s751_s24 }
  0x13   : > { %v864_v2 = vld [vmem:[%s963_s19] sm:$0xff]   ;;  %815 = vmatprep.subr.bf16.mxu1 %v863_v1  ;;  %v868_v6 = vld [vmem:[%s963_s19 + $0x8] sm:$0xff]   ;;  %v872_v10 = vld [vmem:[%s963_s19 + $0x10] sm:$0xff]  }
  0x14   : > { %v865_v3 = vld [vmem:[%s963_s19 + $0x80] sm:$0xff]   ;;  %794 = vmatpush3.bf16.msra.mxu0 %v864_v2  ;;  %v869_v7 = vld [vmem:[%s963_s19 + $0x88] sm:$0xff]   ;;  %v873_v11 = vld [vmem:[%s963_s19 + $0x90] sm:$0xff]  }
  0x15   : > { %816 = vmatpush3.bf16.msra.mxu1 %v865_v3  ;;  %795 = vmatprep.subr.bf16.mxu0 %v866_v4  ;;  %v874_v12 = vld [vmem:[%s963_s19 + $0x58] sm:$0xff]   ;;  %v878_v16 = vld [vmem:[%s963_s19 + $0x60] sm:$0xff]   ;;  %v882_v20 = vld [vmem:[%s963_s19 + $0x68] sm:$0xff]  }
  0x16   : > { %817 = vmatprep.subr.bf16.mxu1 %v867_v5  ;;  %v875_v13 = vld [vmem:[%s963_s19 + $0xd8] sm:$0xff]   ;;  %v879_v17 = vld [vmem:[%s963_s19 + $0xe0] sm:$0xff]   ;;  %v883_v21 = vld [vmem:[%s963_s19 + $0xe8] sm:$0xff]  }
  0x17   : > { %v876_v14 = vld [vmem:[%s963_s19 + $0x18] sm:$0xff]   ;;  %v880_v18 = vld [vmem:[%s963_s19 + $0x20] sm:$0xff]   ;;  %v884_v22 = vld [vmem:[%s963_s19 + $0x28] sm:$0xff]  }
  0x18   : > { %796 = vmatpush3.bf16.msra.mxu0 %v868_v6  ;;  %v877_v15 = vld [vmem:[%s963_s19 + $0x98] sm:$0xff]   ;;  %v881_v19 = vld [vmem:[%s963_s19 + $0xa0] sm:$0xff]   ;;  %v885_v23 = vld [vmem:[%s963_s19 + $0xa8] sm:$0xff]  }
  0x19   : > { %818 = vmatpush3.bf16.msra.mxu1 %v869_v7  ;;  %797 = vmatprep.subr.bf16.mxu0 %v870_v8  ;;  %v886_v24 = vld [vmem:[%s963_s19 + $0x70] sm:$0xff]   ;;  %v890_v28 = vld [vmem:[%s963_s19 + $0x78] sm:$0xff]   ;;  %v268_v32 = vld [vmem:[%s243_s23] sm:$0xff] }
  0x1a   : > { %819 = vmatprep.subr.bf16.mxu1 %v871_v9  ;;  %v887_v25 = vld [vmem:[%s963_s19 + $0xf0] sm:$0xff]   ;;  %v891_v29 = vld [vmem:[%s963_s19 + $0xf8] sm:$0xff]   ;;  %v269_v33 = vld [vmem:[%s243_s23 + $0x8] sm:$0xff]  ;;  %v270_v35 = vmax.bf16 %v918_v34, %v268_v32 }
  0x1b   : > { %v888_v26 = vld [vmem:[%s963_s19 + $0x30] sm:$0xff]   ;;  %v892_v30 = vld [vmem:[%s963_s19 + $0x38] sm:$0xff]   ;;  %v271_v36 = vmax.bf16 %v918_v34, %v269_v33 }
  0x1c   : > { %798 = vmatpush3.bf16.msra.mxu0 %v872_v10  ;;  %v889_v27 = vld [vmem:[%s963_s19 + $0xb0] sm:$0xff]   ;;  %v893_v31 = vld [vmem:[%s963_s19 + $0xb8] sm:$0xff]   ;;  %v753_v37 = vcombine.high %v270_v35, %v270_v35  ;;  %v752_v39 = vcombine.low %v270_v35, %v270_v35 }
  0x1d   : > { %820 = vmatpush3.bf16.msra.mxu1 %v873_v11  ;;  %799 = vmatprep.subr.bf16.mxu0 %v874_v12  ;;  %v755_v38 = vcombine.high %v271_v36, %v271_v36  ;;  %v754_v40 = vcombine.low %v271_v36, %v271_v36 }
  0x1e   : > { %821 = vmatprep.subr.bf16.mxu1 %v875_v13  ;;  %575 = vmatprep.mubr.bf16.mxu0 %v753_v37 }
  0x1f   : > { %615 = vmatprep.mubr.bf16.mxu1 %v755_v38 }
  0x20   : > { %800 = vmatpush3.bf16.msra.mxu0 %v876_v14 }
  0x21   : > { %822 = vmatpush3.bf16.msra.mxu1 %v877_v15  ;;  %801 = vmatprep.subr.bf16.mxu0 %v878_v16 }
  0x22   : > { %823 = vmatprep.subr.bf16.mxu1 %v879_v17 }
  0x24   : > { %802 = vmatpush3.bf16.msra.mxu0 %v880_v18 }
  0x25   : > { %824 = vmatpush3.bf16.msra.mxu1 %v881_v19  ;;  %803 = vmatprep.subr.bf16.mxu0 %v882_v20 }
  0x26   : > { %825 = vmatprep.subr.bf16.mxu1 %v883_v21 }
  0x28   : > { %804 = vmatpush3.bf16.msra.mxu0 %v884_v22 }
  0x29   : > { %826 = vmatpush3.bf16.msra.mxu1 %v885_v23  ;;  %805 = vmatprep.subr.bf16.mxu0 %v886_v24 }
  0x2a   : > { %827 = vmatprep.subr.bf16.mxu1 %v887_v25 }
  0x2c   : > { %806 = vmatpush3.bf16.msra.mxu0 %v888_v26 }
  0x2d   : > { %828 = vmatpush3.bf16.msra.mxu1 %v889_v27  ;;  %807 = vmatprep.subr.bf16.mxu0 %v890_v28 }
  0x2e   : > { %829 = vmatprep.subr.bf16.mxu1 %v891_v29 }
  0x30   : > { %808 = vmatpush3.bf16.msra.mxu0 %v892_v30 }
  0x31   : > { %830 = vmatpush3.bf16.msra.mxu1 %v893_v31 }
  0x33   : > { %576 = vmatmul.mubr.bf16.vlgmr.msra.gmra.mrb[0].mxu0 %v752_v39 }
  0x34   : > { %616 = vmatmul.mubr.bf16.vlgmr.msra.gmra.mrb[0].mxu1 %v754_v40 }
 0x106   : > { %v809_v41 = vpop.f32.mrb[0].mxu0 }
 0x107   : > { %v831_v42 = vpop.f32.mrb[0].mxu1  ;;  %v810_v43 = vpop.f32.mrb[1].mxu0 }
 0x108   : > { %v832_v44 = vpop.f32.mrb[1].mxu1  ;;  %v811_v45 = vadd.f32 %v810_v43, %v809_v41  ;;  %v812_v47 = vpop.f32.mrb[2].mxu0 }
 0x109   : > { %v833_v46 = vadd.f32 %v832_v44, %v831_v42  ;;  %v834_v48 = vpop.f32.mrb[2].mxu1  ;;  %v813_v50 = vpop.f32.mrb[3].mxu0 }
 0x10a   : > { %v835_v51 = vpop.f32.mrb[3].mxu1 }
 0x10b   : > { %v618_v52 = vadd.f32 %v833_v46, %v811_v45 }
 0x10d   : > { %v636_v53 = vadd.f32 %v788_v49, %v618_v52 }
 0x10f   : > { %637 = vst [vmem:[%s261_s29] sm:$0xff] %v636_v53 }
 0x110 PF: > { %s13_s14 = sadd.s32 1, %s916_s14   ;;  %s1021_s12 = smov %s912_s13 }
 0x111   : > { %p10_p5 = scmp.ge.s32.totalorder %s13_s14, 6   ;;  %s1022_s13 = smov %s1024_s15 }
 0x113   :  { %12 = sbr.rel (!%p10_p5) target bundleno = 2 (0x2), region = 73 }

// kernel: _lambda_.41
= control target key start
LH: loop header
LB: loop body
LE: loop exit
PB: predicated region body
PF: predicated region fallthrough
CT: control target
= control target key end

     0   :  { %s801_s12 = smov 0   ;;  %s803_s13 = smov 0   ;;  %s866_s0 = inlined_call_operand.vmem [shape: bf16[4,32,256], index: 0, kind: input, shape index: {}]   ;;  %s867_s1 = inlined_call_operand.vmem [shape: bf16[4,256,128], index: 1, kind: input, shape index: {}]   ;;  %s868_s2 = inlined_call_operand.vmem [shape: f32[1,128], index: 2, kind: input, shape index: {}]   ;;  %s869_s3 = inlined_call_operand.vmem [shape: f32[4,32,128], index: 3, kind: output, shape index: {}]  }
   0x1   :  { %s805_s14 = smov 0  }
   0x2 LB: > { %s32_s15 = sadd.s32 1, %s774_s13  ;;  %p638_p0 = scmp.ge.s32.totalorder %s778_s14, 1  ;;  %s778_s14 = sphi %s805_s14, %s13_s14   ;;  %s774_s13 = sphi %s803_s13, %s871_s13   ;;  %s770_s12 = sphi %s801_s12, %s870_s12  }
   0x3   : > { %p34_p1 = scmp.ge.s32.totalorder %s32_s15, 4  ;;  %p190_p2 = scmp.lt.s32.totalorder %s778_s14, 5 }
   0x5   : > { %s873_s15 = smov (%p34_p1, %s32_s15), 0  ;;  %p191_p3 = pnand %p638_p0, %p190_p2 }
   0x6   : > { %p238_p4 = scmp.lt.s32.totalorder (!%p191_p3), %s770_s12, 3  ;;  %v780_v14 = vmov (!%p191_p3), 0   ;;  %v665_v32 = vld [vmem:[%s868_s2] ss:$0 sm:$0xff] (!%p191_p3) }
   0x7   : > { %194 = sbr.rel (%p191_p3) target bundleno = 270 (0x10e), region = 32 }
   0xe   : > { %s875_s12 = smov (!%p238_p4, %s770_s12), 3 }
   0xf   : > { %s669_s16 = sshll.u32 %s875_s12, 7  ;;  %s668_s20 = sshll.u32 %s875_s12, 5 }
  0x10   : > { %s825_s19 = scalar_lea.vmem %s867_s1, %s669_s16  ;;  %s249_s23 = scalar_lea.vmem %s866_s0, %s668_s20 }
  0x11   : > { %v740_v0 = vld [vmem:[%s825_s19 + $0x40] sm:$0xff]   ;;  %v742_v2 = vld [vmem:[%s825_s19 + $0x48] sm:$0xff]   ;;  %v744_v4 = vld [vmem:[%s825_s19 + $0x50] sm:$0xff]   ;;  %s270_s28 = scalar_lea.vmem %s869_s3, %s668_s20 }
  0x12   : > { %v741_v1 = vld [vmem:[%s825_s19] sm:$0xff]   ;;  %671 = vmatprep.subr.bf16.mxu0 %v740_v0  ;;  %699 = vmatprep.subr.bf16.mxu1 %v740_v0  ;;  %v743_v3 = vld [vmem:[%s825_s19 + $0x8] sm:$0xff]   ;;  %v745_v5 = vld [vmem:[%s825_s19 + $0x10] sm:$0xff]  }
  0x13   : > { %672 = vmatpush3.bf16.msra.mxu0 %v741_v1  ;;  %707 = vmatpush3.bf16.msra.mxu1 %v741_v1  ;;  %v746_v6 = vld [vmem:[%s825_s19 + $0x58] sm:$0xff]   ;;  %v748_v8 = vld [vmem:[%s825_s19 + $0x60] sm:$0xff]   ;;  %v750_v10 = vld [vmem:[%s825_s19 + $0x68] sm:$0xff]  }
  0x14   : > { %673 = vmatprep.subr.bf16.mxu0 %v742_v2  ;;  %700 = vmatprep.subr.bf16.mxu1 %v742_v2  ;;  %v747_v7 = vld [vmem:[%s825_s19 + $0x18] sm:$0xff]   ;;  %v749_v9 = vld [vmem:[%s825_s19 + $0x20] sm:$0xff]   ;;  %v282_v12 = vld [vmem:[%s249_s23 + $0x8] sm:$0xff] }
  0x15   : > { %v281_v11 = vld [vmem:[%s249_s23] sm:$0xff]  ;;  %v283_v13 = vld [vmem:[%s249_s23 + $0x10] sm:$0xff]  ;;  %v286_v16 = vmax.bf16 %v780_v14, %v282_v12  ;;  %v284_v17 = vld [vmem:[%s249_s23 + $0x18] sm:$0xff] }
  0x16   : > { %v285_v15 = vmax.bf16 %v780_v14, %v281_v11  ;;  %v287_v18 = vmax.bf16 %v780_v14, %v283_v13  ;;  %v288_v19 = vmax.bf16 %v780_v14, %v284_v17  ;;  %v751_v20 = vld [vmem:[%s825_s19 + $0x28] sm:$0xff]   ;;  %v752_v22 = vld [vmem:[%s825_s19 + $0x70] sm:$0xff]   ;;  %v754_v25 = vld [vmem:[%s825_s19 + $0x78] sm:$0xff]  }
  0x17   : > { %674 = vmatpush3.bf16.msra.mxu0 %v743_v3  ;;  %708 = vmatpush3.bf16.msra.mxu1 %v743_v3  ;;  %v753_v24 = vld [vmem:[%s825_s19 + $0x30] sm:$0xff]   ;;  %v755_v26 = vld [vmem:[%s825_s19 + $0x38] sm:$0xff]  }
  0x18   : > { %675 = vmatprep.subr.bf16.mxu0 %v744_v4  ;;  %701 = vmatprep.subr.bf16.mxu1 %v744_v4  ;;  %v646_v21 = vcombine.high %v285_v15, %v286_v16  ;;  %v648_v23 = vcombine.high %v287_v18, %v288_v19  ;;  %v645_v27 = vcombine.low %v285_v15, %v286_v16 }
  0x19   : > { %v647_v28 = vcombine.low %v287_v18, %v288_v19 }
  0x1a   : > { %473 = vmatprep.mubr.bf16.mxu0 %v646_v21  ;;  %481 = vmatprep.mubr.bf16.mxu1 %v648_v23 }
  0x1b   : > { %676 = vmatpush3.bf16.msra.mxu0 %v745_v5  ;;  %709 = vmatpush3.bf16.msra.mxu1 %v745_v5 }
  0x1c   : > { %677 = vmatprep.subr.bf16.mxu0 %v746_v6  ;;  %702 = vmatprep.subr.bf16.mxu1 %v746_v6 }
  0x1f   : > { %678 = vmatpush3.bf16.msra.mxu0 %v747_v7  ;;  %710 = vmatpush3.bf16.msra.mxu1 %v747_v7 }
  0x20   : > { %679 = vmatprep.subr.bf16.mxu0 %v748_v8  ;;  %703 = vmatprep.subr.bf16.mxu1 %v748_v8 }
  0x23   : > { %680 = vmatpush3.bf16.msra.mxu0 %v749_v9  ;;  %711 = vmatpush3.bf16.msra.mxu1 %v749_v9 }
  0x24   : > { %681 = vmatprep.subr.bf16.mxu0 %v750_v10  ;;  %704 = vmatprep.subr.bf16.mxu1 %v750_v10 }
  0x27   : > { %682 = vmatpush3.bf16.msra.mxu0 %v751_v20  ;;  %712 = vmatpush3.bf16.msra.mxu1 %v751_v20 }
  0x28   : > { %683 = vmatprep.subr.bf16.mxu0 %v752_v22  ;;  %705 = vmatprep.subr.bf16.mxu1 %v752_v22 }
  0x2b   : > { %684 = vmatpush3.bf16.msra.mxu0 %v753_v24  ;;  %713 = vmatpush3.bf16.msra.mxu1 %v753_v24 }
  0x2c   : > { %685 = vmatprep.subr.bf16.mxu0 %v754_v25  ;;  %706 = vmatprep.subr.bf16.mxu1 %v754_v25 }
  0x2f   : > { %686 = vmatpush3.bf16.msra.mxu0 %v755_v26  ;;  %714 = vmatpush3.bf16.msra.mxu1 %v755_v26 }
  0x32   : > { %474 = vmatmul.mubr.bf16.vlgmr.msra.gmra.mrb[0].mxu0 %v645_v27  ;;  %482 = vmatmul.mubr.bf16.vlgmr.msra.gmra.mrb[0].mxu1 %v647_v28 }
 0x105   : > { %v687_v29 = vpop.f32.mrb[0].mxu0  ;;  %v693_v30 = vpop.f32.mrb[0].mxu1 }
 0x106   : > { %v688_v31 = vpop.f32.mrb[1].mxu0  ;;  %v694_v33 = vpop.f32.mrb[1].mxu1 }
 0x107   : > { %v689_v34 = vadd.f32 %v688_v31, %v687_v29  ;;  %v695_v35 = vadd.f32 %v694_v33, %v693_v30  ;;  %v690_v36 = vpop.f32.mrb[2].mxu0  ;;  %v696_v37 = vpop.f32.mrb[2].mxu1 }
 0x108   : > { %v691_v38 = vpop.f32.mrb[3].mxu0  ;;  %v697_v39 = vpop.f32.mrb[3].mxu1 }
 0x109   : > { %v512_v40 = vadd.f32 %v689_v34, %v665_v32  ;;  %v514_v41 = vadd.f32 %v695_v35, %v665_v32  ;;  %v692_v42 = vadd.f32 %v691_v38, %v690_v36  ;;  %v698_v43 = vadd.f32 %v697_v39, %v696_v37 }
 0x10b   : > { %516 = vst [vmem:[%s270_s28] sm:$0xff] %v512_v40  ;;  %518 = vst [vmem:[%s270_s28 + $0x10] sm:$0xff] %v514_v41  ;;  %v513_v44 = vadd.f32 %v692_v42, %v665_v32  ;;  %v515_v45 = vadd.f32 %v698_v43, %v665_v32 }
 0x10d   : > { %517 = vst [vmem:[%s270_s28 + $0x8] sm:$0xff] %v513_v44  ;;  %519 = vst [vmem:[%s270_s28 + $0x18] sm:$0xff] %v515_v45 }
 0x10e PF: > { %s13_s14 = sadd.s32 1, %s778_s14   ;;  %s870_s12 = smov %s774_s13 }
 0x10f   : > { %p10_p5 = scmp.ge.s32.totalorder %s13_s14, 6   ;;  %s871_s13 = smov %s873_s15 }
 0x111   :  { %12 = sbr.rel (!%p10_p5) target bundleno = 2 (0x2), region = 73 }

// kernel: _lambda_.44
= control target key start
LH: loop header
LB: loop body
LE: loop exit
PB: predicated region body
PF: predicated region fallthrough
CT: control target
= control target key end

     0   :  { %s918_s12 = smov 0   ;;  %s920_s13 = smov 0   ;;  %s1023_s0 = inlined_call_operand.vmem [shape: bf16[4,128,128], index: 0, kind: input, shape index: {}]   ;;  %s1024_s1 = inlined_call_operand.vmem [shape: bf16[4,128,128], index: 1, kind: input, shape index: {}]   ;;  %s1025_s2 = inlined_call_operand.vmem [shape: f32[1,128], index: 2, kind: input, shape index: {}]   ;;  %s1026_s3 = inlined_call_operand.vmem [shape: f32[4,128,128], index: 3, kind: output, shape index: {}]  }
   0x1   :  { %s922_s14 = smov 0  }
   0x2 LB: > { %s32_s15 = sadd.s32 1, %s891_s13  ;;  %p747_p0 = scmp.ge.s32.totalorder %s895_s14, 1  ;;  %s895_s14 = sphi %s922_s14, %s13_s14   ;;  %s891_s13 = sphi %s920_s13, %s1028_s13   ;;  %s887_s12 = sphi %s918_s12, %s1027_s12  }
   0x3   : > { %p34_p1 = scmp.ge.s32.totalorder %s32_s15, 4  ;;  %p187_p2 = scmp.lt.s32.totalorder %s895_s14, 5 }
   0x5   : > { %s1030_s15 = smov (%p34_p1, %s32_s15), 0  ;;  %p188_p3 = pnand %p747_p0, %p187_p2 }
   0x6   : > { %p232_p4 = scmp.lt.s32.totalorder (!%p188_p3), %s887_s12, 3  ;;  %v897_v7 = vmov (!%p188_p3), 0   ;;  %v770_v49 = vld [vmem:[%s1025_s2] ss:$0 sm:$0xff] (!%p188_p3) }
   0x7   : > { %191 = sbr.rel (%p188_p3) target bundleno = 276 (0x114), region = 32 }
   0xe   : > { %s1032_s12 = smov (!%p232_p4, %s887_s12), 3 }
   0xf   : > { %s773_s16 = sshll.u32 %s1032_s12, 6  ;;  %s775_s23 = sshll.u32 %s1032_s12, 7 }
  0x10   : > { %s942_s19 = scalar_lea.vmem %s1024_s1, %s773_s16  ;;  %s950_s22 = scalar_lea.vmem %s1023_s0, %s773_s16 }
  0x11   : > { %v865_v0 = vld [vmem:[%s942_s19] sm:$0xff]   ;;  %v866_v1 = vld [vmem:[%s942_s19 + $0x8] sm:$0xff]   ;;  %v867_v2 = vld [vmem:[%s942_s19 + $0x10] sm:$0xff]   ;;  %s996_s28 = scalar_lea.vmem %s1026_s3, %s775_s23 }
  0x12   : > { %792 = vmatprep.subr.bf16.mxu0 %v865_v0  ;;  %824 = vmatprep.subr.bf16.mxu1 %v865_v0  ;;  %v868_v3 = vld [vmem:[%s942_s19 + $0x18] sm:$0xff]   ;;  %v285_v4 = vld [vmem:[%s950_s22] sm:$0xf]  ;;  %v286_v5 = vld [vmem:[%s950_s22 + $0x4] sm:$0xf] }
  0x13   : > { %793 = vmatpush3.bf16.msra.mxu0 %v865_v0  ;;  %832 = vmatpush3.bf16.msra.mxu1 %v865_v0  ;;  %v293_v6 = vld [vmem:[%s950_s22 + $0x20] sm:$0xf]  ;;  %v301_v8 = vmax.bf16 %v897_v7, %v285_v4  ;;  %v302_v9 = vmax.bf16 %v897_v7, %v286_v5  ;;  %v294_v10 = vld [vmem:[%s950_s22 + $0x24] sm:$0xf]  ;;  %v870_v16 = vld [vmem:[%s942_s19 + $0x28] sm:$0xff]  }
  0x14   : > { %794 = vmatprep.subr.bf16.mxu0 %v866_v1  ;;  %825 = vmatprep.subr.bf16.mxu1 %v866_v1  ;;  %v309_v11 = vmax.bf16 %v897_v7, %v293_v6  ;;  %v310_v12 = vmax.bf16 %v897_v7, %v294_v10  ;;  %v869_v14 = vld [vmem:[%s942_s19 + $0x20] sm:$0xff]   ;;  %v871_v17 = vld [vmem:[%s942_s19 + $0x30] sm:$0xff]   ;;  %v872_v18 = vld [vmem:[%s942_s19 + $0x38] sm:$0xff]  }
  0x15   : > { %v754_v13 = vcombine.low %v301_v8, %v302_v9  ;;  %v287_v19 = vld [vmem:[%s950_s22 + $0x8] sm:$0xf]  ;;  %v288_v20 = vld [vmem:[%s950_s22 + $0xc] sm:$0xf]  ;;  %v289_v23 = vld [vmem:[%s950_s22 + $0x10] sm:$0xf] }
  0x16   : > { %v758_v15 = vcombine.low %v309_v11, %v310_v12  ;;  %v295_v21 = vld [vmem:[%s950_s22 + $0x28] sm:$0xf]  ;;  %v296_v22 = vld [vmem:[%s950_s22 + $0x2c] sm:$0xf]  ;;  %v290_v24 = vld [vmem:[%s950_s22 + $0x14] sm:$0xf]  ;;  %v303_v27 = vmax.bf16 %v897_v7, %v287_v19  ;;  %v304_v28 = vmax.bf16 %v897_v7, %v288_v20  ;;  %v305_v31 = vmax.bf16 %v897_v7, %v289_v23 }
  0x17   : > { %795 = vmatpush3.bf16.msra.mxu0 %v866_v1  ;;  %833 = vmatpush3.bf16.msra.mxu1 %v866_v1  ;;  %v297_v25 = vld [vmem:[%s950_s22 + $0x30] sm:$0xf]  ;;  %v298_v26 = vld [vmem:[%s950_s22 + $0x34] sm:$0xf]  ;;  %v311_v29 = vmax.bf16 %v897_v7, %v295_v21  ;;  %v312_v30 = vmax.bf16 %v897_v7, %v296_v22  ;;  %v306_v32 = vmax.bf16 %v897_v7, %v290_v24  ;;  %v291_v37 = vld [vmem:[%s950_s22 + $0x18] sm:$0xf] }
  0x18   : > { %796 = vmatprep.subr.bf16.mxu0 %v867_v2  ;;  %826 = vmatprep.subr.bf16.mxu1 %v867_v2  ;;  %v313_v33 = vmax.bf16 %v897_v7, %v297_v25  ;;  %v314_v34 = vmax.bf16 %v897_v7, %v298_v26  ;;  %v755_v35 = vcombine.low %v303_v27, %v304_v28  ;;  %v292_v40 = vld [vmem:[%s950_s22 + $0x1c] sm:$0xf]  ;;  %v299_v41 = vld [vmem:[%s950_s22 + $0x38] sm:$0xf] }
  0x19   : > { %808 = vmatprep.mubr.bf16.mxu0 %v754_v13  ;;  %816 = vmatprep.mubr.bf16.mxu1 %v758_v15  ;;  %v759_v36 = vcombine.low %v311_v29, %v312_v30  ;;  %v756_v38 = vcombine.low %v305_v31, %v306_v32  ;;  %v300_v42 = vld [vmem:[%s950_s22 + $0x3c] sm:$0xf]  ;;  %v307_v43 = vmax.bf16 %v897_v7, %v291_v37 }
  0x1a   : > { %v760_v39 = vcombine.low %v313_v33, %v314_v34  ;;  %v308_v44 = vmax.bf16 %v897_v7, %v292_v40  ;;  %v315_v45 = vmax.bf16 %v897_v7, %v299_v41  ;;  %v316_v46 = vmax.bf16 %v897_v7, %v300_v42 }
  0x1b   : > { %797 = vmatpush3.bf16.msra.mxu0 %v867_v2  ;;  %834 = vmatpush3.bf16.msra.mxu1 %v867_v2 }
  0x1c   : > { %798 = vmatprep.subr.bf16.mxu0 %v868_v3  ;;  %827 = vmatprep.subr.bf16.mxu1 %v868_v3  ;;  %v757_v47 = vcombine.low %v307_v43, %v308_v44  ;;  %v761_v48 = vcombine.low %v315_v45, %v316_v46 }
  0x1f   : > { %799 = vmatpush3.bf16.msra.mxu0 %v868_v3  ;;  %835 = vmatpush3.bf16.msra.mxu1 %v868_v3 }
  0x20   : > { %800 = vmatprep.subr.bf16.mxu0 %v869_v14  ;;  %828 = vmatprep.subr.bf16.mxu1 %v869_v14 }
  0x23   : > { %801 = vmatpush3.bf16.msra.mxu0 %v869_v14  ;;  %836 = vmatpush3.bf16.msra.mxu1 %v869_v14 }
  0x24   : > { %802 = vmatprep.subr.bf16.mxu0 %v870_v16  ;;  %829 = vmatprep.subr.bf16.mxu1 %v870_v16 }
  0x27   : > { %803 = vmatpush3.bf16.msra.mxu0 %v870_v16  ;;  %837 = vmatpush3.bf16.msra.mxu1 %v870_v16 }
  0x28   : > { %804 = vmatprep.subr.bf16.mxu0 %v871_v17  ;;  %830 = vmatprep.subr.bf16.mxu1 %v871_v17 }
  0x2b   : > { %805 = vmatpush3.bf16.msra.mxu0 %v871_v17  ;;  %838 = vmatpush3.bf16.msra.mxu1 %v871_v17 }
  0x2c   : > { %806 = vmatprep.subr.bf16.mxu0 %v872_v18  ;;  %831 = vmatprep.subr.bf16.mxu1 %v872_v18 }
  0x2f   : > { %807 = vmatpush3.bf16.msra.mxu0 %v872_v18  ;;  %839 = vmatpush3.bf16.msra.mxu1 %v872_v18 }
  0x32   : > { %809 = vmatmul.mubr.bf16.vlgmr.msra.gmra.mrb[0].mxu0 %v755_v35  ;;  %817 = vmatmul.mubr.bf16.vlgmr.msra.gmra.mrb[0].mxu1 %v759_v36 }
  0x33   : > { %812 = vmatprep.mubr.bf16.mxu0 %v756_v38  ;;  %820 = vmatprep.mubr.bf16.mxu1 %v760_v39 }
  0x3a   : > { %813 = vmatmul.mubr.bf16.gmra.mrb[4].mxu0 %v757_v47  ;;  %821 = vmatmul.mubr.bf16.gmra.mrb[4].mxu1 %v761_v48 }
 0x105   : > { %v810_v50 = vpop.f32.mrb[0].mxu0  ;;  %v818_v51 = vpop.f32.mrb[0].mxu1 }
 0x106   : > { %v602_v52 = vadd.f32 %v810_v50, %v770_v49  ;;  %v610_v53 = vadd.f32 %v818_v51, %v770_v49  ;;  %v479_v54 = vpop.f32.mrb[1].mxu0  ;;  %v511_v55 = vpop.f32.mrb[1].mxu1 }
 0x107   : > { %v600_v56 = vadd.f32 %v770_v49, %v479_v54  ;;  %v608_v57 = vadd.f32 %v770_v49, %v511_v55  ;;  %v811_v58 = vpop.f32.mrb[2].mxu0  ;;  %v819_v59 = vpop.f32.mrb[2].mxu1 }
 0x108   : > { %618 = vst [vmem:[%s996_s28 + $0x10] sm:$0xff] %v602_v52  ;;  %626 = vst [vmem:[%s996_s28 + $0x50] sm:$0xff] %v610_v53  ;;  %v603_v60 = vadd.f32 %v811_v58, %v770_v49  ;;  %v611_v61 = vadd.f32 %v819_v59, %v770_v49  ;;  %v482_v62 = vpop.f32.mrb[3].mxu0  ;;  %v514_v63 = vpop.f32.mrb[3].mxu1 }
 0x109   : > { %616 = vst [vmem:[%s996_s28] sm:$0xff] %v600_v56  ;;  %624 = vst [vmem:[%s996_s28 + $0x40] sm:$0xff] %v608_v57  ;;  %v601_v0 = vadd.f32 %v770_v49, %v482_v62  ;;  %v609_v1 = vadd.f32 %v770_v49, %v514_v63 }
 0x10a   : > { %619 = vst [vmem:[%s996_s28 + $0x18] sm:$0xff] %v603_v60  ;;  %627 = vst [vmem:[%s996_s28 + $0x58] sm:$0xff] %v611_v61 }
 0x10b   : > { %617 = vst [vmem:[%s996_s28 + $0x8] sm:$0xff] %v601_v0  ;;  %625 = vst [vmem:[%s996_s28 + $0x48] sm:$0xff] %v609_v1 }
 0x10d   : > { %v814_v2 = vpop.f32.mrb[4].mxu0  ;;  %v822_v3 = vpop.f32.mrb[4].mxu1 }
 0x10e   : > { %v606_v4 = vadd.f32 %v814_v2, %v770_v49  ;;  %v614_v5 = vadd.f32 %v822_v3, %v770_v49  ;;  %v495_v6 = vpop.f32.mrb[5].mxu0  ;;  %v527_v7 = vpop.f32.mrb[5].mxu1 }
 0x10f   : > { %v604_v8 = vadd.f32 %v770_v49, %v495_v6  ;;  %v612_v9 = vadd.f32 %v770_v49, %v527_v7  ;;  %v815_v10 = vpop.f32.mrb[6].mxu0  ;;  %v823_v11 = vpop.f32.mrb[6].mxu1 }
 0x110   : > { %622 = vst [vmem:[%s996_s28 + $0x30] sm:$0xff] %v606_v4  ;;  %630 = vst [vmem:[%s996_s28 + $0x70] sm:$0xff] %v614_v5  ;;  %v607_v12 = vadd.f32 %v815_v10, %v770_v49  ;;  %v615_v13 = vadd.f32 %v823_v11, %v770_v49  ;;  %v498_v14 = vpop.f32.mrb[7].mxu0  ;;  %v530_v15 = vpop.f32.mrb[7].mxu1 }
 0x111   : > { %620 = vst [vmem:[%s996_s28 + $0x20] sm:$0xff] %v604_v8  ;;  %628 = vst [vmem:[%s996_s28 + $0x60] sm:$0xff] %v612_v9  ;;  %v605_v16 = vadd.f32 %v770_v49, %v498_v14  ;;  %v613_v17 = vadd.f32 %v770_v49, %v530_v15 }
 0x112   : > { %623 = vst [vmem:[%s996_s28 + $0x38] sm:$0xff] %v607_v12  ;;  %631 = vst [vmem:[%s996_s28 + $0x78] sm:$0xff] %v615_v13 }
 0x113   : > { %621 = vst [vmem:[%s996_s28 + $0x28] sm:$0xff] %v605_v16  ;;  %629 = vst [vmem:[%s996_s28 + $0x68] sm:$0xff] %v613_v17 }
 0x114 PF: > { %s13_s14 = sadd.s32 1, %s895_s14   ;;  %s1027_s12 = smov %s891_s13 }
 0x115   : > { %p10_p5 = scmp.ge.s32.totalorder %s13_s14, 6   ;;  %s1028_s13 = smov %s1030_s15 }
 0x117   :  { %12 = sbr.rel (!%p10_p5) target bundleno = 2 (0x2), region = 73 }

// kernel: _lambda_.45
= control target key start
LH: loop header
LB: loop body
LE: loop exit
PB: predicated region body
PF: predicated region fallthrough
CT: control target
= control target key end

     0   :  { %vm14_vm0 = vcmask 57344   ;;  %vm82_vm1 = vcmask 64512   ;;  %v428_v0 = vmov 0.0   ;;  %s1318_s0 = inlined_call_operand.vmem [shape: f32[512,8], index: 0, kind: input, shape index: {}]   ;;  %s1319_s1 = inlined_call_operand.vmem [shape: f32[1,8], index: 1, kind: output, shape index: {0}]   ;;  %s1320_s2 = inlined_call_operand.vmem [shape: f32[1,8], index: 2, kind: output, shape index: {1}]  }
   0x1   :  { %15 = vst.msk [vmem:[%s1319_s1] sm:$0x1] %vm14_vm0, %v428_v0  ;;  %16 = vst.msk [vmem:[%s1320_s2] sm:$0x1] %vm14_vm0, %v428_v0  ;;  %v455_v1 = vld [vmem:[%s1318_s0] sm:$0xff]  ;;  %v460_v2 = vld [vmem:[%s1318_s0 + $0x8] sm:$0xff] }
   0x2   :  { %v465_v3 = vld [vmem:[%s1318_s0 + $0x10] sm:$0xff]  ;;  %v83_v4 = vsel %vm82_vm1, %v455_v1, 0.0  ;;  %v84_v5 = vsel %vm82_vm1, %v460_v2, 0.0  ;;  %v476_v7 = vld [vmem:[%s1318_s0 + $0x18] sm:$0xff]  ;;  %v483_v10 = vld [vmem:[%s1318_s0 + $0x20] sm:$0xff] }
   0x3   :  { %v86_v6 = vsel %vm82_vm1, %v465_v3, 0.0  ;;  %v85_v8 = vadd.f32 %v84_v5, %v83_v4  ;;  %v88_v9 = vsel %vm82_vm1, %v476_v7, 0.0  ;;  %v90_v12 = vsel %vm82_vm1, %v483_v10, 0.0  ;;  %v490_v13 = vld [vmem:[%s1318_s0 + $0x28] sm:$0xff]  ;;  %v497_v16 = vld [vmem:[%s1318_s0 + $0x30] sm:$0xff]  ;;  %v502_v18 = vld [vmem:[%s1318_s0 + $0x38] sm:$0xff] }
   0x4   :  { %v92_v15 = vsel %vm82_vm1, %v490_v13, 0.0  ;;  %v507_v19 = vld [vmem:[%s1318_s0 + $0x40] sm:$0xff]  ;;  %v94_v20 = vsel %vm82_vm1, %v497_v16, 0.0  ;;  %v514_v21 = vld [vmem:[%s1318_s0 + $0x48] sm:$0xff]  ;;  %v519_v22 = vld [vmem:[%s1318_s0 + $0x50] sm:$0xff]  ;;  %v96_v25 = vsel %vm82_vm1, %v502_v18, 0.0 }
   0x5   :  { %v87_v11 = vadd.f32 %v86_v6, %v85_v8  ;;  %v524_v23 = vld [vmem:[%s1318_s0 + $0x58] sm:$0xff]  ;;  %v98_v26 = vsel %vm82_vm1, %v507_v19, 0.0  ;;  %v533_v27 = vld [vmem:[%s1318_s0 + $0x108] sm:$0xff]  ;;  %v538_v28 = vld [vmem:[%s1318_s0 + $0x110] sm:$0xff]  ;;  %v100_v30 = vsel %vm82_vm1, %v514_v21, 0.0  ;;  %v102_v31 = vsel %vm82_vm1, %v519_v22, 0.0 }
   0x6   :  { %v543_v29 = vld [vmem:[%s1318_s0 + $0x118] sm:$0xff]  ;;  %v551_v32 = vsel %vm82_vm1, %v524_v23, 0.0  ;;  %v556_v33 = vld [vmem:[%s1318_s0 + $0x120] sm:$0xff]  ;;  %v561_v34 = vld [vmem:[%s1318_s0 + $0x128] sm:$0xff]  ;;  %v570_v37 = vsel %vm82_vm1, %v533_v27, 0.0  ;;  %v574_v38 = vsel %vm82_vm1, %v538_v28, 0.0 }
   0x7   :  { %v89_v14 = vadd.f32 %v88_v9, %v87_v11  ;;  %v566_v35 = vld [vmem:[%s1318_s0 + $0x130] sm:$0xff]  ;;  %1339 = vst [vmem:[#allocation2_spill] sm:$0xff] %v570_v37  ;;  %1340 = vst [vmem:[#allocation3_spill] sm:$0xff] %v574_v38  ;;  %v578_v39 = vsel %vm82_vm1, %v543_v29, 0.0  ;;  %v583_v40 = vld [vmem:[%s1318_s0 + $0x138] sm:$0xff]  ;;  %v597_v43 = vsel %vm82_vm1, %v556_v33, 0.0  ;;  %v222_v37 = vmul.f32 %v465_v3, %v465_v3 }
   0x8   :  { %1341 = vst [vmem:[#allocation4_spill] sm:$0xff] %v578_v39  ;;  %v588_v41 = vld [vmem:[%s1318_s0 + $0x140] sm:$0xff]  ;;  %v593_v42 = vld [vmem:[%s1318_s0 + $0x148] sm:$0xff]  ;;  %1342 = vst [vmem:[#allocation5_spill] sm:$0xff] %v597_v43  ;;  %v601_v44 = vsel %vm82_vm1, %v561_v34, 0.0  ;;  %v605_v45 = vsel %vm82_vm1, %v566_v35, 0.0 }
   0x9   :  { %v91_v17 = vadd.f32 %v90_v12, %v89_v14  ;;  %1343 = vst [vmem:[#allocation6_spill] sm:$0xff] %v601_v44  ;;  %1344 = vst [vmem:[#allocation7_spill] sm:$0xff] %v605_v45  ;;  %v610_v46 = vld [vmem:[%s1318_s0 + $0x150] sm:$0xff]  ;;  %v615_v47 = vld [vmem:[%s1318_s0 + $0x158] sm:$0xff]  ;;  %v624_v50 = vsel %vm82_vm1, %v583_v40, 0.0  ;;  %v628_v51 = vsel %vm82_vm1, %v588_v41, 0.0 }
   0xa   :  { %v620_v48 = vld [vmem:[%s1318_s0 + $0x160] sm:$0xff]  ;;  %1345 = vst [vmem:[#allocation8_spill] sm:$0xff] %v624_v50  ;;  %1346 = vst [vmem:[#allocation9_spill] sm:$0xff] %v628_v51  ;;  %v632_v52 = vsel %vm82_vm1, %v593_v42, 0.0  ;;  %v637_v53 = vld [vmem:[%s1318_s0 + $0x168] sm:$0xff]  ;;  %v651_v56 = vsel %vm82_vm1, %v610_v46, 0.0 }
   0xb   :  { %v93_v24 = vadd.f32 %v92_v15, %v91_v17  ;;  %1347 = vst [vmem:[#allocation10_spill] sm:$0xff] %v632_v52  ;;  %v642_v54 = vld [vmem:[%s1318_s0 + $0x170] sm:$0xff]  ;;  %v647_v55 = vld [vmem:[%s1318_s0 + $0x178] sm:$0xff]  ;;  %1348 = vst [vmem:[#allocation11_spill] sm:$0xff] %v651_v56  ;;  %v655_v57 = vsel %vm82_vm1, %v615_v47, 0.0  ;;  %v659_v58 = vsel %vm82_vm1, %v620_v48, 0.0 }
   0xc   :  { %1349 = vst [vmem:[#allocation12_spill] sm:$0xff] %v655_v57  ;;  %1350 = vst [vmem:[#allocation13_spill] sm:$0xff] %v659_v58  ;;  %v664_v59 = vld [vmem:[%s1318_s0 + $0x180] sm:$0xff]  ;;  %v669_v60 = vld [vmem:[%s1318_s0 + $0x188] sm:$0xff]  ;;  %v678_v63 = vsel %vm82_vm1, %v637_v53, 0.0  ;;  %v682_v0 = vsel %vm82_vm1, %v642_v54, 0.0 }
   0xd   :  { %v95_v36 = vadd.f32 %v94_v20, %v93_v24  ;;  %v674_v61 = vld [vmem:[%s1318_s0 + $0x190] sm:$0xff]  ;;  %1351 = vst [vmem:[#allocation14_spill] sm:$0xff] %v678_v63  ;;  %1352 = vst [vmem:[#allocation15_spill] sm:$0xff] %v682_v0  ;;  %v686_v4 = vsel %vm82_vm1, %v647_v55, 0.0  ;;  %v691_v5 = vld [vmem:[%s1318_s0 + $0x198] sm:$0xff]  ;;  %v705_v9 = vsel %vm82_vm1, %v664_v59, 0.0 }
   0xe   :  { %1353 = vst [vmem:[#allocation16_spill] sm:$0xff] %v686_v4  ;;  %v696_v6 = vld [vmem:[%s1318_s0 + $0x1a0] sm:$0xff]  ;;  %v701_v8 = vld [vmem:[%s1318_s0 + $0x1a8] sm:$0xff]  ;;  %1354 = vst [vmem:[#allocation17_spill] sm:$0xff] %v705_v9  ;;  %v709_v11 = vsel %vm82_vm1, %v669_v60, 0.0  ;;  %v713_v12 = vsel %vm82_vm1, %v674_v61, 0.0 }
   0xf   :  { %v97_v49 = vadd.f32 %v96_v25, %v95_v36  ;;  %1355 = vst [vmem:[#allocation18_spill] sm:$0xff] %v709_v11  ;;  %1356 = vst [vmem:[#allocation19_spill] sm:$0xff] %v713_v12  ;;  %v718_v14 = vld [vmem:[%s1318_s0 + $0x60] sm:$0xff]  ;;  %v723_v15 = vld [vmem:[%s1318_s0 + $0x1b0] sm:$0xff]  ;;  %v737_v25 = vsel %vm82_vm1, %v691_v5, 0.0  ;;  %v745_v36 = vsel %vm82_vm1, %v701_v8, 0.0 }
  0x10   :  { %v728_v17 = vld [vmem:[%s1318_s0 + $0x1b8] sm:$0xff]  ;;  %v733_v20 = vld [vmem:[%s1318_s0 + $0x1c0] sm:$0xff]  ;;  %1357 = vst [vmem:[#allocation20_spill] sm:$0xff] %v737_v25  ;;  %1359 = vst [vmem:[#allocation22_spill] sm:$0xff] %v745_v36 }
  0x11   :  { %v99_v62 = vadd.f32 %v98_v26, %v97_v49  ;;  %v741_v26 = vsel %vm82_vm1, %v696_v6, 0.0  ;;  %v750_v49 = vld [vmem:[%s1318_s0 + $0x1c8] sm:$0xff]  ;;  %v768_v36 = vsel %vm82_vm1, %v728_v17, 0.0  ;;  %v772_v25 = vsel %vm82_vm1, %v733_v20, 0.0  ;;  %v777_v12 = vld [vmem:[%s1318_s0 + $0x1e0] sm:$0xff]  ;;  %v804_v0 = vld [vmem:[%s1318_s0 + $0x1f8] sm:$0xff] }
  0x12   :  { %1358 = vst [vmem:[#allocation21_spill] sm:$0xff] %v741_v26  ;;  %v764_v26 = vsel %vm82_vm1, %v723_v15, 0.0  ;;  %1361 = vst [vmem:[#allocation24_spill] sm:$0xff] %v768_v36  ;;  %v782_v11 = vld [vmem:[%s1318_s0 + $0x1e8] sm:$0xff]  ;;  %v791_v9 = vsel %vm82_vm1, %v750_v49, 0.0  ;;  %v826_v58 = vsel %vm82_vm1, %v804_v0, 0.0 }
  0x13   :  { %v101_v24 = vadd.f32 %v100_v30, %v99_v62  ;;  %v755_v30 = vld [vmem:[%s1318_s0 + $0x1d0] sm:$0xff]  ;;  %v760_v62 = vld [vmem:[%s1318_s0 + $0x1d8] sm:$0xff]  ;;  %1360 = vst [vmem:[#allocation23_spill] sm:$0xff] %v764_v26  ;;  %1362 = vst [vmem:[#allocation25_spill] sm:$0xff] %v772_v25 }
  0x14   :  { %v787_v26 = vld [vmem:[%s1318_s0 + $0x1f0] sm:$0xff]  ;;  %1364 = vst [vmem:[#allocation27_spill] sm:$0xff] %v791_v9  ;;  %v795_v25 = vsel %vm82_vm1, %v755_v30, 0.0  ;;  %v799_v4 = vsel %vm82_vm1, %v760_v62, 0.0  ;;  %1367 = vst [vmem:[#allocation30_spill] sm:$0xff] %v804_v0  ;;  %v814_v9 = vsel %vm82_vm1, %v782_v11, 0.0 }
  0x15   :  { %1363 = vst [vmem:[#allocation26_spill] sm:$0xff] %v787_v26  ;;  %v103_v36 = vadd.f32 %v102_v31, %v101_v24  ;;  %1365 = vst [vmem:[#allocation28_spill] sm:$0xff] %v795_v25  ;;  %v106_v31 = vsel %vm82_vm1, %v718_v14, 0.0  ;;  %v810_v24 = vsel %vm82_vm1, %v777_v12, 0.0  ;;  %v818_v25 = vsel %vm82_vm1, %v787_v26, 0.0  ;;  %v855_v56 = vld [vmem:[%s1318_s0 + $0x90] sm:$0xff] }
  0x16   :  { %1366 = vst [vmem:[#allocation29_spill] sm:$0xff] %v799_v4  ;;  %1368 = vst [vmem:[#allocation31_spill] sm:$0xff] %v810_v24  ;;  %v30_v4 = vld [vmem:[%s1318_s0 + $0x68] sm:$0xff]  ;;  %v860_v52 = vld [vmem:[%s1318_s0 + $0x98] sm:$0xff] }
  0x17   :  { %1369 = vst [vmem:[#allocation32_spill] sm:$0xff] %v814_v9  ;;  %1370 = vst [vmem:[#allocation33_spill] sm:$0xff] %v818_v25  ;;  %v105_v63 = vadd.f32 %v551_v32, %v103_v36  ;;  %v108_v24 = vsel %vm82_vm1, %v30_v4, 0.0  ;;  %v31_v9 = vld [vmem:[%s1318_s0 + $0x70] sm:$0xff]  ;;  %v835_v25 = vld [vmem:[%s1318_s0 + $0x78] sm:$0xff]  ;;  %v120_v39 = vsel %vm82_vm1, %v860_v52, 0.0 }
  0x18   :  { %1371 = vst [vmem:[#allocation34_spill] sm:$0xff] %v826_v58  ;;  %1372 = vst [vmem:[#allocation35_spill] sm:$0xff] %v835_v25  ;;  %v840_v32 = vld [vmem:[%s1318_s0 + $0x80] sm:$0xff]  ;;  %v845_v36 = vld [vmem:[%s1318_s0 + $0x88] sm:$0xff]  ;;  %v110_v58 = vsel %vm82_vm1, %v31_v9, 0.0 }
  0x19   :  { %v107_v57 = vadd.f32 %v106_v31, %v105_v63  ;;  %1373 = vst [vmem:[#allocation36_spill] sm:$0xff] %v840_v32  ;;  %1374 = vst [vmem:[#allocation37_spill] sm:$0xff] %v845_v36  ;;  %v220_v63 = vmul.f32 %v455_v1, %v455_v1  ;;  %v221_v31 = vmul.f32 %v460_v2, %v460_v2  ;;  %v865_v51 = vld [vmem:[%s1318_s0 + $0xa0] sm:$0xff]  ;;  %v112_v1 = vsel %vm82_vm1, %v835_v25, 0.0  ;;  %v876_v44 = vld [vmem:[%s1318_s0 + $0xa8] sm:$0xff] }
  0x1a   :  { %1375 = vst [vmem:[#allocation38_spill] sm:$0xff] %v855_v56  ;;  %1376 = vst [vmem:[#allocation39_spill] sm:$0xff] %v860_v52  ;;  %v114_v2 = vsel %vm82_vm1, %v840_v32, 0.0  ;;  %v116_v45 = vsel %vm82_vm1, %v845_v36, 0.0  ;;  %v881_v43 = vld [vmem:[%s1318_s0 + $0xb0] sm:$0xff]  ;;  %v122_v38 = vsel %vm82_vm1, %v865_v51, 0.0  ;;  %v223_v25 = vmul.f32 %v476_v7, %v476_v7 }
  0x1b   :  { %1377 = vst [vmem:[#allocation40_spill] sm:$0xff] %v865_v51  ;;  %v109_v50 = vadd.f32 %v108_v24, %v107_v57  ;;  %1378 = vst [vmem:[#allocation41_spill] sm:$0xff] %v876_v44  ;;  %v886_v57 = vld [vmem:[%s1318_s0 + $0xb8] sm:$0xff]  ;;  %v118_v24 = vsel %vm82_vm1, %v855_v56, 0.0  ;;  %v899_v36 = vld [vmem:[%s1318_s0 + $0xc0] sm:$0xff]  ;;  %v124_v51 = vsel %vm82_vm1, %v876_v44, 0.0 }
  0x1c   :  { %1379 = vst [vmem:[#allocation42_spill] sm:$0xff] %v881_v43  ;;  %1380 = vst [vmem:[#allocation43_spill] sm:$0xff] %v886_v57  ;;  %v904_v32 = vld [vmem:[%s1318_s0 + $0xc8] sm:$0xff]  ;;  %v909_v52 = vld [vmem:[%s1318_s0 + $0xd0] sm:$0xff]  ;;  %v915_v3 = vsel %vm82_vm1, %v881_v43, 0.0 }
  0x1d   :  { %1381 = vst [vmem:[#allocation44_spill] sm:$0xff] %v899_v36  ;;  %1382 = vst [vmem:[#allocation45_spill] sm:$0xff] %v904_v32  ;;  %v111_v56 = vadd.f32 %v110_v58, %v109_v50  ;;  %v922_v0 = vld [vmem:[%s1318_s0 + $0xd8] sm:$0xff]  ;;  %v927_v26 = vld [vmem:[%s1318_s0 + $0xe0] sm:$0xff]  ;;  %v931_v50 = vsel %vm82_vm1, %v886_v57, 0.0  ;;  %v935_v58 = vsel %vm82_vm1, %v899_v36, 0.0 }
  0x1e   :  { %1383 = vst [vmem:[#allocation46_spill] sm:$0xff] %v909_v52  ;;  %1384 = vst [vmem:[#allocation47_spill] sm:$0xff] %v922_v0  ;;  %v939_v7 = vsel %vm82_vm1, %v904_v32, 0.0  ;;  %v943_v43 = vsel %vm82_vm1, %v909_v52, 0.0  ;;  %v948_v44 = vld [vmem:[%s1318_s0 + $0xe8] sm:$0xff]  ;;  %v953_v57 = vld [vmem:[%s1318_s0 + $0xf0] sm:$0xff]  ;;  %v224_v52 = vmul.f32 %v483_v10, %v483_v10  ;;  %v228_v10 = vmul.f32 %v507_v19, %v507_v19 }
  0x1f   :  { %1385 = vst [vmem:[#allocation48_spill] sm:$0xff] %v927_v26  ;;  %1386 = vst [vmem:[#allocation49_spill] sm:$0xff] %v935_v58  ;;  %v113_v36 = vadd.f32 %v112_v1, %v111_v56  ;;  %v957_v58 = vsel %vm82_vm1, %v922_v0, 0.0  ;;  %v961_v32 = vsel %vm82_vm1, %v927_v26, 0.0  ;;  %v225_v56 = vmul.f32 %v490_v13, %v490_v13 }
  0x20   :  { %1387 = vst [vmem:[#allocation50_spill] sm:$0xff] %v939_v7  ;;  %1388 = vst [vmem:[#allocation51_spill] sm:$0xff] %v943_v43  ;;  %v967_v43 = vsel %vm82_vm1, %v948_v44, 0.0  ;;  %v971_v7 = vsel %vm82_vm1, %v953_v57, 0.0  ;;  %v226_v1 = vmul.f32 %v497_v16, %v497_v16  ;;  %v227_v26 = vmul.f32 %v502_v18, %v502_v18 }
  0x21   :  { %1389 = vst [vmem:[#allocation52_spill] sm:$0xff] %v948_v44  ;;  %1390 = vst [vmem:[#allocation53_spill] sm:$0xff] %v953_v57  ;;  %v115_v0 = vadd.f32 %v114_v2, %v113_v36  ;;  %v229_v44 = vmul.f32 %v514_v21, %v514_v21  ;;  %v230_v57 = vmul.f32 %v519_v22, %v519_v22 }
  0x22   :  { %1391 = vst [vmem:[#allocation54_spill] sm:$0xff] %v971_v7  ;;  %v231_v7 = vmul.f32 %v524_v23, %v524_v23  ;;  %v232_v13 = vmul.f32 %v718_v14, %v718_v14  ;;  %v989_v16 = vmul.f32 %v30_v4, %v30_v4  ;;  %v991_v2 = vmul.f32 %v31_v9, %v31_v9 }
  0x23   :  { %v117_v36 = vadd.f32 %v116_v45, %v115_v0  ;;  %v253_v18 = vmul.f32 %v533_v27, %v533_v27  ;;  %v254_v19 = vmul.f32 %v538_v28, %v538_v28  ;;  %v255_v21 = vmul.f32 %v543_v29, %v543_v29 }
  0x24   :  { %v256_v22 = vmul.f32 %v556_v33, %v556_v33  ;;  %v257_v23 = vmul.f32 %v561_v34, %v561_v34  ;;  %v258_v45 = vmul.f32 %v566_v35, %v566_v35  ;;  %v259_v4 = vmul.f32 %v583_v40, %v583_v40 }
  0x25   :  { %v119_v0 = vadd.f32 %v118_v24, %v117_v36  ;;  %v260_v27 = vmul.f32 %v588_v41, %v588_v41  ;;  %v261_v28 = vmul.f32 %v593_v42, %v593_v42  ;;  %v262_v29 = vmul.f32 %v610_v46, %v610_v46 }
  0x26   :  { %v263_v33 = vmul.f32 %v615_v47, %v615_v47  ;;  %v284_v34 = vsel %vm82_vm1, %v220_v63, 0.0  ;;  %v285_v35 = vsel %vm82_vm1, %v221_v31, 0.0  ;;  %v264_v40 = vmul.f32 %v620_v48, %v620_v48 }
  0x27   :  { %v121_v9 = vadd.f32 %v120_v39, %v119_v0  ;;  %v286_v14 = vadd.f32 %v285_v35, %v284_v34  ;;  %v287_v41 = vsel %vm82_vm1, %v222_v37, 0.0  ;;  %v265_v42 = vmul.f32 %v637_v53, %v637_v53  ;;  %v1392_v0 = vld [vmem:[#allocation26_spill] sm:$0xff] }
  0x28   :  { %v266_v46 = vmul.f32 %v642_v54, %v642_v54  ;;  %v267_v47 = vmul.f32 %v647_v55, %v647_v55  ;;  %v289_v63 = vsel %vm82_vm1, %v223_v25, 0.0  ;;  %v268_v39 = vmul.f32 %v664_v59, %v664_v59  ;;  %v1393_v34 = vld [vmem:[#allocation30_spill] sm:$0xff] }
  0x29   :  { %v123_v24 = vadd.f32 %v122_v38, %v121_v9  ;;  %v269_v48 = vmul.f32 %v669_v60, %v669_v60  ;;  %v288_v31 = vadd.f32 %v287_v41, %v286_v14  ;;  %v270_v37 = vmul.f32 %v674_v61, %v674_v61  ;;  %v1394_v41 = vld [vmem:[#allocation49_spill] sm:$0xff] }
  0x2a   :  { %v271_v53 = vmul.f32 %v691_v5, %v691_v5  ;;  %v272_v54 = vmul.f32 %v696_v6, %v696_v6  ;;  %v291_v55 = vsel %vm82_vm1, %v224_v52, 0.0  ;;  %v273_v38 = vmul.f32 %v701_v8, %v701_v8 }
  0x2b   :  { %v125_v25 = vadd.f32 %v124_v51, %v123_v24  ;;  %v274_v59 = vmul.f32 %v723_v15, %v723_v15  ;;  %v290_v60 = vadd.f32 %v289_v63, %v288_v31  ;;  %v275_v36 = vmul.f32 %v728_v17, %v728_v17 }
  0x2c   :  { %v276_v61 = vmul.f32 %v733_v20, %v733_v20  ;;  %v277_v5 = vmul.f32 %v750_v49, %v750_v49  ;;  %v293_v6 = vsel %vm82_vm1, %v225_v56, 0.0  ;;  %v278_v52 = vmul.f32 %v755_v30, %v755_v30 }
  0x2d   :  { %v127_v51 = vadd.f32 %v915_v3, %v125_v25  ;;  %v279_v8 = vmul.f32 %v760_v62, %v760_v62  ;;  %v292_v15 = vadd.f32 %v291_v55, %v290_v60  ;;  %v280_v17 = vmul.f32 %v777_v12, %v777_v12  ;;  %v1396_v25 = vld [vmem:[#allocation51_spill] sm:$0xff] }
  0x2e   :  { %v281_v20 = vmul.f32 %v782_v11, %v782_v11  ;;  %v282_v49 = vmul.f32 %v1392_v0, %v1392_v0  ;;  %v295_v56 = vsel %vm82_vm1, %v226_v1, 0.0  ;;  %v283_v30 = vmul.f32 %v1393_v34, %v1393_v34  ;;  %v1398_v34 = vld [vmem:[#allocation54_spill] sm:$0xff] }
  0x2f   :  { %v129_v3 = vadd.f32 %v931_v50, %v127_v51  ;;  %v294_v35 = vadd.f32 %v293_v6, %v292_v15  ;;  %v297_v62 = vsel %vm82_vm1, %v227_v26, 0.0  ;;  %v299_v9 = vsel %vm82_vm1, %v228_v10, 0.0 }
  0x30   :  { %v301_v12 = vsel %vm82_vm1, %v229_v44, 0.0  ;;  %v303_v14 = vsel %vm82_vm1, %v230_v57, 0.0  ;;  %v305_v11 = vsel %vm82_vm1, %v231_v7, 0.0  ;;  %v307_v1 = vsel %vm82_vm1, %v232_v13, 0.0  ;;  %v1395_v7 = vld [vmem:[#allocation50_spill] sm:$0xff] }
  0x31   :  { %v131_v63 = vadd.f32 %v1394_v41, %v129_v3  ;;  %v296_v24 = vadd.f32 %v295_v56, %v294_v35  ;;  %v1072_v50 = vsel %vm82_vm1, %v253_v18, 0.0  ;;  %v1075_v31 = vsel %vm82_vm1, %v254_v19, 0.0  ;;  %v1397_v56 = vld [vmem:[#allocation35_spill] sm:$0xff] }
  0x32   :  { %v1078_v26 = vsel %vm82_vm1, %v255_v21, 0.0  ;;  %v1081_v44 = vsel %vm82_vm1, %v256_v22, 0.0  ;;  %v1084_v57 = vsel %vm82_vm1, %v257_v23, 0.0  ;;  %v1088_v13 = vsel %vm82_vm1, %v258_v45, 0.0 }
  0x33   :  { %v133_v10 = vadd.f32 %v1395_v7, %v131_v63  ;;  %v298_v55 = vadd.f32 %v297_v62, %v296_v24  ;;  %v1091_v18 = vsel %vm82_vm1, %v259_v4, 0.0  ;;  %v1094_v19 = vsel %vm82_vm1, %v260_v27, 0.0  ;;  %v1399_v62 = vld [vmem:[#allocation36_spill] sm:$0xff] }
  0x34   :  { %v1097_v21 = vsel %vm82_vm1, %v261_v28, 0.0  ;;  %v1100_v22 = vsel %vm82_vm1, %v262_v29, 0.0  ;;  %v1103_v23 = vsel %vm82_vm1, %v263_v33, 0.0  ;;  %v1107_v45 = vsel %vm82_vm1, %v264_v40, 0.0 }
  0x35   :  { %v135_v60 = vadd.f32 %v1396_v25, %v133_v10  ;;  %v300_v6 = vadd.f32 %v299_v9, %v298_v55  ;;  %v1110_v4 = vsel %vm82_vm1, %v265_v42, 0.0  ;;  %v1113_v27 = vsel %vm82_vm1, %v266_v46, 0.0  ;;  %v1401_v10 = vld [vmem:[#allocation38_spill] sm:$0xff] }
  0x36   :  { %v1116_v28 = vsel %vm82_vm1, %v267_v47, 0.0  ;;  %v1119_v29 = vsel %vm82_vm1, %v268_v39, 0.0  ;;  %v1122_v33 = vsel %vm82_vm1, %v269_v48, 0.0  ;;  %v1126_v40 = vsel %vm82_vm1, %v270_v37, 0.0  ;;  %v1402_v25 = vld [vmem:[#allocation2_spill] sm:$0xff] }
  0x37   :  { %v137_v51 = vadd.f32 %v957_v58, %v135_v60  ;;  %v302_v15 = vadd.f32 %v301_v12, %v300_v6  ;;  %v1129_v42 = vsel %vm82_vm1, %v271_v53, 0.0  ;;  %v1132_v46 = vsel %vm82_vm1, %v272_v54, 0.0 }
  0x38   :  { %v1135_v47 = vsel %vm82_vm1, %v273_v38, 0.0  ;;  %v1138_v39 = vsel %vm82_vm1, %v274_v59, 0.0  ;;  %v1141_v48 = vsel %vm82_vm1, %v275_v36, 0.0  ;;  %v1145_v37 = vsel %vm82_vm1, %v276_v61, 0.0 }
  0x39   :  { %v139_v58 = vadd.f32 %v961_v32, %v137_v51  ;;  %v304_v0 = vadd.f32 %v303_v14, %v302_v15  ;;  %v1148_v53 = vsel %vm82_vm1, %v277_v5, 0.0  ;;  %v1151_v54 = vsel %vm82_vm1, %v278_v52, 0.0  ;;  %v1165_v32 = vld [vmem:[%s1318_s0 + $0xf8] sm:$0xff]  ;;  %v1403_v51 = vld [vmem:[#allocation39_spill] sm:$0xff] }
  0x3a   :  { %v1154_v38 = vsel %vm82_vm1, %v279_v8, 0.0  ;;  %v1157_v59 = vsel %vm82_vm1, %v280_v17, 0.0  ;;  %v1160_v36 = vsel %vm82_vm1, %v281_v20, 0.0  ;;  %v1169_v52 = vsel %vm82_vm1, %v282_v49, 0.0 }
  0x3b   :  { %v141_v61 = vadd.f32 %v967_v43, %v139_v58  ;;  %v306_v5 = vadd.f32 %v305_v11, %v304_v0  ;;  %v1172_v8 = vsel %vm82_vm1, %v283_v30, 0.0  ;;  %v144_v17 = vsel %vm82_vm1, %v1165_v32, 0.0  ;;  %v1183_v43 = vld [vmem:[%s1318_s0 + $0x100] sm:$0xff]  ;;  %v1404_v58 = vld [vmem:[#allocation3_spill] sm:$0xff] }
  0x3c   :  { %v235_v20 = vmul.f32 %v1397_v56, %v1397_v56  ;;  %v309_v3 = vsel %vm82_vm1, %v989_v16, 0.0  ;;  %v146_v30 = vsel %vm82_vm1, %v1183_v43, 0.0  ;;  %v236_v9 = vmul.f32 %v1399_v62, %v1399_v62  ;;  %v1400_v16 = vld [vmem:[#allocation37_spill] sm:$0xff] }
  0x3d   :  { %v143_v49 = vadd.f32 %v1398_v34, %v141_v61  ;;  %v308_v35 = vadd.f32 %v307_v1, %v306_v5  ;;  %v311_v12 = vsel %vm82_vm1, %v991_v2, 0.0  ;;  %v237_v41 = vmul.f32 %v1400_v16, %v1400_v16  ;;  %v1405_v5 = vld [vmem:[#allocation40_spill] sm:$0xff]  ;;  %v1408_v62 = vld [vmem:[#allocation5_spill] sm:$0xff] }
  0x3e   :  { %v313_v63 = vsel %vm82_vm1, %v235_v20, 0.0  ;;  %v238_v1 = vmul.f32 %v1401_v10, %v1401_v10  ;;  %v315_v55 = vsel %vm82_vm1, %v236_v9, 0.0  ;;  %v239_v2 = vmul.f32 %v1403_v51, %v1403_v51  ;;  %v1406_v20 = vld [vmem:[#allocation4_spill] sm:$0xff] }
  0x3f   :  { %v145_v14 = vadd.f32 %v144_v17, %v143_v49  ;;  %v310_v11 = vadd.f32 %v309_v3, %v308_v35  ;;  %v317_v15 = vsel %vm82_vm1, %v237_v41, 0.0  ;;  %v240_v17 = vmul.f32 %v1405_v5, %v1405_v5  ;;  %v1407_v49 = vld [vmem:[#allocation41_spill] sm:$0xff]  ;;  %v1410_v41 = vld [vmem:[#allocation6_spill] sm:$0xff] }
  0x40   :  { %v319_v56 = vsel %vm82_vm1, %v238_v1, 0.0  ;;  %v241_v35 = vmul.f32 %v1407_v49, %v1407_v49 }
  0x41   :  { %v147_v24 = vadd.f32 %v146_v30, %v145_v14  ;;  %v312_v7 = vadd.f32 %v311_v12, %v310_v11  ;;  %v321_v30 = vsel %vm82_vm1, %v239_v2, 0.0  ;;  %v1409_v14 = vld [vmem:[#allocation42_spill] sm:$0xff]  ;;  %v323_v16 = vsel %vm82_vm1, %v240_v17, 0.0 }
  0x42   :  { %v242_v11 = vmul.f32 %v1409_v14, %v1409_v14  ;;  %v325_v1 = vsel %vm82_vm1, %v241_v35, 0.0 }
  0x43   :  { %v149_v60 = vadd.f32 %v1402_v25, %v147_v24  ;;  %v314_v6 = vadd.f32 %v313_v63, %v312_v7  ;;  %v1411_v7 = vld [vmem:[#allocation43_spill] sm:$0xff] }
  0x44   :  { %v243_v10 = vmul.f32 %v1411_v7, %v1411_v7  ;;  %v327_v2 = vsel %vm82_vm1, %v242_v11, 0.0 }
  0x45   :  { %v151_v0 = vadd.f32 %v1404_v58, %v149_v60  ;;  %v316_v61 = vadd.f32 %v315_v55, %v314_v6  ;;  %v1412_v55 = vld [vmem:[#allocation7_spill] sm:$0xff]  ;;  %v1413_v6 = vld [vmem:[#allocation44_spill] sm:$0xff] }
  0x46   :  { %v244_v51 = vmul.f32 %v1413_v6, %v1413_v6  ;;  %v329_v17 = vsel %vm82_vm1, %v243_v10, 0.0 }
  0x47   :  { %v153_v3 = vadd.f32 %v1406_v20, %v151_v0  ;;  %v318_v34 = vadd.f32 %v317_v15, %v316_v61  ;;  %v1414_v15 = vld [vmem:[#allocation8_spill] sm:$0xff]  ;;  %v1415_v61 = vld [vmem:[#allocation45_spill] sm:$0xff] }
  0x48   :  { %v245_v5 = vmul.f32 %v1415_v61, %v1415_v61  ;;  %v331_v35 = vsel %vm82_vm1, %v244_v51, 0.0 }
  0x49   :  { %v155_v9 = vadd.f32 %v1408_v62, %v153_v3  ;;  %v320_v12 = vadd.f32 %v319_v56, %v318_v34  ;;  %v1416_v56 = vld [vmem:[#allocation9_spill] sm:$0xff]  ;;  %v1417_v34 = vld [vmem:[#allocation46_spill] sm:$0xff] }
  0x4a   :  { %v246_v49 = vmul.f32 %v1417_v34, %v1417_v34  ;;  %v333_v11 = vsel %vm82_vm1, %v245_v5, 0.0 }
  0x4b   :  { %v157_v63 = vadd.f32 %v1410_v41, %v155_v9  ;;  %v322_v24 = vadd.f32 %v321_v30, %v320_v12  ;;  %v1418_v30 = vld [vmem:[#allocation10_spill] sm:$0xff]  ;;  %v1419_v12 = vld [vmem:[#allocation47_spill] sm:$0xff] }
  0x4c   :  { %v247_v14 = vmul.f32 %v1419_v12, %v1419_v12  ;;  %v335_v10 = vsel %vm82_vm1, %v246_v49, 0.0  ;;  %v1427_v49 = vld [vmem:[#allocation15_spill] sm:$0xff]  ;;  %v1428_v12 = vld [vmem:[#allocation16_spill] sm:$0xff] }
  0x4d   :  { %v159_v25 = vadd.f32 %v1412_v55, %v157_v63  ;;  %v324_v60 = vadd.f32 %v323_v16, %v322_v24  ;;  %v1420_v16 = vld [vmem:[#allocation11_spill] sm:$0xff]  ;;  %v1421_v24 = vld [vmem:[#allocation48_spill] sm:$0xff] }
  0x4e   :  { %v248_v7 = vmul.f32 %v1421_v24, %v1421_v24  ;;  %v337_v51 = vsel %vm82_vm1, %v247_v14, 0.0 }
  0x4f   :  { %v161_v58 = vadd.f32 %v1414_v15, %v159_v25  ;;  %v326_v0 = vadd.f32 %v325_v1, %v324_v60  ;;  %v1422_v1 = vld [vmem:[#allocation12_spill] sm:$0xff] }
  0x50   :  { %v1423_v60 = vld [vmem:[#allocation52_spill] sm:$0xff]  ;;  %v339_v5 = vsel %vm82_vm1, %v248_v7, 0.0  ;;  %v1430_v7 = vld [vmem:[#allocation18_spill] sm:$0xff] }
  0x51   :  { %v163_v20 = vadd.f32 %v1416_v56, %v161_v58  ;;  %v328_v3 = vadd.f32 %v327_v2, %v326_v0  ;;  %v249_v6 = vmul.f32 %v1423_v60, %v1423_v60  ;;  %v1424_v2 = vld [vmem:[#allocation13_spill] sm:$0xff] }
  0x52   :  { %v1425_v0 = vld [vmem:[#allocation53_spill] sm:$0xff] }
  0x53   :  { %v165_v62 = vadd.f32 %v1418_v30, %v163_v20  ;;  %v330_v9 = vadd.f32 %v329_v17, %v328_v3  ;;  %v250_v61 = vmul.f32 %v1425_v0, %v1425_v0  ;;  %v1426_v17 = vld [vmem:[#allocation14_spill] sm:$0xff]  ;;  %v251_v3 = vmul.f32 %v1165_v32, %v1165_v32 }
  0x54   :  { %v341_v34 = vsel %vm82_vm1, %v249_v6, 0.0  ;;  %v1432_v6 = vld [vmem:[#allocation20_spill] sm:$0xff]  ;;  %v1434_v0 = vld [vmem:[#allocation22_spill] sm:$0xff] }
  0x55   :  { %v167_v41 = vadd.f32 %v1420_v16, %v165_v62  ;;  %v332_v63 = vadd.f32 %v331_v35, %v330_v9  ;;  %v252_v62 = vmul.f32 %v1183_v43, %v1183_v43  ;;  %v343_v9 = vsel %vm82_vm1, %v250_v61, 0.0 }
  0x56   :  { %v345_v16 = vsel %vm82_vm1, %v251_v3, 0.0  ;;  %v1436_v3 = vld [vmem:[#allocation24_spill] sm:$0xff] }
  0x57   :  { %v169_v55 = vadd.f32 %v1422_v1, %v167_v41  ;;  %v334_v25 = vadd.f32 %v333_v11, %v332_v63  ;;  %v1429_v41 = vld [vmem:[#allocation17_spill] sm:$0xff]  ;;  %v347_v32 = vsel %vm82_vm1, %v252_v62, 0.0  ;;  %v1438_v62 = vld [vmem:[#allocation27_spill] sm:$0xff] }
  0x59   :  { %v171_v15 = vadd.f32 %v1424_v2, %v169_v55  ;;  %v336_v58 = vadd.f32 %v335_v10, %v334_v25  ;;  %v1431_v55 = vld [vmem:[#allocation19_spill] sm:$0xff]  ;;  %v1433_v2 = vld [vmem:[#allocation21_spill] sm:$0xff] }
  0x5b   :  { %v173_v56 = vadd.f32 %v1426_v17, %v171_v15  ;;  %v338_v20 = vadd.f32 %v337_v51, %v336_v58  ;;  %v1435_v17 = vld [vmem:[#allocation23_spill] sm:$0xff] }
  0x5d   :  { %v175_v35 = vadd.f32 %v1427_v49, %v173_v56  ;;  %v340_v30 = vadd.f32 %v339_v5, %v338_v20 }
  0x5f   :  { %v177_v14 = vadd.f32 %v1428_v12, %v175_v35  ;;  %v342_v11 = vadd.f32 %v341_v34, %v340_v30  ;;  %v1437_v35 = vld [vmem:[#allocation25_spill] sm:$0xff]  ;;  %v1439_v12 = vld [vmem:[#allocation28_spill] sm:$0xff] }
  0x61   :  { %v179_v63 = vadd.f32 %v1429_v41, %v177_v14  ;;  %v344_v24 = vadd.f32 %v343_v9, %v342_v11  ;;  %v1440_v11 = vld [vmem:[#allocation29_spill] sm:$0xff]  ;;  %v1441_v41 = vld [vmem:[#allocation31_spill] sm:$0xff] }
  0x63   :  { %v181_v10 = vadd.f32 %v1430_v7, %v179_v63  ;;  %v346_v1 = vadd.f32 %v345_v16, %v344_v24  ;;  %v1442_v24 = vld [vmem:[#allocation32_spill] sm:$0xff]  ;;  %v1443_v7 = vld [vmem:[#allocation33_spill] sm:$0xff] }
  0x65   :  { %v183_v25 = vadd.f32 %v1431_v55, %v181_v10  ;;  %v348_v60 = vadd.f32 %v347_v32, %v346_v1  ;;  %v1444_v1 = vld [vmem:[#allocation34_spill] sm:$0xff] }
  0x67   :  { %v185_v43 = vadd.f32 %v1432_v6, %v183_v25  ;;  %v350_v51 = vadd.f32 %v1072_v50, %v348_v60 }
  0x69   :  { %v187_v15 = vadd.f32 %v1433_v2, %v185_v43  ;;  %v352_v58 = vadd.f32 %v1075_v31, %v350_v51 }
  0x6b   :  { %v189_v61 = vadd.f32 %v1434_v0, %v187_v15  ;;  %v354_v5 = vadd.f32 %v1078_v26, %v352_v58 }
  0x6d   :  { %v191_v56 = vadd.f32 %v1435_v17, %v189_v61  ;;  %v356_v20 = vadd.f32 %v1081_v44, %v354_v5 }
  0x6f   :  { %v193_v34 = vadd.f32 %v1436_v3, %v191_v56  ;;  %v358_v49 = vadd.f32 %v1084_v57, %v356_v20 }
  0x71   :  { %v195_v30 = vadd.f32 %v1437_v35, %v193_v34  ;;  %v360_v50 = vadd.f32 %v1088_v13, %v358_v49 }
  0x73   :  { %v197_v9 = vadd.f32 %v1438_v62, %v195_v30  ;;  %v362_v31 = vadd.f32 %v1091_v18, %v360_v50 }
  0x75   :  { %v199_v14 = vadd.f32 %v1439_v12, %v197_v9  ;;  %v364_v26 = vadd.f32 %v1094_v19, %v362_v31 }
  0x77   :  { %v201_v16 = vadd.f32 %v1440_v11, %v199_v14  ;;  %v366_v44 = vadd.f32 %v1097_v21, %v364_v26 }
  0x79   :  { %v203_v63 = vadd.f32 %v1441_v41, %v201_v16  ;;  %v368_v57 = vadd.f32 %v1100_v22, %v366_v44 }
  0x7b   :  { %v205_v32 = vadd.f32 %v1442_v24, %v203_v63  ;;  %v370_v13 = vadd.f32 %v1103_v23, %v368_v57 }
  0x7d   :  { %v207_v10 = vadd.f32 %v1443_v7, %v205_v32  ;;  %v372_v18 = vadd.f32 %v1107_v45, %v370_v13  ;;  %v81_v45 = vld [vmem:[%s1319_s1] sm:$0x1] }
  0x7f   :  { %v209_v55 = vadd.f32 %v1444_v1, %v207_v10  ;;  %v374_v19 = vadd.f32 %v1110_v4, %v372_v18 }
  0x81   :  { %v210_v25 = vrot.slane %v209_v55, 4  ;;  %v376_v60 = vadd.f32 %v1113_v27, %v374_v19 }
  0x83   :  { %v211_v21 = vadd.f32 %v210_v25, %v209_v55  ;;  %v378_v6 = vadd.f32 %v1116_v28, %v376_v60 }
  0x85   :  { %v212_v43 = vrot.slane %v211_v21, 2  ;;  %v380_v22 = vadd.f32 %v1119_v29, %v378_v6 }
  0x87   :  { %v213_v51 = vadd.f32 %v212_v43, %v211_v21  ;;  %v382_v23 = vadd.f32 %v1122_v33, %v380_v22 }
  0x89   :  { %v214_v2 = vrot.slane %v213_v51, 1  ;;  %v384_v15 = vadd.f32 %v1126_v40, %v382_v23 }
  0x8b   :  { %v215_v4 = vadd.f32 %v214_v2, %v213_v51  ;;  %v386_v58 = vadd.f32 %v1129_v42, %v384_v15 }
  0x8d   :  { %v216_v27 = vadd.f32 %v215_v4, %v81_v45  ;;  %v388_v0 = vadd.f32 %v1132_v46, %v386_v58 }
  0x8f   :  { %218 = vst.msk [vmem:[%s1319_s1] sm:$0x1] %vm14_vm0, %v216_v27  ;;  %v390_v28 = vadd.f32 %v1135_v47, %v388_v0 }
  0x91   :  { %v392_v29 = vadd.f32 %v1138_v39, %v390_v28 }
  0x93   :  { %v394_v33 = vadd.f32 %v1141_v48, %v392_v29 }
  0x95   :  { %v396_v40 = vadd.f32 %v1145_v37, %v394_v33  ;;  %v219_v37 = vld [vmem:[%s1320_s2] sm:$0x1] }
  0x97   :  { %v398_v61 = vadd.f32 %v1148_v53, %v396_v40 }
  0x99   :  { %v400_v42 = vadd.f32 %v1151_v54, %v398_v61 }
  0x9b   :  { %v402_v5 = vadd.f32 %v1154_v38, %v400_v42 }
  0x9d   :  { %v404_v46 = vadd.f32 %v1157_v59, %v402_v5 }
  0x9f   :  { %v406_v17 = vadd.f32 %v1160_v36, %v404_v46 }
  0xa1   :  { %v408_v56 = vadd.f32 %v1169_v52, %v406_v17 }
  0xa3   :  { %v410_v47 = vadd.f32 %v1172_v8, %v408_v56 }
  0xa5   :  { %v411_v20 = vrot.slane %v410_v47, 4 }
  0xa7   :  { %v412_v39 = vadd.f32 %v411_v20, %v410_v47 }
  0xa9   :  { %v413_v3 = vrot.slane %v412_v39, 2 }
  0xab   :  { %v414_v48 = vadd.f32 %v413_v3, %v412_v39 }
  0xad   :  { %v415_v34 = vrot.slane %v414_v48, 1 }
  0xaf   :  { %v416_v53 = vadd.f32 %v415_v34, %v414_v48 }
  0xb1   :  { %v417_v54 = vadd.f32 %v416_v53, %v219_v37 }
  0xb3   :  { %418 = vst.msk [vmem:[%s1320_s2] sm:$0x1] %vm14_vm0, %v417_v54 }

// kernel: _lambda_.46
= control target key start
LH: loop header
LB: loop body
LE: loop exit
PB: predicated region body
PF: predicated region fallthrough
CT: control target
= control target key end

     0   :  { %vm220_vm0 = vcmask 64512   ;;  %s897_s0 = inlined_call_operand.vmem [shape: f32[512,8], index: 0, kind: input, shape index: {}]   ;;  %s898_s1 = inlined_call_operand.vmem [shape: f32[1,8], index: 1, kind: input, shape index: {}]   ;;  %s899_s2 = inlined_call_operand.vmem [shape: f32[1,8], index: 2, kind: input, shape index: {}]   ;;  %s900_s3 = inlined_call_operand.vmem [shape: f32[512,8], index: 3, kind: output, shape index: {}]  }
   0x1   :  { %v14_v0 = vld [vmem:[%s897_s0] sm:$0xff]  ;;  %v15_v4 = vld [vmem:[%s897_s0 + $0x8] sm:$0xff]  ;;  %v16_v5 = vld [vmem:[%s897_s0 + $0x10] sm:$0xff] }
   0x2   :  { %v317_v1 = vld [vmem:[%s898_s1] ss:$0 sm:$0xff]  ;;  %v17_v6 = vld [vmem:[%s897_s0 + $0x18] sm:$0xff]  ;;  %v19_v11 = vld [vmem:[%s897_s0 + $0x28] sm:$0xff] }
   0x3   :  { %v322_v2 = vld [vmem:[%s899_s2] ss:$0 sm:$0xff]  ;;  %v85_v3 = vmul.f32 %v317_v1, %v14_v0  ;;  %v86_v7 = vmul.f32 %v317_v1, %v15_v4  ;;  %v87_v8 = vmul.f32 %v317_v1, %v16_v5  ;;  %v88_v9 = vmul.f32 %v317_v1, %v17_v6  ;;  %v20_v12 = vld [vmem:[%s897_s0 + $0x30] sm:$0xff]  ;;  %v21_v17 = vld [vmem:[%s897_s0 + $0x38] sm:$0xff] }
   0x4   :  { %v18_v10 = vld [vmem:[%s897_s0 + $0x20] sm:$0xff]  ;;  %v90_v15 = vmul.f32 %v317_v1, %v19_v11  ;;  %v91_v16 = vmul.f32 %v317_v1, %v20_v12  ;;  %v23_v19 = vld [vmem:[%s897_s0 + $0x48] sm:$0xff]  ;;  %v92_v23 = vmul.f32 %v317_v1, %v21_v17  ;;  %v24_v24 = vld [vmem:[%s897_s0 + $0x50] sm:$0xff] }
   0x5   :  { %v156_v13 = vadd.f32 %v322_v2, %v85_v3  ;;  %v89_v14 = vmul.f32 %v317_v1, %v18_v10  ;;  %v22_v18 = vld [vmem:[%s897_s0 + $0x40] sm:$0xff]  ;;  %v157_v20 = vadd.f32 %v322_v2, %v86_v7  ;;  %v158_v21 = vadd.f32 %v322_v2, %v87_v8  ;;  %v25_v25 = vld [vmem:[%s897_s0 + $0x58] sm:$0xff]  ;;  %v27_v31 = vld [vmem:[%s897_s0 + $0x68] sm:$0xff] }
   0x6   :  { %v159_v22 = vadd.f32 %v322_v2, %v88_v9  ;;  %v26_v26 = vld [vmem:[%s897_s0 + $0x60] sm:$0xff]  ;;  %v161_v28 = vadd.f32 %v322_v2, %v90_v15  ;;  %v162_v29 = vadd.f32 %v322_v2, %v91_v16  ;;  %v93_v30 = vmul.f32 %v317_v1, %v22_v18  ;;  %v28_v32 = vld [vmem:[%s897_s0 + $0x70] sm:$0xff]  ;;  %v29_v33 = vld [vmem:[%s897_s0 + $0x78] sm:$0xff] }
   0x7   :  { %221 = vst.msk [vmem:[%s900_s3] sm:$0xff] %vm220_vm0, %v156_v13  ;;  %v160_v27 = vadd.f32 %v322_v2, %v89_v14  ;;  %222 = vst.msk [vmem:[%s900_s3 + $0x8] sm:$0xff] %vm220_vm0, %v157_v20  ;;  %v163_v34 = vadd.f32 %v322_v2, %v92_v23  ;;  %v94_v35 = vmul.f32 %v317_v1, %v23_v19  ;;  %v30_v38 = vld [vmem:[%s897_s0 + $0x80] sm:$0xff]  ;;  %v31_v43 = vld [vmem:[%s897_s0 + $0x88] sm:$0xff] }
   0x8   :  { %223 = vst.msk [vmem:[%s900_s3 + $0x10] sm:$0xff] %vm220_vm0, %v158_v21  ;;  %224 = vst.msk [vmem:[%s900_s3 + $0x18] sm:$0xff] %vm220_vm0, %v159_v22  ;;  %v95_v36 = vmul.f32 %v317_v1, %v24_v24  ;;  %v96_v37 = vmul.f32 %v317_v1, %v25_v25  ;;  %v164_v39 = vadd.f32 %v322_v2, %v93_v30  ;;  %v32_v44 = vld [vmem:[%s897_s0 + $0x90] sm:$0xff]  ;;  %v33_v45 = vld [vmem:[%s897_s0 + $0x98] sm:$0xff] }
   0x9   :  { %225 = vst.msk [vmem:[%s900_s3 + $0x20] sm:$0xff] %vm220_vm0, %v160_v27  ;;  %226 = vst.msk [vmem:[%s900_s3 + $0x28] sm:$0xff] %vm220_vm0, %v161_v28  ;;  %v97_v40 = vmul.f32 %v317_v1, %v26_v26  ;;  %v98_v41 = vmul.f32 %v317_v1, %v27_v31  ;;  %v99_v42 = vmul.f32 %v317_v1, %v28_v32  ;;  %v34_v50 = vld [vmem:[%s897_s0 + $0xa0] sm:$0xff]  ;;  %v35_v51 = vld [vmem:[%s897_s0 + $0xa8] sm:$0xff] }
   0xa   :  { %227 = vst.msk [vmem:[%s900_s3 + $0x30] sm:$0xff] %vm220_vm0, %v162_v29  ;;  %228 = vst.msk [vmem:[%s900_s3 + $0x38] sm:$0xff] %vm220_vm0, %v163_v34  ;;  %v165_v46 = vadd.f32 %v322_v2, %v94_v35  ;;  %v166_v47 = vadd.f32 %v322_v2, %v95_v36  ;;  %v167_v48 = vadd.f32 %v322_v2, %v96_v37  ;;  %v36_v52 = vld [vmem:[%s897_s0 + $0xb0] sm:$0xff]  ;;  %v37_v57 = vld [vmem:[%s897_s0 + $0xb8] sm:$0xff] }
   0xb   :  { %v100_v49 = vmul.f32 %v317_v1, %v29_v33  ;;  %229 = vst.msk [vmem:[%s900_s3 + $0x40] sm:$0xff] %vm220_vm0, %v164_v39  ;;  %v168_v53 = vadd.f32 %v322_v2, %v97_v40  ;;  %v169_v54 = vadd.f32 %v322_v2, %v98_v41  ;;  %v170_v55 = vadd.f32 %v322_v2, %v99_v42  ;;  %v38_v62 = vld [vmem:[%s897_s0 + $0xc0] sm:$0xff]  ;;  %v39_v5 = vld [vmem:[%s897_s0 + $0xc8] sm:$0xff]  ;;  %v40_v6 = vld [vmem:[%s897_s0 + $0xd0] sm:$0xff] }
   0xc   :  { %v101_v56 = vmul.f32 %v317_v1, %v30_v38  ;;  %230 = vst.msk [vmem:[%s900_s3 + $0x48] sm:$0xff] %vm220_vm0, %v165_v46  ;;  %231 = vst.msk [vmem:[%s900_s3 + $0x50] sm:$0xff] %vm220_vm0, %v166_v47  ;;  %v102_v59 = vmul.f32 %v317_v1, %v31_v43  ;;  %v103_v60 = vmul.f32 %v317_v1, %v32_v44  ;;  %v41_v7 = vld [vmem:[%s897_s0 + $0xd8] sm:$0xff]  ;;  %v42_v12 = vld [vmem:[%s897_s0 + $0xe0] sm:$0xff] }
   0xd   :  { %232 = vst.msk [vmem:[%s900_s3 + $0x58] sm:$0xff] %vm220_vm0, %v167_v48  ;;  %v171_v58 = vadd.f32 %v322_v2, %v100_v49  ;;  %v104_v61 = vmul.f32 %v317_v1, %v33_v45  ;;  %233 = vst.msk [vmem:[%s900_s3 + $0x60] sm:$0xff] %vm220_vm0, %v168_v53  ;;  %v105_v0 = vmul.f32 %v317_v1, %v34_v50  ;;  %v43_v13 = vld [vmem:[%s897_s0 + $0xe8] sm:$0xff]  ;;  %v44_v14 = vld [vmem:[%s897_s0 + $0xf0] sm:$0xff] }
   0xe   :  { %234 = vst.msk [vmem:[%s900_s3 + $0x68] sm:$0xff] %vm220_vm0, %v169_v54  ;;  %235 = vst.msk [vmem:[%s900_s3 + $0x70] sm:$0xff] %vm220_vm0, %v170_v55  ;;  %v172_v63 = vadd.f32 %v322_v2, %v101_v56  ;;  %v106_v3 = vmul.f32 %v317_v1, %v35_v51  ;;  %v107_v4 = vmul.f32 %v317_v1, %v36_v52  ;;  %v45_v19 = vld [vmem:[%s897_s0 + $0xf8] sm:$0xff]  ;;  %v46_v24 = vld [vmem:[%s897_s0 + $0x100] sm:$0xff] }
   0xf   :  { %236 = vst.msk [vmem:[%s900_s3 + $0x78] sm:$0xff] %vm220_vm0, %v171_v58  ;;  %v173_v8 = vadd.f32 %v322_v2, %v102_v59  ;;  %v174_v9 = vadd.f32 %v322_v2, %v103_v60  ;;  %v175_v10 = vadd.f32 %v322_v2, %v104_v61  ;;  %v108_v11 = vmul.f32 %v317_v1, %v37_v57  ;;  %v47_v29 = vld [vmem:[%s897_s0 + $0x108] sm:$0xff]  ;;  %v48_v30 = vld [vmem:[%s897_s0 + $0x110] sm:$0xff]  ;;  %v49_v31 = vld [vmem:[%s897_s0 + $0x118] sm:$0xff] }
  0x10   :  { %237 = vst.msk [vmem:[%s900_s3 + $0x80] sm:$0xff] %vm220_vm0, %v172_v63  ;;  %v176_v15 = vadd.f32 %v322_v2, %v105_v0  ;;  %v177_v16 = vadd.f32 %v322_v2, %v106_v3  ;;  %v178_v17 = vadd.f32 %v322_v2, %v107_v4  ;;  %v109_v18 = vmul.f32 %v317_v1, %v38_v62  ;;  %v50_v36 = vld [vmem:[%s897_s0 + $0x120] sm:$0xff]  ;;  %v51_v37 = vld [vmem:[%s897_s0 + $0x128] sm:$0xff]  ;;  %v52_v38 = vld [vmem:[%s897_s0 + $0x130] sm:$0xff] }
  0x11   :  { %238 = vst.msk [vmem:[%s900_s3 + $0x88] sm:$0xff] %vm220_vm0, %v173_v8  ;;  %239 = vst.msk [vmem:[%s900_s3 + $0x90] sm:$0xff] %vm220_vm0, %v174_v9  ;;  %v179_v20 = vadd.f32 %v322_v2, %v108_v11  ;;  %v110_v21 = vmul.f32 %v317_v1, %v39_v5  ;;  %v111_v22 = vmul.f32 %v317_v1, %v40_v6  ;;  %v53_v43 = vld [vmem:[%s897_s0 + $0x138] sm:$0xff]  ;;  %v54_v48 = vld [vmem:[%s897_s0 + $0x140] sm:$0xff] }
  0x12   :  { %240 = vst.msk [vmem:[%s900_s3 + $0x98] sm:$0xff] %vm220_vm0, %v175_v10  ;;  %v112_v23 = vmul.f32 %v317_v1, %v41_v7  ;;  %241 = vst.msk [vmem:[%s900_s3 + $0xa0] sm:$0xff] %vm220_vm0, %v176_v15  ;;  %v180_v25 = vadd.f32 %v322_v2, %v109_v18  ;;  %v113_v26 = vmul.f32 %v317_v1, %v42_v12  ;;  %v55_v53 = vld [vmem:[%s897_s0 + $0x148] sm:$0xff]  ;;  %v56_v54 = vld [vmem:[%s897_s0 + $0x150] sm:$0xff] }
  0x13   :  { %242 = vst.msk [vmem:[%s900_s3 + $0xa8] sm:$0xff] %vm220_vm0, %v177_v16  ;;  %243 = vst.msk [vmem:[%s900_s3 + $0xb0] sm:$0xff] %vm220_vm0, %v178_v17  ;;  %v114_v27 = vmul.f32 %v317_v1, %v43_v13  ;;  %v115_v28 = vmul.f32 %v317_v1, %v44_v14  ;;  %v181_v32 = vadd.f32 %v322_v2, %v110_v21  ;;  %v57_v55 = vld [vmem:[%s897_s0 + $0x158] sm:$0xff]  ;;  %v58_v60 = vld [vmem:[%s897_s0 + $0x160] sm:$0xff] }
  0x14   :  { %244 = vst.msk [vmem:[%s900_s3 + $0xb8] sm:$0xff] %vm220_vm0, %v179_v20  ;;  %v182_v33 = vadd.f32 %v322_v2, %v111_v22  ;;  %v183_v34 = vadd.f32 %v322_v2, %v112_v23  ;;  %v116_v35 = vmul.f32 %v317_v1, %v45_v19  ;;  %245 = vst.msk [vmem:[%s900_s3 + $0xc0] sm:$0xff] %vm220_vm0, %v180_v25  ;;  %v59_v61 = vld [vmem:[%s897_s0 + $0x168] sm:$0xff]  ;;  %v60_v62 = vld [vmem:[%s897_s0 + $0x170] sm:$0xff] }
  0x15   :  { %v184_v39 = vadd.f32 %v322_v2, %v113_v26  ;;  %v185_v40 = vadd.f32 %v322_v2, %v114_v27  ;;  %v186_v41 = vadd.f32 %v322_v2, %v115_v28  ;;  %v117_v42 = vmul.f32 %v317_v1, %v46_v24  ;;  %246 = vst.msk [vmem:[%s900_s3 + $0xc8] sm:$0xff] %vm220_vm0, %v181_v32  ;;  %v61_v5 = vld [vmem:[%s897_s0 + $0x178] sm:$0xff]  ;;  %v62_v10 = vld [vmem:[%s897_s0 + $0x180] sm:$0xff]  ;;  %v63_v15 = vld [vmem:[%s897_s0 + $0x188] sm:$0xff] }
  0x16   :  { %247 = vst.msk [vmem:[%s900_s3 + $0xd0] sm:$0xff] %vm220_vm0, %v182_v33  ;;  %248 = vst.msk [vmem:[%s900_s3 + $0xd8] sm:$0xff] %vm220_vm0, %v183_v34  ;;  %v187_v44 = vadd.f32 %v322_v2, %v116_v35  ;;  %v118_v45 = vmul.f32 %v317_v1, %v47_v29  ;;  %v119_v46 = vmul.f32 %v317_v1, %v48_v30  ;;  %v64_v16 = vld [vmem:[%s897_s0 + $0x190] sm:$0xff]  ;;  %v65_v17 = vld [vmem:[%s897_s0 + $0x198] sm:$0xff] }
  0x17   :  { %v120_v47 = vmul.f32 %v317_v1, %v49_v31  ;;  %249 = vst.msk [vmem:[%s900_s3 + $0xe0] sm:$0xff] %vm220_vm0, %v184_v39  ;;  %250 = vst.msk [vmem:[%s900_s3 + $0xe8] sm:$0xff] %vm220_vm0, %v185_v40  ;;  %v188_v49 = vadd.f32 %v322_v2, %v117_v42  ;;  %v121_v50 = vmul.f32 %v317_v1, %v50_v36  ;;  %v66_v22 = vld [vmem:[%s897_s0 + $0x1a0] sm:$0xff]  ;;  %v67_v23 = vld [vmem:[%s897_s0 + $0x1a8] sm:$0xff] }
  0x18   :  { %251 = vst.msk [vmem:[%s900_s3 + $0xf0] sm:$0xff] %vm220_vm0, %v186_v41  ;;  %v122_v51 = vmul.f32 %v317_v1, %v51_v37  ;;  %v123_v52 = vmul.f32 %v317_v1, %v52_v38  ;;  %252 = vst.msk [vmem:[%s900_s3 + $0xf8] sm:$0xff] %vm220_vm0, %v187_v44  ;;  %v189_v56 = vadd.f32 %v322_v2, %v118_v45  ;;  %v68_v24 = vld [vmem:[%s897_s0 + $0x1b0] sm:$0xff]  ;;  %v69_v29 = vld [vmem:[%s897_s0 + $0x1b8] sm:$0xff] }
  0x19   :  { %v190_v57 = vadd.f32 %v322_v2, %v119_v46  ;;  %v191_v58 = vadd.f32 %v322_v2, %v120_v47  ;;  %v124_v59 = vmul.f32 %v317_v1, %v53_v43  ;;  %253 = vst.msk [vmem:[%s900_s3 + $0x100] sm:$0xff] %vm220_vm0, %v188_v49  ;;  %v192_v63 = vadd.f32 %v322_v2, %v121_v50  ;;  %v70_v34 = vld [vmem:[%s897_s0 + $0x1c0] sm:$0xff]  ;;  %v71_v39 = vld [vmem:[%s897_s0 + $0x1c8] sm:$0xff]  ;;  %v72_v40 = vld [vmem:[%s897_s0 + $0x1d0] sm:$0xff] }
  0x1a   :  { %v193_v0 = vadd.f32 %v322_v2, %v122_v51  ;;  %v194_v3 = vadd.f32 %v322_v2, %v123_v52  ;;  %v125_v4 = vmul.f32 %v317_v1, %v54_v48  ;;  %254 = vst.msk [vmem:[%s900_s3 + $0x108] sm:$0xff] %vm220_vm0, %v189_v56  ;;  %v126_v7 = vmul.f32 %v317_v1, %v55_v53  ;;  %v73_v41 = vld [vmem:[%s897_s0 + $0x1d8] sm:$0xff]  ;;  %v74_v46 = vld [vmem:[%s897_s0 + $0x1e0] sm:$0xff]  ;;  %v75_v47 = vld [vmem:[%s897_s0 + $0x1e8] sm:$0xff] }
  0x1b   :  { %255 = vst.msk [vmem:[%s900_s3 + $0x110] sm:$0xff] %vm220_vm0, %v190_v57  ;;  %256 = vst.msk [vmem:[%s900_s3 + $0x118] sm:$0xff] %vm220_vm0, %v191_v58  ;;  %v195_v6 = vadd.f32 %v322_v2, %v124_v59  ;;  %v127_v8 = vmul.f32 %v317_v1, %v56_v54  ;;  %v128_v9 = vmul.f32 %v317_v1, %v57_v55  ;;  %v76_v48 = vld [vmem:[%s897_s0 + $0x1f0] sm:$0xff]  ;;  %v77_v53 = vld [vmem:[%s897_s0 + $0x1f8] sm:$0xff] }
  0x1c   :  { %257 = vst.msk [vmem:[%s900_s3 + $0x120] sm:$0xff] %vm220_vm0, %v192_v63  ;;  %258 = vst.msk [vmem:[%s900_s3 + $0x128] sm:$0xff] %vm220_vm0, %v193_v0  ;;  %v196_v11 = vadd.f32 %v322_v2, %v125_v4  ;;  %v129_v12 = vmul.f32 %v317_v1, %v58_v60  ;;  %v130_v13 = vmul.f32 %v317_v1, %v59_v61 }
  0x1d   :  { %259 = vst.msk [vmem:[%s900_s3 + $0x130] sm:$0xff] %vm220_vm0, %v194_v3  ;;  %v131_v14 = vmul.f32 %v317_v1, %v60_v62  ;;  %260 = vst.msk [vmem:[%s900_s3 + $0x138] sm:$0xff] %vm220_vm0, %v195_v6  ;;  %v197_v18 = vadd.f32 %v322_v2, %v126_v7  ;;  %v198_v19 = vadd.f32 %v322_v2, %v127_v8 }
  0x1e   :  { %v199_v20 = vadd.f32 %v322_v2, %v128_v9  ;;  %v132_v21 = vmul.f32 %v317_v1, %v61_v5  ;;  %261 = vst.msk [vmem:[%s900_s3 + $0x140] sm:$0xff] %vm220_vm0, %v196_v11  ;;  %v200_v25 = vadd.f32 %v322_v2, %v129_v12  ;;  %v201_v26 = vadd.f32 %v322_v2, %v130_v13 }
  0x1f   :  { %v202_v27 = vadd.f32 %v322_v2, %v131_v14  ;;  %v133_v28 = vmul.f32 %v317_v1, %v62_v10  ;;  %262 = vst.msk [vmem:[%s900_s3 + $0x148] sm:$0xff] %vm220_vm0, %v197_v18  ;;  %263 = vst.msk [vmem:[%s900_s3 + $0x150] sm:$0xff] %vm220_vm0, %v198_v19  ;;  %v134_v31 = vmul.f32 %v317_v1, %v63_v15 }
  0x20   :  { %264 = vst.msk [vmem:[%s900_s3 + $0x158] sm:$0xff] %vm220_vm0, %v199_v20  ;;  %v203_v30 = vadd.f32 %v322_v2, %v132_v21  ;;  %v135_v32 = vmul.f32 %v317_v1, %v64_v16  ;;  %v136_v33 = vmul.f32 %v317_v1, %v65_v17  ;;  %265 = vst.msk [vmem:[%s900_s3 + $0x160] sm:$0xff] %vm220_vm0, %v200_v25 }
  0x21   :  { %266 = vst.msk [vmem:[%s900_s3 + $0x168] sm:$0xff] %vm220_vm0, %v201_v26  ;;  %267 = vst.msk [vmem:[%s900_s3 + $0x170] sm:$0xff] %vm220_vm0, %v202_v27  ;;  %v204_v35 = vadd.f32 %v322_v2, %v133_v28  ;;  %v137_v36 = vmul.f32 %v317_v1, %v66_v22  ;;  %v138_v37 = vmul.f32 %v317_v1, %v67_v23 }
  0x22   :  { %v139_v38 = vmul.f32 %v317_v1, %v68_v24  ;;  %268 = vst.msk [vmem:[%s900_s3 + $0x178] sm:$0xff] %vm220_vm0, %v203_v30  ;;  %v205_v42 = vadd.f32 %v322_v2, %v134_v31  ;;  %v206_v43 = vadd.f32 %v322_v2, %v135_v32  ;;  %v207_v44 = vadd.f32 %v322_v2, %v136_v33 }
  0x23   :  { %v140_v45 = vmul.f32 %v317_v1, %v69_v29  ;;  %269 = vst.msk [vmem:[%s900_s3 + $0x180] sm:$0xff] %vm220_vm0, %v204_v35  ;;  %v208_v49 = vadd.f32 %v322_v2, %v137_v36  ;;  %v209_v50 = vadd.f32 %v322_v2, %v138_v37  ;;  %v141_v52 = vmul.f32 %v317_v1, %v70_v34 }
  0x24   :  { %v210_v51 = vadd.f32 %v322_v2, %v139_v38  ;;  %270 = vst.msk [vmem:[%s900_s3 + $0x188] sm:$0xff] %vm220_vm0, %v205_v42  ;;  %271 = vst.msk [vmem:[%s900_s3 + $0x190] sm:$0xff] %vm220_vm0, %v206_v43  ;;  %v142_v55 = vmul.f32 %v317_v1, %v71_v39  ;;  %v143_v56 = vmul.f32 %v317_v1, %v72_v40 }
  0x25   :  { %272 = vst.msk [vmem:[%s900_s3 + $0x198] sm:$0xff] %vm220_vm0, %v207_v44  ;;  %v211_v54 = vadd.f32 %v322_v2, %v140_v45  ;;  %v144_v57 = vmul.f32 %v317_v1, %v73_v41  ;;  %273 = vst.msk [vmem:[%s900_s3 + $0x1a0] sm:$0xff] %vm220_vm0, %v208_v49  ;;  %v212_v58 = vadd.f32 %v322_v2, %v141_v52 }
  0x26   :  { %274 = vst.msk [vmem:[%s900_s3 + $0x1a8] sm:$0xff] %vm220_vm0, %v209_v50  ;;  %275 = vst.msk [vmem:[%s900_s3 + $0x1b0] sm:$0xff] %vm220_vm0, %v210_v51  ;;  %v145_v59 = vmul.f32 %v317_v1, %v74_v46  ;;  %v146_v60 = vmul.f32 %v317_v1, %v75_v47  ;;  %v147_v61 = vmul.f32 %v317_v1, %v76_v48 }
  0x27   :  { %276 = vst.msk [vmem:[%s900_s3 + $0x1b8] sm:$0xff] %vm220_vm0, %v211_v54  ;;  %v213_v62 = vadd.f32 %v322_v2, %v142_v55  ;;  %v214_v63 = vadd.f32 %v322_v2, %v143_v56  ;;  %v215_v0 = vadd.f32 %v322_v2, %v144_v57  ;;  %v148_v3 = vmul.f32 %v317_v1, %v77_v53 }
  0x28   :  { %277 = vst.msk [vmem:[%s900_s3 + $0x1c0] sm:$0xff] %vm220_vm0, %v212_v58  ;;  %v216_v4 = vadd.f32 %v322_v2, %v145_v59  ;;  %v217_v5 = vadd.f32 %v322_v2, %v146_v60  ;;  %v218_v6 = vadd.f32 %v322_v2, %v147_v61 }
  0x29   :  { %278 = vst.msk [vmem:[%s900_s3 + $0x1c8] sm:$0xff] %vm220_vm0, %v213_v62  ;;  %279 = vst.msk [vmem:[%s900_s3 + $0x1d0] sm:$0xff] %vm220_vm0, %v214_v63  ;;  %v219_v1 = vadd.f32 %v322_v2, %v148_v3 }
  0x2a   :  { %280 = vst.msk [vmem:[%s900_s3 + $0x1d8] sm:$0xff] %vm220_vm0, %v215_v0  ;;  %281 = vst.msk [vmem:[%s900_s3 + $0x1e0] sm:$0xff] %vm220_vm0, %v216_v4 }
  0x2b   :  { %282 = vst.msk [vmem:[%s900_s3 + $0x1e8] sm:$0xff] %vm220_vm0, %v217_v5  ;;  %283 = vst.msk [vmem:[%s900_s3 + $0x1f0] sm:$0xff] %vm220_vm0, %v218_v6 }
  0x2c   :  { %284 = vst.msk [vmem:[%s900_s3 + $0x1f8] sm:$0xff] %vm220_vm0, %v219_v1 }

// kernel: _lambda_.47
= control target key start
LH: loop header
LB: loop body
LE: loop exit
PB: predicated region body
PF: predicated region fallthrough
CT: control target
= control target key end

     0   :  { %s1974_s12 = smov 0   ;;  %s1976_s13 = smov 0   ;;  %s2344_s0 = inlined_call_operand.vmem [shape: bf16[4,512,128], index: 0, kind: input, shape index: {}]   ;;  %s2345_s1 = inlined_call_operand.vmem [shape: bf16[4,128,128], index: 1, kind: input, shape index: {}]   ;;  %s2346_s2 = inlined_call_operand.vmem [shape: f32[1,128], index: 2, kind: input, shape index: {}]   ;;  %s2347_s3 = inlined_call_operand.vmem [shape: f32[4,512,128], index: 3, kind: output, shape index: {}]  }
   0x1   :  { %s1978_s14 = smov 0  }
   0x2 LB: > { %s32_s15 = sadd.s32 1, %s1947_s13  ;;  %p1579_p0 = scmp.ge.s32.totalorder %s1951_s14, 1  ;;  %s1951_s14 = sphi %s1978_s14, %s13_s14   ;;  %s1947_s13 = sphi %s1976_s13, %s2349_s13   ;;  %s1943_s12 = sphi %s1974_s12, %s2348_s12  }
   0x3   : > { %p34_p1 = scmp.ge.s32.totalorder %s32_s15, 4  ;;  %p187_p2 = scmp.lt.s32.totalorder %s1951_s14, 5 }
   0x5   : > { %s2351_s15 = smov (%p34_p1, %s32_s15), 0  ;;  %p188_p3 = pnand %p1579_p0, %p187_p2 }
   0x6   : > { %p232_p4 = scmp.lt.s32.totalorder (!%p188_p3), %s1943_s12, 3  ;;  %v1953_v7 = vmov (!%p188_p3), 0  }
   0x7   : > { %191 = sbr.rel (%p188_p3) target bundleno = 342 (0x156), region = 32 }
   0xe   : > { %s2353_s12 = smov (!%p232_p4, %s1943_s12), 3 }
   0xf   : > { %s1630_s16 = sshll.u32 %s2353_s12, 6  ;;  %s1629_s20 = sshll.u32 %s2353_s12, 8 }
  0x10   : > { %s1998_s19 = scalar_lea.vmem %s2345_s1, %s1630_s16  ;;  %s2007_s23 = scalar_lea.vmem %s2344_s0, %s1629_s20 }
  0x11   : > { %v1793_v0 = vld [vmem:[%s1998_s19] sm:$0xff]   ;;  %v1794_v1 = vld [vmem:[%s1998_s19 + $0x8] sm:$0xff]   ;;  %v1795_v2 = vld [vmem:[%s1998_s19 + $0x10] sm:$0xff]   ;;  %s1631_s26 = sshll.u32 %s2353_s12, 9 }
  0x12   : > { %1672 = vmatprep.subr.bf16.mxu0 %v1793_v0  ;;  %1752 = vmatprep.subr.bf16.mxu1 %v1793_v0  ;;  %v1796_v3 = vld [vmem:[%s1998_s19 + $0x18] sm:$0xff]   ;;  %v333_v4 = vld [vmem:[%s2007_s23] sm:$0xf]  ;;  %v334_v5 = vld [vmem:[%s2007_s23 + $0x4] sm:$0xf]  ;;  %s2217_s29 = scalar_lea.vmem %s2347_s3, %s1631_s26 }
  0x13   : > { %1673 = vmatpush3.bf16.msra.mxu0 %v1793_v0  ;;  %1760 = vmatpush3.bf16.msra.mxu1 %v1793_v0  ;;  %v365_v6 = vld [vmem:[%s2007_s23 + $0x80] sm:$0xf]  ;;  %v397_v8 = vmax.bf16 %v1953_v7, %v333_v4  ;;  %v398_v9 = vmax.bf16 %v1953_v7, %v334_v5  ;;  %v366_v10 = vld [vmem:[%s2007_s23 + $0x84] sm:$0xf]  ;;  %v1798_v16 = vld [vmem:[%s1998_s19 + $0x28] sm:$0xff]  }
  0x14   : > { %1674 = vmatprep.subr.bf16.mxu0 %v1794_v1  ;;  %1753 = vmatprep.subr.bf16.mxu1 %v1794_v1  ;;  %v429_v11 = vmax.bf16 %v1953_v7, %v365_v6  ;;  %v430_v12 = vmax.bf16 %v1953_v7, %v366_v10  ;;  %v1797_v14 = vld [vmem:[%s1998_s19 + $0x20] sm:$0xff]   ;;  %v1799_v17 = vld [vmem:[%s1998_s19 + $0x30] sm:$0xff]   ;;  %v335_v18 = vld [vmem:[%s2007_s23 + $0x8] sm:$0xf] }
  0x15   : > { %v1586_v13 = vcombine.low %v397_v8, %v398_v9  ;;  %v336_v19 = vld [vmem:[%s2007_s23 + $0xc] sm:$0xf]  ;;  %v367_v20 = vld [vmem:[%s2007_s23 + $0x88] sm:$0xf]  ;;  %v337_v22 = vld [vmem:[%s2007_s23 + $0x10] sm:$0xf]  ;;  %v399_v23 = vmax.bf16 %v1953_v7, %v335_v18 }
  0x16   : > { %v1602_v15 = vcombine.low %v429_v11, %v430_v12  ;;  %v368_v21 = vld [vmem:[%s2007_s23 + $0x8c] sm:$0xf]  ;;  %v338_v24 = vld [vmem:[%s2007_s23 + $0x14] sm:$0xf]  ;;  %v369_v25 = vld [vmem:[%s2007_s23 + $0x90] sm:$0xf]  ;;  %v400_v28 = vmax.bf16 %v1953_v7, %v336_v19  ;;  %v431_v29 = vmax.bf16 %v1953_v7, %v367_v20  ;;  %v401_v32 = vmax.bf16 %v1953_v7, %v337_v22 }
  0x17   : > { %1675 = vmatpush3.bf16.msra.mxu0 %v1794_v1  ;;  %1761 = vmatpush3.bf16.msra.mxu1 %v1794_v1  ;;  %v370_v26 = vld [vmem:[%s2007_s23 + $0x94] sm:$0xf]  ;;  %v1800_v27 = vld [vmem:[%s1998_s19 + $0x38] sm:$0xff]   ;;  %v432_v30 = vmax.bf16 %v1953_v7, %v368_v21  ;;  %v402_v33 = vmax.bf16 %v1953_v7, %v338_v24  ;;  %v433_v34 = vmax.bf16 %v1953_v7, %v369_v25  ;;  %v341_v39 = vld [vmem:[%s2007_s23 + $0x20] sm:$0xf] }
  0x18   : > { %1676 = vmatprep.subr.bf16.mxu0 %v1795_v2  ;;  %1754 = vmatprep.subr.bf16.mxu1 %v1795_v2  ;;  %v339_v31 = vld [vmem:[%s2007_s23 + $0x18] sm:$0xf]  ;;  %v434_v35 = vmax.bf16 %v1953_v7, %v370_v26  ;;  %v340_v36 = vld [vmem:[%s2007_s23 + $0x1c] sm:$0xf]  ;;  %v342_v40 = vld [vmem:[%s2007_s23 + $0x24] sm:$0xf]  ;;  %v1587_v42 = vcombine.low %v399_v23, %v400_v28  ;;  %v405_v56 = vmax.bf16 %v1953_v7, %v341_v39 }
  0x19   : > { %1688 = vmatprep.mubr.bf16.mxu0 %v1586_v13  ;;  %1720 = vmatprep.mubr.bf16.mxu1 %v1602_v15  ;;  %v371_v37 = vld [vmem:[%s2007_s23 + $0x98] sm:$0xf]  ;;  %v372_v38 = vld [vmem:[%s2007_s23 + $0x9c] sm:$0xf]  ;;  %v359_v41 = vld [vmem:[%s2007_s23 + $0x68] sm:$0xf]  ;;  %v1603_v43 = vcombine.low %v431_v29, %v432_v30  ;;  %v403_v47 = vmax.bf16 %v1953_v7, %v339_v31  ;;  %v404_v48 = vmax.bf16 %v1953_v7, %v340_v36 }
  0x1a   : > { %v373_v44 = vld [vmem:[%s2007_s23 + $0xa0] sm:$0xf]  ;;  %v374_v45 = vld [vmem:[%s2007_s23 + $0xa4] sm:$0xf]  ;;  %v360_v46 = vld [vmem:[%s2007_s23 + $0x6c] sm:$0xf]  ;;  %v435_v49 = vmax.bf16 %v1953_v7, %v371_v37  ;;  %v436_v50 = vmax.bf16 %v1953_v7, %v372_v38  ;;  %v1588_v54 = vcombine.low %v401_v32, %v402_v33  ;;  %v1604_v55 = vcombine.low %v433_v34, %v434_v35 }
  0x1b   : > { %1677 = vmatpush3.bf16.msra.mxu0 %v1795_v2  ;;  %1762 = vmatpush3.bf16.msra.mxu1 %v1795_v2  ;;  %v391_v51 = vld [vmem:[%s2007_s23 + $0xe8] sm:$0xf]  ;;  %v392_v52 = vld [vmem:[%s2007_s23 + $0xec] sm:$0xf]  ;;  %v361_v53 = vld [vmem:[%s2007_s23 + $0x70] sm:$0xf]  ;;  %v2057_v57 = vmax.bf16 %v1953_v7, %v359_v41  ;;  %v406_v61 = vmax.bf16 %v1953_v7, %v342_v40  ;;  %v437_v62 = vmax.bf16 %v1953_v7, %v373_v44 }
  0x1c   : > { %1678 = vmatprep.subr.bf16.mxu0 %v1796_v3  ;;  %1755 = vmatprep.subr.bf16.mxu1 %v1796_v3  ;;  %v362_v58 = vld [vmem:[%s2007_s23 + $0x74] sm:$0xf]  ;;  %v393_v59 = vld [vmem:[%s2007_s23 + $0xf0] sm:$0xf]  ;;  %v2065_v63 = vmax.bf16 %v1953_v7, %v360_v46  ;;  %v363_v0 = vld [vmem:[%s2007_s23 + $0x78] sm:$0xf]  ;;  %v438_v2 = vmax.bf16 %v1953_v7, %v374_v45  ;;  %v2074_v4 = vmax.bf16 %v1953_v7, %v392_v52 }
  0x1d   : > { %v394_v60 = vld [vmem:[%s2007_s23 + $0xf4] sm:$0xf]  ;;  %v364_v1 = vld [vmem:[%s2007_s23 + $0x7c] sm:$0xf]  ;;  %v2077_v5 = vmax.bf16 %v1953_v7, %v361_v53  ;;  %v395_v6 = vld [vmem:[%s2007_s23 + $0xf8] sm:$0xf]  ;;  %v2083_v9 = vmax.bf16 %v1953_v7, %v362_v58  ;;  %v2086_v10 = vmax.bf16 %v1953_v7, %v393_v59  ;;  %v1589_v21 = vcombine.low %v403_v47, %v404_v48 }
  0x1e   : > { %v1599_v8 = vcombine.low %v2057_v57, %v2065_v63  ;;  %v2089_v11 = vmax.bf16 %v1953_v7, %v394_v60  ;;  %v396_v12 = vld [vmem:[%s2007_s23 + $0xfc] sm:$0xf]  ;;  %v2098_v15 = vmax.bf16 %v1953_v7, %v364_v1  ;;  %v2105_v18 = vmax.bf16 %v1953_v7, %v395_v6  ;;  %v343_v23 = vld [vmem:[%s2007_s23 + $0x28] sm:$0xf]  ;;  %v344_v24 = vld [vmem:[%s2007_s23 + $0x2c] sm:$0xf] }
  0x1f   : > { %1679 = vmatpush3.bf16.msra.mxu0 %v1796_v3  ;;  %1763 = vmatpush3.bf16.msra.mxu1 %v1796_v3  ;;  %v2071_v3 = vmax.bf16 %v1953_v7, %v391_v51  ;;  %v2110_v20 = vmax.bf16 %v1953_v7, %v396_v12  ;;  %v1605_v22 = vcombine.low %v435_v49, %v436_v50  ;;  %v375_v28 = vld [vmem:[%s2007_s23 + $0xa8] sm:$0xf]  ;;  %v376_v29 = vld [vmem:[%s2007_s23 + $0xac] sm:$0xf]  ;;  %v345_v30 = vld [vmem:[%s2007_s23 + $0x30] sm:$0xf] }
  0x20   : > { %1680 = vmatprep.subr.bf16.mxu0 %v1797_v14  ;;  %1756 = vmatprep.subr.bf16.mxu1 %v1797_v14  ;;  %v1590_v26 = vcombine.low %v405_v56, %v406_v61  ;;  %v346_v31 = vld [vmem:[%s2007_s23 + $0x34] sm:$0xf]  ;;  %v377_v32 = vld [vmem:[%s2007_s23 + $0xb0] sm:$0xf]  ;;  %v407_v34 = vmax.bf16 %v1953_v7, %v343_v23  ;;  %v408_v35 = vmax.bf16 %v1953_v7, %v344_v24  ;;  %v347_v44 = vld [vmem:[%s2007_s23 + $0x38] sm:$0xf] }
  0x21   : > { %v1615_v13 = vcombine.low %v2071_v3, %v2074_v4  ;;  %v1617_v25 = vcombine.low %v2105_v18, %v2110_v20  ;;  %v378_v33 = vld [vmem:[%s2007_s23 + $0xb4] sm:$0xf]  ;;  %v439_v36 = vmax.bf16 %v1953_v7, %v375_v28  ;;  %v440_v37 = vmax.bf16 %v1953_v7, %v376_v29  ;;  %v348_v45 = vld [vmem:[%s2007_s23 + $0x3c] sm:$0xf]  ;;  %v379_v48 = vld [vmem:[%s2007_s23 + $0xb8] sm:$0xf] }
  0x22   : > { %v409_v38 = vmax.bf16 %v1953_v7, %v345_v30  ;;  %v410_v39 = vmax.bf16 %v1953_v7, %v346_v31  ;;  %v441_v40 = vmax.bf16 %v1953_v7, %v377_v32  ;;  %v442_v41 = vmax.bf16 %v1953_v7, %v378_v33  ;;  %v380_v49 = vld [vmem:[%s2007_s23 + $0xbc] sm:$0xf]  ;;  %v349_v50 = vld [vmem:[%s2007_s23 + $0x40] sm:$0xf]  ;;  %v350_v51 = vld [vmem:[%s2007_s23 + $0x44] sm:$0xf] }
  0x23   : > { %1681 = vmatpush3.bf16.msra.mxu0 %v1797_v14  ;;  %1764 = vmatpush3.bf16.msra.mxu1 %v1797_v14  ;;  %v2095_v14 = vmax.bf16 %v1953_v7, %v363_v0  ;;  %v381_v52 = vld [vmem:[%s2007_s23 + $0xc0] sm:$0xf]  ;;  %v382_v53 = vld [vmem:[%s2007_s23 + $0xc4] sm:$0xf]  ;;  %v443_v56 = vmax.bf16 %v1953_v7, %v379_v48  ;;  %v444_v58 = vmax.bf16 %v1953_v7, %v380_v49  ;;  %v352_v6 = vld [vmem:[%s2007_s23 + $0x4c] sm:$0xf] }
  0x24   : > { %1682 = vmatprep.subr.bf16.mxu0 %v1798_v16  ;;  %1757 = vmatprep.subr.bf16.mxu1 %v1798_v16  ;;  %v1592_v46 = vcombine.low %v409_v38, %v410_v39  ;;  %v1608_v47 = vcombine.low %v441_v40, %v442_v41  ;;  %v413_v59 = vmax.bf16 %v1953_v7, %v349_v50  ;;  %v384_v23 = vld [vmem:[%s2007_s23 + $0xcc] sm:$0xf]  ;;  %v353_v24 = vld [vmem:[%s2007_s23 + $0x50] sm:$0xf]  ;;  %v386_v28 = vld [vmem:[%s2007_s23 + $0xd4] sm:$0xf] }
  0x25   : > { %v1601_v19 = vcombine.low %v2095_v14, %v2098_v15  ;;  %v414_v60 = vmax.bf16 %v1953_v7, %v350_v51  ;;  %v445_v61 = vmax.bf16 %v1953_v7, %v381_v52  ;;  %v1609_v1 = vcombine.low %v443_v56, %v444_v58  ;;  %v355_v39 = vld [vmem:[%s2007_s23 + $0x58] sm:$0xf]  ;;  %v356_v40 = vld [vmem:[%s2007_s23 + $0x5c] sm:$0xf]  ;;  %v390_v48 = vld [vmem:[%s2007_s23 + $0xe4] sm:$0xf] }
  0x26   : > { %v416_v30 = vmax.bf16 %v1953_v7, %v352_v6  ;;  %v448_v32 = vmax.bf16 %v1953_v7, %v384_v23  ;;  %v417_v33 = vmax.bf16 %v1953_v7, %v353_v24  ;;  %v419_v49 = vmax.bf16 %v1953_v7, %v355_v39 }
  0x27   : > { %1683 = vmatpush3.bf16.msra.mxu0 %v1798_v16  ;;  %1765 = vmatpush3.bf16.msra.mxu1 %v1798_v16  ;;  %v1600_v16 = vcombine.low %v2077_v5, %v2083_v9  ;;  %v1594_v12 = vcombine.low %v413_v59, %v414_v60  ;;  %v420_v50 = vmax.bf16 %v1953_v7, %v356_v40 }
  0x28   : > { %1684 = vmatprep.subr.bf16.mxu0 %v1799_v17  ;;  %1758 = vmatprep.subr.bf16.mxu1 %v1799_v17  ;;  %v454_v56 = vmax.bf16 %v1953_v7, %v390_v48 }
  0x29   : > { %v1597_v58 = vcombine.low %v419_v49, %v420_v50 }
  0x2b   : > { %1685 = vmatpush3.bf16.msra.mxu0 %v1799_v17  ;;  %1766 = vmatpush3.bf16.msra.mxu1 %v1799_v17  ;;  %v1616_v17 = vcombine.low %v2086_v10, %v2089_v11 }
  0x2c   : > { %1686 = vmatprep.subr.bf16.mxu0 %v1800_v27  ;;  %1759 = vmatprep.subr.bf16.mxu1 %v1800_v27 }
  0x2f   : > { %1687 = vmatpush3.bf16.msra.mxu0 %v1800_v27  ;;  %1767 = vmatpush3.bf16.msra.mxu1 %v1800_v27  ;;  %v1606_v27 = vcombine.low %v437_v62, %v438_v2  ;;  %v446_v62 = vmax.bf16 %v1953_v7, %v382_v53  ;;  %v351_v2 = vld [vmem:[%s2007_s23 + $0x48] sm:$0xf] }
  0x30   : > { %v415_v29 = vmax.bf16 %v1953_v7, %v351_v2 }
  0x32   : > { %1689 = vmatmul.mubr.bf16.vlgmr.msra.gmra.mrb[0].mxu0 %v1587_v42  ;;  %1721 = vmatmul.mubr.bf16.vlgmr.msra.gmra.mrb[0].mxu1 %v1603_v43  ;;  %v1591_v42 = vcombine.low %v407_v34, %v408_v35  ;;  %v1607_v43 = vcombine.low %v439_v36, %v440_v37  ;;  %v450_v36 = vmax.bf16 %v1953_v7, %v386_v28 }
  0x33   : > { %1692 = vmatprep.mubr.bf16.mxu0 %v1588_v54  ;;  %1724 = vmatprep.mubr.bf16.mxu1 %v1604_v55  ;;  %v411_v54 = vmax.bf16 %v1953_v7, %v347_v44  ;;  %v412_v55 = vmax.bf16 %v1953_v7, %v348_v45  ;;  %v1595_v37 = vcombine.low %v415_v29, %v416_v30  ;;  %v388_v44 = vld [vmem:[%s2007_s23 + $0xdc] sm:$0xf]  ;;  %v357_v45 = vld [vmem:[%s2007_s23 + $0x60] sm:$0xf] }
  0x34   : > { %v452_v52 = vmax.bf16 %v1953_v7, %v388_v44  ;;  %v421_v53 = vmax.bf16 %v1953_v7, %v357_v45 }
  0x35   : > { %v1593_v0 = vcombine.low %v411_v54, %v412_v55 }
  0x3a   : > { %1693 = vmatmul.mubr.bf16.gmra.mrb[4].mxu0 %v1589_v21  ;;  %1725 = vmatmul.mubr.bf16.gmra.mrb[4].mxu1 %v1605_v22  ;;  %v1610_v21 = vcombine.low %v445_v61, %v446_v62  ;;  %v383_v22 = vld [vmem:[%s2007_s23 + $0xc8] sm:$0xf] }
  0x3b   : > { %1696 = vmatprep.mubr.bf16.mxu0 %v1590_v26  ;;  %1728 = vmatprep.mubr.bf16.mxu1 %v1606_v27  ;;  %v354_v26 = vld [vmem:[%s2007_s23 + $0x54] sm:$0xf]  ;;  %v385_v27 = vld [vmem:[%s2007_s23 + $0xd0] sm:$0xf]  ;;  %v447_v31 = vmax.bf16 %v1953_v7, %v383_v22 }
  0x3c   : > { %v418_v34 = vmax.bf16 %v1953_v7, %v354_v26  ;;  %v449_v35 = vmax.bf16 %v1953_v7, %v385_v27 }
  0x3d   : > { %v1611_v38 = vcombine.low %v447_v31, %v448_v32 }
  0x3e   : > { %v1596_v41 = vcombine.low %v417_v33, %v418_v34 }
  0x42   : > { %1697 = vmatmul.mubr.bf16.gmra.mrb[8].mxu0 %v1591_v42  ;;  %1729 = vmatmul.mubr.bf16.gmra.mrb[8].mxu1 %v1607_v43  ;;  %v1612_v42 = vcombine.low %v449_v35, %v450_v36  ;;  %v387_v43 = vld [vmem:[%s2007_s23 + $0xd8] sm:$0xf] }
  0x43   : > { %1700 = vmatprep.mubr.bf16.mxu0 %v1592_v46  ;;  %1732 = vmatprep.mubr.bf16.mxu1 %v1608_v47  ;;  %v358_v46 = vld [vmem:[%s2007_s23 + $0x64] sm:$0xf]  ;;  %v389_v47 = vld [vmem:[%s2007_s23 + $0xe0] sm:$0xf]  ;;  %v451_v51 = vmax.bf16 %v1953_v7, %v387_v43 }
  0x44   : > { %v422_v54 = vmax.bf16 %v1953_v7, %v358_v46  ;;  %v453_v55 = vmax.bf16 %v1953_v7, %v389_v47  ;;  %v2199_v7 = vld [vmem:[%s2346_s2] ss:$0 sm:$0xff] }
  0x45   : > { %v1613_v59 = vcombine.low %v451_v51, %v452_v52 }
  0x46   : > { %v1598_v60 = vcombine.low %v421_v53, %v422_v54  ;;  %v1614_v61 = vcombine.low %v453_v55, %v454_v56 }
  0x4a   : > { %1701 = vmatmul.mubr.bf16.gmra.mrb[12].mxu0 %v1593_v0  ;;  %1733 = vmatmul.mubr.bf16.gmra.mrb[12].mxu1 %v1609_v1 }
  0x4b   : > { %1704 = vmatprep.mubr.bf16.mxu0 %v1594_v12  ;;  %1736 = vmatprep.mubr.bf16.mxu1 %v1610_v21 }
  0x52   : > { %1705 = vmatmul.mubr.bf16.gmra.mrb[16].mxu0 %v1595_v37  ;;  %1737 = vmatmul.mubr.bf16.gmra.mrb[16].mxu1 %v1611_v38 }
  0x53   : > { %1708 = vmatprep.mubr.bf16.mxu0 %v1596_v41  ;;  %1740 = vmatprep.mubr.bf16.mxu1 %v1612_v42 }
  0x5a   : > { %1709 = vmatmul.mubr.bf16.gmra.mrb[20].mxu0 %v1597_v58  ;;  %1741 = vmatmul.mubr.bf16.gmra.mrb[20].mxu1 %v1613_v59 }
  0x5b   : > { %1712 = vmatprep.mubr.bf16.mxu0 %v1598_v60  ;;  %1744 = vmatprep.mubr.bf16.mxu1 %v1614_v61 }
  0x62   : > { %1713 = vmatmul.mubr.bf16.gmra.mrb[24].mxu0 %v1599_v8  ;;  %1745 = vmatmul.mubr.bf16.gmra.mrb[24].mxu1 %v1615_v13 }
  0x63   : > { %1716 = vmatprep.mubr.bf16.mxu0 %v1600_v16  ;;  %1748 = vmatprep.mubr.bf16.mxu1 %v1616_v17 }
  0x6a   : > { %1717 = vmatmul.mubr.bf16.gmra.mrb[28].mxu0 %v1601_v19  ;;  %1749 = vmatmul.mubr.bf16.gmra.mrb[28].mxu1 %v1617_v25 }
 0x105   : > { %v1690_v57 = vpop.f32.mrb[0].mxu0  ;;  %v1722_v63 = vpop.f32.mrb[0].mxu1 }
 0x106   : > { %v1274_v3 = vadd.f32 %v1690_v57, %v2199_v7  ;;  %v1306_v4 = vadd.f32 %v1722_v63, %v2199_v7  ;;  %v815_v5 = vpop.f32.mrb[1].mxu0  ;;  %v943_v8 = vpop.f32.mrb[1].mxu1 }
 0x107   : > { %v1272_v9 = vadd.f32 %v2199_v7, %v815_v5  ;;  %v1304_v10 = vadd.f32 %v2199_v7, %v943_v8  ;;  %v1691_v11 = vpop.f32.mrb[2].mxu0  ;;  %v1723_v13 = vpop.f32.mrb[2].mxu1 }
 0x108   : > { %1801 = vtanh.f32 %v1274_v3  ;;  %v1275_v14 = vadd.f32 %v1691_v11, %v2199_v7  ;;  %v818_v15 = vpop.f32.mrb[3].mxu0  ;;  %v946_v16 = vpop.f32.mrb[3].mxu1  ;;  %v1307_v17 = vadd.f32 %v1723_v13, %v2199_v7 }
 0x109   : > { %1803 = vtanh.f32 %v1306_v4  ;;  %v1273_v18 = vadd.f32 %v2199_v7, %v818_v15  ;;  %v1305_v19 = vadd.f32 %v2199_v7, %v946_v16 }
 0x10a   : > { %1805 = vtanh.f32 %v1272_v9 }
 0x10b   : > { %1807 = vtanh.f32 %v1304_v10 }
 0x10c   : > { %1809 = vtanh.f32 %v1275_v14 }
 0x10d   : > { %1811 = vtanh.f32 %v1307_v17  ;;  %v1694_v20 = vpop.f32.mrb[4].mxu0  ;;  %v1726_v25 = vpop.f32.mrb[4].mxu1 }
 0x10e   : > { %1813 = vtanh.f32 %v1273_v18  ;;  %v1278_v62 = vadd.f32 %v1694_v20, %v2199_v7  ;;  %v1310_v0 = vadd.f32 %v1726_v25, %v2199_v7  ;;  %v831_v1 = vpop.f32.mrb[5].mxu0  ;;  %v959_v2 = vpop.f32.mrb[5].mxu1 }
 0x10f   : > { %1815 = vtanh.f32 %v1305_v19  ;;  %v1276_v6 = vadd.f32 %v2199_v7, %v831_v1  ;;  %v1308_v12 = vadd.f32 %v2199_v7, %v959_v2  ;;  %v1695_v21 = vpop.f32.mrb[6].mxu0  ;;  %v1727_v22 = vpop.f32.mrb[6].mxu1 }
 0x110   : > { %1817 = vtanh.f32 %v1278_v62  ;;  %v1279_v23 = vadd.f32 %v1695_v21, %v2199_v7  ;;  %v834_v24 = vpop.f32.mrb[7].mxu0  ;;  %v962_v26 = vpop.f32.mrb[7].mxu1  ;;  %v1311_v27 = vadd.f32 %v1727_v22, %v2199_v7 }
 0x111   : > { %1819 = vtanh.f32 %v1310_v0  ;;  %v1277_v29 = vadd.f32 %v2199_v7, %v834_v24  ;;  %v1309_v31 = vadd.f32 %v2199_v7, %v962_v26 }
 0x112   : > { %v1802_v28 = vpop.eup %1801  ;;  %1821 = vtanh.f32 %v1276_v6 }
 0x113   : > { %v1804_v30 = vpop.eup %1803  ;;  %1402 = vst [vmem:[%s2217_s29 + $0x10] sm:$0xff] %v1802_v28  ;;  %1823 = vtanh.f32 %v1308_v12 }
 0x114   : > { %v1806_v32 = vpop.eup %1805  ;;  %1434 = vst [vmem:[%s2217_s29 + $0x110] sm:$0xff] %v1804_v30  ;;  %1825 = vtanh.f32 %v1279_v23 }
 0x115   : > { %v1808_v33 = vpop.eup %1807  ;;  %1400 = vst [vmem:[%s2217_s29] sm:$0xff] %v1806_v32  ;;  %1827 = vtanh.f32 %v1311_v27  ;;  %v1698_v34 = vpop.f32.mrb[8].mxu0 }
 0x116   : > { %v1730_v35 = vpop.f32.mrb[8].mxu1  ;;  %v1810_v36 = vpop.eup %1809  ;;  %1432 = vst [vmem:[%s2217_s29 + $0x100] sm:$0xff] %v1808_v33  ;;  %1829 = vtanh.f32 %v1277_v29  ;;  %v1282_v37 = vadd.f32 %v1698_v34, %v2199_v7 }
 0x117   : > { %v1314_v38 = vadd.f32 %v1730_v35, %v2199_v7  ;;  %v847_v39 = vpop.f32.mrb[9].mxu0  ;;  %v975_v40 = vpop.f32.mrb[9].mxu1  ;;  %1403 = vst [vmem:[%s2217_s29 + $0x18] sm:$0xff] %v1810_v36  ;;  %1831 = vtanh.f32 %v1309_v31 }
 0x118   : > { %v1812_v41 = vpop.eup %1811  ;;  %v1280_v42 = vadd.f32 %v2199_v7, %v847_v39  ;;  %v1312_v43 = vadd.f32 %v2199_v7, %v975_v40  ;;  %v1699_v44 = vpop.f32.mrb[10].mxu0  ;;  %1833 = vtanh.f32 %v1282_v37 }
 0x119   : > { %v1731_v45 = vpop.f32.mrb[10].mxu1  ;;  %v1814_v46 = vpop.eup %1813  ;;  %1435 = vst [vmem:[%s2217_s29 + $0x118] sm:$0xff] %v1812_v41  ;;  %v1283_v47 = vadd.f32 %v1699_v44, %v2199_v7  ;;  %1835 = vtanh.f32 %v1314_v38 }
 0x11a   : > { %v850_v48 = vpop.f32.mrb[11].mxu0  ;;  %v978_v49 = vpop.f32.mrb[11].mxu1  ;;  %1401 = vst [vmem:[%s2217_s29 + $0x8] sm:$0xff] %v1814_v46  ;;  %v1315_v51 = vadd.f32 %v1731_v45, %v2199_v7  ;;  %1837 = vtanh.f32 %v1280_v42 }
 0x11b   : > { %v1816_v50 = vpop.eup %1815  ;;  %v1281_v53 = vadd.f32 %v2199_v7, %v850_v48  ;;  %1839 = vtanh.f32 %v1312_v43  ;;  %v1313_v55 = vadd.f32 %v2199_v7, %v978_v49 }
 0x11c   : > { %v1818_v52 = vpop.eup %1817  ;;  %1433 = vst [vmem:[%s2217_s29 + $0x108] sm:$0xff] %v1816_v50  ;;  %1841 = vtanh.f32 %v1283_v47 }
 0x11d   : > { %v1820_v54 = vpop.eup %1819  ;;  %1406 = vst [vmem:[%s2217_s29 + $0x30] sm:$0xff] %v1818_v52  ;;  %1843 = vtanh.f32 %v1315_v51  ;;  %v1702_v59 = vpop.f32.mrb[12].mxu0 }
 0x11e   : > { %v1822_v56 = vpop.eup %1821  ;;  %1438 = vst [vmem:[%s2217_s29 + $0x130] sm:$0xff] %v1820_v54  ;;  %v1734_v60 = vpop.f32.mrb[12].mxu1  ;;  %1845 = vtanh.f32 %v1281_v53  ;;  %v1286_v57 = vadd.f32 %v1702_v59, %v2199_v7 }
 0x11f   : > { %v1824_v58 = vpop.eup %1823  ;;  %1404 = vst [vmem:[%s2217_s29 + $0x20] sm:$0xff] %v1822_v56  ;;  %v1318_v63 = vadd.f32 %v1734_v60, %v2199_v7  ;;  %v863_v3 = vpop.f32.mrb[13].mxu0  ;;  %1847 = vtanh.f32 %v1313_v55 }
 0x120   : > { %v1826_v61 = vpop.eup %1825  ;;  %1436 = vst [vmem:[%s2217_s29 + $0x120] sm:$0xff] %v1824_v58  ;;  %v991_v4 = vpop.f32.mrb[13].mxu1  ;;  %v1284_v8 = vadd.f32 %v2199_v7, %v863_v3  ;;  %1849 = vtanh.f32 %v1286_v57 }
 0x121   : > { %v1828_v5 = vpop.eup %1827  ;;  %1407 = vst [vmem:[%s2217_s29 + $0x38] sm:$0xff] %v1826_v61  ;;  %v1316_v9 = vadd.f32 %v2199_v7, %v991_v4  ;;  %v1703_v10 = vpop.f32.mrb[14].mxu0  ;;  %1851 = vtanh.f32 %v1318_v63 }
 0x122   : > { %v1735_v11 = vpop.f32.mrb[14].mxu1  ;;  %v1830_v13 = vpop.eup %1829  ;;  %1439 = vst [vmem:[%s2217_s29 + $0x138] sm:$0xff] %v1828_v5  ;;  %v1287_v14 = vadd.f32 %v1703_v10, %v2199_v7  ;;  %1853 = vtanh.f32 %v1284_v8 }
 0x123   : > { %v866_v15 = vpop.f32.mrb[15].mxu0  ;;  %v994_v16 = vpop.f32.mrb[15].mxu1  ;;  %1405 = vst [vmem:[%s2217_s29 + $0x28] sm:$0xff] %v1830_v13  ;;  %v1319_v18 = vadd.f32 %v1735_v11, %v2199_v7  ;;  %1855 = vtanh.f32 %v1316_v9 }
 0x124   : > { %v1832_v17 = vpop.eup %1831  ;;  %v1285_v20 = vadd.f32 %v2199_v7, %v866_v15  ;;  %v1317_v62 = vadd.f32 %v2199_v7, %v994_v16  ;;  %1857 = vtanh.f32 %v1287_v14 }
 0x125   : > { %v1834_v19 = vpop.eup %1833  ;;  %1437 = vst [vmem:[%s2217_s29 + $0x128] sm:$0xff] %v1832_v17  ;;  %1859 = vtanh.f32 %v1319_v18  ;;  %v1706_v2 = vpop.f32.mrb[16].mxu0 }
 0x126   : > { %v1836_v25 = vpop.eup %1835  ;;  %1410 = vst [vmem:[%s2217_s29 + $0x50] sm:$0xff] %v1834_v19  ;;  %v1738_v6 = vpop.f32.mrb[16].mxu1  ;;  %1861 = vtanh.f32 %v1285_v20  ;;  %v1290_v21 = vadd.f32 %v1706_v2, %v2199_v7 }
 0x127   : > { %v1838_v0 = vpop.eup %1837  ;;  %1442 = vst [vmem:[%s2217_s29 + $0x150] sm:$0xff] %v1836_v25  ;;  %v1322_v22 = vadd.f32 %v1738_v6, %v2199_v7  ;;  %v879_v23 = vpop.f32.mrb[17].mxu0  ;;  %1863 = vtanh.f32 %v1317_v62 }
 0x128   : > { %v1840_v1 = vpop.eup %1839  ;;  %1408 = vst [vmem:[%s2217_s29 + $0x40] sm:$0xff] %v1838_v0  ;;  %v1007_v24 = vpop.f32.mrb[17].mxu1  ;;  %v1288_v27 = vadd.f32 %v2199_v7, %v879_v23  ;;  %1865 = vtanh.f32 %v1290_v21 }
 0x129   : > { %v1842_v12 = vpop.eup %1841  ;;  %1440 = vst [vmem:[%s2217_s29 + $0x140] sm:$0xff] %v1840_v1  ;;  %v1320_v28 = vadd.f32 %v2199_v7, %v1007_v24  ;;  %v1707_v29 = vpop.f32.mrb[18].mxu0  ;;  %1867 = vtanh.f32 %v1322_v22 }
 0x12a   : > { %v1844_v26 = vpop.eup %1843  ;;  %1411 = vst [vmem:[%s2217_s29 + $0x58] sm:$0xff] %v1842_v12  ;;  %v1739_v30 = vpop.f32.mrb[18].mxu1  ;;  %v1291_v32 = vadd.f32 %v1707_v29, %v2199_v7  ;;  %1869 = vtanh.f32 %v1288_v27 }
 0x12b   : > { %v1846_v31 = vpop.eup %1845  ;;  %1443 = vst [vmem:[%s2217_s29 + $0x158] sm:$0xff] %v1844_v26  ;;  %v882_v33 = vpop.f32.mrb[19].mxu0  ;;  %v1323_v36 = vadd.f32 %v1739_v30, %v2199_v7  ;;  %1871 = vtanh.f32 %v1320_v28 }
 0x12c   : > { %v1010_v34 = vpop.f32.mrb[19].mxu1  ;;  %v1848_v35 = vpop.eup %1847  ;;  %1409 = vst [vmem:[%s2217_s29 + $0x48] sm:$0xff] %v1846_v31  ;;  %v1289_v38 = vadd.f32 %v2199_v7, %v882_v33  ;;  %1873 = vtanh.f32 %v1291_v32 }
 0x12d   : > { %v1850_v37 = vpop.eup %1849  ;;  %1441 = vst [vmem:[%s2217_s29 + $0x148] sm:$0xff] %v1848_v35  ;;  %v1321_v40 = vadd.f32 %v2199_v7, %v1010_v34  ;;  %1875 = vtanh.f32 %v1323_v36  ;;  %v1710_v43 = vpop.f32.mrb[20].mxu0 }
 0x12e   : > { %v1852_v39 = vpop.eup %1851  ;;  %1414 = vst [vmem:[%s2217_s29 + $0x70] sm:$0xff] %v1850_v37  ;;  %v1742_v44 = vpop.f32.mrb[20].mxu1  ;;  %1877 = vtanh.f32 %v1289_v38  ;;  %v1294_v46 = vadd.f32 %v1710_v43, %v2199_v7 }
 0x12f   : > { %v1854_v41 = vpop.eup %1853  ;;  %1446 = vst [vmem:[%s2217_s29 + $0x170] sm:$0xff] %v1852_v39  ;;  %v1326_v47 = vadd.f32 %v1742_v44, %v2199_v7  ;;  %v895_v48 = vpop.f32.mrb[21].mxu0  ;;  %1879 = vtanh.f32 %v1321_v40 }
 0x130   : > { %v1856_v42 = vpop.eup %1855  ;;  %1412 = vst [vmem:[%s2217_s29 + $0x60] sm:$0xff] %v1854_v41  ;;  %v1023_v49 = vpop.f32.mrb[21].mxu1  ;;  %v1292_v51 = vadd.f32 %v2199_v7, %v895_v48  ;;  %1881 = vtanh.f32 %v1294_v46 }
 0x131   : > { %v1858_v45 = vpop.eup %1857  ;;  %1444 = vst [vmem:[%s2217_s29 + $0x160] sm:$0xff] %v1856_v42  ;;  %v1324_v52 = vadd.f32 %v2199_v7, %v1023_v49  ;;  %v1711_v53 = vpop.f32.mrb[22].mxu0  ;;  %1883 = vtanh.f32 %v1326_v47 }
 0x132   : > { %v1860_v50 = vpop.eup %1859  ;;  %1415 = vst [vmem:[%s2217_s29 + $0x78] sm:$0xff] %v1858_v45  ;;  %v1743_v54 = vpop.f32.mrb[22].mxu1  ;;  %v1295_v56 = vadd.f32 %v1711_v53, %v2199_v7  ;;  %1885 = vtanh.f32 %v1292_v51 }
 0x133   : > { %v1862_v55 = vpop.eup %1861  ;;  %1447 = vst [vmem:[%s2217_s29 + $0x178] sm:$0xff] %v1860_v50  ;;  %v898_v58 = vpop.f32.mrb[23].mxu0  ;;  %v1327_v61 = vadd.f32 %v1743_v54, %v2199_v7  ;;  %1887 = vtanh.f32 %v1324_v52 }
 0x134   : > { %v1026_v59 = vpop.f32.mrb[23].mxu1  ;;  %v1864_v60 = vpop.eup %1863  ;;  %1413 = vst [vmem:[%s2217_s29 + $0x68] sm:$0xff] %v1862_v55  ;;  %v1293_v63 = vadd.f32 %v2199_v7, %v898_v58  ;;  %1889 = vtanh.f32 %v1295_v56 }
 0x135   : > { %v1866_v57 = vpop.eup %1865  ;;  %1445 = vst [vmem:[%s2217_s29 + $0x168] sm:$0xff] %v1864_v60  ;;  %v1325_v4 = vadd.f32 %v2199_v7, %v1026_v59  ;;  %1891 = vtanh.f32 %v1327_v61  ;;  %v1714_v9 = vpop.f32.mrb[24].mxu0 }
 0x136   : > { %v1868_v3 = vpop.eup %1867  ;;  %1418 = vst [vmem:[%s2217_s29 + $0x90] sm:$0xff] %v1866_v57  ;;  %v1746_v10 = vpop.f32.mrb[24].mxu1  ;;  %1893 = vtanh.f32 %v1293_v63  ;;  %v1298_v13 = vadd.f32 %v1714_v9, %v2199_v7 }
 0x137   : > { %v1870_v5 = vpop.eup %1869  ;;  %1450 = vst [vmem:[%s2217_s29 + $0x190] sm:$0xff] %v1868_v3  ;;  %v1330_v14 = vadd.f32 %v1746_v10, %v2199_v7  ;;  %v911_v15 = vpop.f32.mrb[25].mxu0  ;;  %1895 = vtanh.f32 %v1325_v4 }
 0x138   : > { %v1872_v8 = vpop.eup %1871  ;;  %1416 = vst [vmem:[%s2217_s29 + $0x80] sm:$0xff] %v1870_v5  ;;  %v1039_v16 = vpop.f32.mrb[25].mxu1  ;;  %v1296_v18 = vadd.f32 %v2199_v7, %v911_v15  ;;  %1897 = vtanh.f32 %v1298_v13 }
 0x139   : > { %v1874_v11 = vpop.eup %1873  ;;  %1448 = vst [vmem:[%s2217_s29 + $0x180] sm:$0xff] %v1872_v8  ;;  %v1328_v19 = vadd.f32 %v2199_v7, %v1039_v16  ;;  %v1715_v20 = vpop.f32.mrb[26].mxu0  ;;  %1899 = vtanh.f32 %v1330_v14 }
 0x13a   : > { %v1876_v17 = vpop.eup %1875  ;;  %1419 = vst [vmem:[%s2217_s29 + $0x98] sm:$0xff] %v1874_v11  ;;  %v1747_v25 = vpop.f32.mrb[26].mxu1  ;;  %v1299_v0 = vadd.f32 %v1715_v20, %v2199_v7  ;;  %1901 = vtanh.f32 %v1296_v18 }
 0x13b   : > { %v1878_v62 = vpop.eup %1877  ;;  %1451 = vst [vmem:[%s2217_s29 + $0x198] sm:$0xff] %v1876_v17  ;;  %v914_v1 = vpop.f32.mrb[27].mxu0  ;;  %v1331_v12 = vadd.f32 %v1747_v25, %v2199_v7  ;;  %1903 = vtanh.f32 %v1328_v19 }
 0x13c   : > { %v1042_v2 = vpop.f32.mrb[27].mxu1  ;;  %v1880_v6 = vpop.eup %1879  ;;  %1417 = vst [vmem:[%s2217_s29 + $0x88] sm:$0xff] %v1878_v62  ;;  %v1297_v22 = vadd.f32 %v2199_v7, %v914_v1  ;;  %1905 = vtanh.f32 %v1299_v0 }
 0x13d   : > { %v1882_v21 = vpop.eup %1881  ;;  %1449 = vst [vmem:[%s2217_s29 + $0x188] sm:$0xff] %v1880_v6  ;;  %v1329_v24 = vadd.f32 %v2199_v7, %v1042_v2  ;;  %1907 = vtanh.f32 %v1331_v12  ;;  %v1718_v28 = vpop.f32.mrb[28].mxu0 }
 0x13e   : > { %v1884_v23 = vpop.eup %1883  ;;  %1422 = vst [vmem:[%s2217_s29 + $0xb0] sm:$0xff] %v1882_v21  ;;  %v1750_v29 = vpop.f32.mrb[28].mxu1  ;;  %1909 = vtanh.f32 %v1297_v22  ;;  %v1302_v31 = vadd.f32 %v1718_v28, %v2199_v7 }
 0x13f   : > { %v1886_v26 = vpop.eup %1885  ;;  %1454 = vst [vmem:[%s2217_s29 + $0x1b0] sm:$0xff] %v1884_v23  ;;  %v1334_v32 = vadd.f32 %v1750_v29, %v2199_v7  ;;  %v927_v33 = vpop.f32.mrb[29].mxu0  ;;  %1911 = vtanh.f32 %v1329_v24 }
 0x140   : > { %v1888_v27 = vpop.eup %1887  ;;  %1420 = vst [vmem:[%s2217_s29 + $0xa0] sm:$0xff] %v1886_v26  ;;  %v1055_v34 = vpop.f32.mrb[29].mxu1  ;;  %v1300_v36 = vadd.f32 %v2199_v7, %v927_v33  ;;  %1913 = vtanh.f32 %v1302_v31 }
 0x141   : > { %v1890_v30 = vpop.eup %1889  ;;  %1452 = vst [vmem:[%s2217_s29 + $0x1a0] sm:$0xff] %v1888_v27  ;;  %v1332_v37 = vadd.f32 %v2199_v7, %v1055_v34  ;;  %v1719_v38 = vpop.f32.mrb[30].mxu0  ;;  %1915 = vtanh.f32 %v1334_v32 }
 0x142   : > { %v1892_v35 = vpop.eup %1891  ;;  %1423 = vst [vmem:[%s2217_s29 + $0xb8] sm:$0xff] %v1890_v30  ;;  %v1751_v39 = vpop.f32.mrb[30].mxu1  ;;  %v1303_v41 = vadd.f32 %v1719_v38, %v2199_v7  ;;  %1917 = vtanh.f32 %v1300_v36 }
 0x143   : > { %v1894_v40 = vpop.eup %1893  ;;  %1455 = vst [vmem:[%s2217_s29 + $0x1b8] sm:$0xff] %v1892_v35  ;;  %v930_v42 = vpop.f32.mrb[31].mxu0  ;;  %v1335_v45 = vadd.f32 %v1751_v39, %v2199_v7  ;;  %1919 = vtanh.f32 %v1332_v37 }
 0x144   : > { %v1058_v43 = vpop.f32.mrb[31].mxu1  ;;  %v1896_v44 = vpop.eup %1895  ;;  %1421 = vst [vmem:[%s2217_s29 + $0xa8] sm:$0xff] %v1894_v40  ;;  %v1301_v47 = vadd.f32 %v2199_v7, %v930_v42  ;;  %1921 = vtanh.f32 %v1303_v41 }
 0x145   : > { %v1898_v46 = vpop.eup %1897  ;;  %1453 = vst [vmem:[%s2217_s29 + $0x1a8] sm:$0xff] %v1896_v44  ;;  %v1333_v49 = vadd.f32 %v2199_v7, %v1058_v43  ;;  %1923 = vtanh.f32 %v1335_v45 }
 0x146   : > { %v1900_v48 = vpop.eup %1899  ;;  %1426 = vst [vmem:[%s2217_s29 + $0xd0] sm:$0xff] %v1898_v46  ;;  %1925 = vtanh.f32 %v1301_v47 }
 0x147   : > { %v1902_v50 = vpop.eup %1901  ;;  %1458 = vst [vmem:[%s2217_s29 + $0x1d0] sm:$0xff] %v1900_v48  ;;  %1927 = vtanh.f32 %v1333_v49 }
 0x148   : > { %v1904_v51 = vpop.eup %1903  ;;  %1424 = vst [vmem:[%s2217_s29 + $0xc0] sm:$0xff] %v1902_v50 }
 0x149   : > { %v1906_v52 = vpop.eup %1905  ;;  %1456 = vst [vmem:[%s2217_s29 + $0x1c0] sm:$0xff] %v1904_v51 }
 0x14a   : > { %v1908_v53 = vpop.eup %1907  ;;  %1427 = vst [vmem:[%s2217_s29 + $0xd8] sm:$0xff] %v1906_v52 }
 0x14b   : > { %v1910_v7 = vpop.eup %1909  ;;  %1459 = vst [vmem:[%s2217_s29 + $0x1d8] sm:$0xff] %v1908_v53 }
 0x14c   : > { %v1912_v54 = vpop.eup %1911  ;;  %1425 = vst [vmem:[%s2217_s29 + $0xc8] sm:$0xff] %v1910_v7 }
 0x14d   : > { %v1914_v55 = vpop.eup %1913  ;;  %1457 = vst [vmem:[%s2217_s29 + $0x1c8] sm:$0xff] %v1912_v54 }
 0x14e   : > { %v1916_v56 = vpop.eup %1915  ;;  %1430 = vst [vmem:[%s2217_s29 + $0xf0] sm:$0xff] %v1914_v55 }
 0x14f   : > { %v1918_v58 = vpop.eup %1917  ;;  %1462 = vst [vmem:[%s2217_s29 + $0x1f0] sm:$0xff] %v1916_v56 }
 0x150   : > { %v1920_v59 = vpop.eup %1919  ;;  %1428 = vst [vmem:[%s2217_s29 + $0xe0] sm:$0xff] %v1918_v58 }
 0x151   : > { %v1922_v60 = vpop.eup %1921  ;;  %1460 = vst [vmem:[%s2217_s29 + $0x1e0] sm:$0xff] %v1920_v59 }
 0x152   : > { %v1924_v61 = vpop.eup %1923  ;;  %1431 = vst [vmem:[%s2217_s29 + $0xf8] sm:$0xff] %v1922_v60 }
 0x153   : > { %v1926_v57 = vpop.eup %1925  ;;  %1463 = vst [vmem:[%s2217_s29 + $0x1f8] sm:$0xff] %v1924_v61 }
 0x154   : > { %v1928_v63 = vpop.eup %1927  ;;  %1429 = vst [vmem:[%s2217_s29 + $0xe8] sm:$0xff] %v1926_v57 }
 0x155   : > { %1461 = vst [vmem:[%s2217_s29 + $0x1e8] sm:$0xff] %v1928_v63 }
 0x156 PF: > { %s13_s14 = sadd.s32 1, %s1951_s14   ;;  %s2348_s12 = smov %s1947_s13 }
 0x157   : > { %p10_p5 = scmp.ge.s32.totalorder %s13_s14, 6   ;;  %s2349_s13 = smov %s2351_s15 }
 0x159   :  { %12 = sbr.rel (!%p10_p5) target bundleno = 2 (0x2), region = 73 }

</bundles_post_ra>
